<compile_context>
chip_gen: v7x
topology: tpu7x:2x2x1
jax: 0.10.0
libtpu: 0.0.40
codegen_flags: <defaults>
</compile_context>

<pallas_src>
import jax
import jax.numpy as jnp
from jax import lax
from jax.experimental import pallas as pl
from jax.experimental.pallas import tpu as pltpu

EPS = 1e-5


def resblock_kernel(xpad_ref, w1_ref, g1_ref, b1_ref, w2_ref, g2_ref, b2_ref,
                    out_ref, slab_ref, hpad_ref):
    N, HP, WP, C = xpad_ref.shape
    H, W = HP - 2, WP - 2
    NHW = N * H * W
    inv_nhw = 1.0 / NHW

    def build_slab(src_ref):
        # im2col: slab[:, t*C:(t+1)*C] = tap (dy, dx) of the padded source.
        # Column blocks start at multiples of 256 lanes, so stores are unmasked.
        for dy in range(3):
            for dx in range(3):
                t = dy * 3 + dx
                patch = src_ref[:, dy:dy + H, dx:dx + W, :].reshape(NHW, C)
                slab_ref[:, t * C:(t + 1) * C] = patch.astype(jnp.bfloat16)

    def conv3x3(w_ref):
        # one MXU matmul per conv: (NHW, 9C)bf16 x (9C, C)bf16 -> f32 accum
        return jnp.dot(slab_ref[...], w_ref[...],
                       preferred_element_type=jnp.float32)

    def bn_fused(acc, g_ref, b_ref):
        # training-mode BN folded into a single per-channel scale/shift
        mean = jnp.sum(acc, axis=0, keepdims=True) * inv_nhw
        ex2 = jnp.sum(acc * acc, axis=0, keepdims=True) * inv_nhw
        var = ex2 - mean * mean
        scale = g_ref[...] * lax.rsqrt(var + EPS)
        shift = b_ref[...] - mean * scale
        return acc * scale + shift

    # ---- conv1 -> bn1 -> relu ----
    build_slab(xpad_ref)
    h = jnp.maximum(bn_fused(conv3x3(w1_ref), g1_ref, b1_ref), 0.0)

    # ---- zero-pad h for conv2: write interior once, zero only the 1-px halo ----
    hpad_ref[:, 0:1, :, :] = jnp.zeros((N, 1, WP, C), jnp.float32)
    hpad_ref[:, HP - 1:HP, :, :] = jnp.zeros((N, 1, WP, C), jnp.float32)
    hpad_ref[:, 1:1 + H, 0:1, :] = jnp.zeros((N, H, 1, C), jnp.float32)
    hpad_ref[:, 1:1 + H, WP - 1:WP, :] = jnp.zeros((N, H, 1, C), jnp.float32)
    hpad_ref[:, 1:1 + H, 1:1 + W, :] = h.reshape(N, H, W, C)

    # ---- conv2 -> bn2 -> +residual -> relu ----
    build_slab(hpad_ref)
    h2 = bn_fused(conv3x3(w2_ref), g2_ref, b2_ref)
    resid = xpad_ref[:, 1:1 + H, 1:1 + W, :].reshape(NHW, C)
    out_ref[...] = jnp.maximum(h2 + resid, 0.0).reshape(N, H, W, C)


def _full_spec(shape):
    nd = len(shape)
    return pl.BlockSpec(shape, lambda i, nd=nd: (0,) * nd)


def _vmem_limit_bytes(args, out_bytes, scratch_bytes):
    # actual footprint (+2x for pipeline double-buffering of inputs/outputs)
    need = (2 * sum(a.size * a.dtype.itemsize for a in args)
            + 2 * out_bytes + scratch_bytes + (4 << 20))
    try:
        cap = pltpu.get_tpu_info().vmem_capacity_bytes
    except Exception:
        cap = 64 * 1024 * 1024          # conservative (v7x physical VMEM)
    return int(min(max(need, 16 << 20), cap - (4 << 20)))


def resblock_forward(x_nchw, params):
    """x_nchw: (N, 256, H, W) float32, PyTorch layout. Returns same layout."""
    w1, g1, b1, w2, g2, b2 = params
    N, C, H, W = x_nchw.shape
    HP, WP = H + 2, W + 2
    NHW = N * H * W

    # glue: NCHW -> NHWC, host-side zero pad, OIHW -> (9*Cin, Cout) bf16
    x = jnp.transpose(x_nchw, (0, 2, 3, 1)).astype(jnp.float32)
    xpad = jnp.pad(x, ((0, 0), (1, 1), (1, 1), (0, 0)))

    def prep_w(w):
        return (jnp.transpose(w, (2, 3, 1, 0))          # (ky, kx, Cin, Cout)
                .reshape(9 * C, C).astype(jnp.bfloat16))

    args = (xpad,
            prep_w(w1), g1.reshape(1, C).astype(jnp.float32),
            b1.reshape(1, C).astype(jnp.float32),
            prep_w(w2), g2.reshape(1, C).astype(jnp.float32),
            b2.reshape(1, C).astype(jnp.float32))

    scratch_bytes = NHW * 9 * C * 2 + N * HP * WP * C * 4
    out_bytes = N * H * W * C * 4

    # NOTE: single-block grid — BN batch statistics couple every pixel, so a
    # tiled version needs a multi-pass (sum/sumsq accumulator) design. That is
    # the next step for large N*H*W / v7x dual-core; unnecessary at these sizes.
    out_nhwc = pl.pallas_call(
        resblock_kernel,
        out_shape=jax.ShapeDtypeStruct((N, H, W, C), jnp.float32),
        grid=(1,),
        in_specs=[_full_spec(a.shape) for a in args],
        out_specs=_full_spec((N, H, W, C)),
        scratch_shapes=[pltpu.VMEM((NHW, 9 * C), jnp.bfloat16),   # im2col slab
                        pltpu.VMEM((N, HP, WP, C), jnp.float32)],  # padded h
        compiler_params=pltpu.CompilerParams(
            dimension_semantics=("arbitrary",),
            vmem_limit_bytes=_vmem_limit_bytes(args, out_bytes, scratch_bytes)),
    )(*args)

    return jnp.transpose(out_nhwc, (0, 3, 1, 2))                  # back to NCHW


def resblock_ref(x, w1, g1, b1, w2, g2, b2):
    """Pure-JAX f32 reference matching PyTorch ResBlock.forward (training BN)."""
    def conv(x, w):
        return lax.conv_general_dilated(
            x, w, window_strides=(1, 1), padding=((1, 1), (1, 1)),
            dimension_numbers=("NCHW", "OIHW", "NCHW"),
            precision=lax.Precision.HIGHEST)

    def bn(x, g, b):
        mean = jnp.mean(x, axis=(0, 2, 3), keepdims=True)
        var = jnp.mean((x - mean) ** 2, axis=(0, 2, 3), keepdims=True)
        return ((x - mean) * lax.rsqrt(var + EPS)
                * g.reshape(1, -1, 1, 1) + b.reshape(1, -1, 1, 1))

    h = jax.nn.relu(bn(conv(x, w1), g1, b1))
    h2 = bn(conv(h, w2), g2, b2)
    return jax.nn.relu(h2 + x)


if __name__ == "__main__":
    N, C, H, W = 2, 256, 8, 8   # channels fixed at 256 by the module
    key = jax.random.PRNGKey(0)
    kx, kw1, kw2 = jax.random.split(key, 3)

    x = jax.random.normal(kx, (N, C, H, W), jnp.float32)

    # deterministic parameter init (kaiming-style scale; BN gamma=1, beta=0)
    fan_in = C * 3 * 3
    w1 = jax.random.normal(kw1, (C, C, 3, 3), jnp.float32) * (2.0 / fan_in) ** 0.5
    w2 = jax.random.normal(kw2, (C, C, 3, 3), jnp.float32) * (2.0 / fan_in) ** 0.5
    g1 = jnp.ones((C,), jnp.float32)
    b1 = jnp.zeros((C,), jnp.float32)
    g2 = jnp.ones((C,), jnp.float32)
    b2 = jnp.zeros((C,), jnp.float32)

    out = resblock_forward(x, (w1, g1, b1, w2, g2, b2))
    out = jax.block_until_ready(out)

    ref = resblock_ref(x, w1, g1, b1, w2, g2, b2)
    assert out.shape == ref.shape == (N, C, H, W)
    max_err = float(jnp.max(jnp.abs(out - ref)))
    # bf16 MXU inputs (with f32 accumulation) loosen numerics vs the f32 ref.
    assert max_err < 5e-2, f"max abs err too large: {max_err}"

    print("KERNEL_OK")
</pallas_src>

<mosaic_0001>
module attributes {stable_mosaic.version = 11 : i64} {
  func.func @resblock_kernel(%arg0: i32, %arg1: memref<2x10x10x256xf32, #tpu.memory_space<vmem>>, %arg2: memref<2304x256xbf16, #tpu.memory_space<vmem>>, %arg3: memref<1x256xf32, #tpu.memory_space<vmem>>, %arg4: memref<1x256xf32, #tpu.memory_space<vmem>>, %arg5: memref<2304x256xbf16, #tpu.memory_space<vmem>>, %arg6: memref<1x256xf32, #tpu.memory_space<vmem>>, %arg7: memref<1x256xf32, #tpu.memory_space<vmem>>, %arg8: memref<2x8x8x256xf32, #tpu.memory_space<vmem>>, %arg9: memref<128x2304xbf16, #tpu.memory_space<vmem>>, %arg10: memref<2x10x10x256xf32, #tpu.memory_space<vmem>>) attributes {dimension_semantics = [#tpu.dimension_semantics<arbitrary>], iteration_bounds = array<i64: 1>, scalar_prefetch = 0 : i64, scratch_operands = 2 : i64, tpu.core_type = #tpu.core_type<tc>, window_params = [{pipeline_mode = #tpu.pipeline_mode<synchronous>, transform_indices = @transform_0, window_bounds = array<i64: 2, 10, 10, 256>}, {pipeline_mode = #tpu.pipeline_mode<synchronous>, transform_indices = @transform_1, window_bounds = array<i64: 2304, 256>}, {pipeline_mode = #tpu.pipeline_mode<synchronous>, transform_indices = @transform_2, window_bounds = array<i64: 1, 256>}, {pipeline_mode = #tpu.pipeline_mode<synchronous>, transform_indices = @transform_3, window_bounds = array<i64: 1, 256>}, {pipeline_mode = #tpu.pipeline_mode<synchronous>, transform_indices = @transform_4, window_bounds = array<i64: 2304, 256>}, {pipeline_mode = #tpu.pipeline_mode<synchronous>, transform_indices = @transform_5, window_bounds = array<i64: 1, 256>}, {pipeline_mode = #tpu.pipeline_mode<synchronous>, transform_indices = @transform_6, window_bounds = array<i64: 1, 256>}, {pipeline_mode = #tpu.pipeline_mode<synchronous>, transform_indices = @transform_7, window_bounds = array<i64: 2, 8, 8, 256>}]} {
    %c0 = arith.constant 0 : index
    %c0_0 = arith.constant 0 : index
    %c0_1 = arith.constant 0 : index
    %c0_2 = arith.constant 0 : index
    %0 = vector.load %arg1[%c0, %c0_0, %c0_1, %c0_2] : memref<2x10x10x256xf32, #tpu.memory_space<vmem>>, vector<2x8x8x256xf32>
    %1 = vector.shape_cast %0 : vector<2x8x8x256xf32> to vector<128x256xf32>
    %2 = arith.truncf %1 : vector<128x256xf32> to vector<128x256xbf16>
    %c0_3 = arith.constant 0 : index
    %c0_4 = arith.constant 0 : index
    %3 = vector.load %arg9[%c0_3, %c0_4] : memref<128x2304xbf16, #tpu.memory_space<vmem>>, vector<128x256xbf16>
    tpu.vector_store %arg9[%c0_3, %c0_4], %2 {strides = array<i32>} : memref<128x2304xbf16, #tpu.memory_space<vmem>>, vector<128x256xbf16>,
    %c0_5 = arith.constant 0 : index
    %c0_6 = arith.constant 0 : index
    %c1 = arith.constant 1 : index
    %c0_7 = arith.constant 0 : index
    %4 = vector.load %arg1[%c0_5, %c0_6, %c1, %c0_7] : memref<2x10x10x256xf32, #tpu.memory_space<vmem>>, vector<2x8x8x256xf32>
    %5 = vector.shape_cast %4 : vector<2x8x8x256xf32> to vector<128x256xf32>
    %6 = arith.truncf %5 : vector<128x256xf32> to vector<128x256xbf16>
    %c0_8 = arith.constant 0 : index
    %c256 = arith.constant 256 : index
    %7 = vector.load %arg9[%c0_8, %c256] : memref<128x2304xbf16, #tpu.memory_space<vmem>>, vector<128x256xbf16>
    tpu.vector_store %arg9[%c0_8, %c256], %6 {strides = array<i32>} : memref<128x2304xbf16, #tpu.memory_space<vmem>>, vector<128x256xbf16>,
    %c0_9 = arith.constant 0 : index
    %c0_10 = arith.constant 0 : index
    %c2 = arith.constant 2 : index
    %c0_11 = arith.constant 0 : index
    %8 = vector.load %arg1[%c0_9, %c0_10, %c2, %c0_11] : memref<2x10x10x256xf32, #tpu.memory_space<vmem>>, vector<2x8x8x256xf32>
    %9 = vector.shape_cast %8 : vector<2x8x8x256xf32> to vector<128x256xf32>
    %10 = arith.truncf %9 : vector<128x256xf32> to vector<128x256xbf16>
    %c0_12 = arith.constant 0 : index
    %c512 = arith.constant 512 : index
    %11 = vector.load %arg9[%c0_12, %c512] : memref<128x2304xbf16, #tpu.memory_space<vmem>>, vector<128x256xbf16>
    tpu.vector_store %arg9[%c0_12, %c512], %10 {strides = array<i32>} : memref<128x2304xbf16, #tpu.memory_space<vmem>>, vector<128x256xbf16>,
    %c0_13 = arith.constant 0 : index
    %c1_14 = arith.constant 1 : index
    %c0_15 = arith.constant 0 : index
    %c0_16 = arith.constant 0 : index
    %12 = vector.load %arg1[%c0_13, %c1_14, %c0_15, %c0_16] : memref<2x10x10x256xf32, #tpu.memory_space<vmem>>, vector<2x8x8x256xf32>
    %13 = vector.shape_cast %12 : vector<2x8x8x256xf32> to vector<128x256xf32>
    %14 = arith.truncf %13 : vector<128x256xf32> to vector<128x256xbf16>
    %c0_17 = arith.constant 0 : index
    %c768 = arith.constant 768 : index
    %15 = vector.load %arg9[%c0_17, %c768] : memref<128x2304xbf16, #tpu.memory_space<vmem>>, vector<128x256xbf16>
    tpu.vector_store %arg9[%c0_17, %c768], %14 {strides = array<i32>} : memref<128x2304xbf16, #tpu.memory_space<vmem>>, vector<128x256xbf16>,
    %c0_18 = arith.constant 0 : index
    %c1_19 = arith.constant 1 : index
    %c1_20 = arith.constant 1 : index
    %c0_21 = arith.constant 0 : index
    %16 = vector.load %arg1[%c0_18, %c1_19, %c1_20, %c0_21] : memref<2x10x10x256xf32, #tpu.memory_space<vmem>>, vector<2x8x8x256xf32>
    %17 = vector.shape_cast %16 : vector<2x8x8x256xf32> to vector<128x256xf32>
    %18 = arith.truncf %17 : vector<128x256xf32> to vector<128x256xbf16>
    %c0_22 = arith.constant 0 : index
    %c1024 = arith.constant 1024 : index
    %19 = vector.load %arg9[%c0_22, %c1024] : memref<128x2304xbf16, #tpu.memory_space<vmem>>, vector<128x256xbf16>
    tpu.vector_store %arg9[%c0_22, %c1024], %18 {strides = array<i32>} : memref<128x2304xbf16, #tpu.memory_space<vmem>>, vector<128x256xbf16>,
    %c0_23 = arith.constant 0 : index
    %c1_24 = arith.constant 1 : index
    %c2_25 = arith.constant 2 : index
    %c0_26 = arith.constant 0 : index
    %20 = vector.load %arg1[%c0_23, %c1_24, %c2_25, %c0_26] : memref<2x10x10x256xf32, #tpu.memory_space<vmem>>, vector<2x8x8x256xf32>
    %21 = vector.shape_cast %20 : vector<2x8x8x256xf32> to vector<128x256xf32>
    %22 = arith.truncf %21 : vector<128x256xf32> to vector<128x256xbf16>
    %c0_27 = arith.constant 0 : index
    %c1280 = arith.constant 1280 : index
    %23 = vector.load %arg9[%c0_27, %c1280] : memref<128x2304xbf16, #tpu.memory_space<vmem>>, vector<128x256xbf16>
    tpu.vector_store %arg9[%c0_27, %c1280], %22 {strides = array<i32>} : memref<128x2304xbf16, #tpu.memory_space<vmem>>, vector<128x256xbf16>,
    %c0_28 = arith.constant 0 : index
    %c2_29 = arith.constant 2 : index
    %c0_30 = arith.constant 0 : index
    %c0_31 = arith.constant 0 : index
    %24 = vector.load %arg1[%c0_28, %c2_29, %c0_30, %c0_31] : memref<2x10x10x256xf32, #tpu.memory_space<vmem>>, vector<2x8x8x256xf32>
    %25 = vector.shape_cast %24 : vector<2x8x8x256xf32> to vector<128x256xf32>
    %26 = arith.truncf %25 : vector<128x256xf32> to vector<128x256xbf16>
    %c0_32 = arith.constant 0 : index
    %c1536 = arith.constant 1536 : index
    %27 = vector.load %arg9[%c0_32, %c1536] : memref<128x2304xbf16, #tpu.memory_space<vmem>>, vector<128x256xbf16>
    tpu.vector_store %arg9[%c0_32, %c1536], %26 {strides = array<i32>} : memref<128x2304xbf16, #tpu.memory_space<vmem>>, vector<128x256xbf16>,
    %c0_33 = arith.constant 0 : index
    %c2_34 = arith.constant 2 : index
    %c1_35 = arith.constant 1 : index
    %c0_36 = arith.constant 0 : index
    %28 = vector.load %arg1[%c0_33, %c2_34, %c1_35, %c0_36] : memref<2x10x10x256xf32, #tpu.memory_space<vmem>>, vector<2x8x8x256xf32>
    %29 = vector.shape_cast %28 : vector<2x8x8x256xf32> to vector<128x256xf32>
    %30 = arith.truncf %29 : vector<128x256xf32> to vector<128x256xbf16>
    %c0_37 = arith.constant 0 : index
    %c1792 = arith.constant 1792 : index
    %31 = vector.load %arg9[%c0_37, %c1792] : memref<128x2304xbf16, #tpu.memory_space<vmem>>, vector<128x256xbf16>
    tpu.vector_store %arg9[%c0_37, %c1792], %30 {strides = array<i32>} : memref<128x2304xbf16, #tpu.memory_space<vmem>>, vector<128x256xbf16>,
    %c0_38 = arith.constant 0 : index
    %c2_39 = arith.constant 2 : index
    %c2_40 = arith.constant 2 : index
    %c0_41 = arith.constant 0 : index
    %32 = vector.load %arg1[%c0_38, %c2_39, %c2_40, %c0_41] : memref<2x10x10x256xf32, #tpu.memory_space<vmem>>, vector<2x8x8x256xf32>
    %33 = vector.shape_cast %32 : vector<2x8x8x256xf32> to vector<128x256xf32>
    %34 = arith.truncf %33 : vector<128x256xf32> to vector<128x256xbf16>
    %c0_42 = arith.constant 0 : index
    %c2048 = arith.constant 2048 : index
    %35 = vector.load %arg9[%c0_42, %c2048] : memref<128x2304xbf16, #tpu.memory_space<vmem>>, vector<128x256xbf16>
    tpu.vector_store %arg9[%c0_42, %c2048], %34 {strides = array<i32>} : memref<128x2304xbf16, #tpu.memory_space<vmem>>, vector<128x256xbf16>,
    %c0_43 = arith.constant 0 : index
    %c0_44 = arith.constant 0 : index
    %36 = vector.load %arg9[%c0_43, %c0_44] : memref<128x2304xbf16, #tpu.memory_space<vmem>>, vector<128x2304xbf16>
    %c0_45 = arith.constant 0 : index
    %c0_46 = arith.constant 0 : index
    %37 = vector.load %arg2[%c0_45, %c0_46] : memref<2304x256xbf16, #tpu.memory_space<vmem>>, vector<2304x256xbf16>
    %cst = arith.constant dense<0.000000e+00> : vector<128x256xf32>
    %38 = tpu.matmul %36, %37, %cst {dimension_numbers = #tpu.dot_dimension_numbers<[1], [0], [0], [1], [0, 0, 1, 1], [], []>} : vector<128x2304xbf16>, vector<2304x256xbf16>, vector<128x256xf32> -> vector<128x256xf32>
    %cst_47 = arith.constant dense<0.000000e+00> : vector<256xf32>
    %39 = vector.multi_reduction <add>, %38, %cst_47 [0] : vector<128x256xf32> to vector<256xf32>
    %40 = vector.shape_cast %39 : vector<256xf32> to vector<1x256xf32>
    %cst_48 = arith.constant 7.812500e-03 : f32
    %41 = vector.broadcast %cst_48 : f32 to vector<1x256xf32>
    %42 = arith.mulf %40, %41 : vector<1x256xf32>
    %43 = arith.mulf %38, %38 : vector<128x256xf32>
    %cst_49 = arith.constant dense<0.000000e+00> : vector<256xf32>
    %44 = vector.multi_reduction <add>, %43, %cst_49 [0] : vector<128x256xf32> to vector<256xf32>
    %45 = vector.shape_cast %44 : vector<256xf32> to vector<1x256xf32>
    %cst_50 = arith.constant 7.812500e-03 : f32
    %46 = vector.broadcast %cst_50 : f32 to vector<1x256xf32>
    %47 = arith.mulf %45, %46 : vector<1x256xf32>
    %48 = arith.mulf %42, %42 : vector<1x256xf32>
    %49 = arith.subf %47, %48 : vector<1x256xf32>
    %c0_51 = arith.constant 0 : index
    %c0_52 = arith.constant 0 : index
    %50 = vector.load %arg3[%c0_51, %c0_52] : memref<1x256xf32, #tpu.memory_space<vmem>>, vector<1x256xf32>
    %cst_53 = arith.constant 9.99999974E-6 : f32
    %51 = vector.broadcast %cst_53 : f32 to vector<1x256xf32>
    %52 = arith.addf %49, %51 : vector<1x256xf32>
    %53 = math.rsqrt %52 : vector<1x256xf32>
    %54 = arith.mulf %50, %53 : vector<1x256xf32>
    %c0_54 = arith.constant 0 : index
    %c0_55 = arith.constant 0 : index
    %55 = vector.load %arg4[%c0_54, %c0_55] : memref<1x256xf32, #tpu.memory_space<vmem>>, vector<1x256xf32>
    %56 = arith.mulf %42, %54 : vector<1x256xf32>
    %57 = arith.subf %55, %56 : vector<1x256xf32>
    %58 = vector.broadcast %54 : vector<1x256xf32> to vector<128x256xf32>
    %59 = arith.mulf %38, %58 : vector<128x256xf32>
    %60 = vector.broadcast %57 : vector<1x256xf32> to vector<128x256xf32>
    %61 = arith.addf %59, %60 : vector<128x256xf32>
    %cst_56 = arith.constant 0.000000e+00 : f32
    %62 = vector.broadcast %cst_56 : f32 to vector<128x256xf32>
    %63 = arith.maximumf %61, %62 : vector<128x256xf32>
    %cst_57 = arith.constant 0.000000e+00 : f32
    %64 = vector.broadcast %cst_57 : f32 to vector<2x1x10x256xf32>
    %c0_58 = arith.constant 0 : index
    %c0_59 = arith.constant 0 : index
    %c0_60 = arith.constant 0 : index
    %c0_61 = arith.constant 0 : index
    %65 = vector.load %arg10[%c0_58, %c0_59, %c0_60, %c0_61] : memref<2x10x10x256xf32, #tpu.memory_space<vmem>>, vector<2x1x10x256xf32>
    tpu.vector_store %arg10[%c0_58, %c0_59, %c0_60, %c0_61], %64 {strides = array<i32>} : memref<2x10x10x256xf32, #tpu.memory_space<vmem>>, vector<2x1x10x256xf32>,
    %cst_62 = arith.constant 0.000000e+00 : f32
    %66 = vector.broadcast %cst_62 : f32 to vector<2x1x10x256xf32>
    %c0_63 = arith.constant 0 : index
    %c9 = arith.constant 9 : index
    %c0_64 = arith.constant 0 : index
    %c0_65 = arith.constant 0 : index
    %67 = vector.load %arg10[%c0_63, %c9, %c0_64, %c0_65] : memref<2x10x10x256xf32, #tpu.memory_space<vmem>>, vector<2x1x10x256xf32>
    tpu.vector_store %arg10[%c0_63, %c9, %c0_64, %c0_65], %66 {strides = array<i32>} : memref<2x10x10x256xf32, #tpu.memory_space<vmem>>, vector<2x1x10x256xf32>,
    %cst_66 = arith.constant 0.000000e+00 : f32
    %68 = vector.broadcast %cst_66 : f32 to vector<2x8x1x256xf32>
    %c0_67 = arith.constant 0 : index
    %c1_68 = arith.constant 1 : index
    %c0_69 = arith.constant 0 : index
    %c0_70 = arith.constant 0 : index
    %69 = vector.load %arg10[%c0_67, %c1_68, %c0_69, %c0_70] : memref<2x10x10x256xf32, #tpu.memory_space<vmem>>, vector<2x8x1x256xf32>
    tpu.vector_store %arg10[%c0_67, %c1_68, %c0_69, %c0_70], %68 {strides = array<i32>} : memref<2x10x10x256xf32, #tpu.memory_space<vmem>>, vector<2x8x1x256xf32>,
    %cst_71 = arith.constant 0.000000e+00 : f32
    %70 = vector.broadcast %cst_71 : f32 to vector<2x8x1x256xf32>
    %c0_72 = arith.constant 0 : index
    %c1_73 = arith.constant 1 : index
    %c9_74 = arith.constant 9 : index
    %c0_75 = arith.constant 0 : index
    %71 = vector.load %arg10[%c0_72, %c1_73, %c9_74, %c0_75] : memref<2x10x10x256xf32, #tpu.memory_space<vmem>>, vector<2x8x1x256xf32>
    tpu.vector_store %arg10[%c0_72, %c1_73, %c9_74, %c0_75], %70 {strides = array<i32>} : memref<2x10x10x256xf32, #tpu.memory_space<vmem>>, vector<2x8x1x256xf32>,
    %72 = vector.shape_cast %63 : vector<128x256xf32> to vector<2x8x8x256xf32>
    %c0_76 = arith.constant 0 : index
    %c1_77 = arith.constant 1 : index
    %c1_78 = arith.constant 1 : index
    %c0_79 = arith.constant 0 : index
    %73 = vector.load %arg10[%c0_76, %c1_77, %c1_78, %c0_79] : memref<2x10x10x256xf32, #tpu.memory_space<vmem>>, vector<2x8x8x256xf32>
    tpu.vector_store %arg10[%c0_76, %c1_77, %c1_78, %c0_79], %72 {strides = array<i32>} : memref<2x10x10x256xf32, #tpu.memory_space<vmem>>, vector<2x8x8x256xf32>,
    %c0_80 = arith.constant 0 : index
    %c0_81 = arith.constant 0 : index
    %c0_82 = arith.constant 0 : index
    %c0_83 = arith.constant 0 : index
    %74 = vector.load %arg10[%c0_80, %c0_81, %c0_82, %c0_83] : memref<2x10x10x256xf32, #tpu.memory_space<vmem>>, vector<2x8x8x256xf32>
    %75 = vector.shape_cast %74 : vector<2x8x8x256xf32> to vector<128x256xf32>
    %76 = arith.truncf %75 : vector<128x256xf32> to vector<128x256xbf16>
    %c0_84 = arith.constant 0 : index
    %c0_85 = arith.constant 0 : index
    %77 = vector.load %arg9[%c0_84, %c0_85] : memref<128x2304xbf16, #tpu.memory_space<vmem>>, vector<128x256xbf16>
    tpu.vector_store %arg9[%c0_84, %c0_85], %76 {strides = array<i32>} : memref<128x2304xbf16, #tpu.memory_space<vmem>>, vector<128x256xbf16>,
    %c0_86 = arith.constant 0 : index
    %c0_87 = arith.constant 0 : index
    %c1_88 = arith.constant 1 : index
    %c0_89 = arith.constant 0 : index
    %78 = vector.load %arg10[%c0_86, %c0_87, %c1_88, %c0_89] : memref<2x10x10x256xf32, #tpu.memory_space<vmem>>, vector<2x8x8x256xf32>
    %79 = vector.shape_cast %78 : vector<2x8x8x256xf32> to vector<128x256xf32>
    %80 = arith.truncf %79 : vector<128x256xf32> to vector<128x256xbf16>
    %c0_90 = arith.constant 0 : index
    %c256_91 = arith.constant 256 : index
    %81 = vector.load %arg9[%c0_90, %c256_91] : memref<128x2304xbf16, #tpu.memory_space<vmem>>, vector<128x256xbf16>
    tpu.vector_store %arg9[%c0_90, %c256_91], %80 {strides = array<i32>} : memref<128x2304xbf16, #tpu.memory_space<vmem>>, vector<128x256xbf16>,
    %c0_92 = arith.constant 0 : index
    %c0_93 = arith.constant 0 : index
    %c2_94 = arith.constant 2 : index
    %c0_95 = arith.constant 0 : index
    %82 = vector.load %arg10[%c0_92, %c0_93, %c2_94, %c0_95] : memref<2x10x10x256xf32, #tpu.memory_space<vmem>>, vector<2x8x8x256xf32>
    %83 = vector.shape_cast %82 : vector<2x8x8x256xf32> to vector<128x256xf32>
    %84 = arith.truncf %83 : vector<128x256xf32> to vector<128x256xbf16>
    %c0_96 = arith.constant 0 : index
    %c512_97 = arith.constant 512 : index
    %85 = vector.load %arg9[%c0_96, %c512_97] : memref<128x2304xbf16, #tpu.memory_space<vmem>>, vector<128x256xbf16>
    tpu.vector_store %arg9[%c0_96, %c512_97], %84 {strides = array<i32>} : memref<128x2304xbf16, #tpu.memory_space<vmem>>, vector<128x256xbf16>,
    %c0_98 = arith.constant 0 : index
    %c1_99 = arith.constant 1 : index
    %c0_100 = arith.constant 0 : index
    %c0_101 = arith.constant 0 : index
    %86 = vector.load %arg10[%c0_98, %c1_99, %c0_100, %c0_101] : memref<2x10x10x256xf32, #tpu.memory_space<vmem>>, vector<2x8x8x256xf32>
    %87 = vector.shape_cast %86 : vector<2x8x8x256xf32> to vector<128x256xf32>
    %88 = arith.truncf %87 : vector<128x256xf32> to vector<128x256xbf16>
    %c0_102 = arith.constant 0 : index
    %c768_103 = arith.constant 768 : index
    %89 = vector.load %arg9[%c0_102, %c768_103] : memref<128x2304xbf16, #tpu.memory_space<vmem>>, vector<128x256xbf16>
    tpu.vector_store %arg9[%c0_102, %c768_103], %88 {strides = array<i32>} : memref<128x2304xbf16, #tpu.memory_space<vmem>>, vector<128x256xbf16>,
    %c0_104 = arith.constant 0 : index
    %c1_105 = arith.constant 1 : index
    %c1_106 = arith.constant 1 : index
    %c0_107 = arith.constant 0 : index
    %90 = vector.load %arg10[%c0_104, %c1_105, %c1_106, %c0_107] : memref<2x10x10x256xf32, #tpu.memory_space<vmem>>, vector<2x8x8x256xf32>
    %91 = vector.shape_cast %90 : vector<2x8x8x256xf32> to vector<128x256xf32>
    %92 = arith.truncf %91 : vector<128x256xf32> to vector<128x256xbf16>
    %c0_108 = arith.constant 0 : index
    %c1024_109 = arith.constant 1024 : index
    %93 = vector.load %arg9[%c0_108, %c1024_109] : memref<128x2304xbf16, #tpu.memory_space<vmem>>, vector<128x256xbf16>
    tpu.vector_store %arg9[%c0_108, %c1024_109], %92 {strides = array<i32>} : memref<128x2304xbf16, #tpu.memory_space<vmem>>, vector<128x256xbf16>,
    %c0_110 = arith.constant 0 : index
    %c1_111 = arith.constant 1 : index
    %c2_112 = arith.constant 2 : index
    %c0_113 = arith.constant 0 : index
    %94 = vector.load %arg10[%c0_110, %c1_111, %c2_112, %c0_113] : memref<2x10x10x256xf32, #tpu.memory_space<vmem>>, vector<2x8x8x256xf32>
    %95 = vector.shape_cast %94 : vector<2x8x8x256xf32> to vector<128x256xf32>
    %96 = arith.truncf %95 : vector<128x256xf32> to vector<128x256xbf16>
    %c0_114 = arith.constant 0 : index
    %c1280_115 = arith.constant 1280 : index
    %97 = vector.load %arg9[%c0_114, %c1280_115] : memref<128x2304xbf16, #tpu.memory_space<vmem>>, vector<128x256xbf16>
    tpu.vector_store %arg9[%c0_114, %c1280_115], %96 {strides = array<i32>} : memref<128x2304xbf16, #tpu.memory_space<vmem>>, vector<128x256xbf16>,
    %c0_116 = arith.constant 0 : index
    %c2_117 = arith.constant 2 : index
    %c0_118 = arith.constant 0 : index
    %c0_119 = arith.constant 0 : index
    %98 = vector.load %arg10[%c0_116, %c2_117, %c0_118, %c0_119] : memref<2x10x10x256xf32, #tpu.memory_space<vmem>>, vector<2x8x8x256xf32>
    %99 = vector.shape_cast %98 : vector<2x8x8x256xf32> to vector<128x256xf32>
    %100 = arith.truncf %99 : vector<128x256xf32> to vector<128x256xbf16>
    %c0_120 = arith.constant 0 : index
    %c1536_121 = arith.constant 1536 : index
    %101 = vector.load %arg9[%c0_120, %c1536_121] : memref<128x2304xbf16, #tpu.memory_space<vmem>>, vector<128x256xbf16>
    tpu.vector_store %arg9[%c0_120, %c1536_121], %100 {strides = array<i32>} : memref<128x2304xbf16, #tpu.memory_space<vmem>>, vector<128x256xbf16>,
    %c0_122 = arith.constant 0 : index
    %c2_123 = arith.constant 2 : index
    %c1_124 = arith.constant 1 : index
    %c0_125 = arith.constant 0 : index
    %102 = vector.load %arg10[%c0_122, %c2_123, %c1_124, %c0_125] : memref<2x10x10x256xf32, #tpu.memory_space<vmem>>, vector<2x8x8x256xf32>
    %103 = vector.shape_cast %102 : vector<2x8x8x256xf32> to vector<128x256xf32>
    %104 = arith.truncf %103 : vector<128x256xf32> to vector<128x256xbf16>
    %c0_126 = arith.constant 0 : index
    %c1792_127 = arith.constant 1792 : index
    %105 = vector.load %arg9[%c0_126, %c1792_127] : memref<128x2304xbf16, #tpu.memory_space<vmem>>, vector<128x256xbf16>
    tpu.vector_store %arg9[%c0_126, %c1792_127], %104 {strides = array<i32>} : memref<128x2304xbf16, #tpu.memory_space<vmem>>, vector<128x256xbf16>,
    %c0_128 = arith.constant 0 : index
    %c2_129 = arith.constant 2 : index
    %c2_130 = arith.constant 2 : index
    %c0_131 = arith.constant 0 : index
    %106 = vector.load %arg10[%c0_128, %c2_129, %c2_130, %c0_131] : memref<2x10x10x256xf32, #tpu.memory_space<vmem>>, vector<2x8x8x256xf32>
    %107 = vector.shape_cast %106 : vector<2x8x8x256xf32> to vector<128x256xf32>
    %108 = arith.truncf %107 : vector<128x256xf32> to vector<128x256xbf16>
    %c0_132 = arith.constant 0 : index
    %c2048_133 = arith.constant 2048 : index
    %109 = vector.load %arg9[%c0_132, %c2048_133] : memref<128x2304xbf16, #tpu.memory_space<vmem>>, vector<128x256xbf16>
    tpu.vector_store %arg9[%c0_132, %c2048_133], %108 {strides = array<i32>} : memref<128x2304xbf16, #tpu.memory_space<vmem>>, vector<128x256xbf16>,
    %c0_134 = arith.constant 0 : index
    %c0_135 = arith.constant 0 : index
    %110 = vector.load %arg9[%c0_134, %c0_135] : memref<128x2304xbf16, #tpu.memory_space<vmem>>, vector<128x2304xbf16>
    %c0_136 = arith.constant 0 : index
    %c0_137 = arith.constant 0 : index
    %111 = vector.load %arg5[%c0_136, %c0_137] : memref<2304x256xbf16, #tpu.memory_space<vmem>>, vector<2304x256xbf16>
    %cst_138 = arith.constant dense<0.000000e+00> : vector<128x256xf32>
    %112 = tpu.matmul %110, %111, %cst_138 {dimension_numbers = #tpu.dot_dimension_numbers<[1], [0], [0], [1], [0, 0, 1, 1], [], []>} : vector<128x2304xbf16>, vector<2304x256xbf16>, vector<128x256xf32> -> vector<128x256xf32>
    %cst_139 = arith.constant dense<0.000000e+00> : vector<256xf32>
    %113 = vector.multi_reduction <add>, %112, %cst_139 [0] : vector<128x256xf32> to vector<256xf32>
    %114 = vector.shape_cast %113 : vector<256xf32> to vector<1x256xf32>
    %cst_140 = arith.constant 7.812500e-03 : f32
    %115 = vector.broadcast %cst_140 : f32 to vector<1x256xf32>
    %116 = arith.mulf %114, %115 : vector<1x256xf32>
    %117 = arith.mulf %112, %112 : vector<128x256xf32>
    %cst_141 = arith.constant dense<0.000000e+00> : vector<256xf32>
    %118 = vector.multi_reduction <add>, %117, %cst_141 [0] : vector<128x256xf32> to vector<256xf32>
    %119 = vector.shape_cast %118 : vector<256xf32> to vector<1x256xf32>
    %cst_142 = arith.constant 7.812500e-03 : f32
    %120 = vector.broadcast %cst_142 : f32 to vector<1x256xf32>
    %121 = arith.mulf %119, %120 : vector<1x256xf32>
    %122 = arith.mulf %116, %116 : vector<1x256xf32>
    %123 = arith.subf %121, %122 : vector<1x256xf32>
    %c0_143 = arith.constant 0 : index
    %c0_144 = arith.constant 0 : index
    %124 = vector.load %arg6[%c0_143, %c0_144] : memref<1x256xf32, #tpu.memory_space<vmem>>, vector<1x256xf32>
    %cst_145 = arith.constant 9.99999974E-6 : f32
    %125 = vector.broadcast %cst_145 : f32 to vector<1x256xf32>
    %126 = arith.addf %123, %125 : vector<1x256xf32>
    %127 = math.rsqrt %126 : vector<1x256xf32>
    %128 = arith.mulf %124, %127 : vector<1x256xf32>
    %c0_146 = arith.constant 0 : index
    %c0_147 = arith.constant 0 : index
    %129 = vector.load %arg7[%c0_146, %c0_147] : memref<1x256xf32, #tpu.memory_space<vmem>>, vector<1x256xf32>
    %130 = arith.mulf %116, %128 : vector<1x256xf32>
    %131 = arith.subf %129, %130 : vector<1x256xf32>
    %132 = vector.broadcast %128 : vector<1x256xf32> to vector<128x256xf32>
    %133 = arith.mulf %112, %132 : vector<128x256xf32>
    %134 = vector.broadcast %131 : vector<1x256xf32> to vector<128x256xf32>
    %135 = arith.addf %133, %134 : vector<128x256xf32>
    %c0_148 = arith.constant 0 : index
    %c1_149 = arith.constant 1 : index
    %c1_150 = arith.constant 1 : index
    %c0_151 = arith.constant 0 : index
    %136 = vector.load %arg1[%c0_148, %c1_149, %c1_150, %c0_151] : memref<2x10x10x256xf32, #tpu.memory_space<vmem>>, vector<2x8x8x256xf32>
    %137 = vector.shape_cast %136 : vector<2x8x8x256xf32> to vector<128x256xf32>
    %138 = arith.addf %135, %137 : vector<128x256xf32>
    %cst_152 = arith.constant 0.000000e+00 : f32
    %139 = vector.broadcast %cst_152 : f32 to vector<128x256xf32>
    %140 = arith.maximumf %138, %139 : vector<128x256xf32>
    %141 = vector.shape_cast %140 : vector<128x256xf32> to vector<2x8x8x256xf32>
    %c0_153 = arith.constant 0 : index
    %c0_154 = arith.constant 0 : index
    %c0_155 = arith.constant 0 : index
    %c0_156 = arith.constant 0 : index
    %142 = vector.load %arg8[%c0_153, %c0_154, %c0_155, %c0_156] : memref<2x8x8x256xf32, #tpu.memory_space<vmem>>, vector<2x8x8x256xf32>
    tpu.vector_store %arg8[%c0_153, %c0_154, %c0_155, %c0_156], %141 {strides = array<i32>} : memref<2x8x8x256xf32, #tpu.memory_space<vmem>>, vector<2x8x8x256xf32>,
    return
  }
  func.func @transform_0(%arg0: i32) -> (i32, i32, i32, i32) {
    %c0_i32 = arith.constant 0 : i32
    %c0_i32_0 = arith.constant 0 : i32
    %c0_i32_1 = arith.constant 0 : i32
    %c0_i32_2 = arith.constant 0 : i32
    %c0_i32_3 = arith.constant 0 : i32
    return %c0_i32, %c0_i32_0, %c0_i32_1, %c0_i32_2 : i32, i32, i32, i32
  }
  func.func @transform_1(%arg0: i32) -> (i32, i32) {
    %c0_i32 = arith.constant 0 : i32
    %c0_i32_0 = arith.constant 0 : i32
    %c0_i32_1 = arith.constant 0 : i32
    return %c0_i32, %c0_i32_0 : i32, i32
  }
  func.func @transform_2(%arg0: i32) -> (i32, i32) {
    %c0_i32 = arith.constant 0 : i32
    %c0_i32_0 = arith.constant 0 : i32
    %c0_i32_1 = arith.constant 0 : i32
    return %c0_i32, %c0_i32_0 : i32, i32
  }
  func.func @transform_3(%arg0: i32) -> (i32, i32) {
    %c0_i32 = arith.constant 0 : i32
    %c0_i32_0 = arith.constant 0 : i32
    %c0_i32_1 = arith.constant 0 : i32
    return %c0_i32, %c0_i32_0 : i32, i32
  }
  func.func @transform_4(%arg0: i32) -> (i32, i32) {
    %c0_i32 = arith.constant 0 : i32
    %c0_i32_0 = arith.constant 0 : i32
    %c0_i32_1 = arith.constant 0 : i32
    return %c0_i32, %c0_i32_0 : i32, i32
  }
  func.func @transform_5(%arg0: i32) -> (i32, i32) {
    %c0_i32 = arith.constant 0 : i32
    %c0_i32_0 = arith.constant 0 : i32
    %c0_i32_1 = arith.constant 0 : i32
    return %c0_i32, %c0_i32_0 : i32, i32
  }
  func.func @transform_6(%arg0: i32) -> (i32, i32) {
    %c0_i32 = arith.constant 0 : i32
    %c0_i32_0 = arith.constant 0 : i32
    %c0_i32_1 = arith.constant 0 : i32
    return %c0_i32, %c0_i32_0 : i32, i32
  }
  func.func @transform_7(%arg0: i32) -> (i32, i32, i32, i32) {
    %c0_i32 = arith.constant 0 : i32
    %c0_i32_0 = arith.constant 0 : i32
    %c0_i32_1 = arith.constant 0 : i32
    %c0_i32_2 = arith.constant 0 : i32
    %c0_i32_3 = arith.constant 0 : i32
    return %c0_i32, %c0_i32_0, %c0_i32_1, %c0_i32_2 : i32, i32, i32, i32
  }
}

</mosaic_0001>

<bundles_post_ra>
// kernel: tpu_custom_call.1
= control target key start
LH: loop header
LB: loop body
LE: loop exit
PB: predicated region body
PF: predicated region fallthrough
CT: control target
= control target key end

     0   :  { %12 = vsyncpa [#allocation5], 0  ;;  %s16588_s0 = inlined_call_operand.vmem [shape: f32[2,10,10,256], index: 0, kind: input, shape index: {}]   ;;  %s16589_s1 = inlined_call_operand.hbm [shape: bf16[2304,256], index: 1, kind: input, shape index: {}]   ;;  %s16590_s2 = inlined_call_operand.hbm [shape: f32[1,256], index: 2, kind: input, shape index: {}]   ;;  %s16591_s3 = inlined_call_operand.hbm [shape: f32[1,256], index: 3, kind: input, shape index: {}]   ;;  %s16592_s4 = inlined_call_operand.hbm [shape: bf16[2304,256], index: 4, kind: input, shape index: {}]   ;;  %s16593_s5 = inlined_call_operand.hbm [shape: f32[1,256], index: 5, kind: input, shape index: {}]   ;;  %s16594_s6 = inlined_call_operand.hbm [shape: f32[1,256], index: 6, kind: input, shape index: {}]   ;;  %s16595_s7 = inlined_call_operand.hbm [shape: f32[2,8,8,256], index: 7, kind: output, shape index: {}]  }
   0x1   :  { %13 = vsyncpa [#allocation8], 0 }
   0x2   :  { %14 = vsyncpa [#allocation11], 0 }
   0x3   :  { %15 = vsyncpa [#allocation14], 0 }
   0x4   :  { %16 = vsyncpa [#allocation6], 0  ;;  %s13470_s24 = smov [#allocation7]   ;;  %s13306_s28 = scalar_lea.hbm %s16590_s2, 32 }
   0x5   :  { %s37_s25 = sshll.u32 %s13470_s24, 4  ;;  %p13307_p0 = scmp.ne.s32.totalorder %s16590_s2, %s13306_s28  ;;  %s38_s25 = int_to_ptr.vmem [resolvable:$true] %s37_s25 }
   0x6   :  { %p13310_p1 = scmp.lt.u32.totalorder %s13306_s28, %s16590_s2 }
   0x8   :  { %p13312_p2 = pnand %p13310_p1, %p13307_p0 }
   0xa   :  { %13315 = shalt.err (!%p13312_p2)
}
   0xb   :  { %s13316_s10 = scalar_lea.vmem %s38_s25, 32  ;;  %p13321_p4 = scmp.lt.s32.totalorder %s38_s25, %s38_s25 }
   0xc   :  { %p13317_p3 = scmp.ne.s32.totalorder %s38_s25, %s13316_s10  ;;  %p13322_p5 = scmp.lt.s32.totalorder %s13316_s10, %s13316_s10 }
   0xe   :  { %p13323_p6 = por %p13322_p5, %p13321_p4 }
  0x10   :  { %p13324_p7 = pnand %p13323_p6, %p13317_p3 }
  0x12   :  { %13327 = shalt.err (!%p13324_p7)
}
  0x13   :  { %40 = dma.hbm_to_vmem [thread:$0]  %s16590_s2, 32, %s38_s25, [#allocation8]  }
  0x14   :  { %s13471_s13 = smov [#allocation10]   ;;  %s13472_s15 = smov [#allocation4]  }
  0x15   :  { %s56_s14 = sshll.u32 %s13471_s13, 4  ;;  %s24_s16 = sshll.u32 %s13472_s15, 4  ;;  %s57_s14 = int_to_ptr.vmem [resolvable:$true] %s56_s14  ;;  %s25_s16 = int_to_ptr.vmem [resolvable:$true] %s24_s16 }
  0x16   :  { %s13328_s19 = scalar_lea.hbm %s16592_s4, 36864 }
  0x17   :  { %p13329_p8 = scmp.ne.s32.totalorder %s16592_s4, %s13328_s19  ;;  %p13332_p9 = scmp.lt.u32.totalorder %s13328_s19, %s16592_s4 }
  0x19   :  { %p13334_p10 = pnand %p13332_p9, %p13329_p8 }
  0x1b   :  { %13337 = shalt.err (!%p13334_p10)
}
  0x1c   :  { %s13338_s2 = scalar_lea.vmem %s57_s14, 36864  ;;  %p13343_p12 = scmp.lt.s32.totalorder %s57_s14, %s57_s14 }
  0x1d   :  { %p13339_p11 = scmp.ne.s32.totalorder %s57_s14, %s13338_s2  ;;  %p13344_p13 = scmp.lt.s32.totalorder %s13338_s2, %s13338_s2 }
  0x1f   :  { %p13345_p0 = por %p13344_p13, %p13343_p12 }
  0x21   :  { %p13346_p1 = pnand %p13345_p0, %p13339_p11 }
  0x23   :  { %13349 = shalt.err (!%p13346_p1)
}
  0x24   :  { %s13473_s24 = smov 128   ;;  %s13474_s25 = smov 8  }
  0x25   :  { %62 = dma.hbm_to_vmem [thread:$0]  %s16592_s4, 36864, %s57_s14, [#allocation11], %s13473_s24, %s13473_s24, %s13474_s25  }
  0x26   :  { %s13350_s30 = scalar_lea.hbm %s16589_s1, 36864 }
  0x27   :  { %p13351_p2 = scmp.ne.s32.totalorder %s16589_s1, %s13350_s30  ;;  %p13354_p3 = scmp.lt.u32.totalorder %s13350_s30, %s16589_s1 }
  0x29   :  { %p13356_p4 = pnand %p13354_p3, %p13351_p2 }
  0x2b   :  { %13359 = shalt.err (!%p13356_p4)
}
  0x2c   :  { %s13360_s12 = scalar_lea.vmem %s25_s16, 36864  ;;  %p13365_p6 = scmp.lt.s32.totalorder %s25_s16, %s25_s16 }
  0x2d   :  { %p13361_p5 = scmp.ne.s32.totalorder %s25_s16, %s13360_s12  ;;  %p13366_p7 = scmp.lt.s32.totalorder %s13360_s12, %s13360_s12 }
  0x2f   :  { %p13367_p8 = por %p13366_p7, %p13365_p6 }
  0x31   :  { %p13368_p9 = pnand %p13367_p8, %p13361_p5 }
  0x33   :  { %13371 = shalt.err (!%p13368_p9)
}
  0x34   :  { %30 = dma.hbm_to_vmem [thread:$0]  %s16589_s1, 36864, %s25_s16, [#allocation5], %s13473_s24, %s13473_s24, %s13474_s25  }
  0x35   :  { %s13475_s14 = smov [#allocation9]   ;;  %s13476_s17 = smov [#allocation12]  }
  0x36   :  { %s47_s15 = sshll.u32 %s13475_s14, 4  ;;  %s69_s18 = sshll.u32 %s13476_s17, 4  ;;  %s48_s15 = int_to_ptr.vmem [resolvable:$true] %s47_s15  ;;  %s70_s18 = int_to_ptr.vmem [resolvable:$true] %s69_s18 }
  0x37   :  { %s13372_s21 = scalar_lea.hbm %s16591_s3, 32 }
  0x38   :  { %p13373_p10 = scmp.ne.s32.totalorder %s16591_s3, %s13372_s21  ;;  %p13376_p11 = scmp.lt.u32.totalorder %s13372_s21, %s16591_s3 }
  0x3a   :  { %p13378_p12 = pnand %p13376_p11, %p13373_p10 }
  0x3c   :  { %13381 = shalt.err (!%p13378_p12)
}
  0x3d   :  { %s13382_s1 = scalar_lea.vmem %s48_s15, 32  ;;  %p13387_p0 = scmp.lt.s32.totalorder %s48_s15, %s48_s15 }
  0x3e   :  { %p13383_p13 = scmp.ne.s32.totalorder %s48_s15, %s13382_s1  ;;  %p13388_p1 = scmp.lt.s32.totalorder %s13382_s1, %s13382_s1 }
  0x40   :  { %p13389_p2 = por %p13388_p1, %p13387_p0 }
  0x42   :  { %p13390_p3 = pnand %p13389_p2, %p13383_p13 }
  0x44   :  { %13393 = shalt.err (!%p13390_p3)
}
  0x45   :  { %50 = dma.hbm_to_vmem [thread:$0]  %s16591_s3, 32, %s48_s15, [#allocation8]  }
  0x46   :  { %s13394_s28 = scalar_lea.hbm %s16593_s5, 32 }
  0x47   :  { %p13395_p4 = scmp.ne.s32.totalorder %s16593_s5, %s13394_s28  ;;  %p13398_p5 = scmp.lt.u32.totalorder %s13394_s28, %s16593_s5 }
  0x49   :  { %p13400_p6 = pnand %p13398_p5, %p13395_p4 }
  0x4b   :  { %13403 = shalt.err (!%p13400_p6)
}
  0x4c   :  { %s13404_s10 = scalar_lea.vmem %s70_s18, 32  ;;  %p13409_p8 = scmp.lt.s32.totalorder %s70_s18, %s70_s18 }
  0x4d   :  { %p13405_p7 = scmp.ne.s32.totalorder %s70_s18, %s13404_s10  ;;  %p13410_p9 = scmp.lt.s32.totalorder %s13404_s10, %s13404_s10 }
  0x4f   :  { %p13411_p10 = por %p13410_p9, %p13409_p8 }
  0x51   :  { %p13412_p11 = pnand %p13411_p10, %p13405_p7 }
  0x53   :  { %13415 = shalt.err (!%p13412_p11)
}
  0x54   :  { %72 = dma.hbm_to_vmem [thread:$0]  %s16593_s5, 32, %s70_s18, [#allocation11]  }
  0x55   :  { %s13477_s12 = smov [#allocation13]   ;;  %s13416_s15 = scalar_lea.hbm %s16594_s6, 32 }
  0x56   :  { %s79_s4 = sshll.u32 %s13477_s12, 4  ;;  %p13417_p12 = scmp.ne.s32.totalorder %s16594_s6, %s13416_s15  ;;  %s80_s4 = int_to_ptr.vmem [resolvable:$true] %s79_s4 }
  0x57   :  { %p13420_p13 = scmp.lt.u32.totalorder %s13416_s15, %s16594_s6 }
  0x59   :  { %p13422_p0 = pnand %p13420_p13, %p13417_p12 }
  0x5b   :  { %13425 = shalt.err (!%p13422_p0)
}
  0x5c   :  { %s13426_s22 = scalar_lea.vmem %s80_s4, 32  ;;  %p13431_p2 = scmp.lt.s32.totalorder %s80_s4, %s80_s4 }
  0x5d   :  { %p13427_p1 = scmp.ne.s32.totalorder %s80_s4, %s13426_s22  ;;  %p13432_p3 = scmp.lt.s32.totalorder %s13426_s22, %s13426_s22 }
  0x5f   :  { %p13433_p4 = por %p13432_p3, %p13431_p2 }
  0x61   :  { %p13434_p5 = pnand %p13433_p4, %p13427_p1 }
  0x63   :  { %13437 = shalt.err (!%p13434_p5)
}
  0x64   :  { %82 = dma.hbm_to_vmem [thread:$0]  %s16594_s6, 32, %s80_s4, [#allocation14]  }
  0x65   :  { %13460 = dma.done.wait [#allocation5], 36864  }
  0x66   :  { %13461 = vsyncadd [#allocation5], 4294930432 }
  0x67   :  { %13462 = dma.done.wait [#allocation8], 64  }
  0x68   :  { %13463 = vsyncadd [#allocation8], 4294967232 }
  0x69   :  { %13464 = dma.done.wait [#allocation11], 36896  }
  0x6a   :  { %13465 = vsyncadd [#allocation11], 4294930400 }
  0x6b   :  { %13466 = dma.done.wait [#allocation14], 32  }
  0x6c   :  { %13467 = vsyncadd [#allocation14], 4294967264  ;;  %v12433_v0 = vld [vmem:[#allocation4 + $0x4] ss:$8 sps:$4 sm:$0xff]   ;;  %v12435_v1 = vld [vmem:[#allocation4] ss:$8 sps:$4 sm:$0xff]  }
  0x6d   :  { %3897 = vmatprep.subr.bf16.mxu0 %v12433_v0  ;;  %v12436_v2 = vld [vmem:[#allocation4 + $0x14] ss:$8 sps:$4 sm:$0xff]   ;;  %v12438_v3 = vld [vmem:[#allocation4 + $0x10] ss:$8 sps:$4 sm:$0xff]   ;;  %v12439_v4 = vld [vmem:[#allocation4 + $0x24] ss:$8 sps:$4 sm:$0xff]  }
  0x6e   :  { %3898 = vmatpush1.bf16.msra.mxu0 %v12435_v1  ;;  %v12441_v5 = vld [vmem:[#allocation4 + $0x20] ss:$8 sps:$4 sm:$0xff]   ;;  %v12442_v6 = vld [vmem:[#allocation4 + $0x34] ss:$8 sps:$4 sm:$0xff]   ;;  %v12444_v7 = vld [vmem:[#allocation4 + $0x30] ss:$8 sps:$4 sm:$0xff]  }
  0x6f   :  { %3899 = vmatprep.subr.bf16.mxu0 %v12436_v2  ;;  %v12445_v8 = vld [vmem:[#allocation4 + $0x44] ss:$8 sps:$4 sm:$0xff]   ;;  %v12447_v9 = vld [vmem:[#allocation4 + $0x40] ss:$8 sps:$4 sm:$0xff]   ;;  %v12448_v10 = vld [vmem:[#allocation4 + $0x54] ss:$8 sps:$4 sm:$0xff]  }
  0x70   :  { %v12450_v11 = vld [vmem:[#allocation4 + $0x50] ss:$8 sps:$4 sm:$0xff]   ;;  %v12451_v12 = vld [vmem:[#allocation4 + $0x64] ss:$8 sps:$4 sm:$0xff]   ;;  %v12453_v16 = vld [vmem:[#allocation4 + $0x60] ss:$8 sps:$4 sm:$0xff]  }
  0x71   :  { %v102_v13 = vld [vmem:[%s16588_s0 + $0x8] sm:$0xff]  ;;  %v12454_v17 = vld [vmem:[#allocation4 + $0x74] ss:$8 sps:$4 sm:$0xff]   ;;  %v12456_v18 = vld [vmem:[#allocation4 + $0x70] ss:$8 sps:$4 sm:$0xff]   ;;  %vm293_vm0 = vcmask 1046528  }
  0x72   :  { %3900 = vmatpush1.bf16.msra.mxu0 %v12438_v3  ;;  %v104_v14 = vld [vmem:[%s16588_s0 + $0x28] sm:$0xff]  ;;  %v12460_v21 = vld [vmem:[#allocation4 + $0x94] ss:$8 sps:$4 sm:$0xff]   ;;  %v12462_v22 = vld [vmem:[#allocation4 + $0x90] ss:$8 sps:$4 sm:$0xff]   ;;  %vm582_vm1 = vcmask 1045504  }
  0x73   :  { %3901 = vmatprep.subr.bf16.mxu0 %v12439_v4  ;;  %v134_v15 = vpack.c.bf16 %v104_v14, %v102_v13  ;;  %v12457_v19 = vld [vmem:[#allocation4 + $0x84] ss:$8 sps:$4 sm:$0xff]   ;;  %v12459_v20 = vld [vmem:[#allocation4 + $0x80] ss:$8 sps:$4 sm:$0xff]   ;;  %v12466_v25 = vld [vmem:[#allocation4 + $0xb4] ss:$8 sps:$4 sm:$0xff]  }
  0x74   :  { %v12463_v23 = vld [vmem:[#allocation4 + $0xa4] ss:$8 sps:$4 sm:$0xff]   ;;  %v12465_v24 = vld [vmem:[#allocation4 + $0xa0] ss:$8 sps:$4 sm:$0xff]   ;;  %v12468_v26 = vld [vmem:[#allocation4 + $0xb0] ss:$8 sps:$4 sm:$0xff]  }
  0x75   :  { %3929 = vmatprep.mubr.bf16.mxu0 %v134_v15  ;;  %v12469_v27 = vld [vmem:[#allocation4 + $0xc4] ss:$8 sps:$4 sm:$0xff]   ;;  %v12471_v28 = vld [vmem:[#allocation4 + $0xc0] ss:$8 sps:$4 sm:$0xff]   ;;  %v12472_v29 = vld [vmem:[#allocation4 + $0xd4] ss:$8 sps:$4 sm:$0xff]  }
  0x76   :  { %3902 = vmatpush1.bf16.msra.mxu0 %v12441_v5  ;;  %v12474_v30 = vld [vmem:[#allocation4 + $0xd0] ss:$8 sps:$4 sm:$0xff]   ;;  %v12475_v31 = vld [vmem:[#allocation4 + $0xe4] ss:$8 sps:$4 sm:$0xff]   ;;  %v12477_v32 = vld [vmem:[#allocation4 + $0xe0] ss:$8 sps:$4 sm:$0xff]  }
  0x77   :  { %3903 = vmatprep.subr.bf16.mxu0 %v12442_v6  ;;  %v12478_v33 = vld [vmem:[#allocation4 + $0xf4] ss:$8 sps:$4 sm:$0xff]   ;;  %v12480_v34 = vld [vmem:[#allocation4 + $0xf0] ss:$8 sps:$4 sm:$0xff]   ;;  %v101_v35 = vld [vmem:[%s16588_s0] sm:$0xff] }
  0x78   :  { %v103_v36 = vld [vmem:[%s16588_s0 + $0x20] sm:$0xff]  ;;  %v106_v38 = vld [vmem:[%s16588_s0 + $0x48] sm:$0xff]  ;;  %v12486_v43 = vld [vmem:[#allocation4 + $0x114] ss:$8 sps:$4 sm:$0xff]  }
  0x79   :  { %v12483_v37 = vld [vmem:[#allocation4 + $0x104] ss:$8 sps:$4 sm:$0xff]   ;;  %v133_v40 = vpack.c.bf16 %v103_v36, %v101_v35  ;;  %v12481_v41 = vld [vmem:[#allocation4 + $0x100] ss:$8 sps:$4 sm:$0xff]   ;;  %v12484_v44 = vld [vmem:[#allocation4 + $0x110] ss:$8 sps:$4 sm:$0xff]  }
  0x7a   :  { %3904 = vmatpush1.bf16.msra.mxu0 %v12444_v7  ;;  %v108_v39 = vld [vmem:[%s16588_s0 + $0x68] sm:$0xff]  ;;  %v105_v45 = vld [vmem:[%s16588_s0 + $0x40] sm:$0xff]  ;;  %v12492_v53 = vld [vmem:[#allocation4 + $0x134] ss:$8 sps:$4 sm:$0xff]  }
  0x7b   :  { %3905 = vmatprep.subr.bf16.mxu0 %v12445_v8  ;;  %v136_v42 = vpack.c.bf16 %v108_v39, %v106_v38  ;;  %v107_v46 = vld [vmem:[%s16588_s0 + $0x60] sm:$0xff]  ;;  %v110_v48 = vld [vmem:[%s16588_s0 + $0x88] sm:$0xff]  ;;  %v12490_v54 = vld [vmem:[#allocation4 + $0x130] ss:$8 sps:$4 sm:$0xff]  }
  0x7c   :  { %v12489_v47 = vld [vmem:[#allocation4 + $0x124] ss:$8 sps:$4 sm:$0xff]   ;;  %v135_v50 = vpack.c.bf16 %v107_v46, %v105_v45  ;;  %v12487_v51 = vld [vmem:[#allocation4 + $0x120] ss:$8 sps:$4 sm:$0xff]   ;;  %v12498_v63 = vld [vmem:[#allocation4 + $0x154] ss:$8 sps:$4 sm:$0xff]  }
  0x7d   :  { %v112_v49 = vld [vmem:[%s16588_s0 + $0xa8] sm:$0xff]  ;;  %v109_v55 = vld [vmem:[%s16588_s0 + $0x80] sm:$0xff]  ;;  %v12496_v0 = vld [vmem:[#allocation4 + $0x150] ss:$8 sps:$4 sm:$0xff]  }
  0x7e   :  { %3906 = vmatpush1.bf16.msra.mxu0 %v12447_v9  ;;  %v138_v52 = vpack.c.bf16 %v112_v49, %v110_v48  ;;  %v111_v56 = vld [vmem:[%s16588_s0 + $0xa0] sm:$0xff]  ;;  %v114_v58 = vld [vmem:[%s16588_s0 + $0xc8] sm:$0xff]  ;;  %v12504_v9 = vld [vmem:[#allocation4 + $0x174] ss:$8 sps:$4 sm:$0xff]  }
  0x7f   :  { %3907 = vmatprep.subr.bf16.mxu0 %v12448_v10  ;;  %v12495_v57 = vld [vmem:[#allocation4 + $0x144] ss:$8 sps:$4 sm:$0xff]   ;;  %v137_v60 = vpack.c.bf16 %v111_v56, %v109_v55  ;;  %v12493_v61 = vld [vmem:[#allocation4 + $0x140] ss:$8 sps:$4 sm:$0xff]   ;;  %v12502_v10 = vld [vmem:[#allocation4 + $0x170] ss:$8 sps:$4 sm:$0xff]  }
  0x80   :  { %v116_v59 = vld [vmem:[%s16588_s0 + $0xe8] sm:$0xff]  ;;  %v113_v1 = vld [vmem:[%s16588_s0 + $0xc0] sm:$0xff]  ;;  %v172_v39 = vld [vmem:[%s16588_s0 + $0x38] sm:$0x1] }
  0x81   :  { %v140_v62 = vpack.c.bf16 %v116_v59, %v114_v58  ;;  %v115_v2 = vld [vmem:[%s16588_s0 + $0xe0] sm:$0xff]  ;;  %v118_v4 = vld [vmem:[%s16588_s0 + $0x148] sm:$0xff]  ;;  %v12520_v48 = vld [vmem:[#allocation4 + $0x1d0] ss:$8 sps:$4 sm:$0xff]  }
  0x82   :  { %3908 = vmatpush1.bf16.msra.mxu0 %v12450_v11  ;;  %v12501_v3 = vld [vmem:[#allocation4 + $0x164] ss:$8 sps:$4 sm:$0xff]   ;;  %v139_v6 = vpack.c.bf16 %v115_v2, %v113_v1  ;;  %v12499_v7 = vld [vmem:[#allocation4 + $0x160] ss:$8 sps:$4 sm:$0xff]   ;;  %v176_v59 = vld [vmem:[%s16588_s0 + $0x58] sm:$0x1] }
  0x83   :  { %3909 = vmatprep.subr.bf16.mxu0 %v12451_v12  ;;  %v120_v5 = vld [vmem:[%s16588_s0 + $0x168] sm:$0xff]  ;;  %v117_v11 = vld [vmem:[%s16588_s0 + $0x140] sm:$0xff] }
  0x84   :  { %v142_v8 = vpack.c.bf16 %v120_v5, %v118_v4  ;;  %v119_v12 = vld [vmem:[%s16588_s0 + $0x160] sm:$0xff]  ;;  %v122_v14 = vld [vmem:[%s16588_s0 + $0x188] sm:$0xff]  ;;  %v12528_v5 = vld [vmem:[#allocation4 + $0x1f4] ss:$8 sps:$4 sm:$0xff]  }
  0x85   :  { %v12507_v13 = vld [vmem:[#allocation4 + $0x184] ss:$8 sps:$4 sm:$0xff]  }
  0x86   :  { %3910 = vmatpush1.bf16.msra.mxu0 %v12453_v16  ;;  %v124_v15 = vld [vmem:[%s16588_s0 + $0x1a8] sm:$0xff]  ;;  %v141_v16 = vpack.c.bf16 %v119_v12, %v117_v11  ;;  %v129_v49 = vld [vmem:[%s16588_s0 + $0x200] sm:$0xff] }
  0x87   :  { %3911 = vmatprep.subr.bf16.mxu0 %v12454_v17  ;;  %v12505_v17 = vld [vmem:[#allocation4 + $0x180] ss:$8 sps:$4 sm:$0xff]   ;;  %v12531_v11 = vld [vmem:[#allocation4 + $0x204] ss:$8 sps:$4 sm:$0xff]  }
  0x88   :  { %v132_v35 = vld [vmem:[%s16588_s0 + $0x228] sm:$0xff]  ;;  %v169_v56 = vld [vmem:[%s16588_s0 + $0x20] sm:$0xfe] }
  0x89   :  { %v166_v36 = vld [vmem:[%s16588_s0 + $0x8] sm:$0xfe]  ;;  %v173_v12 = vld [vmem:[%s16588_s0 + $0x40] sm:$0xfe] }
  0x8a   :  { %3912 = vmatpush1.bf16.msra.mxu0 %v12456_v18  ;;  %v144_v18 = vpack.c.bf16 %v124_v15, %v122_v14  ;;  %v170_v38 = vld [vmem:[%s16588_s0 + $0x28] sm:$0xfe]  ;;  %v177_v14 = vld [vmem:[%s16588_s0 + $0x60] sm:$0xfe] }
  0x8b   :  { %3913 = vmatprep.subr.bf16.mxu0 %v12457_v19  ;;  %v12510_v19 = vld [vmem:[#allocation4 + $0x194] ss:$8 sps:$4 sm:$0xff]   ;;  %v303_v46 = vrot.slane %v170_v38, 1  ;;  %v174_v58 = vld [vmem:[%s16588_s0 + $0x48] sm:$0xfe] }
  0x8e   :  { %3914 = vmatpush1.bf16.msra.mxu0 %v12459_v20  ;;  %v12508_v20 = vld [vmem:[#allocation4 + $0x190] ss:$8 sps:$4 sm:$0xff]  }
  0x8f   :  { %3915 = vmatprep.subr.bf16.mxu0 %v12460_v21  ;;  %v121_v21 = vld [vmem:[%s16588_s0 + $0x180] sm:$0xff] }
  0x92   :  { %3916 = vmatpush1.bf16.msra.mxu0 %v12462_v22  ;;  %v123_v22 = vld [vmem:[%s16588_s0 + $0x1a0] sm:$0xff] }
  0x93   :  { %3917 = vmatprep.subr.bf16.mxu0 %v12463_v23  ;;  %v12513_v23 = vld [vmem:[#allocation4 + $0x1a4] ss:$8 sps:$4 sm:$0xff]  }
  0x96   :  { %3918 = vmatpush1.bf16.msra.mxu0 %v12465_v24  ;;  %v126_v24 = vld [vmem:[%s16588_s0 + $0x1c8] sm:$0xff] }
  0x97   :  { %3919 = vmatprep.subr.bf16.mxu0 %v12466_v25  ;;  %v128_v25 = vld [vmem:[%s16588_s0 + $0x1e8] sm:$0xff] }
  0x9a   :  { %3920 = vmatpush1.bf16.msra.mxu0 %v12468_v26  ;;  %v143_v26 = vpack.c.bf16 %v123_v22, %v121_v21  ;;  %v186_v22 = vld [vmem:[%s16588_s0 + $0xa8] sm:$0xfe] }
  0x9b   :  { %3921 = vmatprep.subr.bf16.mxu0 %v12469_v27  ;;  %v12511_v27 = vld [vmem:[#allocation4 + $0x1a0] ss:$8 sps:$4 sm:$0xff]  }
  0x9e   :  { %3922 = vmatpush1.bf16.msra.mxu0 %v12471_v28  ;;  %v146_v28 = vpack.c.bf16 %v128_v25, %v126_v24  ;;  %v12529_v25 = vld [vmem:[#allocation4 + $0x200] ss:$8 sps:$4 sm:$0xff]  }
  0x9f   :  { %3923 = vmatprep.subr.bf16.mxu0 %v12472_v29  ;;  %v12516_v29 = vld [vmem:[#allocation4 + $0x1b4] ss:$8 sps:$4 sm:$0xff]  }
  0xa2   :  { %3924 = vmatpush1.bf16.msra.mxu0 %v12474_v30  ;;  %v12514_v30 = vld [vmem:[#allocation4 + $0x1b0] ss:$8 sps:$4 sm:$0xff]  }
  0xa3   :  { %3925 = vmatprep.subr.bf16.mxu0 %v12475_v31  ;;  %v125_v31 = vld [vmem:[%s16588_s0 + $0x1c0] sm:$0xff] }
  0xa6   :  { %3926 = vmatpush1.bf16.msra.mxu0 %v12477_v32  ;;  %v127_v32 = vld [vmem:[%s16588_s0 + $0x1e0] sm:$0xff] }
  0xa7   :  { %3927 = vmatprep.subr.bf16.mxu0 %v12478_v33  ;;  %v12519_v33 = vld [vmem:[#allocation4 + $0x1c4] ss:$8 sps:$4 sm:$0xff]  }
  0xaa   :  { %3928 = vmatpush1.bf16.msra.mxu0 %v12480_v34  ;;  %v130_v34 = vld [vmem:[%s16588_s0 + $0x208] sm:$0xff] }
  0xab   :  { %4010 = vmatprep.subr.bf16.mxu0 %v12483_v37  ;;  %v168_v37 = vld [vmem:[%s16588_s0 + $0x18] sm:$0x1] }
  0xac   :  { %v298_v45 = vrot.slane %v168_v37, 1  ;;  %v12537_v37 = vld [vmem:[#allocation4 + $0x224] ss:$8 sps:$4 sm:$0xff]  }
  0xad   :  { %3930 = vmatmul.mubr.bf16.vlgmr.msra.gmra.mrb[0].mxu0 %v133_v40  ;;  %v145_v40 = vpack.c.bf16 %v127_v32, %v125_v31 }
  0xae   :  { %4011 = vmatpush1.bf16.msra.mxu0 %v12481_v41  ;;  %3939 = vmatprep.mubr.bf16.mxu0 %v136_v42  ;;  %v12517_v41 = vld [vmem:[#allocation4 + $0x1c0] ss:$8 sps:$4 sm:$0xff]   ;;  %v148_v42 = vpack.c.bf16 %v132_v35, %v130_v34  ;;  %v327_v34 = vrot.slane %v186_v22, 1 }
  0xaf   :  { %4012 = vmatprep.subr.bf16.mxu0 %v12486_v43  ;;  %v12522_v43 = vld [vmem:[#allocation4 + $0x1d4] ss:$8 sps:$4 sm:$0xff]  }
  0xb2   :  { %4013 = vmatpush1.bf16.msra.mxu0 %v12484_v44  ;;  %v297_v44 = vrot.slane %v166_v36, 1  ;;  %v12532_v36 = vld [vmem:[#allocation4 + $0x210] ss:$8 sps:$4 sm:$0xff]  }
  0xb3   :  { %4014 = vmatprep.subr.bf16.mxu0 %v12489_v47  ;;  %v304_v47 = vrot.slane %v172_v39, 1 }
  0xb5   :  { %3940 = vmatmul.mubr.bf16.gmra.mrb[4].mxu0 %v135_v50  ;;  %v131_v50 = vld [vmem:[%s16588_s0 + $0x220] sm:$0xff]  ;;  %v305_v55 = vsel %vm293_vm0, %v303_v46, %v304_v47  ;;  %v190_v46 = vld [vmem:[%s16588_s0 + $0xc8] sm:$0xfe]  ;;  %v192_v47 = vld [vmem:[%s16588_s0 + $0xd8] sm:$0x1] }
  0xb6   :  { %4015 = vmatpush1.bf16.msra.mxu0 %v12487_v51  ;;  %3949 = vmatprep.mubr.bf16.mxu0 %v138_v52  ;;  %v12525_v51 = vld [vmem:[#allocation4 + $0x1e4] ss:$8 sps:$4 sm:$0xff]  }
  0xb7   :  { %4016 = vmatprep.subr.bf16.mxu0 %v12492_v53  ;;  %v165_v52 = vld [vmem:[%s16588_s0] sm:$0xfe]  ;;  %v167_v53 = vld [vmem:[%s16588_s0 + $0x10] sm:$0x1] }
  0xb8   :  { %v295_v2 = vrot.slane %v167_v53, 1  ;;  %v12540_v53 = vld [vmem:[#allocation4 + $0x234] ss:$8 sps:$4 sm:$0xff]  }
  0xba   :  { %4017 = vmatpush1.bf16.msra.mxu0 %v12490_v54  ;;  %v299_v54 = vsel %vm293_vm0, %v297_v44, %v298_v45  ;;  %v185_v44 = vld [vmem:[%s16588_s0 + $0xa0] sm:$0xfe]  ;;  %v187_v45 = vld [vmem:[%s16588_s0 + $0xb0] sm:$0x1] }
  0xbb   :  { %4018 = vmatprep.subr.bf16.mxu0 %v12495_v57  ;;  %v171_v57 = vld [vmem:[%s16588_s0 + $0x30] sm:$0x1]  ;;  %v423_v1 = vpack.c.bf16 %v305_v55, %v299_v54 }
  0xbc   :  { %v301_v4 = vrot.slane %v171_v57, 1  ;;  %v325_v57 = vrot.slane %v187_v45, 1 }
  0xbd   :  { %3950 = vmatmul.mubr.bf16.gmra.mrb[8].mxu0 %v137_v60  ;;  %v178_v60 = vld [vmem:[%s16588_s0 + $0x68] sm:$0xfe] }
  0xbe   :  { %4019 = vmatpush1.bf16.msra.mxu0 %v12493_v61  ;;  %3959 = vmatprep.mubr.bf16.mxu0 %v140_v62  ;;  %v180_v61 = vld [vmem:[%s16588_s0 + $0x78] sm:$0x1]  ;;  %v147_v62 = vpack.c.bf16 %v131_v50, %v129_v49 }
  0xbf   :  { %4020 = vmatprep.subr.bf16.mxu0 %v12498_v63  ;;  %v12523_v63 = vld [vmem:[#allocation4 + $0x1e0] ss:$8 sps:$4 sm:$0xff]   ;;  %v196_v49 = vld [vmem:[%s16588_s0 + $0xf8] sm:$0x1] }
  0xc2   :  { %4021 = vmatpush1.bf16.msra.mxu0 %v12496_v0  ;;  %v294_v0 = vrot.slane %v165_v52, 1 }
  0xc3   :  { %4022 = vmatprep.subr.bf16.mxu0 %v12501_v3  ;;  %v300_v3 = vrot.slane %v169_v56, 1  ;;  %v324_v56 = vrot.slane %v185_v44, 1 }
  0xc4   :  { %v296_v15 = vsel %vm293_vm0, %v294_v0, %v295_v2  ;;  %v189_v2 = vld [vmem:[%s16588_s0 + $0xc0] sm:$0xfe] }
  0xc5   :  { %3960 = vmatmul.mubr.bf16.gmra.mrb[12].mxu0 %v139_v6  ;;  %v309_v6 = vrot.slane %v174_v58, 1  ;;  %v333_v58 = vrot.slane %v190_v46, 1 }
  0xc6   :  { %4023 = vmatpush1.bf16.msra.mxu0 %v12499_v7  ;;  %3969 = vmatprep.mubr.bf16.mxu0 %v142_v8  ;;  %v310_v7 = vrot.slane %v176_v59, 1  ;;  %v315_v8 = vrot.slane %v178_v60, 1  ;;  %v334_v59 = vrot.slane %v192_v47, 1 }
  0xc7   :  { %4024 = vmatprep.subr.bf16.mxu0 %v12504_v9  ;;  %v316_v9 = vrot.slane %v180_v61, 1  ;;  %v340_v61 = vrot.slane %v196_v49, 1 }
  0xc9   :  { %v317_v21 = vsel %vm293_vm0, %v315_v8, %v316_v9  ;;  %v198_v8 = vld [vmem:[%s16588_s0 + $0x148] sm:$0xfe]  ;;  %v200_v9 = vld [vmem:[%s16588_s0 + $0x158] sm:$0x1] }
  0xca   :  { %4025 = vmatpush1.bf16.msra.mxu0 %v12502_v10  ;;  %v12526_v10 = vld [vmem:[#allocation4 + $0x1f0] ss:$8 sps:$4 sm:$0xff]  }
  0xcb   :  { %4026 = vmatprep.subr.bf16.mxu0 %v12507_v13  ;;  %v175_v13 = vld [vmem:[%s16588_s0 + $0x50] sm:$0x1] }
  0xcd   :  { %3970 = vmatmul.mubr.bf16.gmra.mrb[16].mxu0 %v141_v16  ;;  %v302_v16 = vsel %vm293_vm0, %v300_v3, %v301_v4  ;;  %v191_v3 = vld [vmem:[%s16588_s0 + $0xd0] sm:$0x1]  ;;  %v193_v4 = vld [vmem:[%s16588_s0 + $0xe0] sm:$0xfe] }
  0xce   :  { %4027 = vmatpush1.bf16.msra.mxu0 %v12505_v17  ;;  %3979 = vmatprep.mubr.bf16.mxu0 %v144_v18  ;;  %v179_v17 = vld [vmem:[%s16588_s0 + $0x70] sm:$0x1]  ;;  %v182_v18 = vld [vmem:[%s16588_s0 + $0x88] sm:$0xfe]  ;;  %v422_v24 = vpack.c.bf16 %v302_v16, %v296_v15  ;;  %v331_v16 = vrot.slane %v191_v3, 1 }
  0xcf   :  { %4028 = vmatprep.subr.bf16.mxu0 %v12510_v19  ;;  %v184_v19 = vld [vmem:[%s16588_s0 + $0x98] sm:$0x1]  ;;  %v313_v31 = vrot.slane %v179_v17, 1  ;;  %v321_v32 = vrot.slane %v182_v18, 1  ;;  %v336_v17 = vrot.slane %v193_v4, 1 }
  0xd0   :  { %v12558_v3 = vld [vmem:[#allocation4 + $0x294] ss:$8 sps:$4 sm:$0xff]  }
  0xd2   :  { %4029 = vmatpush1.bf16.msra.mxu0 %v12508_v20  ;;  %v311_v20 = vsel %vm293_vm0, %v309_v6, %v310_v7  ;;  %v195_v7 = vld [vmem:[%s16588_s0 + $0xf0] sm:$0x1] }
  0xd3   :  { %4030 = vmatprep.subr.bf16.mxu0 %v12513_v23  ;;  %v188_v23 = vld [vmem:[%s16588_s0 + $0xb8] sm:$0x1]  ;;  %v337_v18 = vrot.slane %v195_v7, 1 }
  0xd4   :  { %v328_v35 = vrot.slane %v188_v23, 1 }
  0xd5   :  { %3980 = vmatmul.mubr.bf16.gmra.mrb[20].mxu0 %v143_v26  ;;  %v306_v26 = vrot.slane %v173_v12, 1 }
  0xd6   :  { %4031 = vmatpush1.bf16.msra.mxu0 %v12511_v27  ;;  %3989 = vmatprep.mubr.bf16.mxu0 %v146_v28  ;;  %v12534_v27 = vld [vmem:[#allocation4 + $0x214] ss:$8 sps:$4 sm:$0xff]   ;;  %v425_v28 = vpack.c.bf16 %v317_v21, %v311_v20  ;;  %v345_v20 = vrot.slane %v198_v8, 1  ;;  %v346_v21 = vrot.slane %v200_v9, 1 }
  0xd7   :  { %4032 = vmatprep.subr.bf16.mxu0 %v12516_v29  ;;  %v307_v29 = vrot.slane %v175_v13, 1  ;;  %v330_v13 = vrot.slane %v189_v2, 1 }
  0xd9   :  { %v308_v38 = vsel %vm293_vm0, %v306_v26, %v307_v29  ;;  %v197_v26 = vld [vmem:[%s16588_s0 + $0x140] sm:$0xfe]  ;;  %v338_v29 = vsel %vm293_vm0, %v336_v17, %v337_v18 }
  0xda   :  { %4033 = vmatpush1.bf16.msra.mxu0 %v12514_v30  ;;  %v312_v30 = vrot.slane %v177_v14, 1  ;;  %v12541_v14 = vld [vmem:[#allocation4 + $0x240] ss:$8 sps:$4 sm:$0xff]  }
  0xdb   :  { %4034 = vmatprep.subr.bf16.mxu0 %v12519_v33  ;;  %v322_v33 = vrot.slane %v184_v19, 1  ;;  %v12546_v19 = vld [vmem:[#allocation4 + $0x254] ss:$8 sps:$4 sm:$0xff]  }
  0xdc   :  { %v314_v39 = vsel %vm293_vm0, %v312_v30, %v313_v31  ;;  %v201_v30 = vld [vmem:[%s16588_s0 + $0x160] sm:$0xfe]  ;;  %v203_v31 = vld [vmem:[%s16588_s0 + $0x170] sm:$0x1] }
  0xdd   :  { %3990 = vmatmul.mubr.bf16.gmra.mrb[24].mxu0 %v145_v40  ;;  %v181_v40 = vld [vmem:[%s16588_s0 + $0x80] sm:$0xfe]  ;;  %v424_v50 = vpack.c.bf16 %v314_v39, %v308_v38  ;;  %v348_v44 = vrot.slane %v201_v30, 1  ;;  %v349_v45 = vrot.slane %v203_v31, 1 }
  0xde   :  { %4035 = vmatpush1.bf16.msra.mxu0 %v12517_v41  ;;  %3999 = vmatprep.mubr.bf16.mxu0 %v148_v42  ;;  %v183_v41 = vld [vmem:[%s16588_s0 + $0x90] sm:$0x1]  ;;  %v323_v42 = vsel %vm293_vm0, %v321_v32, %v322_v33  ;;  %v318_v52 = vrot.slane %v181_v40, 1  ;;  %v206_v32 = vld [vmem:[%s16588_s0 + $0x188] sm:$0xfe]  ;;  %v347_v33 = vsel %vm293_vm0, %v345_v20, %v346_v21  ;;  %v342_v40 = vrot.slane %v197_v26, 1 }
  0xdf   :  { %4036 = vmatprep.subr.bf16.mxu0 %v12522_v43  ;;  %v329_v43 = vsel %vm293_vm0, %v327_v34, %v328_v35  ;;  %v319_v55 = vrot.slane %v183_v41, 1  ;;  %v208_v35 = vld [vmem:[%s16588_s0 + $0x198] sm:$0x1]  ;;  %v12547_v39 = vld [vmem:[#allocation4 + $0x260] ss:$8 sps:$4 sm:$0xff]   ;;  %v357_v46 = vrot.slane %v206_v32, 1 }
  0xe0   :  { %v427_v54 = vpack.c.bf16 %v329_v43, %v323_v42  ;;  %v12552_v41 = vld [vmem:[#allocation4 + $0x274] ss:$8 sps:$4 sm:$0xff]   ;;  %v358_v47 = vrot.slane %v208_v35, 1  ;;  %v222_v20 = vld [vmem:[%s16588_s0 + $0x208] sm:$0xfe] }
  0xe1   :  { %v320_v0 = vsel %vm293_vm0, %v318_v52, %v319_v55  ;;  %v205_v52 = vld [vmem:[%s16588_s0 + $0x180] sm:$0xfe]  ;;  %v224_v21 = vld [vmem:[%s16588_s0 + $0x218] sm:$0x1] }
  0xe2   :  { %4037 = vmatpush1.bf16.msra.mxu0 %v12520_v48  ;;  %v194_v48 = vld [vmem:[%s16588_s0 + $0xe8] sm:$0xfe]  ;;  %v354_v2 = vrot.slane %v205_v52, 1  ;;  %v382_v35 = vrot.slane %v224_v21, 1 }
  0xe3   :  { %4038 = vmatprep.subr.bf16.mxu0 %v12525_v51  ;;  %v12535_v51 = vld [vmem:[#allocation4 + $0x220] ss:$8 sps:$4 sm:$0xff]   ;;  %v339_v60 = vrot.slane %v194_v48, 1 }
  0xe5   :  { %4000 = vmatmul.mubr.bf16.gmra.mrb[28].mxu0 %v147_v62  ;;  %v12538_v62 = vld [vmem:[#allocation4 + $0x230] ss:$8 sps:$4 sm:$0xff]   ;;  %v341_v6 = vsel %vm293_vm0, %v339_v60, %v340_v61  ;;  %v359_v60 = vsel %vm293_vm0, %v357_v46, %v358_v47  ;;  %v455_v46 = vld [vmem:[%s16588_s0 + $0x8] sm:$0xfc] }
  0xe6   :  { %4039 = vmatpush1.bf16.msra.mxu0 %v12523_v63  ;;  %4042 = vmatprep.mubr.bf16.mxu0 %v423_v1  ;;  %v12543_v63 = vld [vmem:[#allocation4 + $0x244] ss:$8 sps:$4 sm:$0xff]   ;;  %v326_v1 = vsel %vm293_vm0, %v324_v56, %v325_v57  ;;  %v350_v56 = vsel %vm293_vm0, %v348_v44, %v349_v45  ;;  %v211_v57 = vld [vmem:[%s16588_s0 + $0x1b0] sm:$0x1]  ;;  %v457_v47 = vld [vmem:[%s16588_s0 + $0x18] sm:$0x3] }
  0xe7   :  { %4040 = vmatprep.subr.bf16.mxu0 %v12528_v5  ;;  %v335_v5 = vsel %vm293_vm0, %v333_v58, %v334_v59  ;;  %v426_v12 = vpack.c.bf16 %v326_v1, %v320_v0  ;;  %v214_v58 = vld [vmem:[%s16588_s0 + $0x1c8] sm:$0xfe]  ;;  %v216_v59 = vld [vmem:[%s16588_s0 + $0x1d8] sm:$0x1]  ;;  %v361_v7 = vrot.slane %v211_v57, 1 }
  0xe8   :  { %v429_v15 = vpack.c.bf16 %v341_v6, %v335_v5  ;;  %v12553_v1 = vld [vmem:[#allocation4 + $0x280] ss:$8 sps:$4 sm:$0xff]   ;;  %v369_v8 = vrot.slane %v214_v58, 1  ;;  %v370_v9 = vrot.slane %v216_v59, 1  ;;  %v227_v45 = vld [vmem:[%s16588_s0 + $0x230] sm:$0x1] }
  0xe9   :  { %v385_v59 = vrot.slane %v227_v45, 1 }
  0xea   :  { %4041 = vmatpush1.bf16.msra.mxu0 %v12526_v10  ;;  %v202_v10 = vld [vmem:[%s16588_s0 + $0x168] sm:$0xfe] }
  0xeb   :  { %4123 = vmatprep.subr.bf16.mxu0 %v12531_v11  ;;  %v204_v11 = vld [vmem:[%s16588_s0 + $0x178] sm:$0x1]  ;;  %v351_v22 = vrot.slane %v202_v10, 1 }
  0xec   :  { %v352_v23 = vrot.slane %v204_v11, 1 }
  0xed   :  { %4043 = vmatmul.mubr.bf16.vlgmr.msra.gmra.mrb[0].mxu0 %v422_v24  ;;  %v12544_v24 = vld [vmem:[#allocation4 + $0x250] ss:$8 sps:$4 sm:$0xff]  }
  0xee   :  { %4124 = vmatpush1.bf16.msra.mxu0 %v12529_v25  ;;  %4052 = vmatprep.mubr.bf16.mxu0 %v425_v28  ;;  %v12549_v25 = vld [vmem:[#allocation4 + $0x264] ss:$8 sps:$4 sm:$0xff]   ;;  %v332_v28 = vsel %vm293_vm0, %v330_v13, %v331_v16  ;;  %v353_v34 = vsel %vm293_vm0, %v351_v22, %v352_v23  ;;  %v371_v22 = vsel %vm293_vm0, %v369_v8, %v370_v9  ;;  %v465_v9 = vld [vmem:[%s16588_s0 + $0x58] sm:$0x3] }
  0xef   :  { %4125 = vmatprep.subr.bf16.mxu0 %v12534_v27  ;;  %v199_v27 = vld [vmem:[%s16588_s0 + $0x150] sm:$0x1]  ;;  %v428_v38 = vpack.c.bf16 %v338_v29, %v332_v28  ;;  %v431_v42 = vpack.c.bf16 %v353_v34, %v347_v33  ;;  %v12561_v13 = vld [vmem:[#allocation4 + $0x2a4] ss:$8 sps:$4 sm:$0xff]   ;;  %v12564_v29 = vld [vmem:[#allocation4 + $0x2b4] ss:$8 sps:$4 sm:$0xff]  }
  0xf0   :  { %v343_v43 = vrot.slane %v199_v27, 1  ;;  %v217_v16 = vld [vmem:[%s16588_s0 + $0x1e0] sm:$0xfe]  ;;  %v381_v34 = vrot.slane %v222_v20, 1  ;;  %v463_v8 = vld [vmem:[%s16588_s0 + $0x48] sm:$0xfc] }
  0xf1   :  { %v12559_v27 = vld [vmem:[#allocation4 + $0x2a0] ss:$8 sps:$4 sm:$0xff]   ;;  %v372_v32 = vrot.slane %v217_v16, 1 }
  0xf2   :  { %4126 = vmatpush1.bf16.msra.mxu0 %v12532_v36  ;;  %v210_v36 = vld [vmem:[%s16588_s0 + $0x1a8] sm:$0xfe]  ;;  %v344_v55 = vsel %vm293_vm0, %v342_v40, %v343_v43  ;;  %v221_v40 = vld [vmem:[%s16588_s0 + $0x200] sm:$0xfe] }
  0xf3   :  { %4127 = vmatprep.subr.bf16.mxu0 %v12537_v37  ;;  %v212_v37 = vld [vmem:[%s16588_s0 + $0x1b8] sm:$0x1]  ;;  %v363_v48 = vrot.slane %v210_v36, 1  ;;  %v430_v0 = vpack.c.bf16 %v350_v56, %v344_v55  ;;  %v12570_v55 = vld [vmem:[#allocation4 + $0x2d4] ss:$8 sps:$4 sm:$0xff]  }
  0xf4   :  { %v364_v49 = vrot.slane %v212_v37, 1 }
  0xf5   :  { %4053 = vmatmul.mubr.bf16.gmra.mrb[4].mxu0 %v424_v50  ;;  %v12550_v50 = vld [vmem:[#allocation4 + $0x270] ss:$8 sps:$4 sm:$0xff]  }
  0xf6   :  { %4128 = vmatpush1.bf16.msra.mxu0 %v12535_v51  ;;  %4062 = vmatprep.mubr.bf16.mxu0 %v427_v54  ;;  %v12555_v51 = vld [vmem:[#allocation4 + $0x284] ss:$8 sps:$4 sm:$0xff]   ;;  %v365_v61 = vsel %vm293_vm0, %v363_v48, %v364_v49  ;;  %v383_v48 = vsel %vm293_vm0, %v381_v34, %v382_v35  ;;  %v468_v35 = vld [vmem:[%s16588_s0 + $0x70] sm:$0x3] }
  0xf7   :  { %4129 = vmatprep.subr.bf16.mxu0 %v12540_v53  ;;  %v207_v53 = vld [vmem:[%s16588_s0 + $0x190] sm:$0x1]  ;;  %v209_v54 = vld [vmem:[%s16588_s0 + $0x1a0] sm:$0xfe]  ;;  %v433_v4 = vpack.c.bf16 %v365_v61, %v359_v60  ;;  %v586_v60 = vrot.slane %v455_v46, 2  ;;  %v587_v61 = vrot.slane %v457_v47, 2 }
  0xf8   :  { %v355_v5 = vrot.slane %v207_v53, 1  ;;  %v360_v6 = vrot.slane %v209_v54, 1  ;;  %v12565_v53 = vld [vmem:[#allocation4 + $0x2c0] ss:$8 sps:$4 sm:$0xff]   ;;  %v378_v54 = vrot.slane %v221_v40, 1  ;;  %v602_v47 = vrot.slane %v468_v35, 2 }
  0xf9   :  { %v466_v34 = vld [vmem:[%s16588_s0 + $0x60] sm:$0xfc] }
  0xfa   :  { %4130 = vmatpush1.bf16.msra.mxu0 %v12538_v62  ;;  %v218_v62 = vld [vmem:[%s16588_s0 + $0x1e8] sm:$0xfe]  ;;  %v356_v17 = vsel %vm293_vm0, %v354_v2, %v355_v5  ;;  %v362_v18 = vsel %vm293_vm0, %v360_v6, %v361_v7  ;;  %v460_v5 = vld [vmem:[%s16588_s0 + $0x30] sm:$0x3]  ;;  %v601_v46 = vrot.slane %v466_v34, 2 }
  0xfb   :  { %4131 = vmatprep.subr.bf16.mxu0 %v12543_v63  ;;  %v220_v63 = vld [vmem:[%s16588_s0 + $0x1f8] sm:$0x1]  ;;  %v375_v10 = vrot.slane %v218_v62, 1  ;;  %v432_v26 = vpack.c.bf16 %v362_v18, %v356_v17  ;;  %v12573_v2 = vld [vmem:[#allocation4 + $0x2e4] ss:$8 sps:$4 sm:$0xff]   ;;  %v590_v21 = vrot.slane %v460_v5, 2 }
  0xfc   :  { %v376_v11 = vrot.slane %v220_v63, 1  ;;  %v12576_v17 = vld [vmem:[#allocation4 + $0x2f4] ss:$8 sps:$4 sm:$0xff]  }
  0xfd   :  { %4063 = vmatmul.mubr.bf16.gmra.mrb[8].mxu0 %v426_v12  ;;  %v12556_v12 = vld [vmem:[#allocation4 + $0x290] ss:$8 sps:$4 sm:$0xff]  }
  0xfe   :  { %4132 = vmatpush1.bf16.msra.mxu0 %v12541_v14  ;;  %4072 = vmatprep.mubr.bf16.mxu0 %v429_v15  ;;  %v213_v14 = vld [vmem:[%s16588_s0 + $0x1c0] sm:$0xfe]  ;;  %v215_v15 = vld [vmem:[%s16588_s0 + $0x1d0] sm:$0x1]  ;;  %v377_v23 = vsel %vm293_vm0, %v375_v10, %v376_v11  ;;  %v467_v10 = vld [vmem:[%s16588_s0 + $0x68] sm:$0xfc] }
  0xff   :  { %4133 = vmatprep.subr.bf16.mxu0 %v12546_v19  ;;  %v219_v19 = vld [vmem:[%s16588_s0 + $0x1f0] sm:$0x1]  ;;  %v366_v28 = vrot.slane %v213_v14, 1  ;;  %v435_v30 = vpack.c.bf16 %v377_v23, %v371_v22  ;;  %v367_v31 = vrot.slane %v215_v15, 1  ;;  %v469_v11 = vld [vmem:[%s16588_s0 + $0x78] sm:$0x3] }
 0x100   :  { %v373_v33 = vrot.slane %v219_v19, 1  ;;  %v12571_v15 = vld [vmem:[#allocation4 + $0x2e0] ss:$8 sps:$4 sm:$0xff]   ;;  %v598_v22 = vrot.slane %v463_v8, 2  ;;  %v599_v23 = vrot.slane %v465_v9, 2 }
 0x101   :  { %v368_v43 = vsel %vm293_vm0, %v366_v28, %v367_v31  ;;  %v464_v31 = vld [vmem:[%s16588_s0 + $0x50] sm:$0x3] }
 0x102   :  { %4134 = vmatpush1.bf16.msra.mxu0 %v12544_v24  ;;  %v226_v24 = vld [vmem:[%s16588_s0 + $0x228] sm:$0xfe]  ;;  %v374_v44 = vsel %vm293_vm0, %v372_v32, %v373_v33  ;;  %v600_v32 = vsel %vm582_vm1, %v598_v22, %v599_v23  ;;  %v596_v45 = vrot.slane %v464_v31, 2  ;;  %v482_v22 = vld [vmem:[%s16588_s0 + $0xe0] sm:$0xfc] }
 0x103   :  { %4135 = vmatprep.subr.bf16.mxu0 %v12549_v25  ;;  %v228_v25 = vld [vmem:[%s16588_s0 + $0x238] sm:$0x1]  ;;  %v387_v36 = vrot.slane %v226_v24, 1  ;;  %v434_v52 = vpack.c.bf16 %v374_v44, %v368_v43  ;;  %v604_v24 = vrot.slane %v467_v10, 2  ;;  %v484_v23 = vld [vmem:[%s16588_s0 + $0xf0] sm:$0x3] }
 0x104   :  { %v388_v37 = vrot.slane %v228_v25, 1  ;;  %v605_v25 = vrot.slane %v469_v11, 2  ;;  %v625_v34 = vrot.slane %v482_v22, 2  ;;  %v626_v35 = vrot.slane %v484_v23, 2 }
 0x105   :  { %4073 = vmatmul.mubr.bf16.gmra.mrb[12].mxu0 %v428_v38  ;;  %v12562_v38 = vld [vmem:[#allocation4 + $0x2b0] ss:$8 sps:$4 sm:$0xff]  }
 0x106   :  { %4136 = vmatpush1.bf16.msra.mxu0 %v12547_v39  ;;  %4082 = vmatprep.mubr.bf16.mxu0 %v431_v42  ;;  %v12567_v39 = vld [vmem:[#allocation4 + $0x2c4] ss:$8 sps:$4 sm:$0xff]   ;;  %v389_v49 = vsel %vm293_vm0, %v387_v36, %v388_v37  ;;  %v606_v33 = vsel %vm582_vm1, %v604_v24, %v605_v25  ;;  %v473_v37 = vld [vmem:[%s16588_s0 + $0x98] sm:$0x3] }
 0x107   :  { %4137 = vmatprep.subr.bf16.mxu0 %v12552_v41  ;;  %v223_v41 = vld [vmem:[%s16588_s0 + $0x210] sm:$0x1]  ;;  %v225_v42 = vld [vmem:[%s16588_s0 + $0x220] sm:$0xfe]  ;;  %v437_v56 = vpack.c.bf16 %v389_v49, %v383_v48  ;;  %v471_v36 = vld [vmem:[%s16588_s0 + $0x88] sm:$0xfc]  ;;  %v714_v44 = vpack.c.bf16 %v606_v33, %v600_v32 }
 0x108   :  { %v379_v57 = vrot.slane %v223_v41, 1  ;;  %v384_v58 = vrot.slane %v225_v42, 1  ;;  %v12577_v41 = vld [vmem:[#allocation4 + $0x300] ss:$8 sps:$4 sm:$0xff]   ;;  %v12582_v42 = vld [vmem:[#allocation4 + $0x314] ss:$8 sps:$4 sm:$0xff]  }
 0x109   :  { %v610_v48 = vrot.slane %v471_v36, 2  ;;  %v611_v49 = vrot.slane %v473_v37, 2  ;;  %v487_v24 = vld [vmem:[%s16588_s0 + $0x148] sm:$0xfc]  ;;  %v489_v25 = vld [vmem:[%s16588_s0 + $0x158] sm:$0x3] }
 0x10a   :  { %4138 = vmatpush1.bf16.msra.mxu0 %v12550_v50  ;;  %v459_v50 = vld [vmem:[%s16588_s0 + $0x28] sm:$0xfc]  ;;  %v380_v6 = vsel %vm293_vm0, %v378_v54, %v379_v57  ;;  %v386_v7 = vsel %vm293_vm0, %v384_v58, %v385_v59  ;;  %v603_v54 = vsel %vm582_vm1, %v601_v46, %v602_v47  ;;  %v472_v57 = vld [vmem:[%s16588_s0 + $0x90] sm:$0x3]  ;;  %v634_v36 = vrot.slane %v487_v24, 2 }
 0x10b   :  { %4139 = vmatprep.subr.bf16.mxu0 %v12555_v51  ;;  %v461_v51 = vld [vmem:[%s16588_s0 + $0x38] sm:$0x3]  ;;  %v592_v62 = vrot.slane %v459_v50, 2  ;;  %v436_v14 = vpack.c.bf16 %v386_v7, %v380_v6  ;;  %v612_v58 = vsel %vm582_vm1, %v610_v48, %v611_v49  ;;  %v608_v7 = vrot.slane %v472_v57, 2  ;;  %v490_v48 = vld [vmem:[%s16588_s0 + $0x160] sm:$0xfc] }
 0x10c   :  { %v593_v63 = vrot.slane %v461_v51, 2  ;;  %v635_v37 = vrot.slane %v489_v25, 2  ;;  %v492_v49 = vld [vmem:[%s16588_s0 + $0x170] sm:$0x3] }
 0x10d   :  { %4083 = vmatmul.mubr.bf16.gmra.mrb[16].mxu0 %v430_v0  ;;  %v12568_v0 = vld [vmem:[#allocation4 + $0x2d0] ss:$8 sps:$4 sm:$0xff]  }
 0x10e   :  { %4140 = vmatpush1.bf16.msra.mxu0 %v12553_v1  ;;  %4092 = vmatprep.mubr.bf16.mxu0 %v433_v4  ;;  %v454_v1 = vld [vmem:[%s16588_s0] sm:$0xfc]  ;;  %v636_v46 = vsel %vm582_vm1, %v634_v36, %v635_v37  ;;  %v508_v37 = vld [vmem:[%s16588_s0 + $0x1f0] sm:$0x3] }
 0x10f   :  { %4141 = vmatprep.subr.bf16.mxu0 %v12558_v3  ;;  %v456_v3 = vld [vmem:[%s16588_s0 + $0x10] sm:$0x3]  ;;  %v458_v4 = vld [vmem:[%s16588_s0 + $0x20] sm:$0xfc]  ;;  %v583_v16 = vrot.slane %v454_v1, 2 }
 0x110   :  { %v584_v19 = vrot.slane %v456_v3, 2  ;;  %v589_v20 = vrot.slane %v458_v4, 2  ;;  %v485_v1 = vld [vmem:[%s16588_s0 + $0xf8] sm:$0x3]  ;;  %v12583_v3 = vld [vmem:[#allocation4 + $0x320] ss:$8 sps:$4 sm:$0xff]  }
 0x111   :  { %v12588_v4 = vld [vmem:[#allocation4 + $0x334] ss:$8 sps:$4 sm:$0xff]   ;;  %v506_v36 = vld [vmem:[%s16588_s0 + $0x1e0] sm:$0xfc] }
 0x112   :  { %4142 = vmatpush1.bf16.msra.mxu0 %v12556_v12  ;;  %v588_v12 = vsel %vm582_vm1, %v586_v60, %v587_v61  ;;  %v591_v28 = vsel %vm582_vm1, %v589_v20, %v590_v21  ;;  %v474_v60 = vld [vmem:[%s16588_s0 + $0xa0] sm:$0xfc]  ;;  %v476_v61 = vld [vmem:[%s16588_s0 + $0xb0] sm:$0x3] }
 0x113   :  { %4143 = vmatprep.subr.bf16.mxu0 %v12561_v13  ;;  %v594_v13 = vsel %vm582_vm1, %v592_v62, %v593_v63  ;;  %v479_v62 = vld [vmem:[%s16588_s0 + $0xc8] sm:$0xfc]  ;;  %v481_v63 = vld [vmem:[%s16588_s0 + $0xd8] sm:$0x3]  ;;  %v613_v8 = vrot.slane %v474_v60, 2  ;;  %v614_v9 = vrot.slane %v476_v61, 2 }
 0x114   :  { %v712_v18 = vpack.c.bf16 %v594_v13, %v588_v12  ;;  %v622_v10 = vrot.slane %v479_v62, 2  ;;  %v623_v11 = vrot.slane %v481_v63, 2  ;;  %v629_v13 = vrot.slane %v485_v1, 2 }
 0x115   :  { %4093 = vmatmul.mubr.bf16.gmra.mrb[20].mxu0 %v432_v26  ;;  %v12574_v26 = vld [vmem:[#allocation4 + $0x2f0] ss:$8 sps:$4 sm:$0xff]   ;;  %v637_v60 = vrot.slane %v490_v48, 2  ;;  %v638_v61 = vrot.slane %v492_v49, 2  ;;  %v661_v48 = vrot.slane %v506_v36, 2  ;;  %v662_v49 = vrot.slane %v508_v37, 2 }
 0x116   :  { %4144 = vmatpush1.bf16.msra.mxu0 %v12559_v27  ;;  %4102 = vmatprep.mubr.bf16.mxu0 %v435_v30  ;;  %v585_v27 = vsel %vm582_vm1, %v583_v16, %v584_v19  ;;  %v462_v30 = vld [vmem:[%s16588_s0 + $0x40] sm:$0xfc]  ;;  %v615_v16 = vsel %vm582_vm1, %v613_v8, %v614_v9  ;;  %v480_v19 = vld [vmem:[%s16588_s0 + $0xd0] sm:$0x3]  ;;  %v624_v20 = vsel %vm582_vm1, %v622_v10, %v623_v11  ;;  %v12636_v37 = vld [vmem:[#allocation4 + $0x434] ss:$8 sps:$4 sm:$0xff]  }
 0x117   :  { %4145 = vmatprep.subr.bf16.mxu0 %v12564_v29  ;;  %v12579_v29 = vld [vmem:[#allocation4 + $0x304] ss:$8 sps:$4 sm:$0xff]   ;;  %v711_v40 = vpack.c.bf16 %v591_v28, %v585_v27  ;;  %v595_v43 = vrot.slane %v462_v30, 2  ;;  %v493_v27 = vld [vmem:[%s16588_s0 + $0x178] sm:$0x3]  ;;  %v620_v33 = vrot.slane %v480_v19, 2 }
 0x118   :  { %v12594_v30 = vld [vmem:[#allocation4 + $0x354] ss:$8 sps:$4 sm:$0xff]   ;;  %v498_v10 = vld [vmem:[%s16588_s0 + $0x1a0] sm:$0xfc]  ;;  %v500_v11 = vld [vmem:[%s16588_s0 + $0x1b0] sm:$0x3] }
 0x119   :  { %v649_v22 = vrot.slane %v498_v10, 2  ;;  %v650_v23 = vrot.slane %v500_v11, 2  ;;  %v12621_v11 = vld [vmem:[#allocation4 + $0x3e4] ss:$8 sps:$4 sm:$0xff]  }
 0x11a   :  { %4146 = vmatpush1.bf16.msra.mxu0 %v12562_v38  ;;  %v475_v38 = vld [vmem:[%s16588_s0 + $0xa8] sm:$0xfc] }
 0x11b   :  { %4147 = vmatprep.subr.bf16.mxu0 %v12567_v39  ;;  %v477_v39 = vld [vmem:[%s16588_s0 + $0xb8] sm:$0x3]  ;;  %v616_v50 = vrot.slane %v475_v38, 2 }
 0x11c   :  { %v617_v51 = vrot.slane %v477_v39, 2  ;;  %v641_v39 = vrot.slane %v493_v27, 2 }
 0x11d   :  { %4103 = vmatmul.mubr.bf16.gmra.mrb[24].mxu0 %v434_v52  ;;  %v12580_v52 = vld [vmem:[#allocation4 + $0x310] ss:$8 sps:$4 sm:$0xff]  }
 0x11e   :  { %4148 = vmatpush1.bf16.msra.mxu0 %v12565_v53  ;;  %4112 = vmatprep.mubr.bf16.mxu0 %v437_v56  ;;  %v597_v53 = vsel %vm582_vm1, %v595_v43, %v596_v45  ;;  %v470_v56 = vld [vmem:[%s16588_s0 + $0x80] sm:$0xfc]  ;;  %v618_v59 = vsel %vm582_vm1, %v616_v50, %v617_v51  ;;  %v488_v45 = vld [vmem:[%s16588_s0 + $0x150] sm:$0x3]  ;;  %v495_v50 = vld [vmem:[%s16588_s0 + $0x188] sm:$0xfc] }
 0x11f   :  { %4149 = vmatprep.subr.bf16.mxu0 %v12570_v55  ;;  %v12585_v55 = vld [vmem:[#allocation4 + $0x324] ss:$8 sps:$4 sm:$0xff]   ;;  %v607_v5 = vrot.slane %v470_v56, 2  ;;  %v716_v6 = vpack.c.bf16 %v618_v59, %v612_v58  ;;  %v497_v51 = vld [vmem:[%s16588_s0 + $0x198] sm:$0x3]  ;;  %v632_v59 = vrot.slane %v488_v45, 2 }
 0x120   :  { %v12597_v43 = vld [vmem:[#allocation4 + $0x364] ss:$8 sps:$4 sm:$0xff]   ;;  %v12600_v56 = vld [vmem:[#allocation4 + $0x374] ss:$8 sps:$4 sm:$0xff]   ;;  %v646_v62 = vrot.slane %v495_v50, 2  ;;  %v647_v63 = vrot.slane %v497_v51, 2 }
 0x122   :  { %4150 = vmatpush1.bf16.msra.mxu0 %v12568_v0  ;;  %v483_v0 = vld [vmem:[%s16588_s0 + $0xe8] sm:$0xfc]  ;;  %v648_v8 = vsel %vm582_vm1, %v646_v62, %v647_v63  ;;  %v514_v62 = vld [vmem:[%s16588_s0 + $0x220] sm:$0xfc]  ;;  %v516_v63 = vld [vmem:[%s16588_s0 + $0x230] sm:$0x3] }
 0x123   :  { %4151 = vmatprep.subr.bf16.mxu0 %v12573_v2  ;;  %v713_v2 = vpack.c.bf16 %v603_v54, %v597_v53  ;;  %v628_v12 = vrot.slane %v483_v0, 2  ;;  %v501_v53 = vld [vmem:[%s16588_s0 + $0x1b8] sm:$0x3] }
 0x124   :  { %v653_v1 = vrot.slane %v501_v53, 2 }
 0x125   :  { %4113 = vmatmul.mubr.bf16.gmra.mrb[28].mxu0 %v436_v14  ;;  %v12586_v14 = vld [vmem:[#allocation4 + $0x330] ss:$8 sps:$4 sm:$0xff]   ;;  %v630_v21 = vsel %vm582_vm1, %v628_v12, %v629_v13  ;;  %v503_v12 = vld [vmem:[%s16588_s0 + $0x1c8] sm:$0xfc] }
 0x126   :  { %4152 = vmatpush1.bf16.msra.mxu0 %v12571_v15  ;;  %4155 = vmatprep.mubr.bf16.mxu0 %v712_v18  ;;  %v609_v15 = vsel %vm582_vm1, %v607_v5, %v608_v7  ;;  %v478_v18 = vld [vmem:[%s16588_s0 + $0xc0] sm:$0xfc]  ;;  %v718_v32 = vpack.c.bf16 %v630_v21, %v624_v20  ;;  %v496_v7 = vld [vmem:[%s16588_s0 + $0x190] sm:$0x3]  ;;  %v505_v13 = vld [vmem:[%s16588_s0 + $0x1d8] sm:$0x3] }
 0x127   :  { %4153 = vmatprep.subr.bf16.mxu0 %v12576_v17  ;;  %v12591_v17 = vld [vmem:[#allocation4 + $0x344] ss:$8 sps:$4 sm:$0xff]   ;;  %v715_v28 = vpack.c.bf16 %v615_v16, %v609_v15  ;;  %v619_v31 = vrot.slane %v478_v18, 2  ;;  %v509_v15 = vld [vmem:[%s16588_s0 + $0x1f8] sm:$0x3]  ;;  %v644_v21 = vrot.slane %v496_v7, 2 }
 0x128   :  { %v12603_v5 = vld [vmem:[#allocation4 + $0x384] ss:$8 sps:$4 sm:$0xff]   ;;  %v12606_v18 = vld [vmem:[#allocation4 + $0x394] ss:$8 sps:$4 sm:$0xff]   ;;  %v658_v24 = vrot.slane %v503_v12, 2  ;;  %v659_v25 = vrot.slane %v505_v13, 2 }
 0x129   :  { %v665_v27 = vrot.slane %v509_v15, 2  ;;  %v12618_v7 = vld [vmem:[#allocation4 + $0x3d4] ss:$8 sps:$4 sm:$0xff]   ;;  %v10949_v12 = vld [vmem:[%s16588_s0 + $0x28] sm:$0xff] }
 0x12a   :  { %4154 = vmatpush1.bf16.msra.mxu0 %v12574_v26  ;;  %v491_v26 = vld [vmem:[%s16588_s0 + $0x168] sm:$0xfc] }
 0x12b   :  { %4236 = vmatprep.subr.bf16.mxu0 %v12579_v29  ;;  %v12589_v29 = vld [vmem:[#allocation4 + $0x340] ss:$8 sps:$4 sm:$0xff]   ;;  %v640_v38 = vrot.slane %v491_v26, 2 }
 0x12c   :  { %v10951_v13 = vld [vmem:[%s16588_s0 + $0x48] sm:$0xff] }
 0x12d   :  { %4156 = vmatmul.mubr.bf16.vlgmr.msra.gmra.mrb[0].mxu0 %v711_v40  ;;  %v12592_v40 = vld [vmem:[#allocation4 + $0x350] ss:$8 sps:$4 sm:$0xff]   ;;  %v642_v47 = vsel %vm582_vm1, %v640_v38, %v641_v39  ;;  %v511_v38 = vld [vmem:[%s16588_s0 + $0x208] sm:$0xfc] }
 0x12e   :  { %4237 = vmatpush1.bf16.msra.mxu0 %v12577_v41  ;;  %4165 = vmatprep.mubr.bf16.mxu0 %v714_v44  ;;  %v621_v41 = vsel %vm582_vm1, %v619_v31, %v620_v33  ;;  %v486_v44 = vld [vmem:[%s16588_s0 + $0x140] sm:$0xfc]  ;;  %v720_v58 = vpack.c.bf16 %v642_v47, %v636_v46  ;;  %v504_v33 = vld [vmem:[%s16588_s0 + $0x1d0] sm:$0x3]  ;;  %v513_v39 = vld [vmem:[%s16588_s0 + $0x218] sm:$0x3] }
 0x12f   :  { %4238 = vmatprep.subr.bf16.mxu0 %v12582_v42  ;;  %v627_v42 = vsel %vm582_vm1, %v625_v34, %v626_v35  ;;  %v631_v57 = vrot.slane %v486_v44, 2  ;;  %v12609_v31 = vld [vmem:[#allocation4 + $0x3a4] ss:$8 sps:$4 sm:$0xff]   ;;  %v660_v34 = vsel %vm582_vm1, %v658_v24, %v659_v25  ;;  %v12612_v44 = vld [vmem:[#allocation4 + $0x3b4] ss:$8 sps:$4 sm:$0xff]   ;;  %v656_v47 = vrot.slane %v504_v33, 2 }
 0x130   :  { %v717_v54 = vpack.c.bf16 %v627_v42, %v621_v41  ;;  %v517_v41 = vld [vmem:[%s16588_s0 + $0x238] sm:$0x3]  ;;  %v670_v50 = vrot.slane %v511_v38, 2  ;;  %v671_v51 = vrot.slane %v513_v39, 2  ;;  %v12619_v15 = vld [vmem:[#allocation4 + $0x3e0] ss:$8 sps:$4 sm:$0xff]  }
 0x131   :  { %v677_v53 = vrot.slane %v517_v41, 2  ;;  %v12625_v25 = vld [vmem:[#allocation4 + $0x400] ss:$8 sps:$4 sm:$0xff]   ;;  %v12634_v38 = vld [vmem:[#allocation4 + $0x430] ss:$8 sps:$4 sm:$0xff]  }
 0x132   :  { %4239 = vmatpush1.bf16.msra.mxu0 %v12580_v52  ;;  %v499_v52 = vld [vmem:[%s16588_s0 + $0x1a8] sm:$0xfc]  ;;  %v10956_v39 = vld [vmem:[%s16588_s0 + $0xa0] sm:$0xff] }
 0x133   :  { %4240 = vmatprep.subr.bf16.mxu0 %v12585_v55  ;;  %v12595_v55 = vld [vmem:[#allocation4 + $0x360] ss:$8 sps:$4 sm:$0xff]   ;;  %v652_v0 = vrot.slane %v499_v52, 2  ;;  %v12639_v41 = vld [vmem:[#allocation4 + $0x444] ss:$8 sps:$4 sm:$0xff]  }
 0x134   :  { %v10959_v33 = vld [vmem:[%s16588_s0 + $0xc8] sm:$0xff] }
 0x135   :  { %4166 = vmatmul.mubr.bf16.gmra.mrb[4].mxu0 %v713_v2  ;;  %v12598_v2 = vld [vmem:[#allocation4 + $0x370] ss:$8 sps:$4 sm:$0xff]   ;;  %v654_v9 = vsel %vm582_vm1, %v652_v0, %v653_v1  ;;  %v12613_v1 = vld [vmem:[#allocation4 + $0x3c0] ss:$8 sps:$4 sm:$0xff]  }
 0x136   :  { %4241 = vmatpush1.bf16.msra.mxu0 %v12583_v3  ;;  %4175 = vmatprep.mubr.bf16.mxu0 %v716_v6  ;;  %v633_v3 = vsel %vm582_vm1, %v631_v57, %v632_v59  ;;  %v494_v6 = vld [vmem:[%s16588_s0 + $0x180] sm:$0xfc]  ;;  %v722_v20 = vpack.c.bf16 %v654_v9, %v648_v8  ;;  %v672_v59 = vsel %vm582_vm1, %v670_v50, %v671_v51  ;;  %v12616_v8 = vld [vmem:[#allocation4 + $0x3d0] ss:$8 sps:$4 sm:$0xff]  }
 0x137   :  { %4242 = vmatprep.subr.bf16.mxu0 %v12588_v4  ;;  %v639_v4 = vsel %vm582_vm1, %v637_v60, %v638_v61  ;;  %v643_v19 = vrot.slane %v494_v6, 2  ;;  %v12615_v57 = vld [vmem:[#allocation4 + $0x3c4] ss:$8 sps:$4 sm:$0xff]   ;;  %v512_v61 = vld [vmem:[%s16588_s0 + $0x210] sm:$0x3]  ;;  %v674_v6 = vrot.slane %v516_v63, 2 }
 0x138   :  { %v719_v16 = vpack.c.bf16 %v639_v4, %v633_v3  ;;  %v668_v4 = vrot.slane %v512_v61, 2  ;;  %v10962_v50 = vld [vmem:[%s16588_s0 + $0x100] sm:$0xff]  ;;  %v10971_v63 = vld [vmem:[%s16588_s0 + $0x1c8] sm:$0xff] }
 0x139   :  { %v12645_v51 = vld [vmem:[#allocation4 + $0x464] ss:$8 sps:$4 sm:$0xff]  }
 0x13a   :  { %4243 = vmatpush1.bf16.msra.mxu0 %v12586_v14  ;;  %v507_v14 = vld [vmem:[%s16588_s0 + $0x1e8] sm:$0xfc] }
 0x13b   :  { %4244 = vmatprep.subr.bf16.mxu0 %v12591_v17  ;;  %v12601_v17 = vld [vmem:[#allocation4 + $0x380] ss:$8 sps:$4 sm:$0xff]   ;;  %v664_v26 = vrot.slane %v507_v14, 2  ;;  %v12651_v61 = vld [vmem:[#allocation4 + $0x484] ss:$8 sps:$4 sm:$0xff]  }
 0x13d   :  { %4176 = vmatmul.mubr.bf16.gmra.mrb[8].mxu0 %v715_v28  ;;  %v12604_v28 = vld [vmem:[#allocation4 + $0x390] ss:$8 sps:$4 sm:$0xff]   ;;  %v666_v35 = vsel %vm582_vm1, %v664_v26, %v665_v27  ;;  %v12630_v27 = vld [vmem:[#allocation4 + $0x414] ss:$8 sps:$4 sm:$0xff]  }
 0x13e   :  { %4245 = vmatpush1.bf16.msra.mxu0 %v12589_v29  ;;  %4185 = vmatprep.mubr.bf16.mxu0 %v718_v32  ;;  %v645_v29 = vsel %vm582_vm1, %v643_v19, %v644_v21  ;;  %v502_v32 = vld [vmem:[%s16588_s0 + $0x1c0] sm:$0xfc]  ;;  %v724_v46 = vpack.c.bf16 %v666_v35, %v660_v34 }
 0x13f   :  { %4246 = vmatprep.subr.bf16.mxu0 %v12594_v30  ;;  %v651_v30 = vsel %vm582_vm1, %v649_v22, %v650_v23  ;;  %v655_v45 = vrot.slane %v502_v32, 2  ;;  %v10948_v19 = vld [vmem:[%s16588_s0 + $0x20] sm:$0xff]  ;;  %v10953_v22 = vld [vmem:[%s16588_s0 + $0x68] sm:$0xff] }
 0x140   :  { %v721_v42 = vpack.c.bf16 %v651_v30, %v645_v29  ;;  %v12627_v21 = vld [vmem:[#allocation4 + $0x404] ss:$8 sps:$4 sm:$0xff]   ;;  %v12631_v35 = vld [vmem:[#allocation4 + $0x420] ss:$8 sps:$4 sm:$0xff]  }
 0x141   :  { %v10955_v23 = vld [vmem:[%s16588_s0 + $0x88] sm:$0xff]  ;;  %v10952_v29 = vld [vmem:[%s16588_s0 + $0x60] sm:$0xff] }
 0x142   :  { %4247 = vmatpush1.bf16.msra.mxu0 %v12592_v40  ;;  %v515_v40 = vld [vmem:[%s16588_s0 + $0x228] sm:$0xfc]  ;;  %v779_v26 = vpack.c.bf16 %v10955_v23, %v10953_v22  ;;  %v10954_v30 = vld [vmem:[%s16588_s0 + $0x80] sm:$0xff]  ;;  %v10987_v23 = vld [vmem:[%s16588_s0 + $0x58] sm:$0x1] }
 0x143   :  { %4248 = vmatprep.subr.bf16.mxu0 %v12597_v43  ;;  %v12607_v43 = vld [vmem:[#allocation4 + $0x3a0] ss:$8 sps:$4 sm:$0xff]   ;;  %v676_v52 = vrot.slane %v515_v40, 2  ;;  %v778_v34 = vpack.c.bf16 %v10954_v30, %v10952_v29 }
 0x144   :  { %v10957_v32 = vld [vmem:[%s16588_s0 + $0xa8] sm:$0xff]  ;;  %v10958_v40 = vld [vmem:[%s16588_s0 + $0xc0] sm:$0xff] }
 0x145   :  { %4186 = vmatmul.mubr.bf16.gmra.mrb[12].mxu0 %v717_v54  ;;  %v12610_v54 = vld [vmem:[#allocation4 + $0x3b0] ss:$8 sps:$4 sm:$0xff]   ;;  %v678_v60 = vsel %vm582_vm1, %v676_v52, %v677_v53  ;;  %v781_v36 = vpack.c.bf16 %v10959_v33, %v10957_v32  ;;  %v10965_v52 = vld [vmem:[%s16588_s0 + $0x168] sm:$0xff]  ;;  %v10976_v33 = vld [vmem:[%s16588_s0 + $0x220] sm:$0xff] }
 0x146   :  { %4249 = vmatpush1.bf16.msra.mxu0 %v12595_v55  ;;  %4195 = vmatprep.mubr.bf16.mxu0 %v720_v58  ;;  %v657_v55 = vsel %vm582_vm1, %v655_v45, %v656_v47  ;;  %v510_v58 = vld [vmem:[%s16588_s0 + $0x200] sm:$0xfc]  ;;  %v726_v3 = vpack.c.bf16 %v678_v60, %v672_v59  ;;  %v12642_v47 = vld [vmem:[#allocation4 + $0x454] ss:$8 sps:$4 sm:$0xff]   ;;  %v10967_v53 = vld [vmem:[%s16588_s0 + $0x188] sm:$0xff] }
 0x147   :  { %4250 = vmatprep.subr.bf16.mxu0 %v12600_v56  ;;  %v663_v56 = vsel %vm582_vm1, %v661_v48, %v662_v49  ;;  %v12637_v45 = vld [vmem:[#allocation4 + $0x440] ss:$8 sps:$4 sm:$0xff]   ;;  %v12640_v48 = vld [vmem:[#allocation4 + $0x450] ss:$8 sps:$4 sm:$0xff]  }
 0x148   :  { %v723_v0 = vpack.c.bf16 %v663_v56, %v657_v55  ;;  %v10960_v49 = vld [vmem:[%s16588_s0 + $0xe0] sm:$0xff]  ;;  %v785_v56 = vpack.c.bf16 %v10967_v53, %v10965_v52  ;;  %v10985_v22 = vld [vmem:[%s16588_s0 + $0x48] sm:$0xfe]  ;;  %v12664_v32 = vld [vmem:[#allocation4 + $0x4d0] ss:$8 sps:$4 sm:$0xff]  }
 0x149   :  { %v12643_v55 = vld [vmem:[#allocation4 + $0x460] ss:$8 sps:$4 sm:$0xff]   ;;  %v945_v30 = vrot.slane %v10985_v22, 1  ;;  %v12681_v22 = vld [vmem:[#allocation4 + $0x524] ss:$8 sps:$4 sm:$0xff]  }
 0x14a   :  { %4251 = vmatpush1.bf16.msra.mxu0 %v12598_v2  ;;  %v667_v2 = vrot.slane %v510_v58, 2  ;;  %v12646_v58 = vld [vmem:[#allocation4 + $0x470] ss:$8 sps:$4 sm:$0xff]   ;;  %v10964_v59 = vld [vmem:[%s16588_s0 + $0x160] sm:$0xff] }
 0x14b   :  { %4252 = vmatprep.subr.bf16.mxu0 %v12603_v5  ;;  %v673_v5 = vrot.slane %v514_v62, 2  ;;  %v10966_v60 = vld [vmem:[%s16588_s0 + $0x180] sm:$0xff]  ;;  %v10969_v62 = vld [vmem:[%s16588_s0 + $0x1a8] sm:$0xff] }
 0x14c   :  { %v669_v9 = vsel %vm582_vm1, %v667_v2, %v668_v4  ;;  %v787_v2 = vpack.c.bf16 %v10971_v63, %v10969_v62  ;;  %v12652_v4 = vld [vmem:[#allocation4 + $0x490] ss:$8 sps:$4 sm:$0xff]   ;;  %v10992_v62 = vld [vmem:[%s16588_s0 + $0x80] sm:$0xfe] }
 0x14d   :  { %4196 = vmatmul.mubr.bf16.gmra.mrb[16].mxu0 %v719_v16  ;;  %v675_v10 = vsel %vm582_vm1, %v673_v5, %v674_v6  ;;  %v777_v16 = vpack.c.bf16 %v10951_v13, %v10949_v12  ;;  %v10968_v5 = vld [vmem:[%s16588_s0 + $0x1a0] sm:$0xff]  ;;  %v12660_v13 = vld [vmem:[#allocation4 + $0x4b4] ss:$8 sps:$4 sm:$0xff]   ;;  %v10994_v63 = vld [vmem:[%s16588_s0 + $0x90] sm:$0x1] }
 0x14e   :  { %4253 = vmatpush1.bf16.msra.mxu0 %v12601_v17  ;;  %4205 = vmatprep.mubr.bf16.mxu0 %v722_v20  ;;  %v725_v14 = vpack.c.bf16 %v675_v10, %v669_v9  ;;  %v12624_v17 = vld [vmem:[#allocation4 + $0x3f4] ss:$8 sps:$4 sm:$0xff]   ;;  %v10950_v20 = vld [vmem:[%s16588_s0 + $0x40] sm:$0xff]  ;;  %v10975_v9 = vld [vmem:[%s16588_s0 + $0x208] sm:$0xff] }
 0x14f   :  { %4254 = vmatprep.subr.bf16.mxu0 %v12606_v18  ;;  %v12622_v18 = vld [vmem:[#allocation4 + $0x3f0] ss:$8 sps:$4 sm:$0xff]   ;;  %v776_v24 = vpack.c.bf16 %v10950_v20, %v10948_v19  ;;  %v10970_v6 = vld [vmem:[%s16588_s0 + $0x1c0] sm:$0xff]  ;;  %v10979_v19 = vld [vmem:[%s16588_s0 + $0x248] sm:$0xff] }
 0x150   :  { %v786_v10 = vpack.c.bf16 %v10970_v6, %v10968_v5  ;;  %v10981_v20 = vld [vmem:[%s16588_s0 + $0x28] sm:$0xfe]  ;;  %v11003_v5 = vld [vmem:[%s16588_s0 + $0xd8] sm:$0x1] }
 0x152   :  { %4255 = vmatpush1.bf16.msra.mxu0 %v12604_v28  ;;  %v12628_v28 = vld [vmem:[#allocation4 + $0x410] ss:$8 sps:$4 sm:$0xff]  }
 0x153   :  { %4256 = vmatprep.subr.bf16.mxu0 %v12609_v31  ;;  %v12633_v31 = vld [vmem:[#allocation4 + $0x424] ss:$8 sps:$4 sm:$0xff]  }
 0x155   :  { %4206 = vmatmul.mubr.bf16.gmra.mrb[20].mxu0 %v721_v42  ;;  %v10961_v42 = vld [vmem:[%s16588_s0 + $0xe8] sm:$0xff] }
 0x156   :  { %4257 = vmatpush1.bf16.msra.mxu0 %v12607_v43  ;;  %4215 = vmatprep.mubr.bf16.mxu0 %v724_v46  ;;  %v10963_v43 = vld [vmem:[%s16588_s0 + $0x108] sm:$0xff] }
 0x157   :  { %4258 = vmatprep.subr.bf16.mxu0 %v12612_v44  ;;  %v780_v44 = vpack.c.bf16 %v10958_v40, %v10956_v39  ;;  %v783_v46 = vpack.c.bf16 %v10963_v43, %v10961_v42  ;;  %v10984_v40 = vld [vmem:[%s16588_s0 + $0x40] sm:$0xfe]  ;;  %v10989_v42 = vld [vmem:[%s16588_s0 + $0x68] sm:$0xfe]  ;;  %v10991_v43 = vld [vmem:[%s16588_s0 + $0x78] sm:$0x1] }
 0x158   :  { %v942_v52 = vrot.slane %v10984_v40, 1 }
 0x15a   :  { %4259 = vmatpush1.bf16.msra.mxu0 %v12610_v54  ;;  %v782_v54 = vpack.c.bf16 %v10962_v50, %v10960_v49 }
 0x15b   :  { %4260 = vmatprep.subr.bf16.mxu0 %v12615_v57  ;;  %v12648_v57 = vld [vmem:[#allocation4 + $0x474] ss:$8 sps:$4 sm:$0xff]  }
 0x15d   :  { %4216 = vmatmul.mubr.bf16.gmra.mrb[24].mxu0 %v723_v0  ;;  %v784_v0 = vpack.c.bf16 %v10966_v60, %v10964_v59  ;;  %v10988_v59 = vld [vmem:[%s16588_s0 + $0x60] sm:$0xfe] }
 0x15e   :  { %4261 = vmatpush1.bf16.msra.mxu0 %v12613_v1  ;;  %4225 = vmatprep.mubr.bf16.mxu0 %v726_v3  ;;  %v12649_v1 = vld [vmem:[#allocation4 + $0x480] ss:$8 sps:$4 sm:$0xff]   ;;  %v12654_v3 = vld [vmem:[#allocation4 + $0x494] ss:$8 sps:$4 sm:$0xff]   ;;  %v12675_v60 = vld [vmem:[#allocation4 + $0x504] ss:$8 sps:$4 sm:$0xff]  }
 0x15f   :  { %4262 = vmatprep.subr.bf16.mxu0 %v12618_v7  ;;  %v12657_v7 = vld [vmem:[#allocation4 + $0x4a4] ss:$8 sps:$4 sm:$0xff]  }
 0x162   :  { %4263 = vmatpush1.bf16.msra.mxu0 %v12616_v8  ;;  %v10973_v8 = vld [vmem:[%s16588_s0 + $0x1e8] sm:$0xff] }
 0x163   :  { %4264 = vmatprep.subr.bf16.mxu0 %v12621_v11  ;;  %v12655_v11 = vld [vmem:[#allocation4 + $0x4a0] ss:$8 sps:$4 sm:$0xff]   ;;  %v789_v12 = vpack.c.bf16 %v10975_v9, %v10973_v8 }
 0x164   :  { %v12673_v9 = vld [vmem:[#allocation4 + $0x500] ss:$8 sps:$4 sm:$0xff]  }
 0x165   :  { %4226 = vmatmul.mubr.bf16.gmra.mrb[28].mxu0 %v725_v14  ;;  %v12658_v14 = vld [vmem:[#allocation4 + $0x4b0] ss:$8 sps:$4 sm:$0xff]  }
 0x166   :  { %4265 = vmatpush1.bf16.msra.mxu0 %v12619_v15  ;;  %4268 = vmatprep.mubr.bf16.mxu0 %v777_v16  ;;  %v10972_v15 = vld [vmem:[%s16588_s0 + $0x1e0] sm:$0xff] }
 0x167   :  { %4266 = vmatprep.subr.bf16.mxu0 %v12624_v17  ;;  %v10974_v16 = vld [vmem:[%s16588_s0 + $0x200] sm:$0xff] }
 0x168   :  { %v12663_v17 = vld [vmem:[#allocation4 + $0x4c4] ss:$8 sps:$4 sm:$0xff]  }
 0x16a   :  { %4267 = vmatpush1.bf16.msra.mxu0 %v12622_v18  ;;  %v10977_v18 = vld [vmem:[%s16588_s0 + $0x228] sm:$0xff] }
 0x16b   :  { %4349 = vmatprep.subr.bf16.mxu0 %v12627_v21  ;;  %v10983_v21 = vld [vmem:[%s16588_s0 + $0x38] sm:$0x1] }
 0x16c   :  { %v940_v29 = vrot.slane %v10983_v21, 1  ;;  %v10996_v21 = vld [vmem:[%s16588_s0 + $0xa0] sm:$0xfe] }
 0x16d   :  { %4269 = vmatmul.mubr.bf16.vlgmr.msra.gmra.mrb[0].mxu0 %v776_v24  ;;  %v788_v24 = vpack.c.bf16 %v10974_v16, %v10972_v15  ;;  %v955_v15 = vrot.slane %v10994_v63, 1  ;;  %v12690_v63 = vld [vmem:[#allocation4 + $0x554] ss:$8 sps:$4 sm:$0xff]  }
 0x16e   :  { %4350 = vmatpush1.bf16.msra.mxu0 %v12625_v25  ;;  %4278 = vmatprep.mubr.bf16.mxu0 %v779_v26  ;;  %v12661_v25 = vld [vmem:[#allocation4 + $0x4c0] ss:$8 sps:$4 sm:$0xff]   ;;  %v12666_v26 = vld [vmem:[#allocation4 + $0x4d4] ss:$8 sps:$4 sm:$0xff]  }
 0x16f   :  { %4351 = vmatprep.subr.bf16.mxu0 %v12630_v27  ;;  %v791_v27 = vpack.c.bf16 %v10979_v19, %v10977_v18  ;;  %v970_v19 = vrot.slane %v11003_v5, 1 }
 0x172   :  { %4352 = vmatpush1.bf16.msra.mxu0 %v12628_v28  ;;  %v939_v28 = vrot.slane %v10981_v20, 1  ;;  %v12676_v20 = vld [vmem:[#allocation4 + $0x510] ss:$8 sps:$4 sm:$0xff]  }
 0x173   :  { %4353 = vmatprep.subr.bf16.mxu0 %v12633_v31  ;;  %v946_v31 = vrot.slane %v10987_v23, 1  ;;  %v10998_v23 = vld [vmem:[%s16588_s0 + $0xb0] sm:$0x1] }
 0x175   :  { %4279 = vmatmul.mubr.bf16.gmra.mrb[4].mxu0 %v778_v34  ;;  %v10978_v34 = vld [vmem:[%s16588_s0 + $0x240] sm:$0xff]  ;;  %v947_v39 = vsel %vm293_vm0, %v945_v30, %v946_v31  ;;  %v11009_v30 = vld [vmem:[%s16588_s0 + $0x108] sm:$0xfe]  ;;  %v11011_v31 = vld [vmem:[%s16588_s0 + $0x118] sm:$0x1] }
 0x176   :  { %4354 = vmatpush1.bf16.msra.mxu0 %v12631_v35  ;;  %4288 = vmatprep.mubr.bf16.mxu0 %v781_v36  ;;  %v12669_v35 = vld [vmem:[#allocation4 + $0x4e4] ss:$8 sps:$4 sm:$0xff]  }
 0x177   :  { %4355 = vmatprep.subr.bf16.mxu0 %v12636_v37  ;;  %v10980_v36 = vld [vmem:[%s16588_s0 + $0x20] sm:$0xfe]  ;;  %v10982_v37 = vld [vmem:[%s16588_s0 + $0x30] sm:$0x1] }
 0x178   :  { %v936_v49 = vrot.slane %v10980_v36, 1  ;;  %v960_v36 = vrot.slane %v10996_v21, 1 }
 0x17a   :  { %4356 = vmatpush1.bf16.msra.mxu0 %v12634_v38  ;;  %v941_v38 = vsel %vm293_vm0, %v939_v28, %v940_v29  ;;  %v11005_v28 = vld [vmem:[%s16588_s0 + $0xe8] sm:$0xfe]  ;;  %v11007_v29 = vld [vmem:[%s16588_s0 + $0xf8] sm:$0x1] }
 0x17b   :  { %4357 = vmatprep.subr.bf16.mxu0 %v12639_v41  ;;  %v10986_v41 = vld [vmem:[%s16588_s0 + $0x50] sm:$0x1]  ;;  %v1065_v50 = vpack.c.bf16 %v947_v39, %v941_v38  ;;  %v961_v39 = vrot.slane %v10998_v23, 1  ;;  %v12691_v23 = vld [vmem:[#allocation4 + $0x560] ss:$8 sps:$4 sm:$0xff]  }
 0x17c   :  { %v943_v53 = vrot.slane %v10986_v41, 1 }
 0x17d   :  { %4289 = vmatmul.mubr.bf16.gmra.mrb[8].mxu0 %v780_v44  ;;  %v10993_v44 = vld [vmem:[%s16588_s0 + $0x88] sm:$0xfe] }
 0x17e   :  { %4358 = vmatpush1.bf16.msra.mxu0 %v12637_v45  ;;  %4298 = vmatprep.mubr.bf16.mxu0 %v783_v46  ;;  %v10995_v45 = vld [vmem:[%s16588_s0 + $0x98] sm:$0x1]  ;;  %v790_v46 = vpack.c.bf16 %v10978_v34, %v10976_v33 }
 0x17f   :  { %4359 = vmatprep.subr.bf16.mxu0 %v12642_v47  ;;  %v12667_v47 = vld [vmem:[#allocation4 + $0x4e0] ss:$8 sps:$4 sm:$0xff]  }
 0x182   :  { %4360 = vmatpush1.bf16.msra.mxu0 %v12640_v48  ;;  %v12672_v48 = vld [vmem:[#allocation4 + $0x4f4] ss:$8 sps:$4 sm:$0xff]  }
 0x183   :  { %4361 = vmatprep.subr.bf16.mxu0 %v12645_v51  ;;  %v937_v51 = vrot.slane %v10982_v37, 1  ;;  %v12684_v37 = vld [vmem:[#allocation4 + $0x534] ss:$8 sps:$4 sm:$0xff]  }
 0x185   :  { %4299 = vmatmul.mubr.bf16.gmra.mrb[12].mxu0 %v782_v54  ;;  %v951_v54 = vrot.slane %v10989_v42, 1  ;;  %v975_v42 = vrot.slane %v11005_v28, 1 }
 0x186   :  { %4362 = vmatpush1.bf16.msra.mxu0 %v12643_v55  ;;  %4308 = vmatprep.mubr.bf16.mxu0 %v785_v56  ;;  %v952_v55 = vrot.slane %v10991_v43, 1  ;;  %v957_v56 = vrot.slane %v10993_v44, 1  ;;  %v976_v43 = vrot.slane %v11007_v29, 1  ;;  %v981_v44 = vrot.slane %v11009_v30, 1 }
 0x187   :  { %4363 = vmatprep.subr.bf16.mxu0 %v12648_v57  ;;  %v958_v57 = vrot.slane %v10995_v45, 1  ;;  %v982_v45 = vrot.slane %v11011_v31, 1 }
 0x188   :  { %v953_v6 = vsel %vm293_vm0, %v951_v54, %v952_v55  ;;  %v11013_v54 = vld [vmem:[%s16588_s0 + $0x168] sm:$0xfe]  ;;  %v11015_v55 = vld [vmem:[%s16588_s0 + $0x178] sm:$0x1] }
 0x189   :  { %v988_v5 = vrot.slane %v11015_v55, 1 }
 0x18a   :  { %4364 = vmatpush1.bf16.msra.mxu0 %v12646_v58  ;;  %v12670_v58 = vld [vmem:[#allocation4 + $0x4f0] ss:$8 sps:$4 sm:$0xff]  }
 0x18b   :  { %4365 = vmatprep.subr.bf16.mxu0 %v12651_v61  ;;  %v10990_v61 = vld [vmem:[%s16588_s0 + $0x70] sm:$0x1] }
 0x18d   :  { %4309 = vmatmul.mubr.bf16.gmra.mrb[16].mxu0 %v784_v0  ;;  %v938_v0 = vsel %vm293_vm0, %v936_v49, %v937_v51  ;;  %v11006_v49 = vld [vmem:[%s16588_s0 + $0xf0] sm:$0x1] }
 0x18e   :  { %4366 = vmatpush1.bf16.msra.mxu0 %v12649_v1  ;;  %4318 = vmatprep.mubr.bf16.mxu0 %v787_v2  ;;  %v944_v1 = vsel %vm293_vm0, %v942_v52, %v943_v53  ;;  %v10997_v2 = vld [vmem:[%s16588_s0 + $0xa8] sm:$0xfe]  ;;  %v11010_v51 = vld [vmem:[%s16588_s0 + $0x110] sm:$0x1]  ;;  %v962_v52 = vsel %vm293_vm0, %v960_v36, %v961_v39 }
 0x18f   :  { %4367 = vmatprep.subr.bf16.mxu0 %v12654_v3  ;;  %v10999_v3 = vld [vmem:[%s16588_s0 + $0xb8] sm:$0x1]  ;;  %v1064_v8 = vpack.c.bf16 %v944_v1, %v938_v0  ;;  %v963_v16 = vrot.slane %v10997_v2, 1  ;;  %v973_v1 = vrot.slane %v11006_v49, 1  ;;  %v12699_v36 = vld [vmem:[#allocation4 + $0x584] ss:$8 sps:$4 sm:$0xff]  }
 0x190   :  { %v11026_v39 = vld [vmem:[%s16588_s0 + $0x1d0] sm:$0x1]  ;;  %v12697_v49 = vld [vmem:[#allocation4 + $0x580] ss:$8 sps:$4 sm:$0xff]  }
 0x191   :  { %v1003_v55 = vrot.slane %v11026_v39, 1  ;;  %v12714_v39 = vld [vmem:[#allocation4 + $0x5d4] ss:$8 sps:$4 sm:$0xff]  }
 0x192   :  { %4368 = vmatpush1.bf16.msra.mxu0 %v12652_v4  ;;  %v11001_v4 = vld [vmem:[%s16588_s0 + $0xc8] sm:$0xfe] }
 0x193   :  { %4369 = vmatprep.subr.bf16.mxu0 %v12657_v7  ;;  %v959_v7 = vsel %vm293_vm0, %v957_v56, %v958_v57  ;;  %v969_v18 = vrot.slane %v11001_v4, 1  ;;  %v11017_v56 = vld [vmem:[%s16588_s0 + $0x188] sm:$0xfe]  ;;  %v11019_v57 = vld [vmem:[%s16588_s0 + $0x198] sm:$0x1]  ;;  %v987_v4 = vrot.slane %v11013_v54, 1 }
 0x195   :  { %4319 = vmatmul.mubr.bf16.gmra.mrb[20].mxu0 %v786_v10  ;;  %v948_v10 = vrot.slane %v10988_v59, 1  ;;  %v971_v33 = vsel %vm293_vm0, %v969_v18, %v970_v19  ;;  %v983_v59 = vsel %vm293_vm0, %v981_v44, %v982_v45  ;;  %v11025_v18 = vld [vmem:[%s16588_s0 + $0x1c8] sm:$0xfe]  ;;  %v11027_v19 = vld [vmem:[%s16588_s0 + $0x1d8] sm:$0x1] }
 0x196   :  { %4370 = vmatpush1.bf16.msra.mxu0 %v12655_v11  ;;  %4328 = vmatprep.mubr.bf16.mxu0 %v789_v12  ;;  %v12678_v11 = vld [vmem:[#allocation4 + $0x514] ss:$8 sps:$4 sm:$0xff]   ;;  %v1067_v12 = vpack.c.bf16 %v959_v7, %v953_v6  ;;  %v993_v6 = vrot.slane %v11017_v56, 1  ;;  %v994_v7 = vrot.slane %v11019_v57, 1  ;;  %v11033_v44 = vld [vmem:[%s16588_s0 + $0x208] sm:$0xfe] }
 0x197   :  { %4371 = vmatprep.subr.bf16.mxu0 %v12660_v13  ;;  %v949_v13 = vrot.slane %v10990_v61, 1  ;;  %v12685_v61 = vld [vmem:[#allocation4 + $0x540] ss:$8 sps:$4 sm:$0xff]   ;;  %v11035_v45 = vld [vmem:[%s16588_s0 + $0x218] sm:$0x1] }
 0x198   :  { %v995_v21 = vsel %vm293_vm0, %v993_v6, %v994_v7  ;;  %v11041_v6 = vld [vmem:[%s16588_s0 + $0x248] sm:$0xfe]  ;;  %v11043_v7 = vld [vmem:[%s16588_s0 + $0x258] sm:$0x1] }
 0x19a   :  { %4372 = vmatpush1.bf16.msra.mxu0 %v12658_v14  ;;  %v954_v14 = vrot.slane %v10992_v62, 1 }
 0x19b   :  { %4373 = vmatprep.subr.bf16.mxu0 %v12663_v17  ;;  %v964_v17 = vrot.slane %v10999_v3, 1  ;;  %v979_v3 = vrot.slane %v11010_v51, 1  ;;  %v12702_v51 = vld [vmem:[#allocation4 + $0x594] ss:$8 sps:$4 sm:$0xff]  }
 0x19d   :  { %4329 = vmatmul.mubr.bf16.gmra.mrb[24].mxu0 %v788_v24  ;;  %v11000_v24 = vld [vmem:[%s16588_s0 + $0xc0] sm:$0xfe] }
 0x19e   :  { %4374 = vmatpush1.bf16.msra.mxu0 %v12661_v25  ;;  %4338 = vmatprep.mubr.bf16.mxu0 %v791_v27  ;;  %v11002_v25 = vld [vmem:[%s16588_s0 + $0xd0] sm:$0x1]  ;;  %v956_v27 = vsel %vm293_vm0, %v954_v14, %v955_v15  ;;  %v966_v40 = vrot.slane %v11000_v24, 1 }
 0x19f   :  { %4375 = vmatprep.subr.bf16.mxu0 %v12666_v26  ;;  %v950_v26 = vsel %vm293_vm0, %v948_v10, %v949_v13  ;;  %v967_v41 = vrot.slane %v11002_v25, 1  ;;  %v12693_v10 = vld [vmem:[#allocation4 + $0x564] ss:$8 sps:$4 sm:$0xff]   ;;  %v11018_v13 = vld [vmem:[%s16588_s0 + $0x190] sm:$0x1] }
 0x1a0   :  { %v1066_v34 = vpack.c.bf16 %v956_v27, %v950_v26  ;;  %v12696_v25 = vld [vmem:[#allocation4 + $0x574] ss:$8 sps:$4 sm:$0xff]   ;;  %v991_v29 = vrot.slane %v11018_v13, 1 }
 0x1a1   :  { %v968_v53 = vsel %vm293_vm0, %v966_v40, %v967_v41  ;;  %v12708_v13 = vld [vmem:[#allocation4 + $0x5b4] ss:$8 sps:$4 sm:$0xff]  }
 0x1a2   :  { %4376 = vmatpush1.bf16.msra.mxu0 %v12664_v32  ;;  %v965_v32 = vsel %vm293_vm0, %v963_v16, %v964_v17  ;;  %v11021_v16 = vld [vmem:[%s16588_s0 + $0x1a8] sm:$0xfe]  ;;  %v11023_v17 = vld [vmem:[%s16588_s0 + $0x1b8] sm:$0x1] }
 0x1a3   :  { %4377 = vmatprep.subr.bf16.mxu0 %v12669_v35  ;;  %v12679_v35 = vld [vmem:[#allocation4 + $0x520] ss:$8 sps:$4 sm:$0xff]   ;;  %v1069_v38 = vpack.c.bf16 %v971_v33, %v965_v32  ;;  %v999_v30 = vrot.slane %v11021_v16, 1  ;;  %v1000_v31 = vrot.slane %v11023_v17, 1  ;;  %v1005_v32 = vrot.slane %v11025_v18, 1 }
 0x1a4   :  { %v1006_v33 = vrot.slane %v11027_v19, 1 }
 0x1a5   :  { %4339 = vmatmul.mubr.bf16.gmra.mrb[28].mxu0 %v790_v46  ;;  %v12682_v46 = vld [vmem:[#allocation4 + $0x530] ss:$8 sps:$4 sm:$0xff]  }
 0x1a6   :  { %4378 = vmatpush1.bf16.msra.mxu0 %v12667_v47  ;;  %4381 = vmatprep.mubr.bf16.mxu0 %v1065_v50  ;;  %v11004_v47 = vld [vmem:[%s16588_s0 + $0xe0] sm:$0xfe] }
 0x1a7   :  { %4379 = vmatprep.subr.bf16.mxu0 %v12672_v48  ;;  %v12687_v48 = vld [vmem:[#allocation4 + $0x544] ss:$8 sps:$4 sm:$0xff]   ;;  %v972_v62 = vrot.slane %v11004_v47, 1  ;;  %v1007_v47 = vsel %vm293_vm0, %v1005_v32, %v1006_v33  ;;  %v11051_v33 = vld [vmem:[%s16588_s0 + $0x58] sm:$0x3] }
 0x1a8   :  { %v11008_v50 = vld [vmem:[%s16588_s0 + $0x100] sm:$0xfe]  ;;  %v11049_v32 = vld [vmem:[%s16588_s0 + $0x48] sm:$0xfc] }
 0x1a9   :  { %v978_v2 = vrot.slane %v11008_v50, 1  ;;  %v974_v14 = vsel %vm293_vm0, %v972_v62, %v973_v1  ;;  %v12705_v62 = vld [vmem:[#allocation4 + $0x5a4] ss:$8 sps:$4 sm:$0xff]   ;;  %v11034_v1 = vld [vmem:[%s16588_s0 + $0x210] sm:$0x1] }
 0x1aa   :  { %4380 = vmatpush1.bf16.msra.mxu0 %v12670_v58  ;;  %v977_v58 = vsel %vm293_vm0, %v975_v42, %v976_v43  ;;  %v11029_v42 = vld [vmem:[%s16588_s0 + $0x1e8] sm:$0xfe]  ;;  %v11031_v43 = vld [vmem:[%s16588_s0 + $0x1f8] sm:$0x1]  ;;  %v1015_v17 = vrot.slane %v11034_v1, 1 }
 0x1ab   :  { %4462 = vmatprep.subr.bf16.mxu0 %v12675_v60  ;;  %v1068_v60 = vpack.c.bf16 %v968_v53, %v962_v52  ;;  %v1071_v0 = vpack.c.bf16 %v983_v59, %v977_v58  ;;  %v980_v15 = vsel %vm293_vm0, %v978_v2, %v979_v3  ;;  %v1011_v56 = vrot.slane %v11029_v42, 1  ;;  %v12720_v1 = vld [vmem:[#allocation4 + $0x5f4] ss:$8 sps:$4 sm:$0xff]  }
 0x1ac   :  { %v1012_v57 = vrot.slane %v11031_v43, 1  ;;  %v1017_v58 = vrot.slane %v11033_v44, 1  ;;  %v1018_v59 = vrot.slane %v11035_v45, 1 }
 0x1ad   :  { %4382 = vmatmul.mubr.bf16.vlgmr.msra.gmra.mrb[0].mxu0 %v1064_v8  ;;  %v12688_v8 = vld [vmem:[#allocation4 + $0x550] ss:$8 sps:$4 sm:$0xff]  }
 0x1ae   :  { %4463 = vmatpush1.bf16.msra.mxu0 %v12673_v9  ;;  %4391 = vmatprep.mubr.bf16.mxu0 %v1067_v12  ;;  %v11012_v9 = vld [vmem:[%s16588_s0 + $0x160] sm:$0xfe] }
 0x1af   :  { %4464 = vmatprep.subr.bf16.mxu0 %v12678_v11  ;;  %v11014_v11 = vld [vmem:[%s16588_s0 + $0x170] sm:$0x1]  ;;  %v11016_v12 = vld [vmem:[%s16588_s0 + $0x180] sm:$0xfe]  ;;  %v984_v24 = vrot.slane %v11012_v9, 1  ;;  %v1019_v9 = vsel %vm293_vm0, %v1017_v58, %v1018_v59 }
 0x1b0   :  { %v985_v27 = vrot.slane %v11014_v11, 1  ;;  %v990_v28 = vrot.slane %v11016_v12, 1  ;;  %v12703_v11 = vld [vmem:[#allocation4 + $0x5a0] ss:$8 sps:$4 sm:$0xff]   ;;  %v11059_v59 = vld [vmem:[%s16588_s0 + $0x98] sm:$0x3] }
 0x1b1   :  { %v11057_v58 = vld [vmem:[%s16588_s0 + $0x88] sm:$0xfc] }
 0x1b2   :  { %4465 = vmatpush1.bf16.msra.mxu0 %v12676_v20  ;;  %v989_v20 = vsel %vm293_vm0, %v987_v4, %v988_v5  ;;  %v986_v40 = vsel %vm293_vm0, %v984_v24, %v985_v27  ;;  %v992_v41 = vsel %vm293_vm0, %v990_v28, %v991_v29  ;;  %v11037_v4 = vld [vmem:[%s16588_s0 + $0x228] sm:$0xfe]  ;;  %v11039_v5 = vld [vmem:[%s16588_s0 + $0x238] sm:$0x1]  ;;  %v11042_v27 = vld [vmem:[%s16588_s0 + $0x250] sm:$0x1] }
 0x1b3   :  { %4466 = vmatprep.subr.bf16.mxu0 %v12681_v22  ;;  %v1070_v22 = vpack.c.bf16 %v980_v15, %v974_v14  ;;  %v1073_v26 = vpack.c.bf16 %v995_v21, %v989_v20  ;;  %v1023_v18 = vrot.slane %v11037_v4, 1  ;;  %v1024_v19 = vrot.slane %v11039_v5, 1  ;;  %v12711_v24 = vld [vmem:[#allocation4 + $0x5c4] ss:$8 sps:$4 sm:$0xff]  }
 0x1b4   :  { %v1029_v20 = vrot.slane %v11041_v6, 1  ;;  %v1030_v21 = vrot.slane %v11043_v7, 1  ;;  %v1027_v43 = vrot.slane %v11042_v27, 1 }
 0x1b5   :  { %4392 = vmatmul.mubr.bf16.gmra.mrb[4].mxu0 %v1066_v34  ;;  %v12694_v34 = vld [vmem:[#allocation4 + $0x570] ss:$8 sps:$4 sm:$0xff]  }
 0x1b6   :  { %4467 = vmatpush1.bf16.msra.mxu0 %v12679_v35  ;;  %4401 = vmatprep.mubr.bf16.mxu0 %v1069_v38  ;;  %v11020_v35 = vld [vmem:[%s16588_s0 + $0x1a0] sm:$0xfe] }
 0x1b7   :  { %4468 = vmatprep.subr.bf16.mxu0 %v12684_v37  ;;  %v11022_v37 = vld [vmem:[%s16588_s0 + $0x1b0] sm:$0x1]  ;;  %v11024_v38 = vld [vmem:[%s16588_s0 + $0x1c0] sm:$0xfe]  ;;  %v996_v50 = vrot.slane %v11020_v35, 1  ;;  %v1031_v35 = vsel %vm293_vm0, %v1029_v20, %v1030_v21 }
 0x1b8   :  { %v997_v53 = vrot.slane %v11022_v37, 1  ;;  %v1002_v54 = vrot.slane %v11024_v38, 1  ;;  %v12709_v37 = vld [vmem:[#allocation4 + $0x5c0] ss:$8 sps:$4 sm:$0xff]   ;;  %v11063_v21 = vld [vmem:[%s16588_s0 + $0xb8] sm:$0x3] }
 0x1b9   :  { %v11061_v20 = vld [vmem:[%s16588_s0 + $0xa8] sm:$0xfc] }
 0x1ba   :  { %4469 = vmatpush1.bf16.msra.mxu0 %v12682_v46  ;;  %v1001_v46 = vsel %vm293_vm0, %v999_v30, %v1000_v31  ;;  %v998_v2 = vsel %vm293_vm0, %v996_v50, %v997_v53  ;;  %v1004_v3 = vsel %vm293_vm0, %v1002_v54, %v1003_v55  ;;  %v11045_v30 = vld [vmem:[%s16588_s0 + $0x28] sm:$0xfc]  ;;  %v11047_v31 = vld [vmem:[%s16588_s0 + $0x38] sm:$0x3]  ;;  %v11050_v53 = vld [vmem:[%s16588_s0 + $0x50] sm:$0x3] }
 0x1bb   :  { %4470 = vmatprep.subr.bf16.mxu0 %v12687_v48  ;;  %v1072_v48 = vpack.c.bf16 %v992_v41, %v986_v40  ;;  %v1075_v52 = vpack.c.bf16 %v1007_v47, %v1001_v46  ;;  %v1227_v44 = vrot.slane %v11045_v30, 2  ;;  %v1228_v45 = vrot.slane %v11047_v31, 2  ;;  %v12717_v50 = vld [vmem:[#allocation4 + $0x5e4] ss:$8 sps:$4 sm:$0xff]  }
 0x1bc   :  { %v1233_v46 = vrot.slane %v11049_v32, 2  ;;  %v1234_v47 = vrot.slane %v11051_v33, 2  ;;  %v1231_v5 = vrot.slane %v11050_v53, 2  ;;  %v1251_v32 = vrot.slane %v11061_v20, 2 }
 0x1bd   :  { %4402 = vmatmul.mubr.bf16.gmra.mrb[8].mxu0 %v1068_v60  ;;  %v12700_v60 = vld [vmem:[#allocation4 + $0x590] ss:$8 sps:$4 sm:$0xff]   ;;  %v1252_v33 = vrot.slane %v11063_v21, 2 }
 0x1be   :  { %4471 = vmatpush1.bf16.msra.mxu0 %v12685_v61  ;;  %4411 = vmatprep.mubr.bf16.mxu0 %v1071_v0  ;;  %v11028_v61 = vld [vmem:[%s16588_s0 + $0x1e0] sm:$0xfe] }
 0x1bf   :  { %4472 = vmatprep.subr.bf16.mxu0 %v12690_v63  ;;  %v11030_v63 = vld [vmem:[%s16588_s0 + $0x1f0] sm:$0x1]  ;;  %v11032_v0 = vld [vmem:[%s16588_s0 + $0x200] sm:$0xfe]  ;;  %v1008_v12 = vrot.slane %v11028_v61, 1  ;;  %v1235_v61 = vsel %vm582_vm1, %v1233_v46, %v1234_v47 }
 0x1c0   :  { %v1009_v15 = vrot.slane %v11030_v63, 1  ;;  %v1014_v16 = vrot.slane %v11032_v0, 1  ;;  %v12715_v63 = vld [vmem:[#allocation4 + $0x5e0] ss:$8 sps:$4 sm:$0xff]   ;;  %v11071_v47 = vld [vmem:[%s16588_s0 + $0xf8] sm:$0x3] }
 0x1c1   :  { %v11069_v46 = vld [vmem:[%s16588_s0 + $0xe8] sm:$0xfc] }
 0x1c2   :  { %4473 = vmatpush1.bf16.msra.mxu0 %v12688_v8  ;;  %v1013_v8 = vsel %vm293_vm0, %v1011_v56, %v1012_v57  ;;  %v1010_v28 = vsel %vm293_vm0, %v1008_v12, %v1009_v15  ;;  %v1016_v29 = vsel %vm293_vm0, %v1014_v16, %v1015_v17  ;;  %v11053_v56 = vld [vmem:[%s16588_s0 + $0x68] sm:$0xfc]  ;;  %v11055_v57 = vld [vmem:[%s16588_s0 + $0x78] sm:$0x3]  ;;  %v11054_v15 = vld [vmem:[%s16588_s0 + $0x70] sm:$0x3] }
 0x1c3   :  { %4474 = vmatprep.subr.bf16.mxu0 %v12693_v10  ;;  %v1074_v10 = vpack.c.bf16 %v1004_v3, %v998_v2  ;;  %v1077_v14 = vpack.c.bf16 %v1019_v9, %v1013_v8  ;;  %v1239_v6 = vrot.slane %v11053_v56, 2  ;;  %v1240_v7 = vrot.slane %v11055_v57, 2 }
 0x1c4   :  { %v1245_v8 = vrot.slane %v11057_v58, 2  ;;  %v1246_v9 = vrot.slane %v11059_v59, 2  ;;  %v1263_v58 = vrot.slane %v11069_v46, 2  ;;  %v1264_v59 = vrot.slane %v11071_v47, 2 }
 0x1c5   :  { %4412 = vmatmul.mubr.bf16.gmra.mrb[12].mxu0 %v1070_v22  ;;  %v12706_v22 = vld [vmem:[#allocation4 + $0x5b0] ss:$8 sps:$4 sm:$0xff]   ;;  %v1241_v16 = vsel %vm582_vm1, %v1239_v6, %v1240_v7  ;;  %v11072_v6 = vld [vmem:[%s16588_s0 + $0x100] sm:$0xfc] }
 0x1c6   :  { %4475 = vmatpush1.bf16.msra.mxu0 %v12691_v23  ;;  %4421 = vmatprep.mubr.bf16.mxu0 %v1073_v26  ;;  %v11036_v23 = vld [vmem:[%s16588_s0 + $0x220] sm:$0xfe]  ;;  %v1247_v17 = vsel %vm582_vm1, %v1245_v8, %v1246_v9  ;;  %v11074_v7 = vld [vmem:[%s16588_s0 + $0x110] sm:$0x3]  ;;  %v11077_v8 = vld [vmem:[%s16588_s0 + $0x168] sm:$0xfc] }
 0x1c7   :  { %4476 = vmatprep.subr.bf16.mxu0 %v12696_v25  ;;  %v11038_v25 = vld [vmem:[%s16588_s0 + $0x230] sm:$0x1]  ;;  %v11040_v26 = vld [vmem:[%s16588_s0 + $0x240] sm:$0xfe]  ;;  %v1020_v38 = vrot.slane %v11036_v23, 1  ;;  %v1275_v20 = vrot.slane %v11077_v8, 2 }
 0x1c8   :  { %v1021_v41 = vrot.slane %v11038_v25, 1  ;;  %v1026_v42 = vrot.slane %v11040_v26, 1  ;;  %v11067_v23 = vld [vmem:[%s16588_s0 + $0xd8] sm:$0x3]  ;;  %v12721_v25 = vld [vmem:[#allocation4 + $0x600] ss:$8 sps:$4 sm:$0xff]  }
 0x1c9   :  { %v12726_v26 = vld [vmem:[#allocation4 + $0x614] ss:$8 sps:$4 sm:$0xff]   ;;  %v11079_v9 = vld [vmem:[%s16588_s0 + $0x178] sm:$0x3] }
 0x1ca   :  { %4477 = vmatpush1.bf16.msra.mxu0 %v12694_v34  ;;  %v1025_v34 = vsel %vm293_vm0, %v1023_v18, %v1024_v19  ;;  %v1022_v54 = vsel %vm293_vm0, %v1020_v38, %v1021_v41  ;;  %v1028_v55 = vsel %vm293_vm0, %v1026_v42, %v1027_v43  ;;  %v11056_v18 = vld [vmem:[%s16588_s0 + $0x80] sm:$0xfc]  ;;  %v11058_v19 = vld [vmem:[%s16588_s0 + $0x90] sm:$0x3]  ;;  %v1253_v42 = vsel %vm582_vm1, %v1251_v32, %v1252_v33 }
 0x1cb   :  { %4478 = vmatprep.subr.bf16.mxu0 %v12699_v36  ;;  %v1076_v36 = vpack.c.bf16 %v1016_v29, %v1010_v28  ;;  %v1079_v40 = vpack.c.bf16 %v1031_v35, %v1025_v34  ;;  %v1355_v28 = vpack.c.bf16 %v1247_v17, %v1241_v16  ;;  %v1237_v29 = vrot.slane %v11054_v15, 2  ;;  %v11062_v41 = vld [vmem:[%s16588_s0 + $0xb0] sm:$0x3]  ;;  %v11080_v32 = vld [vmem:[%s16588_s0 + $0x180] sm:$0xfc] }
 0x1cc   :  { %v1242_v30 = vrot.slane %v11056_v18, 2  ;;  %v1243_v31 = vrot.slane %v11058_v19, 2  ;;  %v1258_v35 = vrot.slane %v11067_v23, 2  ;;  %v1266_v18 = vrot.slane %v11072_v6, 2  ;;  %v11082_v33 = vld [vmem:[%s16588_s0 + $0x190] sm:$0x3] }
 0x1cd   :  { %4422 = vmatmul.mubr.bf16.gmra.mrb[16].mxu0 %v1072_v48  ;;  %v12712_v48 = vld [vmem:[#allocation4 + $0x5d0] ss:$8 sps:$4 sm:$0xff]   ;;  %v1267_v19 = vrot.slane %v11074_v7, 2  ;;  %v1276_v21 = vrot.slane %v11079_v9, 2 }
 0x1ce   :  { %4479 = vmatpush1.bf16.msra.mxu0 %v12697_v49  ;;  %4431 = vmatprep.mubr.bf16.mxu0 %v1075_v52  ;;  %v11044_v49 = vld [vmem:[%s16588_s0 + $0x20] sm:$0xfc]  ;;  %v1244_v38 = vsel %vm582_vm1, %v1242_v30, %v1243_v31 }
 0x1cf   :  { %4480 = vmatprep.subr.bf16.mxu0 %v12702_v51  ;;  %v11046_v51 = vld [vmem:[%s16588_s0 + $0x30] sm:$0x3]  ;;  %v11048_v52 = vld [vmem:[%s16588_s0 + $0x40] sm:$0xfc]  ;;  %v1224_v0 = vrot.slane %v11044_v49, 2  ;;  %v1277_v30 = vsel %vm582_vm1, %v1275_v20, %v1276_v21 }
 0x1d0   :  { %v1225_v3 = vrot.slane %v11046_v51, 2  ;;  %v1230_v4 = vrot.slane %v11048_v52, 2  ;;  %v11075_v49 = vld [vmem:[%s16588_s0 + $0x118] sm:$0x3]  ;;  %v12727_v51 = vld [vmem:[#allocation4 + $0x620] ss:$8 sps:$4 sm:$0xff]  }
 0x1d1   :  { %v12732_v52 = vld [vmem:[#allocation4 + $0x634] ss:$8 sps:$4 sm:$0xff]   ;;  %v11096_v20 = vld [vmem:[%s16588_s0 + $0x200] sm:$0xfc]  ;;  %v11098_v21 = vld [vmem:[%s16588_s0 + $0x210] sm:$0x3] }
 0x1d2   :  { %4481 = vmatpush1.bf16.msra.mxu0 %v12700_v60  ;;  %v1229_v60 = vsel %vm582_vm1, %v1227_v44, %v1228_v45  ;;  %v1232_v12 = vsel %vm582_vm1, %v1230_v4, %v1231_v5  ;;  %v11064_v44 = vld [vmem:[%s16588_s0 + $0xc0] sm:$0xfc]  ;;  %v11066_v45 = vld [vmem:[%s16588_s0 + $0xd0] sm:$0x3]  ;;  %v1265_v4 = vsel %vm582_vm1, %v1263_v58, %v1264_v59 }
 0x1d3   :  { %4482 = vmatprep.subr.bf16.mxu0 %v12705_v62  ;;  %v1078_v62 = vpack.c.bf16 %v1028_v55, %v1022_v54  ;;  %v1353_v2 = vpack.c.bf16 %v1235_v61, %v1229_v60  ;;  %v1249_v55 = vrot.slane %v11062_v41, 2  ;;  %v1254_v56 = vrot.slane %v11064_v44, 2  ;;  %v11088_v58 = vld [vmem:[%s16588_s0 + $0x1c0] sm:$0xfc]  ;;  %v11090_v59 = vld [vmem:[%s16588_s0 + $0x1d0] sm:$0x3] }
 0x1d4   :  { %v1255_v57 = vrot.slane %v11066_v45, 2  ;;  %v1270_v61 = vrot.slane %v11075_v49, 2  ;;  %v1278_v44 = vrot.slane %v11080_v32, 2  ;;  %v1279_v45 = vrot.slane %v11082_v33, 2 }
 0x1d5   :  { %4432 = vmatmul.mubr.bf16.gmra.mrb[20].mxu0 %v1074_v10  ;;  %v12718_v10 = vld [vmem:[#allocation4 + $0x5f0] ss:$8 sps:$4 sm:$0xff]   ;;  %v1290_v6 = vrot.slane %v11088_v58, 2  ;;  %v1291_v7 = vrot.slane %v11090_v59, 2  ;;  %v1302_v32 = vrot.slane %v11096_v20, 2  ;;  %v1303_v33 = vrot.slane %v11098_v21, 2 }
 0x1d6   :  { %4483 = vmatpush1.bf16.msra.mxu0 %v12703_v11  ;;  %4441 = vmatprep.mubr.bf16.mxu0 %v1077_v14  ;;  %v1226_v11 = vsel %vm582_vm1, %v1224_v0, %v1225_v3  ;;  %v11052_v14 = vld [vmem:[%s16588_s0 + $0x60] sm:$0xfc]  ;;  %v1256_v0 = vsel %vm582_vm1, %v1254_v56, %v1255_v57  ;;  %v11070_v3 = vld [vmem:[%s16588_s0 + $0xf0] sm:$0x3]  ;;  %v12780_v20 = vld [vmem:[#allocation4 + $0x734] ss:$8 sps:$4 sm:$0xff]  }
 0x1d7   :  { %4484 = vmatprep.subr.bf16.mxu0 %v12708_v13  ;;  %v12723_v13 = vld [vmem:[#allocation4 + $0x604] ss:$8 sps:$4 sm:$0xff]   ;;  %v1236_v27 = vrot.slane %v11052_v14, 2  ;;  %v12738_v14 = vld [vmem:[#allocation4 + $0x654] ss:$8 sps:$4 sm:$0xff]   ;;  %v1261_v17 = vrot.slane %v11070_v3, 2 }
 0x1d8   :  { %v12765_v59 = vld [vmem:[#allocation4 + $0x6e4] ss:$8 sps:$4 sm:$0xff]  }
 0x1da   :  { %4485 = vmatpush1.bf16.msra.mxu0 %v12706_v22  ;;  %v11065_v22 = vld [vmem:[%s16588_s0 + $0xc8] sm:$0xfc] }
 0x1db   :  { %4486 = vmatprep.subr.bf16.mxu0 %v12711_v24  ;;  %v1352_v24 = vpack.c.bf16 %v1232_v12, %v1226_v11  ;;  %v1257_v34 = vrot.slane %v11065_v22, 2  ;;  %v11083_v11 = vld [vmem:[%s16588_s0 + $0x198] sm:$0x3] }
 0x1dc   :  { %v1282_v23 = vrot.slane %v11083_v11, 2 }
 0x1dd   :  { %4442 = vmatmul.mubr.bf16.gmra.mrb[24].mxu0 %v1076_v36  ;;  %v12724_v36 = vld [vmem:[#allocation4 + $0x610] ss:$8 sps:$4 sm:$0xff]   ;;  %v1259_v43 = vsel %vm582_vm1, %v1257_v34, %v1258_v35  ;;  %v11085_v34 = vld [vmem:[%s16588_s0 + $0x1a8] sm:$0xfc] }
 0x1de   :  { %4487 = vmatpush1.bf16.msra.mxu0 %v12709_v37  ;;  %4451 = vmatprep.mubr.bf16.mxu0 %v1079_v40  ;;  %v1238_v37 = vsel %vm582_vm1, %v1236_v27, %v1237_v29  ;;  %v11060_v40 = vld [vmem:[%s16588_s0 + $0xa0] sm:$0xfc]  ;;  %v1357_v54 = vpack.c.bf16 %v1259_v43, %v1253_v42  ;;  %v11078_v29 = vld [vmem:[%s16588_s0 + $0x170] sm:$0x3]  ;;  %v11087_v35 = vld [vmem:[%s16588_s0 + $0x1b8] sm:$0x3] }
 0x1df   :  { %4488 = vmatprep.subr.bf16.mxu0 %v12714_v39  ;;  %v12729_v39 = vld [vmem:[#allocation4 + $0x624] ss:$8 sps:$4 sm:$0xff]   ;;  %v1248_v53 = vrot.slane %v11060_v40, 2  ;;  %v12744_v40 = vld [vmem:[#allocation4 + $0x674] ss:$8 sps:$4 sm:$0xff]   ;;  %v1273_v43 = vrot.slane %v11078_v29, 2 }
 0x1e0   :  { %v12741_v27 = vld [vmem:[#allocation4 + $0x664] ss:$8 sps:$4 sm:$0xff]   ;;  %v1287_v46 = vrot.slane %v11085_v34, 2  ;;  %v1288_v47 = vrot.slane %v11087_v35, 2 }
 0x1e2   :  { %4489 = vmatpush1.bf16.msra.mxu0 %v12712_v48  ;;  %v11073_v48 = vld [vmem:[%s16588_s0 + $0x108] sm:$0xfc]  ;;  %v1289_v56 = vsel %vm582_vm1, %v1287_v46, %v1288_v47  ;;  %v11104_v46 = vld [vmem:[%s16588_s0 + $0x240] sm:$0xfc]  ;;  %v11106_v47 = vld [vmem:[%s16588_s0 + $0x250] sm:$0x3] }
 0x1e3   :  { %4490 = vmatprep.subr.bf16.mxu0 %v12717_v50  ;;  %v1354_v50 = vpack.c.bf16 %v1244_v38, %v1238_v37  ;;  %v1269_v60 = vrot.slane %v11073_v48, 2  ;;  %v11091_v37 = vld [vmem:[%s16588_s0 + $0x1d8] sm:$0x3] }
 0x1e4   :  { %v1294_v49 = vrot.slane %v11091_v37, 2 }
 0x1e5   :  { %4452 = vmatmul.mubr.bf16.gmra.mrb[28].mxu0 %v1078_v62  ;;  %v12730_v62 = vld [vmem:[#allocation4 + $0x630] ss:$8 sps:$4 sm:$0xff]   ;;  %v1271_v5 = vsel %vm582_vm1, %v1269_v60, %v1270_v61  ;;  %v11093_v60 = vld [vmem:[%s16588_s0 + $0x1e8] sm:$0xfc] }
 0x1e6   :  { %4491 = vmatpush1.bf16.msra.mxu0 %v12715_v63  ;;  %4494 = vmatprep.mubr.bf16.mxu0 %v1353_v2  ;;  %v1250_v63 = vsel %vm582_vm1, %v1248_v53, %v1249_v55  ;;  %v11068_v2 = vld [vmem:[%s16588_s0 + $0xe0] sm:$0xfc]  ;;  %v1359_v16 = vpack.c.bf16 %v1271_v5, %v1265_v4  ;;  %v11086_v55 = vld [vmem:[%s16588_s0 + $0x1b0] sm:$0x3]  ;;  %v11095_v61 = vld [vmem:[%s16588_s0 + $0x1f8] sm:$0x3] }
 0x1e7   :  { %4492 = vmatprep.subr.bf16.mxu0 %v12720_v1  ;;  %v12735_v1 = vld [vmem:[#allocation4 + $0x644] ss:$8 sps:$4 sm:$0xff]   ;;  %v1356_v12 = vpack.c.bf16 %v1256_v0, %v1250_v63  ;;  %v1260_v15 = vrot.slane %v11068_v2, 2  ;;  %v11099_v63 = vld [vmem:[%s16588_s0 + $0x218] sm:$0x3]  ;;  %v1285_v5 = vrot.slane %v11086_v55, 2 }
 0x1e8   :  { %v12747_v53 = vld [vmem:[#allocation4 + $0x684] ss:$8 sps:$4 sm:$0xff]   ;;  %v12750_v2 = vld [vmem:[#allocation4 + $0x694] ss:$8 sps:$4 sm:$0xff]   ;;  %v1299_v8 = vrot.slane %v11093_v60, 2  ;;  %v1300_v9 = vrot.slane %v11095_v61, 2 }
 0x1e9   :  { %v1306_v11 = vrot.slane %v11099_v63, 2  ;;  %v12762_v55 = vld [vmem:[#allocation4 + $0x6d4] ss:$8 sps:$4 sm:$0xff]   ;;  %v11109_v60 = vld [vmem:[%s16588_s0 + $0x48] sm:$0xff] }
 0x1ea   :  { %4493 = vmatpush1.bf16.msra.mxu0 %v12718_v10  ;;  %v11081_v10 = vld [vmem:[%s16588_s0 + $0x188] sm:$0xfc] }
 0x1eb   :  { %4575 = vmatprep.subr.bf16.mxu0 %v12723_v13  ;;  %v12733_v13 = vld [vmem:[#allocation4 + $0x640] ss:$8 sps:$4 sm:$0xff]   ;;  %v1281_v22 = vrot.slane %v11081_v10, 2 }
 0x1ec   :  { %v11111_v61 = vld [vmem:[%s16588_s0 + $0x68] sm:$0xff] }
 0x1ed   :  { %4495 = vmatmul.mubr.bf16.vlgmr.msra.gmra.mrb[0].mxu0 %v1352_v24  ;;  %v12736_v24 = vld [vmem:[#allocation4 + $0x650] ss:$8 sps:$4 sm:$0xff]   ;;  %v1283_v31 = vsel %vm582_vm1, %v1281_v22, %v1282_v23  ;;  %v11101_v22 = vld [vmem:[%s16588_s0 + $0x228] sm:$0xfc] }
 0x1ee   :  { %4576 = vmatpush1.bf16.msra.mxu0 %v12721_v25  ;;  %4504 = vmatprep.mubr.bf16.mxu0 %v1355_v28  ;;  %v1262_v25 = vsel %vm582_vm1, %v1260_v15, %v1261_v17  ;;  %v11076_v28 = vld [vmem:[%s16588_s0 + $0x160] sm:$0xfc]  ;;  %v1361_v42 = vpack.c.bf16 %v1283_v31, %v1277_v30  ;;  %v11094_v17 = vld [vmem:[%s16588_s0 + $0x1f0] sm:$0x3]  ;;  %v11103_v23 = vld [vmem:[%s16588_s0 + $0x238] sm:$0x3] }
 0x1ef   :  { %4577 = vmatprep.subr.bf16.mxu0 %v12726_v26  ;;  %v1268_v26 = vsel %vm582_vm1, %v1266_v18, %v1267_v19  ;;  %v1272_v41 = vrot.slane %v11076_v28, 2  ;;  %v12753_v15 = vld [vmem:[#allocation4 + $0x6a4] ss:$8 sps:$4 sm:$0xff]   ;;  %v1301_v18 = vsel %vm582_vm1, %v1299_v8, %v1300_v9  ;;  %v12756_v28 = vld [vmem:[#allocation4 + $0x6b4] ss:$8 sps:$4 sm:$0xff]   ;;  %v1297_v31 = vrot.slane %v11094_v17, 2 }
 0x1f0   :  { %v1358_v38 = vpack.c.bf16 %v1268_v26, %v1262_v25  ;;  %v11107_v25 = vld [vmem:[%s16588_s0 + $0x258] sm:$0x3]  ;;  %v1311_v34 = vrot.slane %v11101_v22, 2  ;;  %v1312_v35 = vrot.slane %v11103_v23, 2  ;;  %v12763_v63 = vld [vmem:[#allocation4 + $0x6e0] ss:$8 sps:$4 sm:$0xff]  }
 0x1f1   :  { %v1318_v37 = vrot.slane %v11107_v25, 2  ;;  %v12769_v9 = vld [vmem:[#allocation4 + $0x700] ss:$8 sps:$4 sm:$0xff]   ;;  %v12778_v22 = vld [vmem:[#allocation4 + $0x730] ss:$8 sps:$4 sm:$0xff]  }
 0x1f2   :  { %4578 = vmatpush1.bf16.msra.mxu0 %v12724_v36  ;;  %v11089_v36 = vld [vmem:[%s16588_s0 + $0x1c8] sm:$0xfc]  ;;  %v11116_v23 = vld [vmem:[%s16588_s0 + $0xc0] sm:$0xff] }
 0x1f3   :  { %4579 = vmatprep.subr.bf16.mxu0 %v12729_v39  ;;  %v12739_v39 = vld [vmem:[#allocation4 + $0x660] ss:$8 sps:$4 sm:$0xff]   ;;  %v1293_v48 = vrot.slane %v11089_v36, 2  ;;  %v12783_v25 = vld [vmem:[#allocation4 + $0x744] ss:$8 sps:$4 sm:$0xff]  }
 0x1f4   :  { %v11119_v17 = vld [vmem:[%s16588_s0 + $0xe8] sm:$0xff] }
 0x1f5   :  { %4505 = vmatmul.mubr.bf16.gmra.mrb[4].mxu0 %v1354_v50  ;;  %v12742_v50 = vld [vmem:[#allocation4 + $0x670] ss:$8 sps:$4 sm:$0xff]   ;;  %v1295_v57 = vsel %vm582_vm1, %v1293_v48, %v1294_v49  ;;  %v12757_v49 = vld [vmem:[#allocation4 + $0x6c0] ss:$8 sps:$4 sm:$0xff]  }
 0x1f6   :  { %4580 = vmatpush1.bf16.msra.mxu0 %v12727_v51  ;;  %4514 = vmatprep.mubr.bf16.mxu0 %v1357_v54  ;;  %v1274_v51 = vsel %vm582_vm1, %v1272_v41, %v1273_v43  ;;  %v11084_v54 = vld [vmem:[%s16588_s0 + $0x1a0] sm:$0xfc]  ;;  %v1363_v4 = vpack.c.bf16 %v1295_v57, %v1289_v56  ;;  %v1313_v43 = vsel %vm582_vm1, %v1311_v34, %v1312_v35  ;;  %v12760_v56 = vld [vmem:[#allocation4 + $0x6d0] ss:$8 sps:$4 sm:$0xff]  }
 0x1f7   :  { %4581 = vmatprep.subr.bf16.mxu0 %v12732_v52  ;;  %v1280_v52 = vsel %vm582_vm1, %v1278_v44, %v1279_v45  ;;  %v1284_v3 = vrot.slane %v11084_v54, 2  ;;  %v12759_v41 = vld [vmem:[#allocation4 + $0x6c4] ss:$8 sps:$4 sm:$0xff]   ;;  %v11102_v45 = vld [vmem:[%s16588_s0 + $0x230] sm:$0x3]  ;;  %v1315_v54 = vrot.slane %v11106_v47, 2 }
 0x1f8   :  { %v1360_v0 = vpack.c.bf16 %v1280_v52, %v1274_v51  ;;  %v1309_v52 = vrot.slane %v11102_v45, 2  ;;  %v11122_v34 = vld [vmem:[%s16588_s0 + $0x120] sm:$0xff]  ;;  %v11131_v47 = vld [vmem:[%s16588_s0 + $0x1e8] sm:$0xff] }
 0x1f9   :  { %v12789_v35 = vld [vmem:[#allocation4 + $0x764] ss:$8 sps:$4 sm:$0xff]  }
 0x1fa   :  { %4582 = vmatpush1.bf16.msra.mxu0 %v12730_v62  ;;  %v11097_v62 = vld [vmem:[%s16588_s0 + $0x208] sm:$0xfc] }
 0x1fb   :  { %4583 = vmatprep.subr.bf16.mxu0 %v12735_v1  ;;  %v12745_v1 = vld [vmem:[#allocation4 + $0x680] ss:$8 sps:$4 sm:$0xff]   ;;  %v1305_v10 = vrot.slane %v11097_v62, 2  ;;  %v12795_v45 = vld [vmem:[#allocation4 + $0x784] ss:$8 sps:$4 sm:$0xff]  }
 0x1fd   :  { %4515 = vmatmul.mubr.bf16.gmra.mrb[8].mxu0 %v1356_v12  ;;  %v12748_v12 = vld [vmem:[#allocation4 + $0x690] ss:$8 sps:$4 sm:$0xff]   ;;  %v1307_v19 = vsel %vm582_vm1, %v1305_v10, %v1306_v11  ;;  %v12774_v10 = vld [vmem:[#allocation4 + $0x714] ss:$8 sps:$4 sm:$0xff]  }
 0x1fe   :  { %4584 = vmatpush1.bf16.msra.mxu0 %v12733_v13  ;;  %4524 = vmatprep.mubr.bf16.mxu0 %v1359_v16  ;;  %v1286_v13 = vsel %vm582_vm1, %v1284_v3, %v1285_v5  ;;  %v11092_v16 = vld [vmem:[%s16588_s0 + $0x1e0] sm:$0xfc]  ;;  %v1365_v30 = vpack.c.bf16 %v1307_v19, %v1301_v18 }
 0x1ff   :  { %4585 = vmatprep.subr.bf16.mxu0 %v12738_v14  ;;  %v1292_v14 = vsel %vm582_vm1, %v1290_v6, %v1291_v7  ;;  %v1296_v29 = vrot.slane %v11092_v16, 2  ;;  %v11108_v3 = vld [vmem:[%s16588_s0 + $0x40] sm:$0xff]  ;;  %v11113_v6 = vld [vmem:[%s16588_s0 + $0x88] sm:$0xff] }
 0x200   :  { %v1362_v26 = vpack.c.bf16 %v1292_v14, %v1286_v13  ;;  %v12771_v5 = vld [vmem:[#allocation4 + $0x704] ss:$8 sps:$4 sm:$0xff]   ;;  %v12775_v18 = vld [vmem:[#allocation4 + $0x720] ss:$8 sps:$4 sm:$0xff]  }
 0x201   :  { %v11115_v7 = vld [vmem:[%s16588_s0 + $0xa8] sm:$0xff]  ;;  %v11112_v13 = vld [vmem:[%s16588_s0 + $0x80] sm:$0xff] }
 0x202   :  { %4586 = vmatpush1.bf16.msra.mxu0 %v12736_v24  ;;  %v11105_v24 = vld [vmem:[%s16588_s0 + $0x248] sm:$0xfc]  ;;  %v1420_v11 = vpack.c.bf16 %v11115_v7, %v11113_v6  ;;  %v11114_v14 = vld [vmem:[%s16588_s0 + $0xa0] sm:$0xff]  ;;  %v11147_v7 = vld [vmem:[%s16588_s0 + $0x78] sm:$0x1] }
 0x203   :  { %4587 = vmatprep.subr.bf16.mxu0 %v12741_v27  ;;  %v12751_v27 = vld [vmem:[#allocation4 + $0x6a0] ss:$8 sps:$4 sm:$0xff]   ;;  %v1317_v36 = vrot.slane %v11105_v24, 2  ;;  %v1419_v19 = vpack.c.bf16 %v11114_v14, %v11112_v13 }
 0x204   :  { %v11117_v16 = vld [vmem:[%s16588_s0 + $0xc8] sm:$0xff]  ;;  %v11118_v24 = vld [vmem:[%s16588_s0 + $0xe0] sm:$0xff] }
 0x205   :  { %4525 = vmatmul.mubr.bf16.gmra.mrb[12].mxu0 %v1358_v38  ;;  %v12754_v38 = vld [vmem:[#allocation4 + $0x6b0] ss:$8 sps:$4 sm:$0xff]   ;;  %v1319_v44 = vsel %vm582_vm1, %v1317_v36, %v1318_v37  ;;  %v1422_v21 = vpack.c.bf16 %v11119_v17, %v11117_v16  ;;  %v11125_v36 = vld [vmem:[%s16588_s0 + $0x188] sm:$0xff]  ;;  %v11136_v17 = vld [vmem:[%s16588_s0 + $0x240] sm:$0xff] }
 0x206   :  { %4588 = vmatpush1.bf16.msra.mxu0 %v12739_v39  ;;  %4534 = vmatprep.mubr.bf16.mxu0 %v1361_v42  ;;  %v1298_v39 = vsel %vm582_vm1, %v1296_v29, %v1297_v31  ;;  %v11100_v42 = vld [vmem:[%s16588_s0 + $0x220] sm:$0xfc]  ;;  %v1367_v51 = vpack.c.bf16 %v1319_v44, %v1313_v43  ;;  %v1421_v29 = vpack.c.bf16 %v11118_v24, %v11116_v23  ;;  %v12786_v31 = vld [vmem:[#allocation4 + $0x754] ss:$8 sps:$4 sm:$0xff]   ;;  %v11127_v37 = vld [vmem:[%s16588_s0 + $0x1a8] sm:$0xff] }
 0x207   :  { %4589 = vmatprep.subr.bf16.mxu0 %v12744_v40  ;;  %v1304_v40 = vsel %vm582_vm1, %v1302_v32, %v1303_v33  ;;  %v12784_v32 = vld [vmem:[#allocation4 + $0x750] ss:$8 sps:$4 sm:$0xff]   ;;  %v11120_v33 = vld [vmem:[%s16588_s0 + $0x100] sm:$0xff]  ;;  %v11145_v6 = vld [vmem:[%s16588_s0 + $0x68] sm:$0xfe] }
 0x208   :  { %v1364_v48 = vpack.c.bf16 %v1304_v40, %v1298_v39  ;;  %v12787_v39 = vld [vmem:[#allocation4 + $0x760] ss:$8 sps:$4 sm:$0xff]   ;;  %v1426_v40 = vpack.c.bf16 %v11127_v37, %v11125_v36  ;;  %v1586_v14 = vrot.slane %v11145_v6, 1  ;;  %v12808_v16 = vld [vmem:[#allocation4 + $0x7d0] ss:$8 sps:$4 sm:$0xff]  }
 0x209   :  { %v11124_v43 = vld [vmem:[%s16588_s0 + $0x180] sm:$0xff]  ;;  %v12816_v37 = vld [vmem:[#allocation4 + $0x7f4] ss:$8 sps:$4 sm:$0xff]  }
 0x20a   :  { %4590 = vmatpush1.bf16.msra.mxu0 %v12742_v50  ;;  %v1308_v50 = vrot.slane %v11100_v42, 2  ;;  %v12790_v42 = vld [vmem:[#allocation4 + $0x770] ss:$8 sps:$4 sm:$0xff]   ;;  %v11126_v44 = vld [vmem:[%s16588_s0 + $0x1a0] sm:$0xff] }
 0x20b   :  { %4591 = vmatprep.subr.bf16.mxu0 %v12747_v53  ;;  %v1314_v53 = vrot.slane %v11104_v46, 2  ;;  %v11129_v46 = vld [vmem:[%s16588_s0 + $0x1c8] sm:$0xff]  ;;  %v11144_v24 = vld [vmem:[%s16588_s0 + $0x60] sm:$0xfe] }
 0x20c   :  { %v1310_v57 = vsel %vm582_vm1, %v1308_v50, %v1309_v52  ;;  %v1428_v50 = vpack.c.bf16 %v11131_v47, %v11129_v46  ;;  %v12796_v52 = vld [vmem:[#allocation4 + $0x790] ss:$8 sps:$4 sm:$0xff]   ;;  %v11148_v46 = vld [vmem:[%s16588_s0 + $0x80] sm:$0xfe] }
 0x20d   :  { %4535 = vmatmul.mubr.bf16.gmra.mrb[16].mxu0 %v1360_v0  ;;  %v1316_v58 = vsel %vm582_vm1, %v1314_v53, %v1315_v54  ;;  %v1418_v0 = vpack.c.bf16 %v11111_v61, %v11109_v60  ;;  %v11128_v53 = vld [vmem:[%s16588_s0 + $0x1c0] sm:$0xff]  ;;  %v12804_v61 = vld [vmem:[#allocation4 + $0x7b4] ss:$8 sps:$4 sm:$0xff]   ;;  %v11150_v47 = vld [vmem:[%s16588_s0 + $0x90] sm:$0x1] }
 0x20e   :  { %4592 = vmatpush1.bf16.msra.mxu0 %v12745_v1  ;;  %4544 = vmatprep.mubr.bf16.mxu0 %v1363_v4  ;;  %v1366_v62 = vpack.c.bf16 %v1316_v58, %v1310_v57  ;;  %v12768_v1 = vld [vmem:[#allocation4 + $0x6f4] ss:$8 sps:$4 sm:$0xff]   ;;  %v11110_v4 = vld [vmem:[%s16588_s0 + $0x60] sm:$0xff]  ;;  %v11135_v57 = vld [vmem:[%s16588_s0 + $0x228] sm:$0xff] }
 0x20f   :  { %4593 = vmatprep.subr.bf16.mxu0 %v12750_v2  ;;  %v12766_v2 = vld [vmem:[#allocation4 + $0x6f0] ss:$8 sps:$4 sm:$0xff]   ;;  %v1417_v8 = vpack.c.bf16 %v11110_v4, %v11108_v3  ;;  %v11130_v54 = vld [vmem:[%s16588_s0 + $0x1e0] sm:$0xff]  ;;  %v11139_v3 = vld [vmem:[%s16588_s0 + $0x268] sm:$0xff] }
 0x210   :  { %v1427_v58 = vpack.c.bf16 %v11130_v54, %v11128_v53  ;;  %v11141_v4 = vld [vmem:[%s16588_s0 + $0x48] sm:$0xfe]  ;;  %v11159_v53 = vld [vmem:[%s16588_s0 + $0xd8] sm:$0x1] }
 0x211   :  { %v11161_v54 = vld [vmem:[%s16588_s0 + $0xe8] sm:$0xfe] }
 0x212   :  { %4594 = vmatpush1.bf16.msra.mxu0 %v12748_v12  ;;  %v12772_v12 = vld [vmem:[#allocation4 + $0x710] ss:$8 sps:$4 sm:$0xff]  }
 0x213   :  { %4595 = vmatprep.subr.bf16.mxu0 %v12753_v15  ;;  %v12777_v15 = vld [vmem:[#allocation4 + $0x724] ss:$8 sps:$4 sm:$0xff]  }
 0x215   :  { %4545 = vmatmul.mubr.bf16.gmra.mrb[20].mxu0 %v1362_v26  ;;  %v11121_v26 = vld [vmem:[%s16588_s0 + $0x108] sm:$0xff] }
 0x216   :  { %4596 = vmatpush1.bf16.msra.mxu0 %v12751_v27  ;;  %4554 = vmatprep.mubr.bf16.mxu0 %v1365_v30  ;;  %v11123_v27 = vld [vmem:[%s16588_s0 + $0x128] sm:$0xff] }
 0x217   :  { %4597 = vmatprep.subr.bf16.mxu0 %v12756_v28  ;;  %v12781_v28 = vld [vmem:[#allocation4 + $0x740] ss:$8 sps:$4 sm:$0xff]   ;;  %v1424_v30 = vpack.c.bf16 %v11123_v27, %v11121_v26  ;;  %v11151_v27 = vld [vmem:[%s16588_s0 + $0x98] sm:$0x1] }
 0x218   :  { %v11149_v26 = vld [vmem:[%s16588_s0 + $0x88] sm:$0xfe] }
 0x21a   :  { %4598 = vmatpush1.bf16.msra.mxu0 %v12754_v38  ;;  %v1423_v38 = vpack.c.bf16 %v11122_v34, %v11120_v33 }
 0x21b   :  { %4599 = vmatprep.subr.bf16.mxu0 %v12759_v41  ;;  %v12792_v41 = vld [vmem:[#allocation4 + $0x774] ss:$8 sps:$4 sm:$0xff]  }
 0x21d   :  { %4555 = vmatmul.mubr.bf16.gmra.mrb[24].mxu0 %v1364_v48  ;;  %v1425_v48 = vpack.c.bf16 %v11126_v44, %v11124_v43 }
 0x21e   :  { %4600 = vmatpush1.bf16.msra.mxu0 %v12757_v49  ;;  %4564 = vmatprep.mubr.bf16.mxu0 %v1367_v51  ;;  %v12793_v49 = vld [vmem:[#allocation4 + $0x780] ss:$8 sps:$4 sm:$0xff]   ;;  %v12798_v51 = vld [vmem:[#allocation4 + $0x794] ss:$8 sps:$4 sm:$0xff]  }
 0x21f   :  { %4601 = vmatprep.subr.bf16.mxu0 %v12762_v55  ;;  %v12801_v55 = vld [vmem:[#allocation4 + $0x7a4] ss:$8 sps:$4 sm:$0xff]  }
 0x222   :  { %4602 = vmatpush1.bf16.msra.mxu0 %v12760_v56  ;;  %v11133_v56 = vld [vmem:[%s16588_s0 + $0x208] sm:$0xff] }
 0x223   :  { %4603 = vmatprep.subr.bf16.mxu0 %v12765_v59  ;;  %v12799_v59 = vld [vmem:[#allocation4 + $0x7a0] ss:$8 sps:$4 sm:$0xff]   ;;  %v1430_v60 = vpack.c.bf16 %v11135_v57, %v11133_v56  ;;  %v1589_v57 = vrot.slane %v11148_v46, 1 }
 0x224   :  { %v12829_v46 = vld [vmem:[#allocation4 + $0x840] ss:$8 sps:$4 sm:$0xff]  }
 0x225   :  { %4565 = vmatmul.mubr.bf16.gmra.mrb[28].mxu0 %v1366_v62  ;;  %v12802_v62 = vld [vmem:[#allocation4 + $0x7b0] ss:$8 sps:$4 sm:$0xff]  }
 0x226   :  { %4604 = vmatpush1.bf16.msra.mxu0 %v12763_v63  ;;  %4607 = vmatprep.mubr.bf16.mxu0 %v1418_v0  ;;  %v11132_v63 = vld [vmem:[%s16588_s0 + $0x200] sm:$0xff] }
 0x227   :  { %4605 = vmatprep.subr.bf16.mxu0 %v12768_v1  ;;  %v11134_v0 = vld [vmem:[%s16588_s0 + $0x220] sm:$0xff] }
 0x228   :  { %v12807_v1 = vld [vmem:[#allocation4 + $0x7c4] ss:$8 sps:$4 sm:$0xff]  }
 0x22a   :  { %4606 = vmatpush1.bf16.msra.mxu0 %v12766_v2  ;;  %v11137_v2 = vld [vmem:[%s16588_s0 + $0x248] sm:$0xff] }
 0x22b   :  { %4688 = vmatprep.subr.bf16.mxu0 %v12771_v5  ;;  %v11143_v5 = vld [vmem:[%s16588_s0 + $0x58] sm:$0x1] }
 0x22c   :  { %v1581_v13 = vrot.slane %v11143_v5, 1 }
 0x22d   :  { %4608 = vmatmul.mubr.bf16.vlgmr.msra.gmra.mrb[0].mxu0 %v1417_v8  ;;  %v1429_v8 = vpack.c.bf16 %v11134_v0, %v11132_v63  ;;  %v12822_v63 = vld [vmem:[#allocation4 + $0x814] ss:$8 sps:$4 sm:$0xff]  }
 0x22e   :  { %4689 = vmatpush1.bf16.msra.mxu0 %v12769_v9  ;;  %4617 = vmatprep.mubr.bf16.mxu0 %v1420_v11  ;;  %v12805_v9 = vld [vmem:[#allocation4 + $0x7c0] ss:$8 sps:$4 sm:$0xff]   ;;  %v12810_v11 = vld [vmem:[#allocation4 + $0x7d4] ss:$8 sps:$4 sm:$0xff]  }
 0x22f   :  { %4690 = vmatprep.subr.bf16.mxu0 %v12774_v10  ;;  %v1432_v10 = vpack.c.bf16 %v11139_v3, %v11137_v2  ;;  %v1610_v2 = vrot.slane %v11161_v54, 1 }
 0x232   :  { %4691 = vmatpush1.bf16.msra.mxu0 %v12772_v12  ;;  %v1580_v12 = vrot.slane %v11141_v4, 1  ;;  %v12820_v4 = vld [vmem:[#allocation4 + $0x810] ss:$8 sps:$4 sm:$0xff]  }
 0x233   :  { %4692 = vmatprep.subr.bf16.mxu0 %v12777_v15  ;;  %v1587_v15 = vrot.slane %v11147_v7, 1  ;;  %v12825_v7 = vld [vmem:[#allocation4 + $0x824] ss:$8 sps:$4 sm:$0xff]  }
 0x235   :  { %4618 = vmatmul.mubr.bf16.gmra.mrb[4].mxu0 %v1419_v19  ;;  %v12813_v19 = vld [vmem:[#allocation4 + $0x7e4] ss:$8 sps:$4 sm:$0xff]   ;;  %v1588_v23 = vsel %vm293_vm0, %v1586_v14, %v1587_v15  ;;  %v11167_v15 = vld [vmem:[%s16588_s0 + $0x118] sm:$0x1] }
 0x236   :  { %4693 = vmatpush1.bf16.msra.mxu0 %v12775_v18  ;;  %4627 = vmatprep.mubr.bf16.mxu0 %v1422_v21  ;;  %v11138_v18 = vld [vmem:[%s16588_s0 + $0x260] sm:$0xff]  ;;  %v11142_v21 = vld [vmem:[%s16588_s0 + $0x50] sm:$0x1]  ;;  %v11165_v14 = vld [vmem:[%s16588_s0 + $0x108] sm:$0xfe] }
 0x237   :  { %4694 = vmatprep.subr.bf16.mxu0 %v12780_v20  ;;  %v11140_v20 = vld [vmem:[%s16588_s0 + $0x40] sm:$0xfe]  ;;  %v1578_v34 = vrot.slane %v11142_v21, 1 }
 0x23a   :  { %4695 = vmatpush1.bf16.msra.mxu0 %v12778_v22  ;;  %v1582_v22 = vsel %vm293_vm0, %v1580_v12, %v1581_v13  ;;  %v11160_v12 = vld [vmem:[%s16588_s0 + $0xe0] sm:$0xfe]  ;;  %v11162_v13 = vld [vmem:[%s16588_s0 + $0xf0] sm:$0x1] }
 0x23b   :  { %4696 = vmatprep.subr.bf16.mxu0 %v12783_v25  ;;  %v11146_v25 = vld [vmem:[%s16588_s0 + $0x70] sm:$0x1]  ;;  %v1706_v33 = vpack.c.bf16 %v1588_v23, %v1582_v22  ;;  %v1607_v23 = vrot.slane %v11160_v12, 1 }
 0x23c   :  { %v1584_v36 = vrot.slane %v11146_v25, 1  ;;  %v12828_v25 = vld [vmem:[#allocation4 + $0x834] ss:$8 sps:$4 sm:$0xff]  }
 0x23d   :  { %4628 = vmatmul.mubr.bf16.gmra.mrb[8].mxu0 %v1421_v29  ;;  %v11155_v29 = vld [vmem:[%s16588_s0 + $0xb8] sm:$0x1] }
 0x23e   :  { %4697 = vmatpush1.bf16.msra.mxu0 %v12781_v28  ;;  %4637 = vmatprep.mubr.bf16.mxu0 %v1424_v30  ;;  %v11153_v28 = vld [vmem:[%s16588_s0 + $0xa8] sm:$0xfe]  ;;  %v1431_v30 = vpack.c.bf16 %v11138_v18, %v11136_v17  ;;  %v11171_v17 = vld [vmem:[%s16588_s0 + $0x138] sm:$0x1] }
 0x23f   :  { %4698 = vmatprep.subr.bf16.mxu0 %v12786_v31  ;;  %v1577_v31 = vrot.slane %v11140_v20, 1  ;;  %v12823_v20 = vld [vmem:[#allocation4 + $0x820] ss:$8 sps:$4 sm:$0xff]  }
 0x241   :  { %v1579_v43 = vsel %vm293_vm0, %v1577_v31, %v1578_v34  ;;  %v11164_v34 = vld [vmem:[%s16588_s0 + $0x100] sm:$0xfe] }
 0x242   :  { %4699 = vmatpush1.bf16.msra.mxu0 %v12784_v32  ;;  %v12811_v32 = vld [vmem:[#allocation4 + $0x7e0] ss:$8 sps:$4 sm:$0xff]  }
 0x243   :  { %4700 = vmatprep.subr.bf16.mxu0 %v12789_v35  ;;  %v1583_v35 = vrot.slane %v11144_v24, 1  ;;  %v1608_v24 = vrot.slane %v11162_v13, 1  ;;  %v12840_v13 = vld [vmem:[#allocation4 + $0x874] ss:$8 sps:$4 sm:$0xff]  }
 0x245   :  { %4638 = vmatmul.mubr.bf16.gmra.mrb[12].mxu0 %v1423_v38  ;;  %v1592_v38 = vrot.slane %v11149_v26, 1  ;;  %v1585_v44 = vsel %vm293_vm0, %v1583_v35, %v1584_v36  ;;  %v1616_v26 = vrot.slane %v11165_v14, 1  ;;  %v11166_v35 = vld [vmem:[%s16588_s0 + $0x110] sm:$0x1] }
 0x246   :  { %4701 = vmatpush1.bf16.msra.mxu0 %v12787_v39  ;;  %4647 = vmatprep.mubr.bf16.mxu0 %v1426_v40  ;;  %v1593_v39 = vrot.slane %v11151_v27, 1  ;;  %v1598_v40 = vrot.slane %v11153_v28, 1  ;;  %v1705_v56 = vpack.c.bf16 %v1585_v44, %v1579_v43  ;;  %v1617_v27 = vrot.slane %v11167_v15, 1  ;;  %v11179_v43 = vld [vmem:[%s16588_s0 + $0x1b8] sm:$0x1] }
 0x247   :  { %4702 = vmatprep.subr.bf16.mxu0 %v12792_v41  ;;  %v1599_v41 = vrot.slane %v11155_v29, 1  ;;  %v1623_v29 = vrot.slane %v11171_v17, 1 }
 0x248   :  { %v1618_v36 = vsel %vm293_vm0, %v1616_v26, %v1617_v27  ;;  %v11184_v26 = vld [vmem:[%s16588_s0 + $0x1e0] sm:$0xfe]  ;;  %v11186_v27 = vld [vmem:[%s16588_s0 + $0x1f0] sm:$0x1] }
 0x24a   :  { %4703 = vmatpush1.bf16.msra.mxu0 %v12790_v42  ;;  %v12814_v42 = vld [vmem:[#allocation4 + $0x7f0] ss:$8 sps:$4 sm:$0xff]  }
 0x24b   :  { %4704 = vmatprep.subr.bf16.mxu0 %v12795_v45  ;;  %v12819_v45 = vld [vmem:[#allocation4 + $0x804] ss:$8 sps:$4 sm:$0xff]  }
 0x24d   :  { %4648 = vmatmul.mubr.bf16.gmra.mrb[16].mxu0 %v1425_v48  ;;  %v1594_v48 = vsel %vm293_vm0, %v1592_v38, %v1593_v39  ;;  %v11168_v38 = vld [vmem:[%s16588_s0 + $0x120] sm:$0xfe]  ;;  %v11170_v39 = vld [vmem:[%s16588_s0 + $0x130] sm:$0x1] }
 0x24e   :  { %4705 = vmatpush1.bf16.msra.mxu0 %v12793_v49  ;;  %4657 = vmatprep.mubr.bf16.mxu0 %v1428_v50  ;;  %v1600_v49 = vsel %vm293_vm0, %v1598_v40, %v1599_v41  ;;  %v11152_v50 = vld [vmem:[%s16588_s0 + $0xa0] sm:$0xfe]  ;;  %v11173_v40 = vld [vmem:[%s16588_s0 + $0x188] sm:$0xfe]  ;;  %v11175_v41 = vld [vmem:[%s16588_s0 + $0x198] sm:$0x1] }
 0x24f   :  { %4706 = vmatprep.subr.bf16.mxu0 %v12798_v51  ;;  %v11154_v51 = vld [vmem:[%s16588_s0 + $0xb0] sm:$0x1] }
 0x252   :  { %4707 = vmatpush1.bf16.msra.mxu0 %v12796_v52  ;;  %v11157_v52 = vld [vmem:[%s16588_s0 + $0xc8] sm:$0xfe] }
 0x253   :  { %4708 = vmatprep.subr.bf16.mxu0 %v12801_v55  ;;  %v11163_v55 = vld [vmem:[%s16588_s0 + $0xf8] sm:$0x1]  ;;  %v1604_v0 = vrot.slane %v11157_v52, 1  ;;  %v1628_v52 = vrot.slane %v11173_v40, 1 }
 0x254   :  { %v1611_v3 = vrot.slane %v11163_v55, 1  ;;  %v1635_v55 = vrot.slane %v11179_v43, 1 }
 0x255   :  { %4658 = vmatmul.mubr.bf16.gmra.mrb[20].mxu0 %v1427_v58  ;;  %v12817_v58 = vld [vmem:[#allocation4 + $0x800] ss:$8 sps:$4 sm:$0xff]  }
 0x256   :  { %4709 = vmatpush1.bf16.msra.mxu0 %v12799_v59  ;;  %4667 = vmatprep.mubr.bf16.mxu0 %v1430_v60  ;;  %v1708_v59 = vpack.c.bf16 %v1600_v49, %v1594_v48  ;;  %v1590_v60 = vrot.slane %v11150_v47, 1  ;;  %v1614_v48 = vrot.slane %v11166_v35, 1  ;;  %v1619_v49 = vrot.slane %v11168_v38, 1 }
 0x257   :  { %4710 = vmatprep.subr.bf16.mxu0 %v12804_v61  ;;  %v1595_v61 = vrot.slane %v11152_v50, 1  ;;  %v1620_v50 = vrot.slane %v11170_v39, 1  ;;  %v1644_v38 = vrot.slane %v11186_v27, 1  ;;  %v12846_v39 = vld [vmem:[#allocation4 + $0x894] ss:$8 sps:$4 sm:$0xff]  }
 0x258   :  { %v1591_v5 = vsel %vm293_vm0, %v1589_v57, %v1590_v60  ;;  %v11172_v60 = vld [vmem:[%s16588_s0 + $0x180] sm:$0xfe]  ;;  %v12858_v27 = vld [vmem:[#allocation4 + $0x8d4] ss:$8 sps:$4 sm:$0xff]  }
 0x25a   :  { %4711 = vmatpush1.bf16.msra.mxu0 %v12802_v62  ;;  %v1596_v62 = vrot.slane %v11154_v51, 1  ;;  %v12834_v51 = vld [vmem:[#allocation4 + $0x854] ss:$8 sps:$4 sm:$0xff]  }
 0x25b   :  { %4712 = vmatprep.subr.bf16.mxu0 %v12807_v1  ;;  %v1605_v1 = vrot.slane %v11159_v53, 1  ;;  %v1629_v53 = vrot.slane %v11175_v41, 1 }
 0x25c   :  { %v1597_v6 = vsel %vm293_vm0, %v1595_v61, %v1596_v62  ;;  %v11174_v61 = vld [vmem:[%s16588_s0 + $0x190] sm:$0x1] }
 0x25d   :  { %4668 = vmatmul.mubr.bf16.gmra.mrb[24].mxu0 %v1429_v8  ;;  %v11156_v8 = vld [vmem:[%s16588_s0 + $0xc0] sm:$0xfe]  ;;  %v1707_v18 = vpack.c.bf16 %v1597_v6, %v1591_v5  ;;  %v1630_v62 = vsel %vm293_vm0, %v1628_v52, %v1629_v53  ;;  %v11187_v5 = vld [vmem:[%s16588_s0 + $0x1f8] sm:$0x1]  ;;  %v11194_v53 = vld [vmem:[%s16588_s0 + $0x230] sm:$0x1] }
 0x25e   :  { %4713 = vmatpush1.bf16.msra.mxu0 %v12805_v9  ;;  %4677 = vmatprep.mubr.bf16.mxu0 %v1432_v10  ;;  %v11158_v9 = vld [vmem:[%s16588_s0 + $0xd0] sm:$0x1]  ;;  %v1606_v10 = vsel %vm293_vm0, %v1604_v0, %v1605_v1  ;;  %v11176_v0 = vld [vmem:[%s16588_s0 + $0x1a0] sm:$0xfe]  ;;  %v1647_v17 = vrot.slane %v11187_v5, 1 }
 0x25f   :  { %4714 = vmatprep.subr.bf16.mxu0 %v12810_v11  ;;  %v1612_v11 = vsel %vm293_vm0, %v1610_v2, %v1611_v3  ;;  %v1602_v22 = vrot.slane %v11158_v9, 1  ;;  %v11178_v1 = vld [vmem:[%s16588_s0 + $0x1b0] sm:$0x1]  ;;  %v11181_v2 = vld [vmem:[%s16588_s0 + $0x1c8] sm:$0xfe] }
 0x260   :  { %v1710_v21 = vpack.c.bf16 %v1612_v11, %v1606_v10  ;;  %v11183_v3 = vld [vmem:[%s16588_s0 + $0x1d8] sm:$0x1]  ;;  %v1626_v10 = vrot.slane %v11174_v61, 1  ;;  %v1631_v11 = vrot.slane %v11176_v0, 1  ;;  %v1632_v12 = vrot.slane %v11178_v1, 1 }
 0x261   :  { %v1640_v14 = vrot.slane %v11181_v2, 1  ;;  %v1641_v15 = vrot.slane %v11183_v3, 1  ;;  %v11192_v52 = vld [vmem:[%s16588_s0 + $0x220] sm:$0xfe]  ;;  %v1656_v0 = vrot.slane %v11194_v53, 1 }
 0x262   :  { %4715 = vmatpush1.bf16.msra.mxu0 %v12808_v16  ;;  %v11169_v16 = vld [vmem:[%s16588_s0 + $0x128] sm:$0xfe]  ;;  %v12852_v1 = vld [vmem:[#allocation4 + $0x8b4] ss:$8 sps:$4 sm:$0xff]  }
 0x263   :  { %4716 = vmatprep.subr.bf16.mxu0 %v12813_v19  ;;  %v1601_v19 = vrot.slane %v11156_v8, 1  ;;  %v1622_v28 = vrot.slane %v11169_v16, 1  ;;  %v12835_v8 = vld [vmem:[#allocation4 + $0x860] ss:$8 sps:$4 sm:$0xff]   ;;  %v12864_v53 = vld [vmem:[#allocation4 + $0x8f4] ss:$8 sps:$4 sm:$0xff]  }
 0x265   :  { %4678 = vmatmul.mubr.bf16.gmra.mrb[28].mxu0 %v1431_v30  ;;  %v12826_v30 = vld [vmem:[#allocation4 + $0x830] ss:$8 sps:$4 sm:$0xff]   ;;  %v1603_v31 = vsel %vm293_vm0, %v1601_v19, %v1602_v22  ;;  %v11180_v22 = vld [vmem:[%s16588_s0 + $0x1c0] sm:$0xfe] }
 0x266   :  { %4717 = vmatpush1.bf16.msra.mxu0 %v12811_v32  ;;  %4720 = vmatprep.mubr.bf16.mxu0 %v1706_v33  ;;  %v1609_v32 = vsel %vm293_vm0, %v1607_v23, %v1608_v24  ;;  %v12831_v33 = vld [vmem:[#allocation4 + $0x844] ss:$8 sps:$4 sm:$0xff]   ;;  %v11182_v23 = vld [vmem:[%s16588_s0 + $0x1d0] sm:$0x1]  ;;  %v1642_v24 = vsel %vm293_vm0, %v1640_v14, %v1641_v15 }
 0x267   :  { %4718 = vmatprep.subr.bf16.mxu0 %v12816_v37  ;;  %v1624_v37 = vsel %vm293_vm0, %v1622_v28, %v1623_v29  ;;  %v1709_v44 = vpack.c.bf16 %v1609_v32, %v1603_v31  ;;  %v11189_v28 = vld [vmem:[%s16588_s0 + $0x208] sm:$0xfe]  ;;  %v11191_v29 = vld [vmem:[%s16588_s0 + $0x218] sm:$0x1]  ;;  %v11200_v14 = vld [vmem:[%s16588_s0 + $0x260] sm:$0xfe] }
 0x268   :  { %v1712_v47 = vpack.c.bf16 %v1624_v37, %v1618_v36  ;;  %v11195_v31 = vld [vmem:[%s16588_s0 + $0x238] sm:$0x1]  ;;  %v1638_v36 = vrot.slane %v11182_v23, 1  ;;  %v1643_v37 = vrot.slane %v11184_v26, 1  ;;  %v1652_v40 = vrot.slane %v11189_v28, 1 }
 0x269   :  { %v1653_v41 = vrot.slane %v11191_v29, 1  ;;  %v1659_v43 = vrot.slane %v11195_v31, 1  ;;  %v11202_v15 = vld [vmem:[%s16588_s0 + $0x270] sm:$0x1] }
 0x26a   :  { %4719 = vmatpush1.bf16.msra.mxu0 %v12814_v42  ;;  %v11177_v42 = vld [vmem:[%s16588_s0 + $0x1a8] sm:$0xfe]  ;;  %v1668_v26 = vrot.slane %v11202_v15, 1 }
 0x26b   :  { %4801 = vmatprep.subr.bf16.mxu0 %v12819_v45  ;;  %v1613_v45 = vrot.slane %v11164_v34, 1  ;;  %v1634_v54 = vrot.slane %v11177_v42, 1  ;;  %v12841_v34 = vld [vmem:[#allocation4 + $0x880] ss:$8 sps:$4 sm:$0xff]  }
 0x26d   :  { %4721 = vmatmul.mubr.bf16.vlgmr.msra.gmra.mrb[0].mxu0 %v1705_v56  ;;  %v12832_v56 = vld [vmem:[#allocation4 + $0x850] ss:$8 sps:$4 sm:$0xff]   ;;  %v1615_v57 = vsel %vm293_vm0, %v1613_v45, %v1614_v48  ;;  %v11188_v48 = vld [vmem:[%s16588_s0 + $0x200] sm:$0xfe] }
 0x26e   :  { %4802 = vmatpush1.bf16.msra.mxu0 %v12817_v58  ;;  %4730 = vmatprep.mubr.bf16.mxu0 %v1708_v59  ;;  %v1621_v58 = vsel %vm293_vm0, %v1619_v49, %v1620_v50  ;;  %v12837_v59 = vld [vmem:[#allocation4 + $0x864] ss:$8 sps:$4 sm:$0xff]   ;;  %v11190_v49 = vld [vmem:[%s16588_s0 + $0x210] sm:$0x1]  ;;  %v1654_v50 = vsel %vm293_vm0, %v1652_v40, %v1653_v41 }
 0x26f   :  { %4803 = vmatprep.subr.bf16.mxu0 %v12822_v63  ;;  %v1636_v63 = vsel %vm293_vm0, %v1634_v54, %v1635_v55  ;;  %v1711_v6 = vpack.c.bf16 %v1621_v58, %v1615_v57  ;;  %v11197_v54 = vld [vmem:[%s16588_s0 + $0x248] sm:$0xfe]  ;;  %v11199_v55 = vld [vmem:[%s16588_s0 + $0x258] sm:$0x1]  ;;  %v11208_v40 = vld [vmem:[%s16588_s0 + $0x60] sm:$0xfc] }
 0x270   :  { %v1714_v9 = vpack.c.bf16 %v1636_v63, %v1630_v62  ;;  %v11203_v57 = vld [vmem:[%s16588_s0 + $0x278] sm:$0x1]  ;;  %v1650_v62 = vrot.slane %v11190_v49, 1  ;;  %v1655_v63 = vrot.slane %v11192_v52, 1  ;;  %v1664_v2 = vrot.slane %v11197_v54, 1 }
 0x271   :  { %v1665_v3 = vrot.slane %v11199_v55, 1  ;;  %v1671_v5 = vrot.slane %v11203_v57, 1  ;;  %v11210_v41 = vld [vmem:[%s16588_s0 + $0x70] sm:$0x3] }
 0x272   :  { %4804 = vmatpush1.bf16.msra.mxu0 %v12820_v4  ;;  %v11185_v4 = vld [vmem:[%s16588_s0 + $0x1e8] sm:$0xfe]  ;;  %v1872_v52 = vrot.slane %v11210_v41, 2  ;;  %v11228_v41 = vld [vmem:[%s16588_s0 + $0x100] sm:$0xfc] }
 0x273   :  { %4805 = vmatprep.subr.bf16.mxu0 %v12825_v7  ;;  %v1625_v7 = vrot.slane %v11172_v60, 1  ;;  %v1646_v16 = vrot.slane %v11185_v4, 1  ;;  %v12847_v60 = vld [vmem:[#allocation4 + $0x8a0] ss:$8 sps:$4 sm:$0xff]  }
 0x275   :  { %4731 = vmatmul.mubr.bf16.gmra.mrb[4].mxu0 %v1707_v18  ;;  %v12838_v18 = vld [vmem:[#allocation4 + $0x870] ss:$8 sps:$4 sm:$0xff]   ;;  %v1627_v19 = vsel %vm293_vm0, %v1625_v7, %v1626_v10  ;;  %v11196_v10 = vld [vmem:[%s16588_s0 + $0x240] sm:$0xfe] }
 0x276   :  { %4806 = vmatpush1.bf16.msra.mxu0 %v12823_v20  ;;  %4740 = vmatprep.mubr.bf16.mxu0 %v1710_v21  ;;  %v1633_v20 = vsel %vm293_vm0, %v1631_v11, %v1632_v12  ;;  %v12843_v21 = vld [vmem:[#allocation4 + $0x884] ss:$8 sps:$4 sm:$0xff]   ;;  %v11198_v11 = vld [vmem:[%s16588_s0 + $0x250] sm:$0x1]  ;;  %v1666_v12 = vsel %vm293_vm0, %v1664_v2, %v1665_v3 }
 0x277   :  { %4807 = vmatprep.subr.bf16.mxu0 %v12828_v25  ;;  %v1648_v25 = vsel %vm293_vm0, %v1646_v16, %v1647_v17  ;;  %v1713_v32 = vpack.c.bf16 %v1633_v20, %v1627_v19  ;;  %v11205_v16 = vld [vmem:[%s16588_s0 + $0x48] sm:$0xfc]  ;;  %v11207_v17 = vld [vmem:[%s16588_s0 + $0x58] sm:$0x3]  ;;  %v11218_v2 = vld [vmem:[%s16588_s0 + $0xb0] sm:$0x3] }
 0x278   :  { %v1716_v35 = vpack.c.bf16 %v1648_v25, %v1642_v24  ;;  %v11211_v19 = vld [vmem:[%s16588_s0 + $0x78] sm:$0x3]  ;;  %v1662_v24 = vrot.slane %v11198_v11, 1  ;;  %v1667_v25 = vrot.slane %v11200_v14, 1  ;;  %v1868_v28 = vrot.slane %v11205_v16, 2 }
 0x279   :  { %v1869_v29 = vrot.slane %v11207_v17, 2  ;;  %v1875_v31 = vrot.slane %v11211_v19, 2  ;;  %v11221_v3 = vld [vmem:[%s16588_s0 + $0xc8] sm:$0xfc]  ;;  %v11220_v19 = vld [vmem:[%s16588_s0 + $0xc0] sm:$0xfc] }
 0x27a   :  { %4808 = vmatpush1.bf16.msra.mxu0 %v12826_v30  ;;  %v11193_v30 = vld [vmem:[%s16588_s0 + $0x228] sm:$0xfe] }
 0x27b   :  { %4809 = vmatprep.subr.bf16.mxu0 %v12831_v33  ;;  %v1637_v33 = vrot.slane %v11180_v22, 1  ;;  %v1658_v42 = vrot.slane %v11193_v30, 1  ;;  %v12853_v22 = vld [vmem:[#allocation4 + $0x8c0] ss:$8 sps:$4 sm:$0xff]  }
 0x27d   :  { %4741 = vmatmul.mubr.bf16.gmra.mrb[8].mxu0 %v1709_v44  ;;  %v12844_v44 = vld [vmem:[#allocation4 + $0x890] ss:$8 sps:$4 sm:$0xff]   ;;  %v1639_v45 = vsel %vm293_vm0, %v1637_v33, %v1638_v36  ;;  %v11204_v36 = vld [vmem:[%s16588_s0 + $0x40] sm:$0xfc] }
 0x27e   :  { %4810 = vmatpush1.bf16.msra.mxu0 %v12829_v46  ;;  %4750 = vmatprep.mubr.bf16.mxu0 %v1712_v47  ;;  %v1645_v46 = vsel %vm293_vm0, %v1643_v37, %v1644_v38  ;;  %v12849_v47 = vld [vmem:[#allocation4 + $0x8a4] ss:$8 sps:$4 sm:$0xff]   ;;  %v11206_v37 = vld [vmem:[%s16588_s0 + $0x50] sm:$0x3]  ;;  %v1870_v38 = vsel %vm582_vm1, %v1868_v28, %v1869_v29  ;;  %v11235_v28 = vld [vmem:[%s16588_s0 + $0x138] sm:$0x3] }
 0x27f   :  { %4811 = vmatprep.subr.bf16.mxu0 %v12834_v51  ;;  %v1660_v51 = vsel %vm293_vm0, %v1658_v42, %v1659_v43  ;;  %v1715_v58 = vpack.c.bf16 %v1645_v46, %v1639_v45  ;;  %v11213_v42 = vld [vmem:[%s16588_s0 + $0x88] sm:$0xfc]  ;;  %v11215_v43 = vld [vmem:[%s16588_s0 + $0x98] sm:$0x3] }
 0x280   :  { %v1718_v61 = vpack.c.bf16 %v1660_v51, %v1654_v50  ;;  %v11219_v45 = vld [vmem:[%s16588_s0 + $0xb8] sm:$0x3]  ;;  %v1866_v50 = vrot.slane %v11206_v37, 2  ;;  %v1871_v51 = vrot.slane %v11208_v40, 2  ;;  %v1880_v54 = vrot.slane %v11213_v42, 2 }
 0x281   :  { %v1881_v55 = vrot.slane %v11215_v43, 2  ;;  %v1887_v57 = vrot.slane %v11219_v45, 2  ;;  %v11230_v42 = vld [vmem:[%s16588_s0 + $0x110] sm:$0x3]  ;;  %v11232_v45 = vld [vmem:[%s16588_s0 + $0x120] sm:$0xfc] }
 0x282   :  { %4812 = vmatpush1.bf16.msra.mxu0 %v12832_v56  ;;  %v11201_v56 = vld [vmem:[%s16588_s0 + $0x268] sm:$0xfe] }
 0x283   :  { %4813 = vmatprep.subr.bf16.mxu0 %v12837_v59  ;;  %v1649_v59 = vrot.slane %v11188_v48, 1  ;;  %v1670_v4 = vrot.slane %v11201_v56, 1  ;;  %v12859_v48 = vld [vmem:[#allocation4 + $0x8e0] ss:$8 sps:$4 sm:$0xff]  }
 0x285   :  { %4751 = vmatmul.mubr.bf16.gmra.mrb[12].mxu0 %v1711_v6  ;;  %v12850_v6 = vld [vmem:[#allocation4 + $0x8b0] ss:$8 sps:$4 sm:$0xff]   ;;  %v1651_v7 = vsel %vm293_vm0, %v1649_v59, %v1650_v62 }
 0x286   :  { %4814 = vmatpush1.bf16.msra.mxu0 %v12835_v8  ;;  %4760 = vmatprep.mubr.bf16.mxu0 %v1714_v9  ;;  %v1657_v8 = vsel %vm293_vm0, %v1655_v63, %v1656_v0  ;;  %v12855_v9 = vld [vmem:[#allocation4 + $0x8c4] ss:$8 sps:$4 sm:$0xff]   ;;  %v11214_v62 = vld [vmem:[%s16588_s0 + $0x90] sm:$0x3]  ;;  %v1882_v63 = vsel %vm582_vm1, %v1880_v54, %v1881_v55  ;;  %v1902_v54 = vrot.slane %v11230_v42, 2  ;;  %v1907_v55 = vrot.slane %v11232_v45, 2 }
 0x287   :  { %4815 = vmatprep.subr.bf16.mxu0 %v12840_v13  ;;  %v1672_v13 = vsel %vm293_vm0, %v1670_v4, %v1671_v5  ;;  %v1717_v20 = vpack.c.bf16 %v1657_v8, %v1651_v7  ;;  %v11223_v4 = vld [vmem:[%s16588_s0 + $0xd8] sm:$0x3]  ;;  %v11225_v5 = vld [vmem:[%s16588_s0 + $0xe8] sm:$0xfc] }
 0x288   :  { %v1720_v23 = vpack.c.bf16 %v1672_v13, %v1666_v12  ;;  %v1884_v12 = vrot.slane %v11218_v2, 2  ;;  %v1892_v13 = vrot.slane %v11221_v3, 2  ;;  %v1893_v14 = vrot.slane %v11223_v4, 2  ;;  %v11240_v3 = vld [vmem:[%s16588_s0 + $0x1a0] sm:$0xfc] }
 0x289   :  { %v1898_v15 = vrot.slane %v11225_v5, 2  ;;  %v11242_v4 = vld [vmem:[%s16588_s0 + $0x1b0] sm:$0x3]  ;;  %v11245_v5 = vld [vmem:[%s16588_s0 + $0x1c8] sm:$0xfc] }
 0x28a   :  { %4816 = vmatpush1.bf16.msra.mxu0 %v12838_v18  ;;  %v11209_v18 = vld [vmem:[%s16588_s0 + $0x68] sm:$0xfc] }
 0x28b   :  { %4817 = vmatprep.subr.bf16.mxu0 %v12843_v21  ;;  %v1661_v21 = vrot.slane %v11196_v10, 1  ;;  %v1874_v30 = vrot.slane %v11209_v18, 2  ;;  %v1878_v10 = vrot.slane %v11214_v62, 2 }
 0x28d   :  { %4761 = vmatmul.mubr.bf16.gmra.mrb[16].mxu0 %v1713_v32  ;;  %v12856_v32 = vld [vmem:[#allocation4 + $0x8d0] ss:$8 sps:$4 sm:$0xff]   ;;  %v1663_v33 = vsel %vm293_vm0, %v1661_v21, %v1662_v24  ;;  %v1894_v21 = vsel %vm582_vm1, %v1892_v13, %v1893_v14  ;;  %v1919_v13 = vrot.slane %v11240_v3, 2  ;;  %v1920_v14 = vrot.slane %v11242_v4, 2 }
 0x28e   :  { %4818 = vmatpush1.bf16.msra.mxu0 %v12841_v34  ;;  %4770 = vmatprep.mubr.bf16.mxu0 %v1716_v35  ;;  %v1669_v34 = vsel %vm293_vm0, %v1667_v25, %v1668_v26  ;;  %v12861_v35 = vld [vmem:[#allocation4 + $0x8e4] ss:$8 sps:$4 sm:$0xff]   ;;  %v11226_v24 = vld [vmem:[%s16588_s0 + $0xf0] sm:$0x3]  ;;  %v11231_v26 = vld [vmem:[%s16588_s0 + $0x118] sm:$0x3] }
 0x28f   :  { %4819 = vmatprep.subr.bf16.mxu0 %v12846_v39  ;;  %v1876_v39 = vsel %vm582_vm1, %v1874_v30, %v1875_v31  ;;  %v1719_v46 = vpack.c.bf16 %v1669_v34, %v1663_v33  ;;  %v11229_v25 = vld [vmem:[%s16588_s0 + $0x108] sm:$0xfc]  ;;  %v1889_v30 = vrot.slane %v11220_v19, 2  ;;  %v1896_v34 = vrot.slane %v11226_v24, 2  ;;  %v11262_v4 = vld [vmem:[%s16588_s0 + $0x250] sm:$0x3] }
 0x290   :  { %v1994_v49 = vpack.c.bf16 %v1876_v39, %v1870_v38  ;;  %v1911_v38 = vrot.slane %v11235_v28, 2  ;;  %v11255_v28 = vld [vmem:[%s16588_s0 + $0x218] sm:$0x3] }
 0x292   :  { %4820 = vmatpush1.bf16.msra.mxu0 %v12844_v44  ;;  %v11217_v44 = vld [vmem:[%s16588_s0 + $0xa8] sm:$0xfc] }
 0x293   :  { %4821 = vmatprep.subr.bf16.mxu0 %v12849_v47  ;;  %v1865_v47 = vrot.slane %v11204_v36, 2  ;;  %v1886_v56 = vrot.slane %v11217_v44, 2  ;;  %v1905_v36 = vrot.slane %v11231_v26, 2  ;;  %v11250_v26 = vld [vmem:[%s16588_s0 + $0x1f0] sm:$0x3] }
 0x295   :  { %4771 = vmatmul.mubr.bf16.gmra.mrb[20].mxu0 %v1715_v58  ;;  %v12862_v58 = vld [vmem:[#allocation4 + $0x8f0] ss:$8 sps:$4 sm:$0xff]   ;;  %v1867_v59 = vsel %vm582_vm1, %v1865_v47, %v1866_v50  ;;  %v1888_v0 = vsel %vm582_vm1, %v1886_v56, %v1887_v57  ;;  %v11237_v47 = vld [vmem:[%s16588_s0 + $0x188] sm:$0xfc] }
 0x296   :  { %4822 = vmatpush1.bf16.msra.mxu0 %v12847_v60  ;;  %4780 = vmatprep.mubr.bf16.mxu0 %v1718_v61  ;;  %v1873_v60 = vsel %vm582_vm1, %v1871_v51, %v1872_v52  ;;  %v11212_v61 = vld [vmem:[%s16588_s0 + $0x80] sm:$0xfc]  ;;  %v11243_v50 = vld [vmem:[%s16588_s0 + $0x1b8] sm:$0x3]  ;;  %v1901_v52 = vrot.slane %v11228_v41, 2  ;;  %v1916_v57 = vrot.slane %v11237_v47, 2 }
 0x297   :  { %4823 = vmatprep.subr.bf16.mxu0 %v12852_v1  ;;  %v11216_v1 = vld [vmem:[%s16588_s0 + $0xa0] sm:$0xfc]  ;;  %v1993_v7 = vpack.c.bf16 %v1873_v60, %v1867_v59  ;;  %v1877_v8 = vrot.slane %v11212_v61, 2  ;;  %v1923_v60 = vrot.slane %v11243_v50, 2  ;;  %v11263_v50 = vld [vmem:[%s16588_s0 + $0x258] sm:$0x3] }
 0x298   :  { %v1883_v11 = vrot.slane %v11216_v1, 2  ;;  %v1903_v61 = vsel %vm582_vm1, %v1901_v52, %v1902_v54  ;;  %v11256_v47 = vld [vmem:[%s16588_s0 + $0x220] sm:$0xfc]  ;;  %v11267_v52 = vld [vmem:[%s16588_s0 + $0x278] sm:$0x3] }
 0x299   :  { %v1879_v17 = vsel %vm582_vm1, %v1877_v8, %v1878_v10  ;;  %v11251_v8 = vld [vmem:[%s16588_s0 + $0x1f8] sm:$0x3] }
 0x29a   :  { %4824 = vmatpush1.bf16.msra.mxu0 %v12850_v6  ;;  %v11227_v6 = vld [vmem:[%s16588_s0 + $0xf8] sm:$0x3]  ;;  %v1885_v18 = vsel %vm582_vm1, %v1883_v11, %v1884_v12 }
 0x29b   :  { %4825 = vmatprep.subr.bf16.mxu0 %v12855_v9  ;;  %v1996_v9 = vpack.c.bf16 %v1888_v0, %v1882_v63  ;;  %v1899_v16 = vrot.slane %v11227_v6, 2  ;;  %v1995_v29 = vpack.c.bf16 %v1885_v18, %v1879_v17  ;;  %v11236_v63 = vld [vmem:[%s16588_s0 + $0x180] sm:$0xfc]  ;;  %v11238_v0 = vld [vmem:[%s16588_s0 + $0x190] sm:$0x3]  ;;  %v1935_v18 = vrot.slane %v11251_v8, 2 }
 0x29c   :  { %v11247_v6 = vld [vmem:[%s16588_s0 + $0x1d8] sm:$0x3]  ;;  %v1913_v10 = vrot.slane %v11236_v63, 2  ;;  %v1914_v12 = vrot.slane %v11238_v0, 2 }
 0x29d   :  { %4781 = vmatmul.mubr.bf16.gmra.mrb[24].mxu0 %v1717_v20  ;;  %v11222_v20 = vld [vmem:[%s16588_s0 + $0xd0] sm:$0x3] }
 0x29e   :  { %4826 = vmatpush1.bf16.msra.mxu0 %v12853_v22  ;;  %4790 = vmatprep.mubr.bf16.mxu0 %v1720_v23  ;;  %v1900_v22 = vsel %vm582_vm1, %v1898_v15, %v1899_v16  ;;  %v11224_v23 = vld [vmem:[%s16588_s0 + $0xe0] sm:$0xfc]  ;;  %v1928_v15 = vrot.slane %v11245_v5, 2  ;;  %v1929_v16 = vrot.slane %v11247_v6, 2  ;;  %v1915_v19 = vsel %vm582_vm1, %v1913_v10, %v1914_v12  ;;  %v11266_v6 = vld [vmem:[%s16588_s0 + $0x270] sm:$0x3] }
 0x29f   :  { %4827 = vmatprep.subr.bf16.mxu0 %v12858_v27  ;;  %v11233_v27 = vld [vmem:[%s16588_s0 + $0x128] sm:$0xfc]  ;;  %v1998_v31 = vpack.c.bf16 %v1900_v22, %v1894_v21  ;;  %v1895_v33 = vrot.slane %v11224_v23, 2  ;;  %v11244_v21 = vld [vmem:[%s16588_s0 + $0x1c0] sm:$0xfc]  ;;  %v1950_v10 = vrot.slane %v11262_v4, 2 }
 0x2a0   :  { %v1910_v37 = vrot.slane %v11233_v27, 2  ;;  %v11246_v22 = vld [vmem:[%s16588_s0 + $0x1d0] sm:$0x3]  ;;  %v1930_v23 = vsel %vm582_vm1, %v1928_v15, %v1929_v16  ;;  %v11253_v27 = vld [vmem:[%s16588_s0 + $0x208] sm:$0xfc]  ;;  %v1956_v12 = vrot.slane %v11266_v6, 2 }
 0x2a1   :  { %v1897_v40 = vsel %vm582_vm1, %v1895_v33, %v1896_v34  ;;  %v1926_v34 = vrot.slane %v11246_v22, 2  ;;  %v11264_v5 = vld [vmem:[%s16588_s0 + $0x260] sm:$0xfc]  ;;  %v12865_v16 = vld [vmem:[#allocation10 + $0x4] ss:$8 sps:$4 sm:$0xff]  }
 0x2a2   :  { %4828 = vmatpush1.bf16.msra.mxu0 %v12856_v32  ;;  %v1890_v32 = vrot.slane %v11222_v20, 2  ;;  %v1912_v44 = vsel %vm582_vm1, %v1910_v37, %v1911_v38  ;;  %v1921_v20 = vsel %vm582_vm1, %v1919_v13, %v1920_v14  ;;  %v1940_v37 = vrot.slane %v11253_v27, 2  ;;  %9272 = vmatprep.subr.bf16.mxu1 %v12865_v16  ;;  %v12874_v22 = vld [vmem:[#allocation10 + $0x34] ss:$8 sps:$4 sm:$0xff]   ;;  %v12882_v27 = vld [vmem:[#allocation10 + $0x50] ss:$8 sps:$4 sm:$0xff]  }
 0x2a3   :  { %4829 = vmatprep.subr.bf16.mxu0 %v12861_v35  ;;  %v1904_v35 = vrot.slane %v11229_v25, 2  ;;  %v11248_v25 = vld [vmem:[%s16588_s0 + $0x1e0] sm:$0xfc]  ;;  %v1941_v38 = vrot.slane %v11255_v28, 2  ;;  %v12883_v28 = vld [vmem:[#allocation10 + $0x64] ss:$8 sps:$4 sm:$0xff]  }
 0x2a4   :  { %v1891_v39 = vsel %vm582_vm1, %v1889_v30, %v1890_v32  ;;  %v11259_v30 = vld [vmem:[%s16588_s0 + $0x238] sm:$0x3]  ;;  %v1925_v32 = vrot.slane %v11244_v21, 2  ;;  %v12873_v21 = vld [vmem:[#allocation10 + $0x20] ss:$8 sps:$4 sm:$0xff]  }
 0x2a5   :  { %4791 = vmatmul.mubr.bf16.gmra.mrb[28].mxu0 %v1719_v46  ;;  %v1906_v43 = vsel %vm582_vm1, %v1904_v35, %v1905_v36  ;;  %v11234_v46 = vld [vmem:[%s16588_s0 + $0x130] sm:$0x3]  ;;  %v1997_v51 = vpack.c.bf16 %v1897_v40, %v1891_v39  ;;  %v1931_v35 = vrot.slane %v11248_v25, 2  ;;  %v1932_v36 = vrot.slane %v11250_v26, 2  ;;  %v12879_v25 = vld [vmem:[#allocation10 + $0x40] ss:$8 sps:$4 sm:$0xff]  }
 0x2a6   :  { %4830 = vmatpush1.bf16.msra.mxu0 %v12859_v48  ;;  %4833 = vmatprep.mubr.bf16.mxu0 %v1994_v49  ;;  %v11239_v48 = vld [vmem:[%s16588_s0 + $0x198] sm:$0x3]  ;;  %v11241_v49 = vld [vmem:[%s16588_s0 + $0x1a8] sm:$0xfc]  ;;  %v1908_v56 = vrot.slane %v11234_v46, 2  ;;  %v1947_v40 = vrot.slane %v11259_v30, 2  ;;  %v1927_v41 = vsel %vm582_vm1, %v1925_v32, %v1926_v34  ;;  %v1942_v45 = vsel %vm582_vm1, %v1940_v37, %v1941_v38 }
 0x2a7   :  { %4831 = vmatprep.subr.bf16.mxu0 %v12864_v53  ;;  %v2000_v53 = vpack.c.bf16 %v1912_v44, %v1906_v43  ;;  %v1922_v59 = vrot.slane %v11241_v49, 2  ;;  %v1933_v42 = vsel %vm582_vm1, %v1931_v35, %v1932_v36  ;;  %v11252_v43 = vld [vmem:[%s16588_s0 + $0x200] sm:$0xfc]  ;;  %v11254_v44 = vld [vmem:[%s16588_s0 + $0x210] sm:$0x3] }
 0x2a8   :  { %v1909_v62 = vsel %vm582_vm1, %v1907_v55, %v1908_v56  ;;  %v11261_v49 = vld [vmem:[%s16588_s0 + $0x248] sm:$0xfc]  ;;  %v1937_v54 = vrot.slane %v11252_v43, 2  ;;  %v1938_v56 = vrot.slane %v11254_v44, 2  ;;  %v12880_v26 = vld [vmem:[#allocation10 + $0x54] ss:$8 sps:$4 sm:$0xff]  }
 0x2a9   :  { %v1924_v2 = vsel %vm582_vm1, %v1922_v59, %v1923_v60  ;;  %v1952_v59 = vrot.slane %v11261_v49, 2  ;;  %v1953_v60 = vrot.slane %v11263_v50, 2  ;;  %v12886_v30 = vld [vmem:[#allocation10 + $0x74] ss:$8 sps:$4 sm:$0xff]   ;;  %v12889_v32 = vld [vmem:[#allocation10 + $0x84] ss:$8 sps:$4 sm:$0xff]  }
 0x2aa   :  { %4832 = vmatpush1.bf16.msra.mxu0 %v12862_v58  ;;  %v1917_v58 = vrot.slane %v11239_v48, 2  ;;  %v11258_v48 = vld [vmem:[%s16588_s0 + $0x230] sm:$0x3]  ;;  %v1939_v63 = vsel %vm582_vm1, %v1937_v54, %v1938_v56  ;;  %v12892_v34 = vld [vmem:[#allocation10 + $0x94] ss:$8 sps:$4 sm:$0xff]  }
 0x2ab   :  { %v12894_v35 = vld [vmem:[#allocation10 + $0x90] ss:$8 sps:$4 sm:$0xff]   ;;  %v12895_v36 = vld [vmem:[#allocation10 + $0xa4] ss:$8 sps:$4 sm:$0xff]   ;;  %v12897_v37 = vld [vmem:[#allocation10 + $0xa0] ss:$8 sps:$4 sm:$0xff]  }
 0x2ac   :  { %v1918_v1 = vsel %vm582_vm1, %v1916_v57, %v1917_v58  ;;  %v1943_v57 = vrot.slane %v11256_v47, 2  ;;  %v1944_v58 = vrot.slane %v11258_v48, 2  ;;  %v12898_v38 = vld [vmem:[#allocation10 + $0xb4] ss:$8 sps:$4 sm:$0xff]   ;;  %v12909_v47 = vld [vmem:[#allocation10 + $0xe0] ss:$8 sps:$4 sm:$0xff]  }
 0x2ad   :  { %4834 = vmatmul.mubr.bf16.vlgmr.msra.gmra.mrb[0].mxu0 %v1993_v7  ;;  %v11249_v7 = vld [vmem:[%s16588_s0 + $0x1e8] sm:$0xfc]  ;;  %v2002_v11 = vpack.c.bf16 %v1924_v2, %v1918_v1  ;;  %v11260_v1 = vld [vmem:[%s16588_s0 + $0x240] sm:$0xfc]  ;;  %v1954_v2 = vsel %vm582_vm1, %v1952_v59, %v1953_v60  ;;  %v13478_v48 = vmov 0.0  }
 0x2ae   :  { %4843 = vmatprep.mubr.bf16.mxu0 %v1996_v9  ;;  %v1999_v9 = vpack.c.bf16 %v1909_v62, %v1903_v61  ;;  %v1934_v17 = vrot.slane %v11249_v7, 2  ;;  %v1959_v62 = vrot.slane %v11267_v52, 2  ;;  %v1945_v0 = vsel %vm582_vm1, %v1943_v57, %v1944_v58  ;;  %v12904_v44 = vld [vmem:[#allocation10 + $0xd4] ss:$8 sps:$4 sm:$0xff]   ;;  %5203 = vst [vmem:[#allocation3 + $0x8] sm:$0xff] %v13478_v48  ;;  %5202 = vst [vmem:[#allocation3] sm:$0xff] %v13478_v48 }
 0x2af   :  { %v2005_v7 = vpack.c.bf16 %v1945_v0, %v1939_v63  ;;  %v1949_v8 = vrot.slane %v11260_v1, 2  ;;  %5204 = vst [vmem:[#allocation3 + $0x10] sm:$0x3] %v13478_v48  ;;  %5205 = vst [vmem:[#allocation3 + $0x18] sm:$0x3] %v13478_v48 }
 0x2b0   :  { %v1936_v24 = vsel %vm582_vm1, %v1934_v17, %v1935_v18  ;;  %v12867_v17 = vld [vmem:[#allocation10] ss:$8 sps:$4 sm:$0xff]   ;;  %v12868_v18 = vld [vmem:[#allocation10 + $0x14] ss:$8 sps:$4 sm:$0xff]   ;;  %5206 = vst [vmem:[#allocation3 + $0x140] sm:$0xff] %v13478_v48  ;;  %5207 = vst [vmem:[#allocation3 + $0x148] sm:$0xff] %v13478_v48 }
 0x2b1   :  { %v2004_v33 = vpack.c.bf16 %v1936_v24, %v1930_v23  ;;  %v1951_v13 = vsel %vm582_vm1, %v1949_v8, %v1950_v10  ;;  %9273 = vmatpush1.bf16.msra.mxu1 %v12867_v17  ;;  %v12876_v23 = vld [vmem:[#allocation10 + $0x30] ss:$8 sps:$4 sm:$0xff]   ;;  %v12877_v24 = vld [vmem:[#allocation10 + $0x44] ss:$8 sps:$4 sm:$0xff]   ;;  %5208 = vst [vmem:[#allocation3 + $0x150] sm:$0x3] %v13478_v48 }
 0x2b2   :  { %9274 = vmatprep.subr.bf16.mxu1 %v12868_v18  ;;  %5209 = vst [vmem:[#allocation3 + $0x158] sm:$0x3] %v13478_v48  ;;  %5211 = vst [vmem:[#allocation3 + $0x120] sm:$0xff] %v13478_v48  ;;  %v12910_v49 = vld [vmem:[#allocation10 + $0xf4] ss:$8 sps:$4 sm:$0xff]  }
 0x2b3   :  { %5212 = vst [vmem:[#allocation3 + $0x128] sm:$0xff] %v13478_v48  ;;  %5213 = vst [vmem:[#allocation3 + $0x130] sm:$0x3] %v13478_v48  ;;  %v12912_v50 = vld [vmem:[#allocation10 + $0xf0] ss:$8 sps:$4 sm:$0xff]  }
 0x2b4   :  { %5214 = vst [vmem:[#allocation3 + $0x138] sm:$0x3] %v13478_v48  ;;  %5215 = vst [vmem:[#allocation3 + $0x260] sm:$0xff] %v13478_v48  ;;  %v12915_v58 = vld [vmem:[#allocation10 + $0x104] ss:$8 sps:$4 sm:$0xff]  }
 0x2b5   :  { %4844 = vmatmul.mubr.bf16.gmra.mrb[4].mxu0 %v1995_v29  ;;  %v11257_v29 = vld [vmem:[%s16588_s0 + $0x228] sm:$0xfc]  ;;  %5216 = vst [vmem:[#allocation3 + $0x268] sm:$0xff] %v13478_v48  ;;  %5217 = vst [vmem:[#allocation3 + $0x270] sm:$0x3] %v13478_v48 }
 0x2b6   :  { %4853 = vmatprep.mubr.bf16.mxu0 %v1998_v31  ;;  %v2001_v31 = vpack.c.bf16 %v1921_v20, %v1915_v19  ;;  %v1946_v39 = vrot.slane %v11257_v29, 2  ;;  %v12870_v19 = vld [vmem:[#allocation10 + $0x10] ss:$8 sps:$4 sm:$0xff]   ;;  %v12871_v20 = vld [vmem:[#allocation10 + $0x24] ss:$8 sps:$4 sm:$0xff]  }
 0x2b7   :  { %9275 = vmatpush1.bf16.msra.mxu1 %v12870_v19  ;;  %v12885_v29 = vld [vmem:[#allocation10 + $0x60] ss:$8 sps:$4 sm:$0xff]   ;;  %5218 = vst [vmem:[#allocation3 + $0x278] sm:$0x3] %v13478_v48 }
 0x2b8   :  { %v1948_v46 = vsel %vm582_vm1, %v1946_v39, %v1947_v40  ;;  %9276 = vmatprep.subr.bf16.mxu1 %v12871_v20  ;;  %v12900_v39 = vld [vmem:[#allocation10 + $0xb0] ss:$8 sps:$4 sm:$0xff]   ;;  %v12901_v40 = vld [vmem:[#allocation10 + $0xc4] ss:$8 sps:$4 sm:$0xff]  }
 0x2b9   :  { %v2006_v55 = vpack.c.bf16 %v1948_v46, %v1942_v45  ;;  %v12906_v45 = vld [vmem:[#allocation10 + $0xd0] ss:$8 sps:$4 sm:$0xff]   ;;  %v12907_v46 = vld [vmem:[#allocation10 + $0xe4] ss:$8 sps:$4 sm:$0xff]  }
 0x2bb   :  { %9277 = vmatpush1.bf16.msra.mxu1 %v12873_v21 }
 0x2bc   :  { %9278 = vmatprep.subr.bf16.mxu1 %v12874_v22 }
 0x2bd   :  { %4854 = vmatmul.mubr.bf16.gmra.mrb[8].mxu0 %v1997_v51  ;;  %v11265_v51 = vld [vmem:[%s16588_s0 + $0x268] sm:$0xfc] }
 0x2be   :  { %4863 = vmatprep.mubr.bf16.mxu0 %v2000_v53  ;;  %v2003_v53 = vpack.c.bf16 %v1933_v42, %v1927_v41  ;;  %v1958_v61 = vrot.slane %v11265_v51, 2  ;;  %v12903_v41 = vld [vmem:[#allocation10 + $0xc0] ss:$8 sps:$4 sm:$0xff]   ;;  %v5049_v42 = vlaneseq }
 0x2bf   :  { %9279 = vmatpush1.bf16.msra.mxu1 %v12876_v23 }
 0x2c0   :  { %v1960_v3 = vsel %vm582_vm1, %v1958_v61, %v1959_v62  ;;  %9280 = vmatprep.subr.bf16.mxu1 %v12877_v24  ;;  %vm15228_vm2 = vcmp.lt.s32.totalorder %v5049_v42, 256 }
 0x2c1   :  { %5224 = vst.msk [vmem:[#allocation3 + $0x20] ss:$8 sm:$0x3] %vm15228_vm2, %v13478_v48  ;;  %5227 = vst.msk [vmem:[#allocation3 + $0x40] ss:$8 sm:$0x3] %vm15228_vm2, %v13478_v48 }
 0x2c2   :  { %5230 = vst.msk [vmem:[#allocation3 + $0x60] ss:$8 sm:$0x3] %vm15228_vm2, %v13478_v48  ;;  %5233 = vst.msk [vmem:[#allocation3 + $0x80] ss:$8 sm:$0x3] %vm15228_vm2, %v13478_v48 }
 0x2c3   :  { %9281 = vmatpush1.bf16.msra.mxu1 %v12879_v25  ;;  %5236 = vst.msk [vmem:[#allocation3 + $0xa0] ss:$8 sm:$0x3] %vm15228_vm2, %v13478_v48  ;;  %5239 = vst.msk [vmem:[#allocation3 + $0xc0] ss:$8 sm:$0x3] %vm15228_vm2, %v13478_v48 }
 0x2c4   :  { %9282 = vmatprep.subr.bf16.mxu1 %v12880_v26  ;;  %5242 = vst.msk [vmem:[#allocation3 + $0xe0] ss:$8 sm:$0x3] %vm15228_vm2, %v13478_v48  ;;  %5245 = vst.msk [vmem:[#allocation3 + $0x100] ss:$8 sm:$0x3] %vm15228_vm2, %v13478_v48 }
 0x2c5   :  { %4864 = vmatmul.mubr.bf16.gmra.mrb[12].mxu0 %v1999_v9  ;;  %v2008_v9 = vpack.c.bf16 %v1960_v3, %v1954_v2  ;;  %5248 = vst.msk [vmem:[#allocation3 + $0x160] ss:$8 sm:$0x3] %vm15228_vm2, %v13478_v48  ;;  %5251 = vst.msk [vmem:[#allocation3 + $0x180] ss:$8 sm:$0x3] %vm15228_vm2, %v13478_v48 }
 0x2c6   :  { %4873 = vmatprep.mubr.bf16.mxu0 %v2002_v11  ;;  %v1955_v11 = vrot.slane %v11264_v5, 2  ;;  %5254 = vst.msk [vmem:[#allocation3 + $0x1a0] ss:$8 sm:$0x3] %vm15228_vm2, %v13478_v48 }
 0x2c7   :  { %9283 = vmatpush1.bf16.msra.mxu1 %v12882_v27  ;;  %5257 = vst.msk [vmem:[#allocation3 + $0x1c0] ss:$8 sm:$0x3] %vm15228_vm2, %v13478_v48  ;;  %5260 = vst.msk [vmem:[#allocation3 + $0x1e0] ss:$8 sm:$0x3] %vm15228_vm2, %v13478_v48 }
 0x2c8   :  { %v1957_v14 = vsel %vm582_vm1, %v1955_v11, %v1956_v12  ;;  %9284 = vmatprep.subr.bf16.mxu1 %v12883_v28  ;;  %5263 = vst.msk [vmem:[#allocation3 + $0x200] ss:$8 sm:$0x3] %vm15228_vm2, %v13478_v48  ;;  %5266 = vst.msk [vmem:[#allocation3 + $0x220] ss:$8 sm:$0x3] %vm15228_vm2, %v13478_v48 }
 0x2c9   :  { %v2007_v15 = vpack.c.bf16 %v1957_v14, %v1951_v13  ;;  %5269 = vst.msk [vmem:[#allocation3 + $0x240] ss:$8 sm:$0x3] %vm15228_vm2, %v13478_v48  ;;  %5272 = vst.msk [vmem:[#allocation3 + $0x31] ss:$8 sm:$0x3] %vm15228_vm2, %v13478_v48 }
 0x2ca   :  { %5275 = vst.msk [vmem:[#allocation3 + $0x51] ss:$8 sm:$0x3] %vm15228_vm2, %v13478_v48  ;;  %5278 = vst.msk [vmem:[#allocation3 + $0x71] ss:$8 sm:$0x3] %vm15228_vm2, %v13478_v48 }
 0x2cb   :  { %9285 = vmatpush1.bf16.msra.mxu1 %v12885_v29  ;;  %5281 = vst.msk [vmem:[#allocation3 + $0x91] ss:$8 sm:$0x3] %vm15228_vm2, %v13478_v48  ;;  %5284 = vst.msk [vmem:[#allocation3 + $0xb1] ss:$8 sm:$0x3] %vm15228_vm2, %v13478_v48 }
 0x2cc   :  { %9286 = vmatprep.subr.bf16.mxu1 %v12886_v30  ;;  %5287 = vst.msk [vmem:[#allocation3 + $0xd1] ss:$8 sm:$0x3] %vm15228_vm2, %v13478_v48  ;;  %5290 = vst.msk [vmem:[#allocation3 + $0xf1] ss:$8 sm:$0x3] %vm15228_vm2, %v13478_v48 }
 0x2cd   :  { %4874 = vmatmul.mubr.bf16.gmra.mrb[16].mxu0 %v2001_v31  ;;  %v12888_v31 = vld [vmem:[#allocation10 + $0x70] ss:$8 sps:$4 sm:$0xff]   ;;  %5293 = vst.msk [vmem:[#allocation3 + $0x111] ss:$8 sm:$0x3] %vm15228_vm2, %v13478_v48 }
 0x2ce   :  { %4883 = vmatprep.mubr.bf16.mxu0 %v2004_v33  ;;  %v12891_v33 = vld [vmem:[#allocation10 + $0x80] ss:$8 sps:$4 sm:$0xff]   ;;  %5296 = vst.msk [vmem:[#allocation3 + $0x171] ss:$8 sm:$0x3] %vm15228_vm2, %v13478_v48 }
 0x2cf   :  { %9287 = vmatpush1.bf16.msra.mxu1 %v12888_v31  ;;  %5299 = vst.msk [vmem:[#allocation3 + $0x191] ss:$8 sm:$0x3] %vm15228_vm2, %v13478_v48  ;;  %5302 = vst.msk [vmem:[#allocation3 + $0x1b1] ss:$8 sm:$0x3] %vm15228_vm2, %v13478_v48 }
 0x2d0   :  { %9288 = vmatprep.subr.bf16.mxu1 %v12889_v32  ;;  %5305 = vst.msk [vmem:[#allocation3 + $0x1d1] ss:$8 sm:$0x3] %vm15228_vm2, %v13478_v48  ;;  %5308 = vst.msk [vmem:[#allocation3 + $0x1f1] ss:$8 sm:$0x3] %vm15228_vm2, %v13478_v48 }
 0x2d1   :  { %5311 = vst.msk [vmem:[#allocation3 + $0x211] ss:$8 sm:$0x3] %vm15228_vm2, %v13478_v48  ;;  %5314 = vst.msk [vmem:[#allocation3 + $0x231] ss:$8 sm:$0x3] %vm15228_vm2, %v13478_v48 }
 0x2d2   :  { %5317 = vst.msk [vmem:[#allocation3 + $0x251] ss:$8 sm:$0x3] %vm15228_vm2, %v13478_v48 }
 0x2d3   :  { %9289 = vmatpush1.bf16.msra.mxu1 %v12891_v33 }
 0x2d4   :  { %9290 = vmatprep.subr.bf16.mxu1 %v12892_v34 }
 0x2d5   :  { %4884 = vmatmul.mubr.bf16.gmra.mrb[20].mxu0 %v2003_v53 }
 0x2d6   :  { %4893 = vmatprep.mubr.bf16.mxu0 %v2006_v55 }
 0x2d7   :  { %9291 = vmatpush1.bf16.msra.mxu1 %v12894_v35 }
 0x2d8   :  { %9292 = vmatprep.subr.bf16.mxu1 %v12895_v36 }
 0x2db   :  { %9293 = vmatpush1.bf16.msra.mxu1 %v12897_v37 }
 0x2dc   :  { %9294 = vmatprep.subr.bf16.mxu1 %v12898_v38 }
 0x2dd   :  { %4894 = vmatmul.mubr.bf16.gmra.mrb[24].mxu0 %v2005_v7 }
 0x2de   :  { %4903 = vmatprep.mubr.bf16.mxu0 %v2008_v9 }
 0x2df   :  { %9295 = vmatpush1.bf16.msra.mxu1 %v12900_v39 }
 0x2e0   :  { %9296 = vmatprep.subr.bf16.mxu1 %v12901_v40 }
 0x2e3   :  { %9297 = vmatpush1.bf16.msra.mxu1 %v12903_v41 }
 0x2e4   :  { %9298 = vmatprep.subr.bf16.mxu1 %v12904_v44 }
 0x2e5   :  { %4904 = vmatmul.mubr.bf16.gmra.mrb[28].mxu0 %v2007_v15 }
 0x2e7   :  { %9299 = vmatpush1.bf16.msra.mxu1 %v12906_v45 }
 0x2e8   :  { %9300 = vmatprep.subr.bf16.mxu1 %v12907_v46 }
 0x2eb   :  { %9301 = vmatpush1.bf16.msra.mxu1 %v12909_v47 }
 0x2ec   :  { %9302 = vmatprep.subr.bf16.mxu1 %v12910_v49 }
 0x2ef   :  { %9303 = vmatpush1.bf16.msra.mxu1 %v12912_v50 }
 0x2f0   :  { %9385 = vmatprep.subr.bf16.mxu1 %v12915_v58 }
 0x380   :  { %v15344_v51 = vpop.f32.mrb[0].mxu0 }
 0x381   :  { %v15346_v52 = vpop.f32.mrb[1].mxu0  ;;  %v4958_v54 = vmul.f32 %v15344_v51, %v15344_v51 }
 0x382   :  { %v15348_v53 = vpop.f32.mrb[2].mxu0  ;;  %v4959_v59 = vmul.f32 %v15346_v52, %v15346_v52 }
 0x383   :  { %v4914_v55 = vadd.f32 %v15348_v53, %v15344_v51  ;;  %v4960_v56 = vmul.f32 %v15348_v53, %v15348_v53  ;;  %v15356_v57 = vpop.f32.mrb[3].mxu0 }
 0x384   :  { %v4935_v60 = vadd.f32 %v15356_v57, %v15346_v52  ;;  %v4961_v61 = vmul.f32 %v15356_v57, %v15356_v57 }
 0x385   :  { %v4990_v62 = vadd.f32 %v4960_v56, %v4958_v54 }
 0x386   :  { %v5011_v63 = vadd.f32 %v4961_v61, %v4959_v59 }
 0x388   :  { %v15364_v0 = vpop.f32.mrb[4].mxu0 }
 0x389   :  { %v4915_v1 = vadd.f32 %v4914_v55, %v15364_v0  ;;  %v4962_v2 = vmul.f32 %v15364_v0, %v15364_v0  ;;  %v15369_v3 = vpop.f32.mrb[5].mxu0 }
 0x38a   :  { %v4936_v4 = vadd.f32 %v4935_v60, %v15369_v3  ;;  %v4963_v5 = vmul.f32 %v15369_v3, %v15369_v3  ;;  %v15374_v6 = vpop.f32.mrb[6].mxu0 }
 0x38b   :  { %v4991_v7 = vadd.f32 %v4990_v62, %v4962_v2  ;;  %v4916_v8 = vadd.f32 %v4915_v1, %v15374_v6  ;;  %v4964_v9 = vmul.f32 %v15374_v6, %v15374_v6  ;;  %v15379_v10 = vpop.f32.mrb[7].mxu0 }
 0x38c   :  { %v5012_v11 = vadd.f32 %v5011_v63, %v4963_v5  ;;  %v4937_v12 = vadd.f32 %v4936_v4, %v15379_v10  ;;  %v4965_v13 = vmul.f32 %v15379_v10, %v15379_v10 }
 0x38d   :  { %v4992_v14 = vadd.f32 %v4991_v7, %v4964_v9 }
 0x38e   :  { %v5013_v15 = vadd.f32 %v5012_v11, %v4965_v13 }
 0x390   :  { %v15384_v16 = vpop.f32.mrb[8].mxu0 }
 0x391   :  { %v4917_v17 = vadd.f32 %v4916_v8, %v15384_v16  ;;  %v4966_v18 = vmul.f32 %v15384_v16, %v15384_v16  ;;  %v15389_v19 = vpop.f32.mrb[9].mxu0 }
 0x392   :  { %v4938_v20 = vadd.f32 %v4937_v12, %v15389_v19  ;;  %v4967_v21 = vmul.f32 %v15389_v19, %v15389_v19  ;;  %v15394_v22 = vpop.f32.mrb[10].mxu0 }
 0x393   :  { %v4993_v23 = vadd.f32 %v4992_v14, %v4966_v18  ;;  %v4918_v24 = vadd.f32 %v4917_v17, %v15394_v22  ;;  %v4968_v25 = vmul.f32 %v15394_v22, %v15394_v22  ;;  %v15399_v26 = vpop.f32.mrb[11].mxu0 }
 0x394   :  { %v5014_v27 = vadd.f32 %v5013_v15, %v4967_v21  ;;  %v4939_v28 = vadd.f32 %v4938_v20, %v15399_v26  ;;  %v4969_v29 = vmul.f32 %v15399_v26, %v15399_v26 }
 0x395   :  { %v4994_v30 = vadd.f32 %v4993_v23, %v4968_v25 }
 0x396   :  { %v5015_v31 = vadd.f32 %v5014_v27, %v4969_v29 }
 0x398   :  { %v15404_v32 = vpop.f32.mrb[12].mxu0 }
 0x399   :  { %v4919_v33 = vadd.f32 %v4918_v24, %v15404_v32  ;;  %v4970_v34 = vmul.f32 %v15404_v32, %v15404_v32  ;;  %v15409_v35 = vpop.f32.mrb[13].mxu0 }
 0x39a   :  { %v4940_v36 = vadd.f32 %v4939_v28, %v15409_v35  ;;  %v4971_v37 = vmul.f32 %v15409_v35, %v15409_v35  ;;  %v15414_v38 = vpop.f32.mrb[14].mxu0 }
 0x39b   :  { %v4995_v39 = vadd.f32 %v4994_v30, %v4970_v34  ;;  %v4920_v40 = vadd.f32 %v4919_v33, %v15414_v38  ;;  %v4972_v41 = vmul.f32 %v15414_v38, %v15414_v38  ;;  %v15419_v43 = vpop.f32.mrb[15].mxu0 }
 0x39c   :  { %v5016_v44 = vadd.f32 %v5015_v31, %v4971_v37  ;;  %v4941_v45 = vadd.f32 %v4940_v36, %v15419_v43  ;;  %v4973_v46 = vmul.f32 %v15419_v43, %v15419_v43 }
 0x39d   :  { %v4996_v47 = vadd.f32 %v4995_v39, %v4972_v41 }
 0x39e   :  { %v5017_v49 = vadd.f32 %v5016_v44, %v4973_v46 }
 0x3a0   :  { %v15424_v50 = vpop.f32.mrb[16].mxu0 }
 0x3a1   :  { %v4921_v54 = vadd.f32 %v4920_v40, %v15424_v50  ;;  %v4974_v55 = vmul.f32 %v15424_v50, %v15424_v50  ;;  %v15429_v56 = vpop.f32.mrb[17].mxu0 }
 0x3a2   :  { %v4942_v58 = vadd.f32 %v4941_v45, %v15429_v56  ;;  %v4975_v59 = vmul.f32 %v15429_v56, %v15429_v56  ;;  %v15434_v60 = vpop.f32.mrb[18].mxu0 }
 0x3a3   :  { %v4997_v61 = vadd.f32 %v4996_v47, %v4974_v55  ;;  %v4922_v62 = vadd.f32 %v4921_v54, %v15434_v60  ;;  %v4976_v63 = vmul.f32 %v15434_v60, %v15434_v60  ;;  %v15439_v1 = vpop.f32.mrb[19].mxu0 }
 0x3a4   :  { %v5018_v2 = vadd.f32 %v5017_v49, %v4975_v59  ;;  %v4943_v4 = vadd.f32 %v4942_v58, %v15439_v1  ;;  %v4977_v5 = vmul.f32 %v15439_v1, %v15439_v1 }
 0x3a5   :  { %v4998_v7 = vadd.f32 %v4997_v61, %v4976_v63 }
 0x3a6   :  { %v5019_v8 = vadd.f32 %v5018_v2, %v4977_v5 }
 0x3a8   :  { %v15444_v9 = vpop.f32.mrb[20].mxu0 }
 0x3a9   :  { %v4923_v11 = vadd.f32 %v4922_v62, %v15444_v9  ;;  %v4978_v12 = vmul.f32 %v15444_v9, %v15444_v9  ;;  %v15449_v13 = vpop.f32.mrb[21].mxu0 }
 0x3aa   :  { %v4944_v14 = vadd.f32 %v4943_v4, %v15449_v13  ;;  %v4979_v15 = vmul.f32 %v15449_v13, %v15449_v13  ;;  %v15454_v17 = vpop.f32.mrb[22].mxu0 }
 0x3ab   :  { %v4999_v18 = vadd.f32 %v4998_v7, %v4978_v12  ;;  %v4924_v20 = vadd.f32 %v4923_v11, %v15454_v17  ;;  %v4980_v21 = vmul.f32 %v15454_v17, %v15454_v17  ;;  %v15459_v23 = vpop.f32.mrb[23].mxu0 }
 0x3ac   :  { %v5020_v24 = vadd.f32 %v5019_v8, %v4979_v15  ;;  %v4945_v25 = vadd.f32 %v4944_v14, %v15459_v23  ;;  %v4981_v27 = vmul.f32 %v15459_v23, %v15459_v23 }
 0x3ad   :  { %v5000_v28 = vadd.f32 %v4999_v18, %v4980_v21 }
 0x3ae   :  { %v5021_v29 = vadd.f32 %v5020_v24, %v4981_v27 }
 0x3b0   :  { %v15464_v30 = vpop.f32.mrb[24].mxu0 }
 0x3b1   :  { %v4925_v31 = vadd.f32 %v4924_v20, %v15464_v30  ;;  %v4982_v33 = vmul.f32 %v15464_v30, %v15464_v30  ;;  %v15469_v34 = vpop.f32.mrb[25].mxu0 }
 0x3b2   :  { %v4946_v36 = vadd.f32 %v4945_v25, %v15469_v34  ;;  %v4983_v37 = vmul.f32 %v15469_v34, %v15469_v34  ;;  %v15474_v39 = vpop.f32.mrb[26].mxu0 }
 0x3b3   :  { %v5001_v40 = vadd.f32 %v5000_v28, %v4982_v33  ;;  %v4926_v41 = vadd.f32 %v4925_v31, %v15474_v39  ;;  %v4984_v44 = vmul.f32 %v15474_v39, %v15474_v39  ;;  %v15479_v45 = vpop.f32.mrb[27].mxu0 }
 0x3b4   :  { %v5022_v46 = vadd.f32 %v5021_v29, %v4983_v37  ;;  %v4947_v47 = vadd.f32 %v4946_v36, %v15479_v45  ;;  %v4985_v49 = vmul.f32 %v15479_v45, %v15479_v45 }
 0x3b5   :  { %v5002_v54 = vadd.f32 %v5001_v40, %v4984_v44 }
 0x3b6   :  { %v5023_v55 = vadd.f32 %v5022_v46, %v4985_v49 }
 0x3b8   :  { %v15484_v58 = vpop.f32.mrb[28].mxu0 }
 0x3b9   :  { %v4927_v59 = vadd.f32 %v4926_v41, %v15484_v58  ;;  %v4986_v61 = vmul.f32 %v15484_v58, %v15484_v58  ;;  %v15489_v62 = vpop.f32.mrb[29].mxu0 }
 0x3ba   :  { %v4948_v63 = vadd.f32 %v4947_v47, %v15489_v62  ;;  %v4987_v2 = vmul.f32 %v15489_v62, %v15489_v62  ;;  %v15494_v4 = vpop.f32.mrb[30].mxu0 }
 0x3bb   :  { %v5003_v5 = vadd.f32 %v5002_v54, %v4986_v61  ;;  %v4928_v7 = vadd.f32 %v4927_v59, %v15494_v4  ;;  %v4988_v8 = vmul.f32 %v15494_v4, %v15494_v4  ;;  %v4911_v11 = vpop.f32.mrb[31].mxu0 }
 0x3bc   :  { %v5024_v12 = vadd.f32 %v5023_v55, %v4987_v2  ;;  %v4949_v14 = vadd.f32 %v4948_v63, %v4911_v11  ;;  %v4989_v15 = vmul.f32 %v4911_v11, %v4911_v11 }
 0x3bd   :  { %v4929_v18 = vrot.slane %v4928_v7, 4  ;;  %v5004_v20 = vadd.f32 %v5003_v5, %v4988_v8 }
 0x3be   :  { %v4950_v21 = vrot.slane %v4949_v14, 4  ;;  %v5025_v24 = vadd.f32 %v5024_v12, %v4989_v15 }
 0x3bf   :  { %v4930_v25 = vadd.f32 %v4929_v18, %v4928_v7  ;;  %v5005_v27 = vrot.slane %v5004_v20, 4 }
 0x3c0   :  { %v4951_v28 = vadd.f32 %v4950_v21, %v4949_v14  ;;  %v5026_v29 = vrot.slane %v5025_v24, 4 }
 0x3c1   :  { %v4931_v31 = vrot.slane %v4930_v25, 2  ;;  %v5006_v33 = vadd.f32 %v5005_v27, %v5004_v20 }
 0x3c2   :  { %v4952_v36 = vrot.slane %v4951_v28, 2  ;;  %v5027_v37 = vadd.f32 %v5026_v29, %v5025_v24 }
 0x3c3   :  { %v4932_v40 = vadd.f32 %v4931_v31, %v4930_v25  ;;  %v5007_v41 = vrot.slane %v5006_v33, 2 }
 0x3c4   :  { %v4953_v44 = vadd.f32 %v4952_v36, %v4951_v28  ;;  %v5028_v46 = vrot.slane %v5027_v37, 2  ;;  %v13479_v28 = vmov 1966171168  }
 0x3c5   :  { %v4933_v47 = vrot.slane %v4932_v40, 1  ;;  %v5008_v49 = vadd.f32 %v5007_v41, %v5006_v33  ;;  %v5047_v29 = vunpack.c.l.s4 %v13479_v28  ;;  %v5050_v33 = vshrl.u32 %v5049_v42, 7 }
 0x3c6   :  { %v4954_v54 = vrot.slane %v4953_v44, 1  ;;  %v5029_v55 = vadd.f32 %v5028_v46, %v5027_v37  ;;  %v5038_v46 = vld [vmem:[#allocation7] sm:$0x3] }
 0x3c7   :  { %v4934_v59 = vadd.f32 %v4933_v47, %v4932_v40  ;;  %v5009_v61 = vrot.slane %v5008_v49, 1  ;;  %v5048_v31 = vunpack.c.0.s8 %v5047_v29 }
 0x3c8   :  { %v4955_v63 = vadd.f32 %v4954_v54, %v4953_v44  ;;  %v5030_v2 = vrot.slane %v5029_v55, 1  ;;  %v15506_v54 = vsub.s32 1, %v5050_v33 }
 0x3c9   :  { %v4956_v5 = vmul.f32 0.0078125, %v4934_v59  ;;  %v5010_v7 = vadd.f32 %v5009_v61, %v5008_v49  ;;  %v15500_v37 = vsub.s32 %v5048_v31, %v5050_v33  ;;  %v15504_v49 = vsub.s32 0, %v5050_v33 }
 0x3ca   :  { %v4957_v8 = vmul.f32 0.0078125, %v4955_v63  ;;  %v5031_v12 = vadd.f32 %v5030_v2, %v5029_v55  ;;  %16611 = vst [vmem:[#allocation21_spill] sm:$0xff] %v15506_v54 }
 0x3cb   :  { %v5032_v14 = vmul.f32 0.0078125, %v5010_v7  ;;  %v5034_v15 = vmul.f32 %v4956_v5, %v4956_v5 }
 0x3cc   :  { %v5033_v18 = vmul.f32 0.0078125, %v5031_v12  ;;  %v5035_v20 = vmul.f32 %v4957_v8, %v4957_v8 }
 0x3cd   :  { %v5036_v21 = vsub.f32 %v5032_v14, %v5034_v15 }
 0x3ce   :  { %v5037_v24 = vsub.f32 %v5033_v18, %v5035_v20 }
 0x3cf   :  { %v5039_v25 = vadd.f32 1e-05, %v5036_v21 }
 0x3d0   :  { %v5040_v27 = vadd.f32 1e-05, %v5037_v24 }
 0x3d1   :  { %13297 = vrsqrt.f32 %v5039_v25 }
 0x3d2   :  { %13299 = vrsqrt.f32 %v5040_v27 }
 0x3db   :  { %v13298_v36 = vpop.eup %13297 }
 0x3dc   :  { %v13300_v40 = vpop.eup %13299 }
 0x3dd   :  { %v5045_v41 = vcombine.low %v13298_v36, %v13300_v40 }
 0x3df   :  { %v5052_v44 = vrot.slane %v5045_v41, %v15500_v37 }
 0x3e1   :  { %v5059_v47 = vrot.slane %v5052_v44, %v15500_v37 }
 0x3e3   :  { %v5061_v55 = vmul.f32 %v5059_v47, %v5038_v46 }
 0x3e5   :  { %v5067_v59 = vrot.slane %v5061_v55, %v15504_v49  ;;  %v5071_v61 = vrot.slane %v5061_v55, %v15506_v54 }
 0x3e7   :  { %v5074_v42 = vmul.f32 %v5067_v59, %v4956_v5  ;;  %v5075_v63 = vmul.f32 %v5071_v61, %v4957_v8  ;;  %v5126_v2 = vmul.f32 %v5071_v61, %v4911_v11  ;;  %v5096_v7 = vmul.f32 %v5071_v61, %v15346_v52 }
 0x3e8   :  { %v5095_v12 = vmul.f32 %v5067_v59, %v15344_v51  ;;  %v5098_v14 = vmul.f32 %v5071_v61, %v15356_v57  ;;  %v5100_v15 = vmul.f32 %v5071_v61, %v15369_v3  ;;  %v5097_v18 = vmul.f32 %v5067_v59, %v15348_v53 }
 0x3e9   :  { %v5078_v20 = vcombine.low %v5074_v42, %v5075_v63  ;;  %v5099_v21 = vmul.f32 %v5067_v59, %v15364_v0  ;;  %v5102_v24 = vmul.f32 %v5071_v61, %v15379_v10  ;;  %v5104_v25 = vmul.f32 %v5071_v61, %v15389_v19  ;;  %v5062_v10 = vld [vmem:[#allocation9] sm:$0x3] }
 0x3ea   :  { %v5101_v5 = vmul.f32 %v5067_v59, %v15374_v6  ;;  %v5103_v11 = vmul.f32 %v5067_v59, %v15384_v16  ;;  %v5106_v52 = vmul.f32 %v5071_v61, %v15399_v26  ;;  %v15522_v51 = vmul.f32 %v5071_v61, %v15409_v35 }
 0x3eb   :  { %v5085_v57 = vrot.slane %v5078_v20, %v15500_v37  ;;  %v15526_v53 = vmul.f32 %v5067_v59, %v15394_v22  ;;  %v15529_v0 = vmul.f32 %v5067_v59, %v15404_v32  ;;  %v15532_v3 = vmul.f32 %v5071_v61, %v15429_v56 }
 0x3ec   :  { %v15535_v6 = vmul.f32 %v5067_v59, %v15424_v50  ;;  %v15538_v16 = vmul.f32 %v5071_v61, %v15439_v1  ;;  %v15541_v19 = vmul.f32 %v5071_v61, %v15449_v13  ;;  %v15544_v26 = vmul.f32 %v5067_v59, %v15434_v60 }
 0x3ed   :  { %v5092_v22 = vrot.slane %v5085_v57, %v15500_v37  ;;  %v15548_v32 = vmul.f32 %v5067_v59, %v15444_v9  ;;  %v15551_v35 = vmul.f32 %v5071_v61, %v15459_v23  ;;  %v15554_v50 = vmul.f32 %v5071_v61, %v15469_v34 }
 0x3ee   :  { %v15557_v56 = vmul.f32 %v5067_v59, %v15454_v17  ;;  %v15560_v1 = vmul.f32 %v5067_v59, %v15464_v30  ;;  %v15563_v60 = vmul.f32 %v5071_v61, %v15479_v45  ;;  %v15566_v13 = vmul.f32 %v5071_v61, %v15489_v62 }
 0x3ef   :  { %v5094_v9 = vsub.f32 %v5062_v10, %v5092_v22  ;;  %v15569_v8 = vmul.f32 %v5067_v59, %v15474_v39  ;;  %v15572_v23 = vmul.f32 %v5067_v59, %v15484_v58  ;;  %v15575_v34 = vmul.f32 %v5071_v61, %v15419_v43 }
 0x3f0   :  { %v15578_v17 = vmul.f32 %v5067_v59, %v15414_v38  ;;  %v15581_v30 = vmul.f32 %v5067_v59, %v15494_v4 }
 0x3f1   :  { %v15584_v45 = vrot.slane %v5094_v9, %v15504_v49  ;;  %v15587_v62 = vrot.slane %v5094_v9, %v15506_v54 }
 0x3f3   :  { %v5169_v39 = vadd.f32 %v15587_v62, %v5126_v2  ;;  %v5139_v58 = vadd.f32 %v15587_v62, %v5096_v7  ;;  %v5138_v27 = vadd.f32 %v15584_v45, %v5095_v12  ;;  %v5141_v43 = vadd.f32 %v15587_v62, %v5098_v14 }
 0x3f4   :  { %v5143_v38 = vadd.f32 %v15587_v62, %v5100_v15  ;;  %v5140_v28 = vadd.f32 %v15584_v45, %v5097_v18  ;;  %v5142_v4 = vadd.f32 %v15584_v45, %v5099_v21  ;;  %v5145_v29 = vadd.f32 %v15587_v62, %v5102_v24 }
 0x3f5   :  { %v5201_v31 = vmax.f32 %v5169_v39, 0.0  ;;  %v5171_v33 = vmax.f32 %v5139_v58, 0.0  ;;  %v5170_v36 = vmax.f32 %v5138_v27, 0.0  ;;  %v5173_v40 = vmax.f32 %v5141_v43, 0.0 }
 0x3f6   :  { %v5175_v41 = vmax.f32 %v5143_v38, 0.0  ;;  %v5172_v44 = vmax.f32 %v5140_v28, 0.0  ;;  %v5174_v46 = vmax.f32 %v5142_v4, 0.0  ;;  %v5147_v47 = vadd.f32 %v15587_v62, %v5104_v25 }
 0x3f7   :  { %v5382_v55 = vrot.slane %v5201_v31, 7  ;;  %v5352_v59 = vrot.slane %v5171_v33, 7  ;;  %v5351_v61 = vrot.slane %v5170_v36, 7  ;;  %v5354_v42 = vrot.slane %v5173_v40, 7 }
 0x3f8   :  { %v5356_v63 = vrot.slane %v5175_v41, 7  ;;  %v5353_v2 = vrot.slane %v5172_v44, 7  ;;  %v5355_v7 = vrot.slane %v5174_v46, 7  ;;  %v5177_v12 = vmax.f32 %v5145_v29, 0.0 }
 0x3f9   :  { %5476 = vst [vmem:[#allocation3 + $0x248] sm:$0xfe] %v5382_v55  ;;  %5478 = vst [vmem:[#allocation3 + $0x258] sm:$0x1] %v5382_v55  ;;  %v5179_v14 = vmax.f32 %v5147_v47, 0.0  ;;  %v5144_v15 = vadd.f32 %v15584_v45, %v5101_v5  ;;  %v5146_v18 = vadd.f32 %v15584_v45, %v5103_v11  ;;  %v5149_v20 = vadd.f32 %v15587_v62, %v5106_v52 }
 0x3fa   :  { %5416 = vst [vmem:[#allocation3 + $0x28] sm:$0xfe] %v5352_v59  ;;  %5418 = vst [vmem:[#allocation3 + $0x38] sm:$0x1] %v5352_v59  ;;  %v5358_v21 = vrot.slane %v5177_v12, 7  ;;  %v5151_v24 = vadd.f32 %v15587_v62, %v15522_v51  ;;  %v5148_v25 = vadd.f32 %v15584_v45, %v15526_v53  ;;  %v5150_v5 = vadd.f32 %v15584_v45, %v15529_v0 }
 0x3fb   :  { %5415 = vst [vmem:[#allocation3 + $0x20] sm:$0xfe] %v5351_v61  ;;  %5417 = vst [vmem:[#allocation3 + $0x30] sm:$0x1] %v5351_v61  ;;  %v5360_v57 = vrot.slane %v5179_v14, 7  ;;  %v5176_v11 = vmax.f32 %v5144_v15, 0.0  ;;  %v5155_v58 = vadd.f32 %v15587_v62, %v15532_v3  ;;  %v5154_v0 = vadd.f32 %v15584_v45, %v15535_v6 }
 0x3fc   :  { %5420 = vst [vmem:[#allocation3 + $0x48] sm:$0xfe] %v5354_v42  ;;  %5422 = vst [vmem:[#allocation3 + $0x58] sm:$0x1] %v5354_v42  ;;  %v5178_v10 = vmax.f32 %v5146_v18, 0.0  ;;  %v5181_v52 = vmax.f32 %v5149_v20, 0.0  ;;  %v5157_v3 = vadd.f32 %v15587_v62, %v15538_v16  ;;  %v5159_v31 = vadd.f32 %v15587_v62, %v15541_v19 }
 0x3fd   :  { %5424 = vst [vmem:[#allocation3 + $0x68] sm:$0xfe] %v5356_v63  ;;  %5426 = vst [vmem:[#allocation3 + $0x78] sm:$0x1] %v5356_v63  ;;  %v5183_v22 = vmax.f32 %v5151_v24, 0.0  ;;  %v5180_v9 = vmax.f32 %v5148_v25, 0.0  ;;  %v5156_v6 = vadd.f32 %v15584_v45, %v15544_v26  ;;  %v5158_v44 = vadd.f32 %v15584_v45, %v15548_v32 }
 0x3fe   :  { %5419 = vst [vmem:[#allocation3 + $0x40] sm:$0xfe] %v5353_v2  ;;  %5421 = vst [vmem:[#allocation3 + $0x50] sm:$0x1] %v5353_v2  ;;  %v5182_v39 = vmax.f32 %v5150_v5, 0.0  ;;  %v5357_v51 = vrot.slane %v5176_v11, 7  ;;  %v5161_v16 = vadd.f32 %v15587_v62, %v15551_v35  ;;  %v5163_v19 = vadd.f32 %v15587_v62, %v15554_v50 }
 0x3ff   :  { %5423 = vst [vmem:[#allocation3 + $0x60] sm:$0xfe] %v5355_v7  ;;  %5425 = vst [vmem:[#allocation3 + $0x70] sm:$0x1] %v5355_v7  ;;  %v5359_v27 = vrot.slane %v5178_v10, 7  ;;  %v5362_v53 = vrot.slane %v5181_v52, 7  ;;  %v5160_v18 = vadd.f32 %v15584_v45, %v15557_v56  ;;  %v5162_v20 = vadd.f32 %v15584_v45, %v15560_v1 }
 0x400   :  { %5428 = vst [vmem:[#allocation3 + $0x88] sm:$0xfe] %v5358_v21  ;;  %5430 = vst [vmem:[#allocation3 + $0x98] sm:$0x1] %v5358_v21  ;;  %v5364_v43 = vrot.slane %v5183_v22, 7  ;;  %v5361_v38 = vrot.slane %v5180_v9, 7  ;;  %v5165_v56 = vadd.f32 %v15587_v62, %v15563_v60  ;;  %v5167_v1 = vadd.f32 %v15587_v62, %v15566_v13 }
 0x401   :  { %5432 = vst [vmem:[#allocation3 + $0xa8] sm:$0xfe] %v5360_v57  ;;  %5434 = vst [vmem:[#allocation3 + $0xb8] sm:$0x1] %v5360_v57  ;;  %v5363_v28 = vrot.slane %v5182_v39, 7  ;;  %v5187_v4 = vmax.f32 %v5155_v58, 0.0  ;;  %v5164_v9 = vadd.f32 %v15584_v45, %v15569_v8  ;;  %v5166_v39 = vadd.f32 %v15584_v45, %v15572_v23 }
 0x402   :  { %5427 = vst [vmem:[#allocation3 + $0x80] sm:$0xfe] %v5357_v51  ;;  %5429 = vst [vmem:[#allocation3 + $0x90] sm:$0x1] %v5357_v51  ;;  %v5186_v29 = vmax.f32 %v5154_v0, 0.0  ;;  %v5482_v33 = vld [vmem:[#allocation3 + $0x28] sm:$0xff] }
 0x403   :  { %5431 = vst [vmem:[#allocation3 + $0xa0] sm:$0xfe] %v5359_v27  ;;  %5433 = vst [vmem:[#allocation3 + $0xb0] sm:$0x1] %v5359_v27  ;;  %v5481_v36 = vld [vmem:[#allocation3 + $0x20] sm:$0xff]  ;;  %v5484_v40 = vld [vmem:[#allocation3 + $0x48] sm:$0xff]  ;;  %v5512_v26 = vpack.c.bf16 %v5482_v33, %v13478_v48 }
 0x404   :  { %5436 = vst [vmem:[#allocation3 + $0xc8] sm:$0xfe] %v5362_v53  ;;  %5438 = vst [vmem:[#allocation3 + $0xd8] sm:$0x1] %v5362_v53  ;;  %v5368_v41 = vrot.slane %v5187_v4, 7  ;;  %v5511_v46 = vpack.c.bf16 %v5481_v36, %v13478_v48  ;;  %v5486_v55 = vld [vmem:[#allocation3 + $0x68] sm:$0xff] }
 0x405   :  { %5440 = vst [vmem:[#allocation3 + $0xe8] sm:$0xfe] %v5364_v43  ;;  %5442 = vst [vmem:[#allocation3 + $0xf8] sm:$0x1] %v5364_v43  ;;  %v12913_v47 = vld [vmem:[#allocation10 + $0x100] ss:$8 sps:$4 sm:$0xff]   ;;  %v5514_v42 = vpack.c.bf16 %v5486_v55, %v5484_v40  ;;  %9304 = vmatprep.mubr.bf16.mxu1 %v5512_v26 }
 0x406   :  { %5435 = vst [vmem:[#allocation3 + $0xc0] sm:$0xfe] %v5361_v38  ;;  %5437 = vst [vmem:[#allocation3 + $0xd0] sm:$0x1] %v5361_v38  ;;  %v5367_v59 = vrot.slane %v5186_v29, 7  ;;  %v5189_v61 = vmax.f32 %v5157_v3, 0.0  ;;  %9305 = vmatmul.mubr.bf16.vlgmr.msra.gmra.mrb[0].mxu1 %v5511_v46 }
 0x407   :  { %5439 = vst [vmem:[#allocation3 + $0xe0] sm:$0xfe] %v5363_v28  ;;  %5441 = vst [vmem:[#allocation3 + $0xf0] sm:$0x1] %v5363_v28  ;;  %v12918_v63 = vld [vmem:[#allocation10 + $0x114] ss:$8 sps:$4 sm:$0xff]   ;;  %9314 = vmatprep.mubr.bf16.mxu1 %v5514_v42  ;;  %9386 = vmatpush1.bf16.msra.mxu1 %v12913_v47  ;;  %v15639_v42 = vadd.f32 %v15587_v62, %v15575_v34 }
 0x408   :  { %5448 = vst [vmem:[#allocation3 + $0x168] sm:$0xfe] %v5368_v41  ;;  %5450 = vst [vmem:[#allocation3 + $0x178] sm:$0x1] %v5368_v41  ;;  %v5191_v2 = vmax.f32 %v5159_v31, 0.0  ;;  %v5188_v32 = vmax.f32 %v5156_v6, 0.0  ;;  %9387 = vmatprep.subr.bf16.mxu1 %v12918_v63 }
 0x409   :  { %5447 = vst [vmem:[#allocation3 + $0x160] sm:$0xfe] %v5367_v59  ;;  %5449 = vst [vmem:[#allocation3 + $0x170] sm:$0x1] %v5367_v59  ;;  %v5370_v35 = vrot.slane %v5189_v61, 7  ;;  %v5190_v7 = vmax.f32 %v5158_v44, 0.0 }
 0x40a   :  { %v5193_v50 = vmax.f32 %v5161_v16, 0.0  ;;  %v5195_v12 = vmax.f32 %v5163_v19, 0.0  ;;  %v5372_v14 = vrot.slane %v5191_v2, 7  ;;  %v5369_v15 = vrot.slane %v5188_v32, 7  ;;  %v12916_v21 = vld [vmem:[#allocation10 + $0x110] ss:$8 sps:$4 sm:$0xff]  }
 0x40b   :  { %5452 = vst [vmem:[#allocation3 + $0x188] sm:$0xfe] %v5370_v35  ;;  %5454 = vst [vmem:[#allocation3 + $0x198] sm:$0x1] %v5370_v35  ;;  %v5371_v24 = vrot.slane %v5190_v7, 7  ;;  %v5192_v11 = vmax.f32 %v5160_v18, 0.0  ;;  %9388 = vmatpush1.bf16.msra.mxu1 %v12916_v21  ;;  %v15643_v2 = vadd.f32 %v15584_v45, %v15578_v17  ;;  %v15647_v35 = vadd.f32 %v15584_v45, %v15581_v30 }
 0x40c   :  { %v5374_v25 = vrot.slane %v5193_v50, 7  ;;  %v5376_v5 = vrot.slane %v5195_v12, 7  ;;  %v12921_v57 = vld [vmem:[#allocation10 + $0x124] ss:$8 sps:$4 sm:$0xff]   ;;  %5456 = vst [vmem:[#allocation3 + $0x1a8] sm:$0xfe] %v5372_v14 }
 0x40d   :  { %5458 = vst [vmem:[#allocation3 + $0x1b8] sm:$0x1] %v5372_v14  ;;  %5451 = vst [vmem:[#allocation3 + $0x180] sm:$0xfe] %v5369_v15  ;;  %v5194_v10 = vmax.f32 %v5162_v20, 0.0  ;;  %v5483_v52 = vld [vmem:[#allocation3 + $0x40] sm:$0xff]  ;;  %9389 = vmatprep.subr.bf16.mxu1 %v12921_v57 }
 0x40e   :  { %5453 = vst [vmem:[#allocation3 + $0x190] sm:$0x1] %v5369_v15  ;;  %v5485_v22 = vld [vmem:[#allocation3 + $0x60] sm:$0xff]  ;;  %5455 = vst [vmem:[#allocation3 + $0x1a0] sm:$0xfe] %v5371_v24  ;;  %v5488_v58 = vld [vmem:[#allocation3 + $0x88] sm:$0xff] }
 0x40f   :  { %5457 = vst [vmem:[#allocation3 + $0x1b0] sm:$0x1] %v5371_v24  ;;  %5460 = vst [vmem:[#allocation3 + $0x1c8] sm:$0xfe] %v5374_v25  ;;  %v5490_v51 = vld [vmem:[#allocation3 + $0xa8] sm:$0xff]  ;;  %v5373_v60 = vrot.slane %v5192_v11, 7  ;;  %v5513_v28 = vpack.c.bf16 %v5485_v22, %v5483_v52 }
 0x410   :  { %5462 = vst [vmem:[#allocation3 + $0x1d8] sm:$0x1] %v5374_v25  ;;  %5464 = vst [vmem:[#allocation3 + $0x1e8] sm:$0xfe] %v5376_v5  ;;  %v5375_v27 = vrot.slane %v5194_v10, 7  ;;  %v5197_v53 = vmax.f32 %v5165_v56, 0.0  ;;  %v5516_v8 = vpack.c.bf16 %v5490_v51, %v5488_v58 }
 0x411   :  { %5466 = vst [vmem:[#allocation3 + $0x1f8] sm:$0x1] %v5376_v5  ;;  %v12919_v13 = vld [vmem:[#allocation10 + $0x120] ss:$8 sps:$4 sm:$0xff]   ;;  %v5199_v0 = vmax.f32 %v5167_v1, 0.0  ;;  %v5196_v43 = vmax.f32 %v5164_v9, 0.0  ;;  %9315 = vmatmul.mubr.bf16.gmra.mrb[4].mxu1 %v5513_v28 }
 0x412   :  { %v5198_v38 = vmax.f32 %v5166_v39, 0.0  ;;  %v12924_v4 = vld [vmem:[#allocation10 + $0x134] ss:$8 sps:$4 sm:$0xff]   ;;  %5459 = vst [vmem:[#allocation3 + $0x1c0] sm:$0xfe] %v5373_v60  ;;  %v5378_v29 = vrot.slane %v5197_v53, 7  ;;  %9324 = vmatprep.mubr.bf16.mxu1 %v5516_v8  ;;  %9390 = vmatpush1.bf16.msra.mxu1 %v12919_v13 }
 0x413   :  { %5461 = vst [vmem:[#allocation3 + $0x1d0] sm:$0x1] %v5373_v60  ;;  %5463 = vst [vmem:[#allocation3 + $0x1e0] sm:$0xfe] %v5375_v27  ;;  %v5380_v23 = vrot.slane %v5199_v0, 7  ;;  %v5377_v3 = vrot.slane %v5196_v43, 7  ;;  %9391 = vmatprep.subr.bf16.mxu1 %v12924_v4 }
 0x414   :  { %5465 = vst [vmem:[#allocation3 + $0x1f0] sm:$0x1] %v5375_v27  ;;  %v5379_v31 = vrot.slane %v5198_v38, 7  ;;  %v12922_v6 = vld [vmem:[#allocation10 + $0x130] ss:$8 sps:$4 sm:$0xff]   ;;  %v5487_v36 = vld [vmem:[#allocation3 + $0x80] sm:$0xff] }
 0x415   :  { %5468 = vst [vmem:[#allocation3 + $0x208] sm:$0xfe] %v5378_v29  ;;  %5470 = vst [vmem:[#allocation3 + $0x218] sm:$0x1] %v5378_v29  ;;  %v12927_v33 = vld [vmem:[#allocation10 + $0x144] ss:$8 sps:$4 sm:$0xff]  }
 0x416   :  { %5472 = vst [vmem:[#allocation3 + $0x228] sm:$0xfe] %v5380_v23  ;;  %5474 = vst [vmem:[#allocation3 + $0x238] sm:$0x1] %v5380_v23  ;;  %v5489_v40 = vld [vmem:[#allocation3 + $0xa0] sm:$0xff]  ;;  %v5492_v41 = vld [vmem:[#allocation3 + $0xc8] sm:$0xff]  ;;  %9392 = vmatpush1.bf16.msra.mxu1 %v12922_v6 }
 0x417   :  { %5467 = vst [vmem:[#allocation3 + $0x200] sm:$0xfe] %v5377_v3  ;;  %5469 = vst [vmem:[#allocation3 + $0x210] sm:$0x1] %v5377_v3  ;;  %v5494_v44 = vld [vmem:[#allocation3 + $0xe8] sm:$0xff]  ;;  %v5515_v19 = vpack.c.bf16 %v5489_v40, %v5487_v36  ;;  %9393 = vmatprep.subr.bf16.mxu1 %v12927_v33  ;;  %v5491_v59 = vld [vmem:[#allocation3 + $0xc0] sm:$0xff] }
 0x418   :  { %5471 = vst [vmem:[#allocation3 + $0x220] sm:$0xfe] %v5379_v31  ;;  %5473 = vst [vmem:[#allocation3 + $0x230] sm:$0x1] %v5379_v31  ;;  %v12925_v16 = vld [vmem:[#allocation10 + $0x140] ss:$8 sps:$4 sm:$0xff]   ;;  %v5518_v46 = vpack.c.bf16 %v5494_v44, %v5492_v41 }
 0x419   :  { %v12930_v26 = vld [vmem:[#allocation10 + $0x154] ss:$8 sps:$4 sm:$0xff]   ;;  %9325 = vmatmul.mubr.bf16.gmra.mrb[8].mxu1 %v5515_v19  ;;  %v12928_v47 = vld [vmem:[#allocation10 + $0x150] ss:$8 sps:$4 sm:$0xff]   ;;  %v12933_v55 = vld [vmem:[#allocation10 + $0x164] ss:$8 sps:$4 sm:$0xff]  }
 0x41a   :  { %9334 = vmatprep.mubr.bf16.mxu1 %v5518_v46  ;;  %9394 = vmatpush1.bf16.msra.mxu1 %v12925_v16  ;;  %v5493_v61 = vld [vmem:[#allocation3 + $0xe0] sm:$0xff]  ;;  %v5498_v63 = vld [vmem:[#allocation3 + $0x168] sm:$0xff]  ;;  %v12934_v34 = vld [vmem:[#allocation10 + $0x170] ss:$8 sps:$4 sm:$0xff]  }
 0x41b   :  { %9395 = vmatprep.subr.bf16.mxu1 %v12930_v26  ;;  %v12931_v32 = vld [vmem:[#allocation10 + $0x160] ss:$8 sps:$4 sm:$0xff]   ;;  %v5517_v7 = vpack.c.bf16 %v5493_v61, %v5491_v59  ;;  %v12936_v50 = vld [vmem:[#allocation10 + $0x174] ss:$8 sps:$4 sm:$0xff]   ;;  %v5520_v12 = vpack.c.bf16 %v5498_v63, %v13478_v48  ;;  %v12939_v62 = vld [vmem:[#allocation10 + $0x184] ss:$8 sps:$4 sm:$0xff]  }
 0x41c   :  { %v5497_v14 = vld [vmem:[#allocation3 + $0x160] sm:$0xff]  ;;  %v5500_v17 = vld [vmem:[#allocation3 + $0x188] sm:$0xff]  ;;  %v12940_v21 = vld [vmem:[#allocation10 + $0x190] ss:$8 sps:$4 sm:$0xff]  }
 0x41d   :  { %v5502_v15 = vld [vmem:[#allocation3 + $0x1a8] sm:$0xff]  ;;  %v5519_v20 = vpack.c.bf16 %v5497_v14, %v13478_v48  ;;  %v12942_v30 = vld [vmem:[#allocation10 + $0x194] ss:$8 sps:$4 sm:$0xff]   ;;  %v12946_v48 = vld [vmem:[#allocation10 + $0x1b0] ss:$8 sps:$4 sm:$0xff]  }
 0x41e   :  { %9396 = vmatpush1.bf16.msra.mxu1 %v12928_v47  ;;  %v12937_v18 = vld [vmem:[#allocation10 + $0x180] ss:$8 sps:$4 sm:$0xff]   ;;  %v5522_v45 = vpack.c.bf16 %v5502_v15, %v5500_v17  ;;  %v12945_v24 = vld [vmem:[#allocation10 + $0x1a4] ss:$8 sps:$4 sm:$0xff]   ;;  %v12948_v1 = vld [vmem:[#allocation10 + $0x1b4] ss:$8 sps:$4 sm:$0xff]  }
 0x41f   :  { %9397 = vmatprep.subr.bf16.mxu1 %v12933_v55  ;;  %v5499_v25 = vld [vmem:[#allocation3 + $0x180] sm:$0xff]  ;;  %v5504_v57 = vld [vmem:[#allocation3 + $0x1c8] sm:$0xff]  ;;  %v5546_v27 = vld [vmem:[#allocation3 + $0x18] sm:$0x1]  ;;  %v5185_v47 = vmax.f32 %v15639_v42, 0.0  ;;  %v5184_v42 = vmax.f32 %v15643_v2, 0.0 }
 0x420   :  { %v5501_v5 = vld [vmem:[#allocation3 + $0x1a0] sm:$0xff]  ;;  %v5506_v11 = vld [vmem:[#allocation3 + $0x1e8] sm:$0xff]  ;;  %v5550_v0 = vld [vmem:[#allocation3 + $0x38] sm:$0x1]  ;;  %v5675_v8 = vrot.slane %v5546_v27, 1 }
 0x421   :  { %9335 = vmatmul.mubr.bf16.gmra.mrb[12].mxu1 %v5517_v7  ;;  %v12943_v10 = vld [vmem:[#allocation10 + $0x1a0] ss:$8 sps:$4 sm:$0xff]   ;;  %v5521_v56 = vpack.c.bf16 %v5501_v5, %v5499_v25  ;;  %v5524_v52 = vpack.c.bf16 %v5506_v11, %v5504_v57  ;;  %v12951_v22 = vld [vmem:[#allocation10 + $0x1c4] ss:$8 sps:$4 sm:$0xff]   ;;  %v12954_v38 = vld [vmem:[#allocation10 + $0x1d4] ss:$8 sps:$4 sm:$0xff]  }
 0x422   :  { %9344 = vmatprep.mubr.bf16.mxu1 %v5520_v12  ;;  %9398 = vmatpush1.bf16.msra.mxu1 %v12931_v32  ;;  %v5503_v9 = vld [vmem:[#allocation3 + $0x1c0] sm:$0xff]  ;;  %v5544_v58 = vld [vmem:[#allocation3 + $0x8] sm:$0xfe]  ;;  %v5681_v23 = vrot.slane %v5550_v0, 1  ;;  %v12952_v3 = vld [vmem:[#allocation10 + $0x1d0] ss:$8 sps:$4 sm:$0xff]  }
 0x423   :  { %9399 = vmatprep.subr.bf16.mxu1 %v12936_v50  ;;  %v5505_v39 = vld [vmem:[#allocation3 + $0x1e0] sm:$0xff]  ;;  %v5508_v51 = vld [vmem:[#allocation3 + $0x208] sm:$0xff]  ;;  %v5674_v4 = vrot.slane %v5544_v58, 1  ;;  %v5545_v33 = vld [vmem:[#allocation3 + $0x10] sm:$0x1]  ;;  %v5366_v17 = vrot.slane %v5185_v47, 7 }
 0x424   :  { %v5510_v60 = vld [vmem:[#allocation3 + $0x228] sm:$0xff]  ;;  %v5523_v43 = vpack.c.bf16 %v5505_v39, %v5503_v9  ;;  %v5543_v6 = vld [vmem:[#allocation3] sm:$0xfe]  ;;  %v5549_v26 = vld [vmem:[#allocation3 + $0x30] sm:$0x1]  ;;  %v5672_v50 = vrot.slane %v5545_v33, 1 }
 0x425   :  { %v12949_v13 = vld [vmem:[#allocation10 + $0x1c0] ss:$8 sps:$4 sm:$0xff]   ;;  %v5526_v28 = vpack.c.bf16 %v5510_v60, %v5508_v51  ;;  %v12957_v31 = vld [vmem:[#allocation10 + $0x1e4] ss:$8 sps:$4 sm:$0xff]   ;;  %v5676_v16 = vsel %vm293_vm0, %v5674_v4, %v5675_v8  ;;  %v5554_v55 = vld [vmem:[#allocation3 + $0x58] sm:$0x1] }
 0x426   :  { %9400 = vmatpush1.bf16.msra.mxu1 %v12934_v34  ;;  %v5548_v53 = vld [vmem:[#allocation3 + $0x28] sm:$0xfe]  ;;  %v5507_v36 = vld [vmem:[#allocation3 + $0x200] sm:$0xff]  ;;  %v5558_v61 = vld [vmem:[#allocation3 + $0x78] sm:$0x1]  ;;  %v5671_v7 = vrot.slane %v5543_v6, 1 }
 0x427   :  { %9401 = vmatprep.subr.bf16.mxu1 %v12939_v62  ;;  %v5680_v29 = vrot.slane %v5548_v53, 1  ;;  %v5509_v40 = vld [vmem:[#allocation3 + $0x220] sm:$0xff]  ;;  %v5552_v46 = vld [vmem:[#allocation3 + $0x48] sm:$0xfe]  ;;  %v5678_v62 = vrot.slane %v5549_v26, 1  ;;  %v5687_v15 = vrot.slane %v5554_v55, 1 }
 0x428   :  { %v12955_v41 = vld [vmem:[#allocation10 + $0x1e0] ss:$8 sps:$4 sm:$0xff]   ;;  %v5525_v63 = vpack.c.bf16 %v5509_v40, %v5507_v36  ;;  %v12960_v32 = vld [vmem:[#allocation10 + $0x1f4] ss:$8 sps:$4 sm:$0xff]   ;;  %v5686_v14 = vrot.slane %v5552_v46, 1 }
 0x429   :  { %9345 = vmatmul.mubr.bf16.gmra.mrb[16].mxu1 %v5519_v20  ;;  %v5547_v44 = vld [vmem:[#allocation3 + $0x20] sm:$0xfe]  ;;  %v5682_v19 = vsel %vm293_vm0, %v5680_v29, %v5681_v23  ;;  %v5556_v59 = vld [vmem:[#allocation3 + $0x68] sm:$0xfe]  ;;  %v5693_v20 = vrot.slane %v5558_v61, 1 }
 0x42a   :  { %9354 = vmatprep.mubr.bf16.mxu1 %v5522_v45  ;;  %9402 = vmatpush1.bf16.msra.mxu1 %v12937_v18  ;;  %v5677_v12 = vrot.slane %v5547_v44, 1  ;;  %v5800_v34 = vpack.c.bf16 %v5682_v19, %v5676_v16  ;;  %v5692_v18 = vrot.slane %v5556_v59, 1  ;;  %5444 = vst [vmem:[#allocation3 + $0x108] sm:$0xfe] %v5366_v17  ;;  %5446 = vst [vmem:[#allocation3 + $0x118] sm:$0x1] %v5366_v17 }
 0x42b   :  { %9403 = vmatprep.subr.bf16.mxu1 %v12942_v30  ;;  %v12958_v30 = vld [vmem:[#allocation10 + $0x1f0] ss:$8 sps:$4 sm:$0xff]   ;;  %v12963_v45 = vld [vmem:[#allocation10 + $0x204] ss:$8 sps:$4 sm:$0xff]   ;;  %v12961_v5 = vld [vmem:[#allocation10 + $0x200] ss:$8 sps:$4 sm:$0xff]  }
 0x42c   :  { %v5679_v25 = vsel %vm293_vm0, %v5677_v12, %v5678_v62  ;;  %v5551_v57 = vld [vmem:[#allocation3 + $0x40] sm:$0xfe]  ;;  %v5553_v11 = vld [vmem:[#allocation3 + $0x50] sm:$0x1]  ;;  %v5566_v9 = vld [vmem:[#allocation3 + $0xb8] sm:$0x1] }
 0x42d   :  { %v5555_v2 = vld [vmem:[#allocation3 + $0x60] sm:$0xfe]  ;;  %v5683_v51 = vrot.slane %v5551_v57, 1  ;;  %v5684_v27 = vrot.slane %v5553_v11, 1  ;;  %v12964_v4 = vld [vmem:[#allocation10 + $0x210] ss:$8 sps:$4 sm:$0xff]  }
 0x42e   :  { %9404 = vmatpush1.bf16.msra.mxu1 %v12940_v21  ;;  %v5365_v21 = vrot.slane %v5184_v42, 7  ;;  %v12966_v58 = vld [vmem:[#allocation10 + $0x214] ss:$8 sps:$4 sm:$0xff]   ;;  %v12969_v8 = vld [vmem:[#allocation10 + $0x224] ss:$8 sps:$4 sm:$0xff]  }
 0x42f   :  { %9405 = vmatprep.subr.bf16.mxu1 %v12945_v24  ;;  %v5673_v24 = vsel %vm293_vm0, %v5671_v7, %v5672_v50  ;;  %v5685_v29 = vsel %vm293_vm0, %v5683_v51, %v5684_v27  ;;  %v5561_v6 = vld [vmem:[#allocation3 + $0x90] sm:$0x1]  ;;  %v5563_v40 = vld [vmem:[#allocation3 + $0xa0] sm:$0xfe]  ;;  %v5568_v44 = vld [vmem:[#allocation3 + $0xc8] sm:$0xfe] }
 0x430   :  { %5443 = vst [vmem:[#allocation3 + $0x100] sm:$0xfe] %v5365_v21  ;;  %5445 = vst [vmem:[#allocation3 + $0x110] sm:$0x1] %v5365_v21  ;;  %v5799_v39 = vpack.c.bf16 %v5679_v25, %v5673_v24  ;;  %v5570_v16 = vld [vmem:[#allocation3 + $0xd8] sm:$0x1] }
 0x431   :  { %9355 = vmatmul.mubr.bf16.gmra.mrb[20].mxu1 %v5521_v56  ;;  %v5694_v56 = vsel %vm293_vm0, %v5692_v18, %v5693_v20  ;;  %v5572_v19 = vld [vmem:[#allocation3 + $0xe8] sm:$0xfe]  ;;  %v5574_v26 = vld [vmem:[#allocation3 + $0xf8] sm:$0x1]  ;;  %v5696_v61 = vrot.slane %v5561_v6, 1  ;;  %v5710_v7 = vrot.slane %v5568_v44, 1 }
 0x432   :  { %9364 = vmatprep.mubr.bf16.mxu1 %v5524_v52  ;;  %9406 = vmatpush1.bf16.msra.mxu1 %v12943_v10  ;;  %v5688_v10 = vsel %vm293_vm0, %v5686_v14, %v5687_v15  ;;  %v5560_v52 = vld [vmem:[#allocation3 + $0x88] sm:$0xfe]  ;;  %v12972_v47 = vld [vmem:[#allocation10 + $0x234] ss:$8 sps:$4 sm:$0xff]   ;;  %v5711_v50 = vrot.slane %v5570_v16, 1  ;;  %v5716_v12 = vrot.slane %v5572_v19, 1 }
 0x433   :  { %9407 = vmatprep.subr.bf16.mxu1 %v12948_v1  ;;  %v5557_v1 = vld [vmem:[#allocation3 + $0x70] sm:$0x1]  ;;  %v5802_v60 = vpack.c.bf16 %v5694_v56, %v5688_v10  ;;  %v5698_v0 = vrot.slane %v5560_v52, 1  ;;  %v12970_v62 = vld [vmem:[#allocation10 + $0x230] ss:$8 sps:$4 sm:$0xff]  }
 0x434   :  { %v5690_v53 = vrot.slane %v5557_v1, 1  ;;  %v12975_v14 = vld [vmem:[#allocation10 + $0x244] ss:$8 sps:$4 sm:$0xff]   ;;  %v5567_v18 = vld [vmem:[#allocation3 + $0xc0] sm:$0xfe] }
 0x435   :  { %v5576_v20 = vld [vmem:[#allocation3 + $0x148] sm:$0xfe]  ;;  %v5578_v42 = vld [vmem:[#allocation3 + $0x158] sm:$0x1]  ;;  %v5569_v21 = vld [vmem:[#allocation3 + $0xd0] sm:$0x1] }
 0x436   :  { %9408 = vmatpush1.bf16.msra.mxu1 %v12946_v48  ;;  %v5562_v48 = vld [vmem:[#allocation3 + $0x98] sm:$0x1]  ;;  %v5571_v24 = vld [vmem:[#allocation3 + $0xe0] sm:$0xfe]  ;;  %v5573_v25 = vld [vmem:[#allocation3 + $0xf0] sm:$0x1] }
 0x437   :  { %9409 = vmatprep.subr.bf16.mxu1 %v12951_v22  ;;  %v5564_v22 = vld [vmem:[#allocation3 + $0xa8] sm:$0xfe]  ;;  %v5582_v11 = vld [vmem:[#allocation3 + $0x178] sm:$0x1]  ;;  %v5708_v52 = vrot.slane %v5569_v21, 1 }
 0x438   :  { %v5580_v57 = vld [vmem:[#allocation3 + $0x168] sm:$0xfe]  ;;  %v12978_v56 = vld [vmem:[#allocation10 + $0x254] ss:$8 sps:$4 sm:$0xff]   ;;  %v5729_v51 = vrot.slane %v5582_v11, 1 }
 0x439   :  { %9365 = vmatmul.mubr.bf16.gmra.mrb[24].mxu1 %v5523_v43  ;;  %v5699_v43 = vrot.slane %v5562_v48, 1  ;;  %v5713_v48 = vrot.slane %v5571_v24, 1  ;;  %v12981_v27 = vld [vmem:[#allocation10 + $0x264] ss:$8 sps:$4 sm:$0xff]   ;;  %v5586_v6 = vld [vmem:[#allocation3 + $0x198] sm:$0x1] }
 0x43a   :  { %9374 = vmatprep.mubr.bf16.mxu1 %v5526_v28  ;;  %9410 = vmatpush1.bf16.msra.mxu1 %v12949_v13  ;;  %v5689_v13 = vrot.slane %v5555_v2, 1  ;;  %v5705_v28 = vrot.slane %v5566_v9, 1  ;;  %v5707_v2 = vrot.slane %v5567_v18, 1  ;;  %v5722_v9 = vrot.slane %v5576_v20, 1  ;;  %v5592_v18 = vld [vmem:[#allocation3 + $0x1c8] sm:$0xfe] }
 0x43b   :  { %9411 = vmatprep.subr.bf16.mxu1 %v12954_v38  ;;  %v5704_v38 = vrot.slane %v5564_v22, 1  ;;  %v5700_v33 = vsel %vm293_vm0, %v5698_v0, %v5699_v43  ;;  %v5714_v22 = vrot.slane %v5573_v25, 1  ;;  %v5594_v20 = vld [vmem:[#allocation3 + $0x1d8] sm:$0x1] }
 0x43c   :  { %v5691_v23 = vsel %vm293_vm0, %v5689_v13, %v5690_v53  ;;  %v5575_v13 = vld [vmem:[#allocation3 + $0x140] sm:$0xfe]  ;;  %v5200_v53 = vmax.f32 %v15647_v35, 0.0  ;;  %v5709_v0 = vsel %vm293_vm0, %v5707_v2, %v5708_v52  ;;  %v12988_v52 = vld [vmem:[#allocation10 + $0x290] ss:$8 sps:$4 sm:$0xff]  }
 0x43d   :  { %v5706_v36 = vsel %vm293_vm0, %v5704_v38, %v5705_v28  ;;  %v5801_v46 = vpack.c.bf16 %v5691_v23, %v5685_v29  ;;  %v5715_v43 = vsel %vm293_vm0, %v5713_v48, %v5714_v22  ;;  %v12979_v38 = vld [vmem:[#allocation10 + $0x260] ss:$8 sps:$4 sm:$0xff]   ;;  %v5577_v28 = vld [vmem:[#allocation3 + $0x150] sm:$0x1]  ;;  %v12984_v35 = vld [vmem:[#allocation10 + $0x274] ss:$8 sps:$4 sm:$0xff]  }
 0x43e   :  { %9412 = vmatpush1.bf16.msra.mxu1 %v12952_v3  ;;  %v12967_v3 = vld [vmem:[#allocation10 + $0x220] ss:$8 sps:$4 sm:$0xff]   ;;  %v5804_v59 = vpack.c.bf16 %v5706_v36, %v5700_v33  ;;  %v5581_v23 = vld [vmem:[#allocation3 + $0x170] sm:$0x1]  ;;  %v5590_v36 = vld [vmem:[#allocation3 + $0x1b8] sm:$0x1] }
 0x43f   :  { %9413 = vmatprep.subr.bf16.mxu1 %v12957_v31  ;;  %v5559_v31 = vld [vmem:[#allocation3 + $0x80] sm:$0xfe]  ;;  %v5588_v33 = vld [vmem:[#allocation3 + $0x1a8] sm:$0xfe]  ;;  %v5720_v16 = vrot.slane %v5577_v28, 1 }
 0x440   :  { %v5695_v55 = vrot.slane %v5559_v31, 1  ;;  %v5381_v31 = vrot.slane %v5200_v53, 7  ;;  %v12990_v21 = vld [vmem:[#allocation10 + $0x294] ss:$8 sps:$4 sm:$0xff]   ;;  %v12993_v48 = vld [vmem:[#allocation10 + $0x2a4] ss:$8 sps:$4 sm:$0xff]  }
 0x441   :  { %9375 = vmatmul.mubr.bf16.gmra.mrb[28].mxu1 %v5525_v63  ;;  %v5701_v63 = vrot.slane %v5563_v40, 1  ;;  %v5805_v40 = vpack.c.bf16 %v5715_v43, %v5709_v0  ;;  %v5597_v53 = vld [vmem:[#allocation3 + $0x1f0] sm:$0x1]  ;;  %v5600_v0 = vld [vmem:[#allocation3 + $0x208] sm:$0xfe] }
 0x442   :  { %9414 = vmatpush1.bf16.msra.mxu1 %v12955_v41  ;;  %9417 = vmatprep.mubr.bf16.mxu1 %v5800_v34  ;;  %v5565_v41 = vld [vmem:[#allocation3 + $0xb0] sm:$0x1]  ;;  %v5717_v34 = vrot.slane %v5574_v26, 1  ;;  %v5697_v17 = vsel %vm293_vm0, %v5695_v55, %v5696_v61  ;;  %5475 = vst [vmem:[#allocation3 + $0x240] sm:$0xfe] %v5381_v31  ;;  %v5726_v26 = vrot.slane %v5581_v23, 1 }
 0x443   :  { %9415 = vmatprep.subr.bf16.mxu1 %v12960_v32  ;;  %v5702_v32 = vrot.slane %v5565_v41, 1  ;;  %v5719_v41 = vrot.slane %v5575_v13, 1  ;;  %5477 = vst [vmem:[#allocation3 + $0x250] sm:$0x1] %v5381_v31  ;;  %v5740_v55 = vrot.slane %v5588_v33, 1  ;;  %v5758_v33 = vrot.slane %v5600_v0, 1 }
 0x444   :  { %v12982_v61 = vld [vmem:[#allocation10 + $0x270] ss:$8 sps:$4 sm:$0xff]   ;;  %v5595_v13 = vld [vmem:[#allocation3 + $0x1e0] sm:$0xfe]  ;;  %v5602_v43 = vld [vmem:[#allocation3 + $0x218] sm:$0x1] }
 0x445   :  { %v5703_v15 = vsel %vm293_vm0, %v5701_v63, %v5702_v32  ;;  %v12987_v63 = vld [vmem:[#allocation10 + $0x284] ss:$8 sps:$4 sm:$0xff]   ;;  %v5721_v32 = vsel %vm293_vm0, %v5719_v41, %v5720_v16  ;;  %v5606_v28 = vld [vmem:[#allocation3 + $0x238] sm:$0x1]  ;;  %v5749_v31 = vrot.slane %v5595_v13, 1 }
 0x446   :  { %9416 = vmatpush1.bf16.msra.mxu1 %v12958_v30  ;;  %v5712_v30 = vsel %vm293_vm0, %v5710_v7, %v5711_v50  ;;  %v5803_v10 = vpack.c.bf16 %v5703_v15, %v5697_v17  ;;  %v12985_v50 = vld [vmem:[#allocation10 + $0x280] ss:$8 sps:$4 sm:$0xff]   ;;  %v5589_v15 = vld [vmem:[#allocation3 + $0x1b0] sm:$0x1]  ;;  %v12994_v41 = vld [vmem:[#allocation10 + $0x2b0] ss:$8 sps:$4 sm:$0xff]  }
 0x447   :  { %9498 = vmatprep.subr.bf16.mxu1 %v12963_v45  ;;  %v5718_v45 = vsel %vm293_vm0, %v5716_v12, %v5717_v34  ;;  %v5583_v12 = vld [vmem:[#allocation3 + $0x180] sm:$0xfe]  ;;  %v5585_v34 = vld [vmem:[#allocation3 + $0x190] sm:$0x1]  ;;  %v5738_v11 = vrot.slane %v5589_v15, 1 }
 0x448   :  { %v5806_v1 = vpack.c.bf16 %v5718_v45, %v5712_v30  ;;  %v5587_v17 = vld [vmem:[#allocation3 + $0x1a0] sm:$0xfe]  ;;  %v5598_v30 = vld [vmem:[#allocation3 + $0x1f8] sm:$0x1]  ;;  %v5731_v24 = vrot.slane %v5583_v12, 1 }
 0x449   :  { %9418 = vmatmul.mubr.bf16.vlgmr.msra.gmra.mrb[0].mxu1 %v5799_v39  ;;  %v5723_v39 = vrot.slane %v5578_v42, 1  ;;  %v5596_v42 = vld [vmem:[#allocation3 + $0x1e8] sm:$0xfe]  ;;  %v5838_v12 = vld [vmem:[#allocation3 + $0x38] sm:$0x3] }
 0x44a   :  { %9427 = vmatprep.mubr.bf16.mxu1 %v5802_v60  ;;  %9499 = vmatpush1.bf16.msra.mxu1 %v12961_v5  ;;  %v12973_v5 = vld [vmem:[#allocation10 + $0x240] ss:$8 sps:$4 sm:$0xff]   ;;  %v12976_v60 = vld [vmem:[#allocation10 + $0x250] ss:$8 sps:$4 sm:$0xff]   ;;  %v5752_v2 = vrot.slane %v5596_v42, 1 }
 0x44b   :  { %9500 = vmatprep.subr.bf16.mxu1 %v12966_v58  ;;  %v5728_v58 = vrot.slane %v5580_v57, 1  ;;  %v5737_v57 = vrot.slane %v5587_v17, 1 }
 0x44d   :  { %v5730_v29 = vsel %vm293_vm0, %v5728_v58, %v5729_v51  ;;  %v5591_v58 = vld [vmem:[#allocation3 + $0x1c0] sm:$0xfe]  ;;  %v5593_v51 = vld [vmem:[#allocation3 + $0x1d0] sm:$0x1] }
 0x44e   :  { %9501 = vmatpush1.bf16.msra.mxu1 %v12964_v4  ;;  %v5579_v4 = vld [vmem:[#allocation3 + $0x160] sm:$0xfe] }
 0x44f   :  { %9502 = vmatprep.subr.bf16.mxu1 %v12969_v8  ;;  %v5724_v8 = vsel %vm293_vm0, %v5722_v9, %v5723_v39  ;;  %v5725_v19 = vrot.slane %v5579_v4, 1  ;;  %v5739_v9 = vsel %vm293_vm0, %v5737_v57, %v5738_v11  ;;  %v12991_v39 = vld [vmem:[#allocation10 + $0x2a0] ss:$8 sps:$4 sm:$0xff]  }
 0x450   :  { %v5808_v44 = vpack.c.bf16 %v5730_v29, %v5724_v8  ;;  %v12996_v8 = vld [vmem:[#allocation10 + $0x2b4] ss:$8 sps:$4 sm:$0xff]   ;;  %v5743_v29 = vrot.slane %v5591_v58, 1  ;;  %v13003_v11 = vld [vmem:[#allocation10 + $0x2e0] ss:$8 sps:$4 sm:$0xff]  }
 0x451   :  { %9428 = vmatmul.mubr.bf16.gmra.mrb[4].mxu1 %v5801_v46  ;;  %v5727_v7 = vsel %vm293_vm0, %v5725_v19, %v5726_v26  ;;  %v5599_v26 = vld [vmem:[#allocation3 + $0x200] sm:$0xfe]  ;;  %v5846_v58 = vld [vmem:[#allocation3 + $0x78] sm:$0x3] }
 0x452   :  { %9437 = vmatprep.mubr.bf16.mxu1 %v5804_v59  ;;  %9503 = vmatpush1.bf16.msra.mxu1 %v12967_v3  ;;  %v5584_v3 = vld [vmem:[#allocation3 + $0x188] sm:$0xfe]  ;;  %v5741_v59 = vrot.slane %v5590_v36, 1  ;;  %v5807_v45 = vpack.c.bf16 %v5727_v7, %v5721_v32  ;;  %v5759_v36 = vrot.slane %v5602_v43, 1  ;;  %v5605_v32 = vld [vmem:[#allocation3 + $0x230] sm:$0x1] }
 0x453   :  { %9504 = vmatprep.subr.bf16.mxu1 %v12972_v47  ;;  %v5734_v46 = vrot.slane %v5584_v3, 1  ;;  %v5735_v47 = vrot.slane %v5586_v6, 1  ;;  %v5744_v3 = vrot.slane %v5593_v51, 1  ;;  %v5750_v6 = vrot.slane %v5597_v53, 1  ;;  %v12997_v7 = vld [vmem:[#allocation10 + $0x2c0] ss:$8 sps:$4 sm:$0xff]  }
 0x455   :  { %v5745_v16 = vsel %vm293_vm0, %v5743_v29, %v5744_v3  ;;  %v5751_v19 = vsel %vm293_vm0, %v5749_v31, %v5750_v6  ;;  %v13006_v29 = vld [vmem:[#allocation10 + $0x2f0] ss:$8 sps:$4 sm:$0xff]   ;;  %v13009_v6 = vld [vmem:[#allocation10 + $0x300] ss:$8 sps:$4 sm:$0xff]  }
 0x456   :  { %9505 = vmatpush1.bf16.msra.mxu1 %v12970_v62  ;;  %v5736_v62 = vsel %vm293_vm0, %v5734_v46, %v5735_v47  ;;  %v5832_v46 = vld [vmem:[#allocation3 + $0x8] sm:$0xfc]  ;;  %v5834_v47 = vld [vmem:[#allocation3 + $0x18] sm:$0x3] }
 0x457   :  { %9506 = vmatprep.subr.bf16.mxu1 %v12975_v14  ;;  %v5742_v14 = vsel %vm293_vm0, %v5740_v55, %v5741_v59  ;;  %v5760_v55 = vsel %vm293_vm0, %v5758_v33, %v5759_v36  ;;  %v5962_v42 = vrot.slane %v5832_v46, 2  ;;  %v5839_v33 = vld [vmem:[#allocation3 + $0x40] sm:$0xfc]  ;;  %v5841_v36 = vld [vmem:[#allocation3 + $0x50] sm:$0x3] }
 0x458   :  { %v5810_v25 = vpack.c.bf16 %v5742_v14, %v5736_v62  ;;  %v13002_v62 = vld [vmem:[#allocation10 + $0x2d4] ss:$8 sps:$4 sm:$0xff]   ;;  %v5755_v14 = vrot.slane %v5599_v26, 1  ;;  %v5852_v26 = vld [vmem:[#allocation3 + $0xa8] sm:$0xfc] }
 0x459   :  { %9438 = vmatmul.mubr.bf16.gmra.mrb[8].mxu1 %v5803_v10  ;;  %v5746_v10 = vrot.slane %v5592_v18, 1  ;;  %v5854_v46 = vld [vmem:[#allocation3 + $0xb8] sm:$0x3] }
 0x45a   :  { %9447 = vmatprep.mubr.bf16.mxu1 %v5806_v1  ;;  %9507 = vmatpush1.bf16.msra.mxu1 %v12973_v5  ;;  %v5732_v5 = vrot.slane %v5585_v34, 1  ;;  %v5753_v1 = vrot.slane %v5598_v30, 1  ;;  %v5811_v34 = vpack.c.bf16 %v5751_v19, %v5745_v16  ;;  %v5963_v30 = vrot.slane %v5834_v47, 2  ;;  %v5848_v16 = vld [vmem:[#allocation3 + $0x88] sm:$0xfc] }
 0x45b   :  { %9508 = vmatprep.subr.bf16.mxu1 %v12978_v56  ;;  %v5747_v56 = vrot.slane %v5594_v20, 1  ;;  %v5762_v20 = vrot.slane %v5605_v32, 1  ;;  %v5850_v19 = vld [vmem:[#allocation3 + $0x98] sm:$0x3] }
 0x45c   :  { %v5733_v22 = vsel %vm293_vm0, %v5731_v24, %v5732_v5  ;;  %v13000_v24 = vld [vmem:[#allocation10 + $0x2d0] ss:$8 sps:$4 sm:$0xff]  }
 0x45d   :  { %v5809_v4 = vpack.c.bf16 %v5739_v9, %v5733_v22  ;;  %v5840_v22 = vld [vmem:[#allocation3 + $0x48] sm:$0xfc]  ;;  %v5842_v9 = vld [vmem:[#allocation3 + $0x58] sm:$0x3] }
 0x45e   :  { %9509 = vmatpush1.bf16.msra.mxu1 %v12976_v60  ;;  %v5748_v60 = vsel %vm293_vm0, %v5746_v10, %v5747_v56  ;;  %v5831_v10 = vld [vmem:[#allocation3] sm:$0xfc]  ;;  %v5833_v56 = vld [vmem:[#allocation3 + $0x10] sm:$0x3] }
 0x45f   :  { %9510 = vmatprep.subr.bf16.mxu1 %v12981_v27  ;;  %v5754_v27 = vsel %vm293_vm0, %v5752_v2, %v5753_v1  ;;  %v5964_v2 = vsel %vm582_vm1, %v5962_v42, %v5963_v30  ;;  %v5960_v53 = vrot.slane %v5833_v56, 2  ;;  %v5847_v42 = vld [vmem:[#allocation3 + $0x80] sm:$0xfc]  ;;  %v5849_v30 = vld [vmem:[#allocation3 + $0x90] sm:$0x3] }
 0x460   :  { %v5812_v23 = vpack.c.bf16 %v5754_v27, %v5748_v60  ;;  %v13008_v60 = vld [vmem:[#allocation10 + $0x2f4] ss:$8 sps:$4 sm:$0xff]   ;;  %v5959_v27 = vrot.slane %v5831_v10, 2 }
 0x461   :  { %9448 = vmatmul.mubr.bf16.gmra.mrb[12].mxu1 %v5805_v40  ;;  %v5862_v10 = vld [vmem:[#allocation3 + $0xf8] sm:$0x3] }
 0x462   :  { %9457 = vmatprep.mubr.bf16.mxu1 %v5808_v44  ;;  %9511 = vmatpush1.bf16.msra.mxu1 %v12979_v38  ;;  %v5604_v38 = vld [vmem:[#allocation3 + $0x228] sm:$0xfe]  ;;  %v5961_v3 = vsel %vm582_vm1, %v5959_v27, %v5960_v53  ;;  %v13018_v27 = vld [vmem:[#allocation10 + $0x330] ss:$8 sps:$4 sm:$0xff]  }
 0x463   :  { %9512 = vmatprep.subr.bf16.mxu1 %v12984_v35  ;;  %v5764_v40 = vrot.slane %v5604_v38, 1  ;;  %v5765_v35 = vrot.slane %v5606_v28, 1  ;;  %v12999_v44 = vld [vmem:[#allocation10 + $0x2c4] ss:$8 sps:$4 sm:$0xff]   ;;  %v5974_v38 = vrot.slane %v5840_v22, 2  ;;  %v5975_v28 = vrot.slane %v5842_v9, 2 }
 0x465   :  { %v5766_v59 = vsel %vm293_vm0, %v5764_v40, %v5765_v35  ;;  %v5976_v40 = vsel %vm582_vm1, %v5974_v38, %v5975_v28  ;;  %v5864_v38 = vld [vmem:[#allocation3 + $0x148] sm:$0xfc]  ;;  %v5866_v28 = vld [vmem:[#allocation3 + $0x158] sm:$0x3] }
 0x466   :  { %9513 = vmatpush1.bf16.msra.mxu1 %v12982_v61  ;;  %v5601_v61 = vld [vmem:[#allocation3 + $0x210] sm:$0x1]  ;;  %v5814_v17 = vpack.c.bf16 %v5766_v59, %v5760_v55  ;;  %v13014_v55 = vld [vmem:[#allocation10 + $0x314] ss:$8 sps:$4 sm:$0xff]   ;;  %v5971_v59 = vrot.slane %v5839_v33, 2 }
 0x467   :  { %9514 = vmatprep.subr.bf16.mxu1 %v12987_v63  ;;  %v5603_v63 = vld [vmem:[#allocation3 + $0x220] sm:$0xfe]  ;;  %v5756_v15 = vrot.slane %v5601_v61, 1  ;;  %v5870_v33 = vld [vmem:[#allocation3 + $0x178] sm:$0x3] }
 0x468   :  { %v5761_v18 = vrot.slane %v5603_v63, 1  ;;  %v5972_v63 = vrot.slane %v5841_v36, 2 }
 0x469   :  { %9458 = vmatmul.mubr.bf16.gmra.mrb[16].mxu1 %v5807_v45  ;;  %v5757_v5 = vsel %vm293_vm0, %v5755_v14, %v5756_v15  ;;  %v13012_v14 = vld [vmem:[#allocation10 + $0x310] ss:$8 sps:$4 sm:$0xff]  }
 0x46a   :  { %9467 = vmatprep.mubr.bf16.mxu1 %v5810_v25  ;;  %9515 = vmatpush1.bf16.msra.mxu1 %v12985_v50  ;;  %v5836_v50 = vld [vmem:[#allocation3 + $0x28] sm:$0xfc]  ;;  %v5763_v57 = vsel %vm293_vm0, %v5761_v18, %v5762_v20  ;;  %v5973_v15 = vsel %vm582_vm1, %v5971_v59, %v5972_v63  ;;  %v13024_v59 = vld [vmem:[#allocation10 + $0x350] ss:$8 sps:$4 sm:$0xff]  }
 0x46b   :  { %9516 = vmatprep.subr.bf16.mxu1 %v12990_v21  ;;  %v5968_v45 = vrot.slane %v5836_v50, 2  ;;  %v5969_v21 = vrot.slane %v5838_v12, 2  ;;  %v13005_v25 = vld [vmem:[#allocation10 + $0x2e4] ss:$8 sps:$4 sm:$0xff]   ;;  %v5813_v51 = vpack.c.bf16 %v5763_v57, %v5757_v5  ;;  %v5986_v50 = vrot.slane %v5848_v16, 2 }
 0x46c   :  { %v5987_v12 = vrot.slane %v5850_v19, 2  ;;  %v13015_v20 = vld [vmem:[#allocation10 + $0x320] ss:$8 sps:$4 sm:$0xff]   ;;  %v5858_v57 = vld [vmem:[#allocation3 + $0xd8] sm:$0x3] }
 0x46d   :  { %v5970_v1 = vsel %vm582_vm1, %v5968_v45, %v5969_v21  ;;  %v5856_v5 = vld [vmem:[#allocation3 + $0xc8] sm:$0xfc] }
 0x46e   :  { %9517 = vmatpush1.bf16.msra.mxu1 %v12988_v52  ;;  %v5835_v52 = vld [vmem:[#allocation3 + $0x20] sm:$0xfc]  ;;  %v6088_v13 = vpack.c.bf16 %v5970_v1, %v5964_v2  ;;  %v5988_v45 = vsel %vm582_vm1, %v5986_v50, %v5987_v12  ;;  %v5983_v1 = vrot.slane %v5847_v42, 2  ;;  %v5865_v12 = vld [vmem:[#allocation3 + $0x150] sm:$0x3] }
 0x46f   :  { %9518 = vmatprep.subr.bf16.mxu1 %v12993_v48  ;;  %v5837_v48 = vld [vmem:[#allocation3 + $0x30] sm:$0x3]  ;;  %v5965_v0 = vrot.slane %v5835_v52, 2  ;;  %v13020_v2 = vld [vmem:[#allocation10 + $0x334] ss:$8 sps:$4 sm:$0xff]  }
 0x470   :  { %v5966_v43 = vrot.slane %v5837_v48, 2  ;;  %v5984_v48 = vrot.slane %v5849_v30, 2  ;;  %v5863_v50 = vld [vmem:[#allocation3 + $0x140] sm:$0xfc]  ;;  %v5878_v42 = vld [vmem:[#allocation3 + $0x1b8] sm:$0x3] }
 0x471   :  { %9468 = vmatmul.mubr.bf16.gmra.mrb[20].mxu1 %v5809_v4 }
 0x472   :  { %9477 = vmatprep.mubr.bf16.mxu1 %v5812_v23  ;;  %9519 = vmatpush1.bf16.msra.mxu1 %v12991_v39  ;;  %v5844_v39 = vld [vmem:[#allocation3 + $0x68] sm:$0xfc]  ;;  %v5967_v31 = vsel %vm582_vm1, %v5965_v0, %v5966_v43  ;;  %v5985_v53 = vsel %vm582_vm1, %v5983_v1, %v5984_v48  ;;  %v5855_v43 = vld [vmem:[#allocation3 + $0xc0] sm:$0xfc]  ;;  %v13030_v1 = vld [vmem:[#allocation10 + $0x370] ss:$8 sps:$4 sm:$0xff]  }
 0x473   :  { %9520 = vmatprep.subr.bf16.mxu1 %v12996_v8  ;;  %v5980_v4 = vrot.slane %v5844_v39, 2  ;;  %v5981_v8 = vrot.slane %v5846_v58, 2  ;;  %v13011_v23 = vld [vmem:[#allocation10 + $0x304] ss:$8 sps:$4 sm:$0xff]   ;;  %v6087_v47 = vpack.c.bf16 %v5967_v31, %v5961_v3  ;;  %v5998_v39 = vrot.slane %v5856_v5, 2 }
 0x474   :  { %v5999_v58 = vrot.slane %v5858_v57, 2  ;;  %v5861_v3 = vld [vmem:[#allocation3 + $0xf0] sm:$0x3]  ;;  %v13021_v31 = vld [vmem:[#allocation10 + $0x340] ss:$8 sps:$4 sm:$0xff]  }
 0x475   :  { %v5982_v35 = vsel %vm582_vm1, %v5980_v4, %v5981_v8  ;;  %v6002_v19 = vrot.slane %v5861_v3, 2 }
 0x476   :  { %9521 = vmatpush1.bf16.msra.mxu1 %v12994_v41  ;;  %v5843_v41 = vld [vmem:[#allocation3 + $0x60] sm:$0xfc]  ;;  %v6090_v61 = vpack.c.bf16 %v5982_v35, %v5976_v40  ;;  %v6000_v4 = vsel %vm582_vm1, %v5998_v39, %v5999_v58  ;;  %v5995_v35 = vrot.slane %v5855_v43, 2  ;;  %v5873_v58 = vld [vmem:[#allocation3 + $0x190] sm:$0x3] }
 0x477   :  { %9522 = vmatprep.subr.bf16.mxu1 %v12999_v44  ;;  %v5845_v44 = vld [vmem:[#allocation3 + $0x70] sm:$0x3]  ;;  %v5977_v32 = vrot.slane %v5843_v41, 2  ;;  %v13026_v40 = vld [vmem:[#allocation10 + $0x354] ss:$8 sps:$4 sm:$0xff]  }
 0x478   :  { %v5871_v39 = vld [vmem:[#allocation3 + $0x180] sm:$0xfc]  ;;  %v5884_v43 = vld [vmem:[#allocation3 + $0x1e8] sm:$0xfc] }
 0x479   :  { %9478 = vmatmul.mubr.bf16.gmra.mrb[24].mxu1 %v5811_v34  ;;  %v5992_v34 = vrot.slane %v5852_v26, 2  ;;  %v6010_v26 = vrot.slane %v5864_v38, 2  ;;  %v5886_v38 = vld [vmem:[#allocation3 + $0x1f8] sm:$0x3] }
 0x47a   :  { %9487 = vmatprep.mubr.bf16.mxu1 %v5814_v17  ;;  %9523 = vmatpush1.bf16.msra.mxu1 %v12997_v7  ;;  %v5978_v7 = vrot.slane %v5845_v44, 2  ;;  %v13017_v17 = vld [vmem:[#allocation10 + $0x324] ss:$8 sps:$4 sm:$0xff]  }
 0x47b   :  { %9524 = vmatprep.subr.bf16.mxu1 %v13002_v62  ;;  %v5993_v62 = vrot.slane %v5854_v46, 2  ;;  %v6011_v46 = vrot.slane %v5866_v28, 2 }
 0x47c   :  { %v5979_v18 = vsel %vm582_vm1, %v5977_v32, %v5978_v7  ;;  %v13027_v7 = vld [vmem:[#allocation10 + $0x360] ss:$8 sps:$4 sm:$0xff]  }
 0x47d   :  { %v5994_v21 = vsel %vm582_vm1, %v5992_v34, %v5993_v62  ;;  %v6089_v56 = vpack.c.bf16 %v5979_v18, %v5973_v15  ;;  %v6012_v34 = vsel %vm582_vm1, %v6010_v26, %v6011_v46  ;;  %v5872_v15 = vld [vmem:[#allocation3 + $0x188] sm:$0xfc]  ;;  %v5874_v18 = vld [vmem:[#allocation3 + $0x198] sm:$0x3]  ;;  %v5879_v26 = vld [vmem:[#allocation3 + $0x1c0] sm:$0xfc] }
 0x47e   :  { %9525 = vmatpush1.bf16.msra.mxu1 %v13000_v24  ;;  %v5851_v24 = vld [vmem:[#allocation3 + $0xa0] sm:$0xfc]  ;;  %v6092_v52 = vpack.c.bf16 %v5994_v21, %v5988_v45  ;;  %v6007_v21 = vrot.slane %v5863_v50, 2  ;;  %v5881_v46 = vld [vmem:[#allocation3 + $0x1d0] sm:$0x3] }
 0x47f   :  { %9526 = vmatprep.subr.bf16.mxu1 %v13005_v25  ;;  %v5853_v25 = vld [vmem:[#allocation3 + $0xb0] sm:$0x3]  ;;  %v5989_v22 = vrot.slane %v5851_v24, 2  ;;  %v13032_v45 = vld [vmem:[#allocation10 + $0x374] ss:$8 sps:$4 sm:$0xff]  }
 0x480   :  { %v5990_v9 = vrot.slane %v5853_v25, 2  ;;  %v6008_v25 = vrot.slane %v5865_v12, 2  ;;  %v5894_v50 = vld [vmem:[#allocation3 + $0x238] sm:$0x3] }
 0x481   :  { %9488 = vmatmul.mubr.bf16.gmra.mrb[28].mxu1 %v5813_v51 }
 0x482   :  { %9527 = vmatpush1.bf16.msra.mxu1 %v13003_v11  ;;  %9530 = vmatprep.mubr.bf16.mxu1 %v6088_v13  ;;  %v5860_v11 = vld [vmem:[#allocation3 + $0xe8] sm:$0xfc]  ;;  %v5991_v0 = vsel %vm582_vm1, %v5989_v22, %v5990_v9  ;;  %v6009_v48 = vsel %vm582_vm1, %v6007_v21, %v6008_v25  ;;  %v13042_v21 = vld [vmem:[#allocation10 + $0x3b0] ss:$8 sps:$4 sm:$0xff]  }
 0x483   :  { %9528 = vmatprep.subr.bf16.mxu1 %v13008_v60  ;;  %v6004_v51 = vrot.slane %v5860_v11, 2  ;;  %v6005_v60 = vrot.slane %v5862_v10, 2  ;;  %v13023_v13 = vld [vmem:[#allocation10 + $0x344] ss:$8 sps:$4 sm:$0xff]   ;;  %v6091_v36 = vpack.c.bf16 %v5991_v0, %v5985_v53  ;;  %v6022_v11 = vrot.slane %v5872_v15, 2 }
 0x484   :  { %v6023_v10 = vrot.slane %v5874_v18, 2  ;;  %v13033_v9 = vld [vmem:[#allocation10 + $0x380] ss:$8 sps:$4 sm:$0xff]   ;;  %v5882_v0 = vld [vmem:[#allocation3 + $0x1d8] sm:$0x3] }
 0x485   :  { %v6006_v8 = vsel %vm582_vm1, %v6004_v51, %v6005_v60  ;;  %v5880_v53 = vld [vmem:[#allocation3 + $0x1c8] sm:$0xfc] }
 0x486   :  { %9529 = vmatpush1.bf16.msra.mxu1 %v13006_v29  ;;  %v5857_v29 = vld [vmem:[#allocation3 + $0xd0] sm:$0x3]  ;;  %v6094_v41 = vpack.c.bf16 %v6006_v8, %v6000_v4  ;;  %v6024_v51 = vsel %vm582_vm1, %v6022_v11, %v6023_v10  ;;  %v13038_v4 = vld [vmem:[#allocation10 + $0x394] ss:$8 sps:$4 sm:$0xff]   ;;  %v6019_v8 = vrot.slane %v5871_v39, 2 }
 0x487   :  { %9611 = vmatprep.subr.bf16.mxu1 %v13011_v23  ;;  %v5859_v23 = vld [vmem:[#allocation3 + $0xe0] sm:$0xfc]  ;;  %v5996_v44 = vrot.slane %v5857_v29, 2 }
 0x488   :  { %v6001_v16 = vrot.slane %v5859_v23, 2  ;;  %v6020_v23 = vrot.slane %v5873_v58, 2 }
 0x489   :  { %9531 = vmatmul.mubr.bf16.vlgmr.msra.gmra.mrb[0].mxu1 %v6087_v47  ;;  %v5997_v63 = vsel %vm582_vm1, %v5995_v35, %v5996_v44  ;;  %v13036_v35 = vld [vmem:[#allocation10 + $0x390] ss:$8 sps:$4 sm:$0xff]  }
 0x48a   :  { %9540 = vmatprep.mubr.bf16.mxu1 %v6090_v61  ;;  %9612 = vmatpush1.bf16.msra.mxu1 %v13009_v6  ;;  %v5868_v6 = vld [vmem:[#allocation3 + $0x168] sm:$0xfc]  ;;  %v6003_v32 = vsel %vm582_vm1, %v6001_v16, %v6002_v19  ;;  %v6021_v44 = vsel %vm582_vm1, %v6019_v8, %v6020_v23  ;;  %v13056_v8 = vld [vmem:[#allocation10 + $0x3f4] ss:$8 sps:$4 sm:$0xff]   ;;  %v13054_v23 = vld [vmem:[#allocation10 + $0x3f0] ss:$8 sps:$4 sm:$0xff]  }
 0x48b   :  { %9613 = vmatprep.subr.bf16.mxu1 %v13014_v55  ;;  %v6016_v47 = vrot.slane %v5868_v6, 2  ;;  %v6017_v55 = vrot.slane %v5870_v33, 2  ;;  %v13029_v61 = vld [vmem:[#allocation10 + $0x364] ss:$8 sps:$4 sm:$0xff]   ;;  %v6093_v30 = vpack.c.bf16 %v6003_v32, %v5997_v63  ;;  %v6034_v6 = vrot.slane %v5880_v53, 2 }
 0x48c   :  { %v6035_v33 = vrot.slane %v5882_v0, 2  ;;  %v13039_v19 = vld [vmem:[#allocation10 + $0x3a0] ss:$8 sps:$4 sm:$0xff]   ;;  %v5890_v32 = vld [vmem:[#allocation3 + $0x218] sm:$0x3] }
 0x48d   :  { %v6018_v62 = vsel %vm582_vm1, %v6016_v47, %v6017_v55  ;;  %v5888_v63 = vld [vmem:[#allocation3 + $0x208] sm:$0xfc] }
 0x48e   :  { %9614 = vmatpush1.bf16.msra.mxu1 %v13012_v14  ;;  %v5867_v14 = vld [vmem:[#allocation3 + $0x160] sm:$0xfc]  ;;  %v6096_v24 = vpack.c.bf16 %v6018_v62, %v6012_v34  ;;  %v6036_v47 = vsel %vm582_vm1, %v6034_v6, %v6035_v33  ;;  %v6031_v62 = vrot.slane %v5879_v26, 2  ;;  %v6124_v33 = vld [vmem:[#allocation3 + $0x68] sm:$0xff] }
 0x48f   :  { %9615 = vmatprep.subr.bf16.mxu1 %v13017_v17  ;;  %v5869_v17 = vld [vmem:[#allocation3 + $0x170] sm:$0x3]  ;;  %v6013_v5 = vrot.slane %v5867_v14, 2  ;;  %v13044_v34 = vld [vmem:[#allocation10 + $0x3b4] ss:$8 sps:$4 sm:$0xff]  }
 0x490   :  { %v6014_v57 = vrot.slane %v5869_v17, 2  ;;  %v6032_v17 = vrot.slane %v5881_v46, 2  ;;  %v6121_v6 = vld [vmem:[#allocation3 + $0x40] sm:$0xff] }
 0x491   :  { %9541 = vmatmul.mubr.bf16.gmra.mrb[4].mxu1 %v6089_v56  ;;  %v6123_v26 = vld [vmem:[#allocation3 + $0x60] sm:$0xff] }
 0x492   :  { %9550 = vmatprep.mubr.bf16.mxu1 %v6092_v52  ;;  %9616 = vmatpush1.bf16.msra.mxu1 %v13015_v20  ;;  %v5876_v20 = vld [vmem:[#allocation3 + $0x1a8] sm:$0xfc]  ;;  %v6015_v22 = vsel %vm582_vm1, %v6013_v5, %v6014_v57  ;;  %v6033_v25 = vsel %vm582_vm1, %v6031_v62, %v6032_v17  ;;  %v5887_v57 = vld [vmem:[#allocation3 + $0x200] sm:$0xfc] }
 0x493   :  { %9617 = vmatprep.subr.bf16.mxu1 %v13020_v2  ;;  %v6028_v56 = vrot.slane %v5876_v20, 2  ;;  %v6029_v2 = vrot.slane %v5878_v42, 2  ;;  %v13035_v52 = vld [vmem:[#allocation10 + $0x384] ss:$8 sps:$4 sm:$0xff]   ;;  %v6095_v28 = vpack.c.bf16 %v6015_v22, %v6009_v48  ;;  %v6046_v20 = vrot.slane %v5888_v63, 2  ;;  %v6125_v46 = vld [vmem:[#allocation3 + $0x80] sm:$0xff] }
 0x494   :  { %v6047_v42 = vrot.slane %v5890_v32, 2  ;;  %v13050_v22 = vld [vmem:[#allocation10 + $0x3d4] ss:$8 sps:$4 sm:$0xff]   ;;  %v6132_v62 = vld [vmem:[#allocation3 + $0xe8] sm:$0xff] }
 0x495   :  { %v6030_v60 = vsel %vm582_vm1, %v6028_v56, %v6029_v2  ;;  %v5889_v56 = vld [vmem:[#allocation3 + $0x210] sm:$0x3]  ;;  %v5891_v2 = vld [vmem:[#allocation3 + $0x220] sm:$0xfc] }
 0x496   :  { %9618 = vmatpush1.bf16.msra.mxu1 %v13018_v27  ;;  %v5875_v27 = vld [vmem:[#allocation3 + $0x1a0] sm:$0xfc]  ;;  %v6098_v29 = vpack.c.bf16 %v6030_v60, %v6024_v51  ;;  %v6048_v11 = vsel %vm582_vm1, %v6046_v20, %v6047_v42  ;;  %v6044_v58 = vrot.slane %v5889_v56, 2  ;;  %v6049_v51 = vrot.slane %v5891_v2, 2  ;;  %v13072_v42 = vld [vmem:[#allocation10 + $0x450] ss:$8 sps:$4 sm:$0xff]  }
 0x497   :  { %9619 = vmatprep.subr.bf16.mxu1 %v13023_v13  ;;  %v5877_v13 = vld [vmem:[#allocation3 + $0x1b0] sm:$0x3]  ;;  %v6025_v3 = vrot.slane %v5875_v27, 2  ;;  %v13048_v27 = vld [vmem:[#allocation10 + $0x3d0] ss:$8 sps:$4 sm:$0xff]  }
 0x498   :  { %v13068_v63 = vld [vmem:[#allocation10 + $0x434] ss:$8 sps:$4 sm:$0xff]   ;;  %v13069_v17 = vld [vmem:[#allocation10 + $0x440] ss:$8 sps:$4 sm:$0xff]   ;;  %v13078_v56 = vld [vmem:[#allocation10 + $0x470] ss:$8 sps:$4 sm:$0xff]  }
 0x499   :  { %9551 = vmatmul.mubr.bf16.gmra.mrb[8].mxu1 %v6091_v36  ;;  %v6040_v36 = vrot.slane %v5884_v43, 2  ;;  %v6120_v43 = vld [vmem:[#allocation3 + $0x28] sm:$0xff] }
 0x49a   :  { %9560 = vmatprep.mubr.bf16.mxu1 %v6094_v41  ;;  %9620 = vmatpush1.bf16.msra.mxu1 %v13021_v31  ;;  %v6026_v31 = vrot.slane %v5877_v13, 2  ;;  %v13041_v41 = vld [vmem:[#allocation10 + $0x3a4] ss:$8 sps:$4 sm:$0xff]  }
 0x49b   :  { %9621 = vmatprep.subr.bf16.mxu1 %v13026_v40  ;;  %v6041_v40 = vrot.slane %v5886_v38, 2  ;;  %v13053_v13 = vld [vmem:[#allocation10 + $0x3e4] ss:$8 sps:$4 sm:$0xff]  }
 0x49c   :  { %v6027_v16 = vsel %vm582_vm1, %v6025_v3, %v6026_v31  ;;  %v6122_v38 = vld [vmem:[#allocation3 + $0x48] sm:$0xff]  ;;  %v6119_v31 = vld [vmem:[#allocation3 + $0x20] sm:$0xff] }
 0x49d   :  { %v6042_v55 = vsel %vm582_vm1, %v6040_v36, %v6041_v40  ;;  %v6097_v12 = vpack.c.bf16 %v6027_v16, %v6021_v44  ;;  %v13059_v3 = vld [vmem:[#allocation10 + $0x404] ss:$8 sps:$4 sm:$0xff]   ;;  %v13057_v40 = vld [vmem:[#allocation10 + $0x400] ss:$8 sps:$4 sm:$0xff]   ;;  %v13060_v16 = vld [vmem:[#allocation10 + $0x410] ss:$8 sps:$4 sm:$0xff]  }
 0x49e   :  { %9622 = vmatpush1.bf16.msra.mxu1 %v13024_v59  ;;  %v5883_v59 = vld [vmem:[#allocation3 + $0x1e0] sm:$0xfc]  ;;  %v6100_v14 = vpack.c.bf16 %v6042_v55, %v6036_v47  ;;  %v6126_v36 = vld [vmem:[#allocation3 + $0x88] sm:$0xff] }
 0x49f   :  { %9623 = vmatprep.subr.bf16.mxu1 %v13029_v61  ;;  %v5885_v61 = vld [vmem:[#allocation3 + $0x1f0] sm:$0x3]  ;;  %v6037_v15 = vrot.slane %v5883_v59, 2  ;;  %v6154_v44 = vpack.c.bf16 %v6126_v36, %v6124_v33  ;;  %v6128_v47 = vld [vmem:[#allocation3 + $0xa8] sm:$0xff] }
 0x4a0   :  { %v6038_v18 = vrot.slane %v5885_v61, 2  ;;  %v6130_v55 = vld [vmem:[#allocation3 + $0xc8] sm:$0xff]  ;;  %v6153_v61 = vpack.c.bf16 %v6125_v46, %v6123_v26 }
 0x4a1   :  { %9561 = vmatmul.mubr.bf16.gmra.mrb[12].mxu1 %v6093_v30  ;;  %v13063_v59 = vld [vmem:[#allocation10 + $0x420] ss:$8 sps:$4 sm:$0xff]   ;;  %v6156_v32 = vpack.c.bf16 %v6130_v55, %v6128_v47  ;;  %v13083_v2 = vld [vmem:[#allocation10 + $0x484] ss:$8 sps:$4 sm:$0xff]  }
 0x4a2   :  { %9570 = vmatprep.mubr.bf16.mxu1 %v6096_v24  ;;  %9624 = vmatpush1.bf16.msra.mxu1 %v13027_v7  ;;  %v5892_v7 = vld [vmem:[#allocation3 + $0x228] sm:$0xfc]  ;;  %v6039_v5 = vsel %vm582_vm1, %v6037_v15, %v6038_v18  ;;  %v13074_v18 = vld [vmem:[#allocation10 + $0x454] ss:$8 sps:$4 sm:$0xff]  }
 0x4a3   :  { %9625 = vmatprep.subr.bf16.mxu1 %v13032_v45  ;;  %v6052_v30 = vrot.slane %v5892_v7, 2  ;;  %v6053_v45 = vrot.slane %v5894_v50, 2  ;;  %v13047_v24 = vld [vmem:[#allocation10 + $0x3c4] ss:$8 sps:$4 sm:$0xff]   ;;  %v6099_v48 = vpack.c.bf16 %v6039_v5, %v6033_v25  ;;  %v13066_v7 = vld [vmem:[#allocation10 + $0x430] ss:$8 sps:$4 sm:$0xff]  }
 0x4a4   :  { %v13071_v50 = vld [vmem:[#allocation10 + $0x444] ss:$8 sps:$4 sm:$0xff]   ;;  %v13075_v5 = vld [vmem:[#allocation10 + $0x460] ss:$8 sps:$4 sm:$0xff]  }
 0x4a5   :  { %v6054_v10 = vsel %vm582_vm1, %v6052_v30, %v6053_v45  ;;  %v13077_v30 = vld [vmem:[#allocation10 + $0x464] ss:$8 sps:$4 sm:$0xff]   ;;  %v6131_v45 = vld [vmem:[#allocation3 + $0xe0] sm:$0xff] }
 0x4a6   :  { %9626 = vmatpush1.bf16.msra.mxu1 %v13030_v1  ;;  %v5893_v1 = vld [vmem:[#allocation3 + $0x230] sm:$0x3]  ;;  %v6102_v39 = vpack.c.bf16 %v6054_v10, %v6048_v11  ;;  %v6138_v25 = vld [vmem:[#allocation3 + $0x188] sm:$0xff]  ;;  %v13080_v11 = vld [vmem:[#allocation10 + $0x474] ss:$8 sps:$4 sm:$0xff]  }
 0x4a7   :  { %9627 = vmatprep.subr.bf16.mxu1 %v13035_v52  ;;  %v13045_v52 = vld [vmem:[#allocation10 + $0x3c0] ss:$8 sps:$4 sm:$0xff]   ;;  %v6050_v60 = vrot.slane %v5893_v1, 2 }
 0x4a8   :  { %v6135_v1 = vld [vmem:[#allocation3 + $0x160] sm:$0xff]  ;;  %v6150_v33 = vld [vmem:[#allocation3 + $0x248] sm:$0xff] }
 0x4a9   :  { %9571 = vmatmul.mubr.bf16.gmra.mrb[16].mxu1 %v6095_v28  ;;  %v6051_v0 = vsel %vm582_vm1, %v6049_v51, %v6050_v60  ;;  %v13051_v28 = vld [vmem:[#allocation10 + $0x3e0] ss:$8 sps:$4 sm:$0xff]   ;;  %v13084_v60 = vld [vmem:[#allocation10 + $0x490] ss:$8 sps:$4 sm:$0xff]  }
 0x4aa   :  { %9580 = vmatprep.mubr.bf16.mxu1 %v6098_v29  ;;  %9628 = vmatpush1.bf16.msra.mxu1 %v13033_v9  ;;  %v6043_v9 = vrot.slane %v5887_v57, 2  ;;  %v6152_v29 = vpack.c.bf16 %v6122_v38, %v6120_v43  ;;  %v6146_v43 = vld [vmem:[#allocation3 + $0x208] sm:$0xff] }
 0x4ab   :  { %9629 = vmatprep.subr.bf16.mxu1 %v13038_v4  ;;  %v13087_v38 = vld [vmem:[#allocation10 + $0x4a0] ss:$8 sps:$4 sm:$0xff]  }
 0x4ac   :  { %v6045_v53 = vsel %vm582_vm1, %v6043_v9, %v6044_v58  ;;  %v13081_v9 = vld [vmem:[#allocation10 + $0x480] ss:$8 sps:$4 sm:$0xff]   ;;  %v13086_v58 = vld [vmem:[#allocation10 + $0x494] ss:$8 sps:$4 sm:$0xff]  }
 0x4ad   :  { %v6101_v4 = vpack.c.bf16 %v6051_v0, %v6045_v53  ;;  %v6141_v53 = vld [vmem:[#allocation3 + $0x1c0] sm:$0xff]  ;;  %v6144_v0 = vld [vmem:[#allocation3 + $0x1e8] sm:$0xff] }
 0x4ae   :  { %9630 = vmatpush1.bf16.msra.mxu1 %v13036_v35  ;;  %v6151_v35 = vpack.c.bf16 %v6121_v6, %v6119_v31  ;;  %v6145_v31 = vld [vmem:[#allocation3 + $0x200] sm:$0xff]  ;;  %v6148_v6 = vld [vmem:[#allocation3 + $0x228] sm:$0xff] }
 0x4af   :  { %9631 = vmatprep.subr.bf16.mxu1 %v13041_v41  ;;  %v13062_v41 = vld [vmem:[#allocation10 + $0x414] ss:$8 sps:$4 sm:$0xff]   ;;  %v6184_v36 = vld [vmem:[#allocation3 + $0x28] sm:$0xfe]  ;;  %v6166_v26 = vpack.c.bf16 %v6150_v33, %v6148_v6 }
 0x4b0   :  { %v6314_v46 = vrot.slane %v6184_v36, 1 }
 0x4b1   :  { %9581 = vmatmul.mubr.bf16.gmra.mrb[20].mxu1 %v6097_v12  ;;  %v6127_v12 = vld [vmem:[#allocation3 + $0xa0] sm:$0xff] }
 0x4b2   :  { %9590 = vmatprep.mubr.bf16.mxu1 %v6100_v14  ;;  %9632 = vmatpush1.bf16.msra.mxu1 %v13039_v19  ;;  %v13065_v19 = vld [vmem:[#allocation10 + $0x424] ss:$8 sps:$4 sm:$0xff]  }
 0x4b3   :  { %9633 = vmatprep.subr.bf16.mxu1 %v13044_v34  ;;  %v6129_v34 = vld [vmem:[#allocation3 + $0xc0] sm:$0xff]  ;;  %v6134_v14 = vld [vmem:[#allocation3 + $0x108] sm:$0xff] }
 0x4b4   :  { %v6155_v15 = vpack.c.bf16 %v6129_v34, %v6127_v12  ;;  %v6158_v20 = vpack.c.bf16 %v6134_v14, %v6132_v62  ;;  %v6185_v12 = vld [vmem:[#allocation3 + $0x30] sm:$0x1]  ;;  %v6187_v34 = vld [vmem:[#allocation3 + $0x40] sm:$0xfe] }
 0x4b6   :  { %9634 = vmatpush1.bf16.msra.mxu1 %v13042_v21  ;;  %v6133_v21 = vld [vmem:[#allocation3 + $0x100] sm:$0xff] }
 0x4b7   :  { %9635 = vmatprep.subr.bf16.mxu1 %v13047_v24  ;;  %v6136_v24 = vld [vmem:[#allocation3 + $0x168] sm:$0xff]  ;;  %v6157_v57 = vpack.c.bf16 %v6133_v21, %v6131_v45  ;;  %v13104_v21 = vld [vmem:[#allocation10 + $0x4f4] ss:$8 sps:$4 sm:$0xff]  }
 0x4b8   :  { %v6160_v10 = vpack.c.bf16 %v6138_v25, %v6136_v24 }
 0x4b9   :  { %9591 = vmatmul.mubr.bf16.gmra.mrb[24].mxu1 %v6099_v48  ;;  %v6140_v48 = vld [vmem:[#allocation3 + $0x1a8] sm:$0xff] }
 0x4ba   :  { %9600 = vmatprep.mubr.bf16.mxu1 %v6102_v39  ;;  %9636 = vmatpush1.bf16.msra.mxu1 %v13045_v52  ;;  %v6137_v52 = vld [vmem:[#allocation3 + $0x180] sm:$0xff] }
 0x4bb   :  { %9637 = vmatprep.subr.bf16.mxu1 %v13050_v22  ;;  %v6142_v22 = vld [vmem:[#allocation3 + $0x1c8] sm:$0xff]  ;;  %v6159_v39 = vpack.c.bf16 %v6137_v52, %v6135_v1  ;;  %v13102_v52 = vld [vmem:[#allocation10 + $0x4f0] ss:$8 sps:$4 sm:$0xff]  }
 0x4bc   :  { %v6162_v51 = vpack.c.bf16 %v6142_v22, %v6140_v48  ;;  %v13107_v48 = vld [vmem:[#allocation10 + $0x504] ss:$8 sps:$4 sm:$0xff]  }
 0x4be   :  { %9638 = vmatpush1.bf16.msra.mxu1 %v13048_v27  ;;  %v13089_v27 = vld [vmem:[#allocation10 + $0x4a4] ss:$8 sps:$4 sm:$0xff]  }
 0x4bf   :  { %9639 = vmatprep.subr.bf16.mxu1 %v13053_v13  ;;  %v6139_v13 = vld [vmem:[#allocation3 + $0x1a0] sm:$0xff] }
 0x4c1   :  { %9601 = vmatmul.mubr.bf16.gmra.mrb[28].mxu1 %v6101_v4  ;;  %v13092_v4 = vld [vmem:[#allocation10 + $0x4b4] ss:$8 sps:$4 sm:$0xff]  }
 0x4c2   :  { %9640 = vmatpush1.bf16.msra.mxu1 %v13051_v28  ;;  %9643 = vmatprep.mubr.bf16.mxu1 %v6152_v29  ;;  %v6161_v28 = vpack.c.bf16 %v6141_v53, %v6139_v13  ;;  %v13090_v29 = vld [vmem:[#allocation10 + $0x4b0] ss:$8 sps:$4 sm:$0xff]   ;;  %v6197_v13 = vld [vmem:[#allocation3 + $0x90] sm:$0x1]  ;;  %v6200_v53 = vld [vmem:[#allocation3 + $0xa8] sm:$0xfe] }
 0x4c3   :  { %9641 = vmatprep.subr.bf16.mxu1 %v13056_v8  ;;  %v6164_v8 = vpack.c.bf16 %v6146_v43, %v6144_v0  ;;  %v6202_v0 = vld [vmem:[#allocation3 + $0xb8] sm:$0x1]  ;;  %v13105_v43 = vld [vmem:[#allocation10 + $0x500] ss:$8 sps:$4 sm:$0xff]   ;;  %v6330_v6 = vrot.slane %v6197_v13, 1  ;;  %v6338_v33 = vrot.slane %v6200_v53, 1 }
 0x4c4   :  { %v6339_v36 = vrot.slane %v6202_v0, 1 }
 0x4c6   :  { %9642 = vmatpush1.bf16.msra.mxu1 %v13054_v23  ;;  %v13095_v23 = vld [vmem:[#allocation10 + $0x4c4] ss:$8 sps:$4 sm:$0xff]  }
 0x4c7   :  { %9724 = vmatprep.subr.bf16.mxu1 %v13059_v3  ;;  %v6143_v3 = vld [vmem:[#allocation3 + $0x1e0] sm:$0xff] }
 0x4c9   :  { %9644 = vmatmul.mubr.bf16.vlgmr.msra.gmra.mrb[0].mxu1 %v6151_v35  ;;  %v13093_v35 = vld [vmem:[#allocation10 + $0x4c0] ss:$8 sps:$4 sm:$0xff]  }
 0x4ca   :  { %9653 = vmatprep.mubr.bf16.mxu1 %v6154_v44  ;;  %9725 = vmatpush1.bf16.msra.mxu1 %v13057_v40  ;;  %v6186_v40 = vld [vmem:[#allocation3 + $0x38] sm:$0x1] }
 0x4cb   :  { %9726 = vmatprep.subr.bf16.mxu1 %v13062_v41  ;;  %v6188_v41 = vld [vmem:[#allocation3 + $0x48] sm:$0xfe]  ;;  %v6190_v44 = vld [vmem:[#allocation3 + $0x58] sm:$0x1]  ;;  %v6315_v47 = vrot.slane %v6186_v40, 1 }
 0x4cc   :  { %v6320_v55 = vrot.slane %v6188_v41, 1  ;;  %v13108_v41 = vld [vmem:[#allocation10 + $0x510] ss:$8 sps:$4 sm:$0xff]  }
 0x4cd   :  { %v6316_v62 = vsel %vm293_vm0, %v6314_v46, %v6315_v47  ;;  %v6201_v46 = vld [vmem:[#allocation3 + $0xb0] sm:$0x1]  ;;  %v6203_v47 = vld [vmem:[#allocation3 + $0xc0] sm:$0xfe] }
 0x4ce   :  { %9727 = vmatpush1.bf16.msra.mxu1 %v13060_v16  ;;  %v6163_v16 = vpack.c.bf16 %v6145_v31, %v6143_v3 }
 0x4cf   :  { %9728 = vmatprep.subr.bf16.mxu1 %v13065_v19  ;;  %v13098_v19 = vld [vmem:[#allocation10 + $0x4d4] ss:$8 sps:$4 sm:$0xff]  }
 0x4d1   :  { %9654 = vmatmul.mubr.bf16.gmra.mrb[4].mxu1 %v6153_v61  ;;  %v13096_v61 = vld [vmem:[#allocation10 + $0x4d0] ss:$8 sps:$4 sm:$0xff]  }
 0x4d2   :  { %9663 = vmatprep.mubr.bf16.mxu1 %v6156_v32  ;;  %9729 = vmatpush1.bf16.msra.mxu1 %v13063_v59  ;;  %v6321_v59 = vrot.slane %v6190_v44, 1  ;;  %v13101_v32 = vld [vmem:[#allocation10 + $0x4e4] ss:$8 sps:$4 sm:$0xff]  }
 0x4d3   :  { %9730 = vmatprep.subr.bf16.mxu1 %v13068_v63  ;;  %v6147_v63 = vld [vmem:[#allocation3 + $0x220] sm:$0xff]  ;;  %v13113_v44 = vld [vmem:[#allocation10 + $0x524] ss:$8 sps:$4 sm:$0xff]  }
 0x4d4   :  { %v6322_v14 = vsel %vm293_vm0, %v6320_v55, %v6321_v59  ;;  %v6340_v55 = vsel %vm293_vm0, %v6338_v33, %v6339_v36  ;;  %v6217_v33 = vld [vmem:[#allocation3 + $0x170] sm:$0x1]  ;;  %v6219_v36 = vld [vmem:[#allocation3 + $0x180] sm:$0xfe] }
 0x4d5   :  { %v6440_v25 = vpack.c.bf16 %v6322_v14, %v6316_v62  ;;  %v13116_v62 = vld [vmem:[#allocation10 + $0x534] ss:$8 sps:$4 sm:$0xff]  }
 0x4d6   :  { %9731 = vmatpush1.bf16.msra.mxu1 %v13066_v7  ;;  %v6183_v7 = vld [vmem:[#allocation3 + $0x20] sm:$0xfe] }
 0x4d7   :  { %9732 = vmatprep.subr.bf16.mxu1 %v13071_v50  ;;  %v6149_v50 = vld [vmem:[#allocation3 + $0x240] sm:$0xff]  ;;  %v6311_v24 = vrot.slane %v6183_v7, 1 }
 0x4d8   :  { %v6165_v45 = vpack.c.bf16 %v6149_v50, %v6147_v63  ;;  %v6208_v63 = vld [vmem:[#allocation3 + $0xe8] sm:$0xfe] }
 0x4d9   :  { %9664 = vmatmul.mubr.bf16.gmra.mrb[8].mxu1 %v6155_v15  ;;  %v6192_v15 = vld [vmem:[#allocation3 + $0x68] sm:$0xfe] }
 0x4da   :  { %9673 = vmatprep.mubr.bf16.mxu1 %v6158_v20  ;;  %9733 = vmatpush1.bf16.msra.mxu1 %v13069_v17  ;;  %v6189_v17 = vld [vmem:[#allocation3 + $0x50] sm:$0x1]  ;;  %v13099_v20 = vld [vmem:[#allocation10 + $0x4e0] ss:$8 sps:$4 sm:$0xff]  }
 0x4db   :  { %9734 = vmatprep.subr.bf16.mxu1 %v13074_v18  ;;  %v6194_v18 = vld [vmem:[#allocation3 + $0x78] sm:$0x1]  ;;  %v13111_v7 = vld [vmem:[#allocation10 + $0x520] ss:$8 sps:$4 sm:$0xff]  }
 0x4dc   :  { %v6212_v50 = vld [vmem:[#allocation3 + $0x108] sm:$0xfe] }
 0x4de   :  { %9735 = vmatpush1.bf16.msra.mxu1 %v13072_v42  ;;  %v6196_v42 = vld [vmem:[#allocation3 + $0x88] sm:$0xfe] }
 0x4df   :  { %9736 = vmatprep.subr.bf16.mxu1 %v13077_v30  ;;  %v6198_v30 = vld [vmem:[#allocation3 + $0x98] sm:$0x1] }
 0x4e0   :  { %v6333_v1 = vrot.slane %v6198_v30, 1 }
 0x4e1   :  { %9674 = vmatmul.mubr.bf16.gmra.mrb[12].mxu1 %v6157_v57  ;;  %v6317_v57 = vrot.slane %v6187_v34, 1 }
 0x4e2   :  { %9683 = vmatprep.mubr.bf16.mxu1 %v6160_v10  ;;  %9737 = vmatpush1.bf16.msra.mxu1 %v13075_v5  ;;  %v6312_v5 = vrot.slane %v6185_v12, 1  ;;  %v6326_v10 = vrot.slane %v6192_v15, 1  ;;  %v6214_v12 = vld [vmem:[#allocation3 + $0x118] sm:$0x1]  ;;  %v6336_v15 = vrot.slane %v6201_v46, 1 }
 0x4e3   :  { %9738 = vmatprep.subr.bf16.mxu1 %v13080_v11  ;;  %v6318_v11 = vrot.slane %v6189_v17, 1  ;;  %v6230_v46 = vld [vmem:[#allocation3 + $0x1d8] sm:$0x1] }
 0x4e4   :  { %v6313_v22 = vsel %vm293_vm0, %v6311_v24, %v6312_v5  ;;  %v13114_v24 = vld [vmem:[#allocation10 + $0x530] ss:$8 sps:$4 sm:$0xff]  }
 0x4e6   :  { %9739 = vmatpush1.bf16.msra.mxu1 %v13078_v56  ;;  %v6327_v56 = vrot.slane %v6194_v18, 1  ;;  %v6341_v18 = vrot.slane %v6203_v47, 1 }
 0x4e7   :  { %9740 = vmatprep.subr.bf16.mxu1 %v13083_v2  ;;  %v6332_v2 = vrot.slane %v6196_v42, 1  ;;  %v6350_v42 = vrot.slane %v6208_v63, 1  ;;  %v6360_v63 = vrot.slane %v6217_v33, 1  ;;  %v6244_v33 = vld [vmem:[#allocation3 + $0x248] sm:$0xfe] }
 0x4e9   :  { %9684 = vmatmul.mubr.bf16.gmra.mrb[16].mxu1 %v6159_v39  ;;  %v6191_v39 = vld [vmem:[#allocation3 + $0x60] sm:$0xfe] }
 0x4ea   :  { %9693 = vmatprep.mubr.bf16.mxu1 %v6162_v51  ;;  %9741 = vmatpush1.bf16.msra.mxu1 %v13081_v9  ;;  %v6319_v9 = vsel %vm293_vm0, %v6317_v57, %v6318_v11  ;;  %v6195_v51 = vld [vmem:[#allocation3 + $0x80] sm:$0xfe] }
 0x4eb   :  { %9742 = vmatprep.subr.bf16.mxu1 %v13086_v58  ;;  %v6193_v58 = vld [vmem:[#allocation3 + $0x70] sm:$0x1]  ;;  %v6329_v31 = vrot.slane %v6195_v51, 1  ;;  %v6207_v11 = vld [vmem:[#allocation3 + $0xe0] sm:$0xfe] }
 0x4ec   :  { %v6324_v3 = vrot.slane %v6193_v58, 1  ;;  %v6222_v58 = vld [vmem:[#allocation3 + $0x198] sm:$0x1] }
 0x4ee   :  { %9743 = vmatpush1.bf16.msra.mxu1 %v13084_v60  ;;  %v6328_v60 = vsel %vm293_vm0, %v6326_v10, %v6327_v56  ;;  %v6209_v10 = vld [vmem:[#allocation3 + $0xf0] sm:$0x1]  ;;  %v6211_v56 = vld [vmem:[#allocation3 + $0x100] sm:$0xfe] }
 0x4ef   :  { %9744 = vmatprep.subr.bf16.mxu1 %v13089_v27  ;;  %v6334_v27 = vsel %vm293_vm0, %v6332_v2, %v6333_v1  ;;  %v6348_v53 = vrot.slane %v6209_v10, 1  ;;  %v6353_v0 = vrot.slane %v6211_v56, 1  ;;  %v6236_v10 = vld [vmem:[#allocation3 + $0x208] sm:$0xfe]  ;;  %v6238_v56 = vld [vmem:[#allocation3 + $0x218] sm:$0x1] }
 0x4f1   :  { %9694 = vmatmul.mubr.bf16.gmra.mrb[20].mxu1 %v6161_v28  ;;  %v6206_v28 = vld [vmem:[#allocation3 + $0xd8] sm:$0x1] }
 0x4f2   :  { %9703 = vmatprep.mubr.bf16.mxu1 %v6164_v8  ;;  %9745 = vmatpush1.bf16.msra.mxu1 %v13087_v38  ;;  %v6204_v38 = vld [vmem:[#allocation3 + $0xc8] sm:$0xfe]  ;;  %v13110_v8 = vld [vmem:[#allocation10 + $0x514] ss:$8 sps:$4 sm:$0xff]  }
 0x4f3   :  { %9746 = vmatprep.subr.bf16.mxu1 %v13092_v4  ;;  %v6439_v4 = vpack.c.bf16 %v6319_v9, %v6313_v22  ;;  %v6344_v40 = vrot.slane %v6204_v38, 1  ;;  %v6218_v22 = vld [vmem:[#allocation3 + $0x178] sm:$0x1]  ;;  %v13117_v9 = vld [vmem:[#allocation10 + $0x540] ss:$8 sps:$4 sm:$0xff]  }
 0x4f6   :  { %9747 = vmatpush1.bf16.msra.mxu1 %v13090_v29  ;;  %v6323_v29 = vrot.slane %v6191_v39, 1  ;;  %v6220_v39 = vld [vmem:[#allocation3 + $0x188] sm:$0xfe] }
 0x4f7   :  { %9748 = vmatprep.subr.bf16.mxu1 %v13095_v23  ;;  %v6442_v23 = vpack.c.bf16 %v6334_v27, %v6328_v60  ;;  %v13122_v60 = vld [vmem:[#allocation10 + $0x554] ss:$8 sps:$4 sm:$0xff]   ;;  %v6347_v27 = vrot.slane %v6207_v11, 1  ;;  %v13129_v11 = vld [vmem:[#allocation10 + $0x580] ss:$8 sps:$4 sm:$0xff]  }
 0x4f9   :  { %9704 = vmatmul.mubr.bf16.gmra.mrb[24].mxu1 %v6163_v16  ;;  %v6325_v16 = vsel %vm293_vm0, %v6323_v29, %v6324_v3  ;;  %v13120_v29 = vld [vmem:[#allocation10 + $0x550] ss:$8 sps:$4 sm:$0xff]   ;;  %v6349_v3 = vsel %vm293_vm0, %v6347_v27, %v6348_v53 }
 0x4fa   :  { %9713 = vmatprep.mubr.bf16.mxu1 %v6166_v26  ;;  %9749 = vmatpush1.bf16.msra.mxu1 %v13093_v35  ;;  %v6345_v35 = vrot.slane %v6206_v28, 1  ;;  %v6199_v26 = vld [vmem:[#allocation3 + $0xa0] sm:$0xfe]  ;;  %v6363_v28 = vrot.slane %v6218_v22, 1  ;;  %v13132_v27 = vld [vmem:[#allocation10 + $0x590] ss:$8 sps:$4 sm:$0xff]  }
 0x4fb   :  { %9750 = vmatprep.subr.bf16.mxu1 %v13098_v19  ;;  %v6331_v19 = vsel %vm293_vm0, %v6329_v31, %v6330_v6  ;;  %v6335_v14 = vrot.slane %v6199_v26, 1  ;;  %v6215_v6 = vld [vmem:[#allocation3 + $0x160] sm:$0xfe]  ;;  %v6228_v26 = vld [vmem:[#allocation3 + $0x1c8] sm:$0xfe] }
 0x4fc   :  { %v6346_v59 = vsel %vm293_vm0, %v6344_v40, %v6345_v35  ;;  %v6441_v34 = vpack.c.bf16 %v6331_v19, %v6325_v16  ;;  %v6226_v16 = vld [vmem:[#allocation3 + $0x1b8] sm:$0x1]  ;;  %v13123_v19 = vld [vmem:[#allocation10 + $0x560] ss:$8 sps:$4 sm:$0xff]  }
 0x4fd   :  { %v6444_v17 = vpack.c.bf16 %v6346_v59, %v6340_v55  ;;  %v6337_v5 = vsel %vm293_vm0, %v6335_v14, %v6336_v15  ;;  %v13128_v55 = vld [vmem:[#allocation10 + $0x574] ss:$8 sps:$4 sm:$0xff]   ;;  %v6359_v59 = vrot.slane %v6215_v6, 1  ;;  %v13126_v14 = vld [vmem:[#allocation10 + $0x570] ss:$8 sps:$4 sm:$0xff]  }
 0x4fe   :  { %9751 = vmatpush1.bf16.msra.mxu1 %v13096_v61  ;;  %v6205_v61 = vld [vmem:[#allocation3 + $0xd0] sm:$0x1]  ;;  %v13135_v6 = vld [vmem:[#allocation10 + $0x5a0] ss:$8 sps:$4 sm:$0xff]  }
 0x4ff   :  { %9752 = vmatprep.subr.bf16.mxu1 %v13101_v32  ;;  %v6210_v32 = vld [vmem:[#allocation3 + $0xf8] sm:$0x1]  ;;  %v13131_v15 = vld [vmem:[#allocation10 + $0x584] ss:$8 sps:$4 sm:$0xff]  }
 0x500   :  { %v6351_v30 = vrot.slane %v6210_v32, 1  ;;  %v6365_v32 = vrot.slane %v6219_v36, 1  ;;  %v6246_v36 = vld [vmem:[#allocation3 + $0x258] sm:$0x1] }
 0x501   :  { %9714 = vmatmul.mubr.bf16.gmra.mrb[28].mxu1 %v6165_v45  ;;  %v6356_v45 = vrot.slane %v6212_v50, 1 }
 0x502   :  { %9753 = vmatpush1.bf16.msra.mxu1 %v13099_v20  ;;  %9756 = vmatprep.mubr.bf16.mxu1 %v6440_v25  ;;  %v6342_v20 = vrot.slane %v6205_v61, 1  ;;  %v13119_v25 = vld [vmem:[#allocation10 + $0x544] ss:$8 sps:$4 sm:$0xff]   ;;  %v6352_v2 = vsel %vm293_vm0, %v6350_v42, %v6351_v30  ;;  %v6227_v30 = vld [vmem:[#allocation3 + $0x1c0] sm:$0xfe] }
 0x503   :  { %9754 = vmatprep.subr.bf16.mxu1 %v13104_v21  ;;  %v6357_v21 = vrot.slane %v6214_v12, 1  ;;  %v6375_v12 = vrot.slane %v6226_v16, 1  ;;  %v6225_v42 = vld [vmem:[#allocation3 + $0x1b0] sm:$0x1] }
 0x504   :  { %v6343_v57 = vsel %vm293_vm0, %v6341_v18, %v6342_v20  ;;  %v6361_v18 = vsel %vm293_vm0, %v6359_v59, %v6360_v63  ;;  %v13138_v59 = vld [vmem:[#allocation10 + $0x5b0] ss:$8 sps:$4 sm:$0xff]  }
 0x505   :  { %v6358_v1 = vsel %vm293_vm0, %v6356_v45, %v6357_v21  ;;  %v6443_v51 = vpack.c.bf16 %v6343_v57, %v6337_v5  ;;  %v6229_v45 = vld [vmem:[#allocation3 + $0x1d0] sm:$0x1]  ;;  %v6232_v5 = vld [vmem:[#allocation3 + $0x1e8] sm:$0xfe]  ;;  %v6234_v57 = vld [vmem:[#allocation3 + $0x1f8] sm:$0x1] }
 0x506   :  { %9755 = vmatpush1.bf16.msra.mxu1 %v13102_v52  ;;  %v6213_v52 = vld [vmem:[#allocation3 + $0x110] sm:$0x1]  ;;  %v6446_v13 = vpack.c.bf16 %v6358_v1, %v6352_v2  ;;  %v13134_v1 = vld [vmem:[#allocation10 + $0x594] ss:$8 sps:$4 sm:$0xff]   ;;  %v6378_v22 = vrot.slane %v6229_v45, 1 }
 0x507   :  { %9837 = vmatprep.subr.bf16.mxu1 %v13107_v48  ;;  %v6216_v48 = vld [vmem:[#allocation3 + $0x168] sm:$0xfe]  ;;  %v13146_v45 = vld [vmem:[#allocation10 + $0x5d4] ss:$8 sps:$4 sm:$0xff]  }
 0x508   :  { %v6362_v38 = vrot.slane %v6216_v48, 1  ;;  %v6377_v48 = vrot.slane %v6227_v30, 1  ;;  %v6478_v30 = vld [vmem:[#allocation3 + $0x58] sm:$0x3] }
 0x509   :  { %9757 = vmatmul.mubr.bf16.vlgmr.msra.gmra.mrb[0].mxu1 %v6439_v4  ;;  %v6368_v4 = vrot.slane %v6220_v39, 1  ;;  %v6386_v39 = vrot.slane %v6232_v5, 1 }
 0x50a   :  { %9766 = vmatprep.mubr.bf16.mxu1 %v6442_v23  ;;  %9838 = vmatpush1.bf16.msra.mxu1 %v13105_v43  ;;  %v6354_v43 = vrot.slane %v6213_v52, 1  ;;  %v13125_v23 = vld [vmem:[#allocation10 + $0x564] ss:$8 sps:$4 sm:$0xff]   ;;  %v6364_v40 = vsel %vm293_vm0, %v6362_v38, %v6363_v28  ;;  %v6372_v52 = vrot.slane %v6225_v42, 1  ;;  %v6379_v53 = vsel %vm293_vm0, %v6377_v48, %v6378_v22  ;;  %v6235_v28 = vld [vmem:[#allocation3 + $0x200] sm:$0xfe] }
 0x50b   :  { %9839 = vmatprep.subr.bf16.mxu1 %v13110_v8  ;;  %v6369_v8 = vrot.slane %v6222_v58, 1  ;;  %v6387_v58 = vrot.slane %v6234_v57, 1  ;;  %v6233_v38 = vld [vmem:[#allocation3 + $0x1f0] sm:$0x1]  ;;  %v6476_v42 = vld [vmem:[#allocation3 + $0x48] sm:$0xfc] }
 0x50c   :  { %v6355_v31 = vsel %vm293_vm0, %v6353_v0, %v6354_v43  ;;  %v13137_v0 = vld [vmem:[#allocation10 + $0x5a4] ss:$8 sps:$4 sm:$0xff]   ;;  %v6231_v43 = vld [vmem:[#allocation3 + $0x1e0] sm:$0xfe] }
 0x50d   :  { %v6370_v35 = vsel %vm293_vm0, %v6368_v4, %v6369_v8  ;;  %v6445_v47 = vpack.c.bf16 %v6355_v31, %v6349_v3  ;;  %v6237_v4 = vld [vmem:[#allocation3 + $0x210] sm:$0x1]  ;;  %v6388_v8 = vsel %vm293_vm0, %v6386_v39, %v6387_v58  ;;  %v6242_v3 = vld [vmem:[#allocation3 + $0x238] sm:$0x1]  ;;  %v6475_v58 = vld [vmem:[#allocation3 + $0x40] sm:$0xfc] }
 0x50e   :  { %9840 = vmatpush1.bf16.msra.mxu1 %v13108_v41  ;;  %v6221_v41 = vld [vmem:[#allocation3 + $0x190] sm:$0x1]  ;;  %v6448_v61 = vpack.c.bf16 %v6370_v35, %v6364_v40  ;;  %v13140_v40 = vld [vmem:[#allocation10 + $0x5b4] ss:$8 sps:$4 sm:$0xff]   ;;  %v6383_v35 = vrot.slane %v6231_v43, 1  ;;  %v6390_v16 = vrot.slane %v6237_v4, 1 }
 0x50f   :  { %9841 = vmatprep.subr.bf16.mxu1 %v13113_v44  ;;  %v6224_v44 = vld [vmem:[#allocation3 + $0x1a8] sm:$0xfe]  ;;  %v6473_v39 = vld [vmem:[#allocation3 + $0x30] sm:$0x3]  ;;  %v6486_v43 = vld [vmem:[#allocation3 + $0x98] sm:$0x3] }
 0x510   :  { %v6374_v50 = vrot.slane %v6224_v44, 1  ;;  %v6389_v44 = vrot.slane %v6235_v28, 1  ;;  %v13149_v22 = vld [vmem:[#allocation10 + $0x5e4] ss:$8 sps:$4 sm:$0xff]   ;;  %v13147_v28 = vld [vmem:[#allocation10 + $0x5e0] ss:$8 sps:$4 sm:$0xff]  }
 0x511   :  { %9767 = vmatmul.mubr.bf16.gmra.mrb[4].mxu1 %v6441_v34  ;;  %v6380_v34 = vrot.slane %v6228_v26, 1 }
 0x512   :  { %9776 = vmatprep.mubr.bf16.mxu1 %v6444_v17  ;;  %9842 = vmatpush1.bf16.msra.mxu1 %v13111_v7  ;;  %v6366_v7 = vrot.slane %v6221_v41, 1  ;;  %v6223_v17 = vld [vmem:[#allocation3 + $0x1a0] sm:$0xfe]  ;;  %v6376_v21 = vsel %vm293_vm0, %v6374_v50, %v6375_v12  ;;  %v6384_v41 = vrot.slane %v6233_v38, 1  ;;  %v6391_v63 = vsel %vm293_vm0, %v6389_v44, %v6390_v16  ;;  %v6241_v50 = vld [vmem:[#allocation3 + $0x230] sm:$0x1] }
 0x513   :  { %9843 = vmatprep.subr.bf16.mxu1 %v13116_v62  ;;  %v6381_v62 = vrot.slane %v6230_v46, 1  ;;  %v6399_v46 = vrot.slane %v6242_v3, 1  ;;  %v6243_v12 = vld [vmem:[#allocation3 + $0x240] sm:$0xfe]  ;;  %v13155_v16 = vld [vmem:[#allocation10 + $0x604] ss:$8 sps:$4 sm:$0xff]  }
 0x514   :  { %v6367_v20 = vsel %vm293_vm0, %v6365_v32, %v6366_v7  ;;  %v13143_v32 = vld [vmem:[#allocation10 + $0x5c4] ss:$8 sps:$4 sm:$0xff]   ;;  %v6239_v7 = vld [vmem:[#allocation3 + $0x220] sm:$0xfe] }
 0x515   :  { %v6447_v2 = vpack.c.bf16 %v6367_v20, %v6361_v18  ;;  %v13141_v20 = vld [vmem:[#allocation10 + $0x5c0] ss:$8 sps:$4 sm:$0xff]  }
 0x516   :  { %9844 = vmatpush1.bf16.msra.mxu1 %v13114_v24  ;;  %v6382_v24 = vsel %vm293_vm0, %v6380_v34, %v6381_v62  ;;  %v6245_v34 = vld [vmem:[#allocation3 + $0x250] sm:$0x1] }
 0x517   :  { %9845 = vmatprep.subr.bf16.mxu1 %v13119_v25  ;;  %v6371_v25 = vrot.slane %v6223_v17, 1  ;;  %v6472_v17 = vld [vmem:[#allocation3 + $0x28] sm:$0xfc]  ;;  %v6402_v5 = vrot.slane %v6245_v34, 1 }
 0x519   :  { %9777 = vmatmul.mubr.bf16.gmra.mrb[8].mxu1 %v6443_v51  ;;  %v6392_v51 = vrot.slane %v6236_v10, 1 }
 0x51a   :  { %9786 = vmatprep.mubr.bf16.mxu1 %v6446_v13  ;;  %9846 = vmatpush1.bf16.msra.mxu1 %v13117_v9  ;;  %v6450_v9 = vpack.c.bf16 %v6382_v24, %v6376_v21  ;;  %v6373_v13 = vsel %vm293_vm0, %v6371_v25, %v6372_v52  ;;  %v6395_v21 = vrot.slane %v6239_v7, 1  ;;  %v6396_v24 = vrot.slane %v6241_v50, 1  ;;  %v6494_v7 = vld [vmem:[#allocation3 + $0xd8] sm:$0x3] }
 0x51b   :  { %9847 = vmatprep.subr.bf16.mxu1 %v13122_v60  ;;  %v6393_v60 = vrot.slane %v6238_v56, 1  ;;  %v6449_v31 = vpack.c.bf16 %v6379_v53, %v6373_v13  ;;  %v6401_v25 = vrot.slane %v6243_v12, 1  ;;  %v6608_v56 = vrot.slane %v6476_v42, 2  ;;  %v6482_v53 = vld [vmem:[#allocation3 + $0x78] sm:$0x3] }
 0x51c   :  { %v6397_v52 = vsel %vm293_vm0, %v6395_v21, %v6396_v24  ;;  %v13153_v12 = vld [vmem:[#allocation10 + $0x600] ss:$8 sps:$4 sm:$0xff]   ;;  %v13156_v21 = vld [vmem:[#allocation10 + $0x610] ss:$8 sps:$4 sm:$0xff]   ;;  %v13161_v24 = vld [vmem:[#allocation10 + $0x624] ss:$8 sps:$4 sm:$0xff]  }
 0x51d   :  { %v6403_v48 = vsel %vm293_vm0, %v6401_v25, %v6402_v5 }
 0x51e   :  { %9848 = vmatpush1.bf16.msra.mxu1 %v13120_v29  ;;  %v6394_v29 = vsel %vm293_vm0, %v6392_v51, %v6393_v60  ;;  %v6477_v51 = vld [vmem:[#allocation3 + $0x50] sm:$0x3]  ;;  %v6480_v60 = vld [vmem:[#allocation3 + $0x68] sm:$0xfc]  ;;  %v6453_v38 = vpack.c.bf16 %v6403_v48, %v6397_v52  ;;  %v6498_v48 = vld [vmem:[#allocation3 + $0xf8] sm:$0x3] }
 0x51f   :  { %9849 = vmatprep.subr.bf16.mxu1 %v13125_v23  ;;  %v6240_v23 = vld [vmem:[#allocation3 + $0x228] sm:$0xfe]  ;;  %v6606_v3 = vrot.slane %v6477_v51, 2 }
 0x520   :  { %v6398_v26 = vrot.slane %v6240_v23, 1  ;;  %v6605_v23 = vrot.slane %v6475_v58, 2  ;;  %v6496_v52 = vld [vmem:[#allocation3 + $0xe8] sm:$0xfc] }
 0x521   :  { %9787 = vmatmul.mubr.bf16.gmra.mrb[12].mxu1 %v6445_v47  ;;  %v6404_v47 = vrot.slane %v6244_v33, 1  ;;  %v6615_v33 = vrot.slane %v6482_v53, 2 }
 0x522   :  { %9796 = vmatprep.mubr.bf16.mxu1 %v6448_v61  ;;  %9850 = vmatpush1.bf16.msra.mxu1 %v13123_v19  ;;  %v6452_v19 = vpack.c.bf16 %v6394_v29, %v6388_v8  ;;  %v6385_v61 = vsel %vm293_vm0, %v6383_v35, %v6384_v41  ;;  %v6400_v62 = vsel %vm293_vm0, %v6398_v26, %v6399_v46  ;;  %v13152_v8 = vld [vmem:[#allocation10 + $0x5f4] ss:$8 sps:$4 sm:$0xff]   ;;  %v6600_v29 = vrot.slane %v6473_v39, 2  ;;  %v13150_v35 = vld [vmem:[#allocation10 + $0x5f0] ss:$8 sps:$4 sm:$0xff]  }
 0x523   :  { %9851 = vmatprep.subr.bf16.mxu1 %v13128_v55  ;;  %v6405_v55 = vrot.slane %v6246_v36, 1  ;;  %v6451_v18 = vpack.c.bf16 %v6391_v63, %v6385_v61  ;;  %v6607_v44 = vsel %vm582_vm1, %v6605_v23, %v6606_v3  ;;  %v6481_v26 = vld [vmem:[#allocation3 + $0x70] sm:$0x3]  ;;  %v6488_v61 = vld [vmem:[#allocation3 + $0xa8] sm:$0xfc] }
 0x524   :  { %v6490_v63 = vld [vmem:[#allocation3 + $0xb8] sm:$0x3] }
 0x525   :  { %v6627_v42 = vrot.slane %v6490_v63, 2  ;;  %v6502_v39 = vld [vmem:[#allocation3 + $0x118] sm:$0x3] }
 0x526   :  { %9852 = vmatpush1.bf16.msra.mxu1 %v13126_v14  ;;  %v6406_v14 = vsel %vm293_vm0, %v6404_v47, %v6405_v55  ;;  %v6483_v55 = vld [vmem:[#allocation3 + $0x80] sm:$0xfc] }
 0x527   :  { %9853 = vmatprep.subr.bf16.mxu1 %v13131_v15  ;;  %v6474_v15 = vld [vmem:[#allocation3 + $0x38] sm:$0x3]  ;;  %v6454_v57 = vpack.c.bf16 %v6406_v14, %v6400_v62 }
 0x528   :  { %v6603_v10 = vrot.slane %v6474_v15, 2  ;;  %v13158_v14 = vld [vmem:[#allocation10 + $0x614] ss:$8 sps:$4 sm:$0xff]   ;;  %v6617_v15 = vrot.slane %v6483_v55, 2 }
 0x529   :  { %9797 = vmatmul.mubr.bf16.gmra.mrb[16].mxu1 %v6447_v2  ;;  %v6609_v2 = vrot.slane %v6478_v30, 2 }
 0x52a   :  { %9806 = vmatprep.mubr.bf16.mxu1 %v6450_v9  ;;  %9854 = vmatpush1.bf16.msra.mxu1 %v13129_v11  ;;  %v6602_v11 = vrot.slane %v6472_v17, 2  ;;  %v6471_v9 = vld [vmem:[#allocation3 + $0x20] sm:$0xfc]  ;;  %v6612_v17 = vrot.slane %v6481_v26, 2  ;;  %v6510_v26 = vld [vmem:[#allocation3 + $0x198] sm:$0x3] }
 0x52b   :  { %9855 = vmatprep.subr.bf16.mxu1 %v13134_v1  ;;  %v13144_v1 = vld [vmem:[#allocation10 + $0x5d0] ss:$8 sps:$4 sm:$0xff]   ;;  %v6610_v13 = vsel %vm582_vm1, %v6608_v56, %v6609_v2  ;;  %v6599_v4 = vrot.slane %v6471_v9, 2  ;;  %v6489_v56 = vld [vmem:[#allocation3 + $0xb0] sm:$0x3] }
 0x52c   :  { %v6491_v2 = vld [vmem:[#allocation3 + $0xc0] sm:$0xfc]  ;;  %v6500_v9 = vld [vmem:[#allocation3 + $0x108] sm:$0xfc] }
 0x52d   :  { %v6601_v41 = vsel %vm582_vm1, %v6599_v4, %v6600_v29  ;;  %v6629_v53 = vrot.slane %v6491_v2, 2  ;;  %v6645_v4 = vrot.slane %v6502_v39, 2  ;;  %v13167_v29 = vld [vmem:[#allocation10 + $0x644] ss:$8 sps:$4 sm:$0xff]  }
 0x52e   :  { %9856 = vmatpush1.bf16.msra.mxu1 %v13132_v27  ;;  %v6604_v27 = vsel %vm582_vm1, %v6602_v11, %v6603_v10  ;;  %v6727_v50 = vpack.c.bf16 %v6607_v44, %v6601_v41  ;;  %v6487_v10 = vld [vmem:[#allocation3 + $0xa0] sm:$0xfc]  ;;  %v6504_v41 = vld [vmem:[#allocation3 + $0x168] sm:$0xfc]  ;;  %v6506_v44 = vld [vmem:[#allocation3 + $0x178] sm:$0x3] }
 0x52f   :  { %9857 = vmatprep.subr.bf16.mxu1 %v13137_v0  ;;  %v6484_v0 = vld [vmem:[#allocation3 + $0x88] sm:$0xfc] }
 0x530   :  { %v6620_v36 = vrot.slane %v6484_v0, 2 }
 0x531   :  { %9807 = vmatmul.mubr.bf16.gmra.mrb[20].mxu1 %v6449_v31  ;;  %v6614_v31 = vrot.slane %v6480_v60, 2  ;;  %v13164_v60 = vld [vmem:[#allocation10 + $0x634] ss:$8 sps:$4 sm:$0xff]  }
 0x532   :  { %9816 = vmatprep.mubr.bf16.mxu1 %v6452_v19  ;;  %9858 = vmatpush1.bf16.msra.mxu1 %v13135_v6  ;;  %v6728_v6 = vpack.c.bf16 %v6610_v13, %v6604_v27  ;;  %v6479_v19 = vld [vmem:[#allocation3 + $0x60] sm:$0xfc]  ;;  %v6623_v27 = vrot.slane %v6487_v10, 2  ;;  %v6624_v13 = vrot.slane %v6489_v56, 2 }
 0x533   :  { %9859 = vmatprep.subr.bf16.mxu1 %v13140_v40  ;;  %v6621_v40 = vrot.slane %v6486_v43, 2  ;;  %v6616_v46 = vsel %vm582_vm1, %v6614_v31, %v6615_v33  ;;  %v6611_v34 = vrot.slane %v6479_v19, 2  ;;  %v6638_v43 = vrot.slane %v6496_v52, 2  ;;  %v6495_v31 = vld [vmem:[#allocation3 + $0xe0] sm:$0xfc] }
 0x534   :  { %v6625_v23 = vsel %vm582_vm1, %v6623_v27, %v6624_v13  ;;  %v6499_v33 = vld [vmem:[#allocation3 + $0x100] sm:$0xfc]  ;;  %v6508_v19 = vld [vmem:[#allocation3 + $0x188] sm:$0xfc]  ;;  %v6635_v55 = vrot.slane %v6495_v31, 2 }
 0x535   :  { %v6622_v47 = vsel %vm582_vm1, %v6620_v36, %v6621_v40  ;;  %v6613_v25 = vsel %vm582_vm1, %v6611_v34, %v6612_v17  ;;  %v6641_v63 = vrot.slane %v6499_v33, 2  ;;  %v6657_v34 = vrot.slane %v6510_v26, 2  ;;  %v13176_v56 = vld [vmem:[#allocation10 + $0x674] ss:$8 sps:$4 sm:$0xff]   ;;  %v13179_v27 = vld [vmem:[#allocation10 + $0x684] ss:$8 sps:$4 sm:$0xff]  }
 0x536   :  { %9860 = vmatpush1.bf16.msra.mxu1 %v13138_v59  ;;  %v6485_v59 = vld [vmem:[#allocation3 + $0x90] sm:$0x3]  ;;  %v6730_v62 = vpack.c.bf16 %v6622_v47, %v6616_v46  ;;  %v13170_v47 = vld [vmem:[#allocation10 + $0x654] ss:$8 sps:$4 sm:$0xff]   ;;  %v6524_v31 = vld [vmem:[#allocation3 + $0x208] sm:$0xfc] }
 0x537   :  { %9861 = vmatprep.subr.bf16.mxu1 %v13143_v32  ;;  %v6492_v32 = vld [vmem:[#allocation3 + $0xc8] sm:$0xfc] }
 0x538   :  { %v6632_v30 = vrot.slane %v6492_v32, 2 }
 0x539   :  { %9817 = vmatmul.mubr.bf16.gmra.mrb[24].mxu1 %v6451_v18  ;;  %v6618_v18 = vrot.slane %v6485_v59, 2 }
 0x53a   :  { %9826 = vmatprep.mubr.bf16.mxu1 %v6454_v57  ;;  %9862 = vmatpush1.bf16.msra.mxu1 %v13141_v20  ;;  %v6626_v20 = vrot.slane %v6488_v61, 2 }
 0x53b   :  { %9863 = vmatprep.subr.bf16.mxu1 %v13146_v45  ;;  %v6633_v45 = vrot.slane %v6494_v7, 2  ;;  %v6619_v5 = vsel %vm582_vm1, %v6617_v15, %v6618_v18  ;;  %v6650_v7 = vrot.slane %v6504_v41, 2  ;;  %v6503_v18 = vld [vmem:[#allocation3 + $0x160] sm:$0xfc] }
 0x53c   :  { %v6628_v57 = vsel %vm582_vm1, %v6626_v20, %v6627_v42  ;;  %v6729_v58 = vpack.c.bf16 %v6619_v5, %v6613_v25  ;;  %v6505_v20 = vld [vmem:[#allocation3 + $0x170] sm:$0x3]  ;;  %v6507_v42 = vld [vmem:[#allocation3 + $0x180] sm:$0xfc]  ;;  %v6514_v25 = vld [vmem:[#allocation3 + $0x1b8] sm:$0x3] }
 0x53d   :  { %v6634_v11 = vsel %vm582_vm1, %v6632_v30, %v6633_v45  ;;  %v13171_v5 = vld [vmem:[#allocation10 + $0x660] ss:$8 sps:$4 sm:$0xff]   ;;  %v6647_v2 = vrot.slane %v6503_v18, 2  ;;  %v6648_v52 = vrot.slane %v6505_v20, 2  ;;  %v6663_v39 = vrot.slane %v6514_v25, 2 }
 0x53e   :  { %9864 = vmatpush1.bf16.msra.mxu1 %v13144_v1  ;;  %v6493_v1 = vld [vmem:[#allocation3 + $0xd0] sm:$0x3]  ;;  %v6732_v51 = vpack.c.bf16 %v6634_v11, %v6628_v57  ;;  %v6516_v57 = vld [vmem:[#allocation3 + $0x1c8] sm:$0xfc]  ;;  %v6518_v11 = vld [vmem:[#allocation3 + $0x1d8] sm:$0x3] }
 0x53f   :  { %9865 = vmatprep.subr.bf16.mxu1 %v13149_v22  ;;  %v13159_v22 = vld [vmem:[#allocation10 + $0x620] ss:$8 sps:$4 sm:$0xff]   ;;  %v6630_v0 = vrot.slane %v6493_v1, 2  ;;  %v6649_v13 = vsel %vm582_vm1, %v6647_v2, %v6648_v52  ;;  %v6534_v20 = vld [vmem:[#allocation3 + $0x258] sm:$0x3] }
 0x540   :  { %v6532_v18 = vld [vmem:[#allocation3 + $0x248] sm:$0xfc]  ;;  %v13186_v2 = vld [vmem:[#allocation10 + $0x6b0] ss:$8 sps:$4 sm:$0xff]  }
 0x541   :  { %9827 = vmatmul.mubr.bf16.gmra.mrb[28].mxu1 %v6453_v38  ;;  %v6639_v38 = vrot.slane %v6498_v48, 2  ;;  %v6631_v3 = vsel %vm582_vm1, %v6629_v53, %v6630_v0  ;;  %v6653_v48 = vrot.slane %v6507_v42, 2  ;;  %v6511_v0 = vld [vmem:[#allocation3 + $0x1a0] sm:$0xfc] }
 0x542   :  { %9866 = vmatpush1.bf16.msra.mxu1 %v13147_v28  ;;  %9869 = vmatprep.mubr.bf16.mxu1 %v6728_v6  ;;  %v6644_v28 = vrot.slane %v6500_v9, 2  ;;  %v6497_v6 = vld [vmem:[#allocation3 + $0xf0] sm:$0x3]  ;;  %v6731_v46 = vpack.c.bf16 %v6631_v3, %v6625_v23  ;;  %v6522_v23 = vld [vmem:[#allocation3 + $0x1f8] sm:$0x3] }
 0x543   :  { %9867 = vmatprep.subr.bf16.mxu1 %v13152_v8  ;;  %v13162_v8 = vld [vmem:[#allocation10 + $0x630] ss:$8 sps:$4 sm:$0xff]   ;;  %v6640_v36 = vsel %vm582_vm1, %v6638_v43, %v6639_v38  ;;  %v6636_v61 = vrot.slane %v6497_v6, 2  ;;  %v6513_v43 = vld [vmem:[#allocation3 + $0x1b0] sm:$0x3]  ;;  %v6675_v26 = vrot.slane %v6522_v23, 2 }
 0x544   :  { %v6646_v40 = vsel %vm582_vm1, %v6644_v28, %v6645_v4  ;;  %v6515_v38 = vld [vmem:[#allocation3 + $0x1c0] sm:$0xfc]  ;;  %v6526_v6 = vld [vmem:[#allocation3 + $0x218] sm:$0x3]  ;;  %v6660_v41 = vrot.slane %v6513_v43, 2 }
 0x545   :  { %v6734_v59 = vpack.c.bf16 %v6646_v40, %v6640_v36  ;;  %v6637_v17 = vsel %vm582_vm1, %v6635_v55, %v6636_v61  ;;  %v13177_v3 = vld [vmem:[#allocation10 + $0x680] ss:$8 sps:$4 sm:$0xff]   ;;  %v13182_v36 = vld [vmem:[#allocation10 + $0x694] ss:$8 sps:$4 sm:$0xff]   ;;  %v6659_v40 = vrot.slane %v6511_v0, 2 }
 0x546   :  { %9868 = vmatpush1.bf16.msra.mxu1 %v13150_v35  ;;  %v6501_v35 = vld [vmem:[#allocation3 + $0x110] sm:$0x3]  ;;  %v13180_v55 = vld [vmem:[#allocation10 + $0x690] ss:$8 sps:$4 sm:$0xff]  }
 0x547   :  { %9950 = vmatprep.subr.bf16.mxu1 %v13155_v16  ;;  %v13165_v16 = vld [vmem:[#allocation10 + $0x640] ss:$8 sps:$4 sm:$0xff]   ;;  %v6642_v32 = vrot.slane %v6501_v35, 2  ;;  %v6661_v61 = vsel %vm582_vm1, %v6659_v40, %v6660_v41  ;;  %v13200_v40 = vld [vmem:[#allocation10 + $0x6f4] ss:$8 sps:$4 sm:$0xff]  }
 0x548   :  { %v13198_v41 = vld [vmem:[#allocation10 + $0x6f0] ss:$8 sps:$4 sm:$0xff]  }
 0x549   :  { %9870 = vmatmul.mubr.bf16.vlgmr.msra.gmra.mrb[0].mxu1 %v6727_v50  ;;  %v6651_v50 = vrot.slane %v6506_v44, 2  ;;  %v6643_v15 = vsel %vm582_vm1, %v6641_v63, %v6642_v32  ;;  %v6665_v44 = vrot.slane %v6515_v38, 2  ;;  %v6519_v32 = vld [vmem:[#allocation3 + $0x1e0] sm:$0xfc] }
 0x54a   :  { %9879 = vmatprep.mubr.bf16.mxu1 %v6730_v62  ;;  %9951 = vmatpush1.bf16.msra.mxu1 %v13153_v12  ;;  %v6656_v12 = vrot.slane %v6508_v19, 2  ;;  %v13168_v62 = vld [vmem:[#allocation10 + $0x650] ss:$8 sps:$4 sm:$0xff]   ;;  %v6733_v10 = vpack.c.bf16 %v6643_v15, %v6637_v17  ;;  %v6530_v17 = vld [vmem:[#allocation3 + $0x238] sm:$0x3] }
 0x54b   :  { %9952 = vmatprep.subr.bf16.mxu1 %v13158_v14  ;;  %v13173_v14 = vld [vmem:[#allocation10 + $0x664] ss:$8 sps:$4 sm:$0xff]   ;;  %v6652_v30 = vsel %vm582_vm1, %v6650_v7, %v6651_v50  ;;  %v6523_v50 = vld [vmem:[#allocation3 + $0x200] sm:$0xfc] }
 0x54c   :  { %v6658_v45 = vsel %vm582_vm1, %v6656_v12, %v6657_v34  ;;  %v6521_v7 = vld [vmem:[#allocation3 + $0x1f0] sm:$0x3]  ;;  %v13183_v15 = vld [vmem:[#allocation10 + $0x6a0] ss:$8 sps:$4 sm:$0xff]   ;;  %v6677_v25 = vrot.slane %v6523_v50, 2 }
 0x54d   :  { %v6736_v1 = vpack.c.bf16 %v6658_v45, %v6652_v30  ;;  %v13188_v30 = vld [vmem:[#allocation10 + $0x6b4] ss:$8 sps:$4 sm:$0xff]   ;;  %v6671_v45 = vrot.slane %v6519_v32, 2  ;;  %v13209_v32 = vld [vmem:[#allocation10 + $0x724] ss:$8 sps:$4 sm:$0xff]  }
 0x54e   :  { %9953 = vmatpush1.bf16.msra.mxu1 %v13156_v21  ;;  %v6509_v21 = vld [vmem:[#allocation3 + $0x190] sm:$0x3]  ;;  %v6766_v50 = vld [vmem:[#allocation3 + $0xa0] sm:$0xff] }
 0x54f   :  { %9954 = vmatprep.subr.bf16.mxu1 %v13161_v24  ;;  %v6512_v24 = vld [vmem:[#allocation3 + $0x1a8] sm:$0xfc] }
 0x550   :  { %v6662_v9 = vrot.slane %v6512_v24, 2  ;;  %v6672_v24 = vrot.slane %v6521_v7, 2  ;;  %v6764_v7 = vld [vmem:[#allocation3 + $0x80] sm:$0xff] }
 0x551   :  { %9880 = vmatmul.mubr.bf16.gmra.mrb[4].mxu1 %v6729_v58  ;;  %v6668_v58 = vrot.slane %v6516_v57, 2 }
 0x552   :  { %9889 = vmatprep.mubr.bf16.mxu1 %v6732_v51  ;;  %9955 = vmatpush1.bf16.msra.mxu1 %v13159_v22  ;;  %v6654_v22 = vrot.slane %v6509_v21, 2  ;;  %v6669_v51 = vrot.slane %v6518_v11, 2  ;;  %v6664_v28 = vsel %vm582_vm1, %v6662_v9, %v6663_v39  ;;  %v6687_v11 = vrot.slane %v6530_v17, 2  ;;  %v13212_v17 = vld [vmem:[#allocation10 + $0x734] ss:$8 sps:$4 sm:$0xff]  }
 0x553   :  { %9956 = vmatprep.subr.bf16.mxu1 %v13164_v60  ;;  %v13174_v60 = vld [vmem:[#allocation10 + $0x670] ss:$8 sps:$4 sm:$0xff]   ;;  %v6673_v52 = vsel %vm582_vm1, %v6671_v45, %v6672_v24  ;;  %v6773_v45 = vld [vmem:[#allocation3 + $0x108] sm:$0xff] }
 0x554   :  { %v6655_v53 = vsel %vm582_vm1, %v6653_v48, %v6654_v22  ;;  %v6670_v4 = vsel %vm582_vm1, %v6668_v58, %v6669_v51  ;;  %v6527_v22 = vld [vmem:[#allocation3 + $0x220] sm:$0xfc]  ;;  %v6529_v58 = vld [vmem:[#allocation3 + $0x230] sm:$0x3] }
 0x555   :  { %v6735_v33 = vpack.c.bf16 %v6655_v53, %v6649_v13  ;;  %v6738_v35 = vpack.c.bf16 %v6670_v4, %v6664_v28  ;;  %v6531_v51 = vld [vmem:[#allocation3 + $0x240] sm:$0xfc]  ;;  %v6683_v0 = vrot.slane %v6527_v22, 2  ;;  %v6684_v38 = vrot.slane %v6529_v58, 2  ;;  %v13227_v58 = vld [vmem:[#allocation10 + $0x784] ss:$8 sps:$4 sm:$0xff]  }
 0x556   :  { %9957 = vmatpush1.bf16.msra.mxu1 %v13162_v8  ;;  %v6517_v8 = vld [vmem:[#allocation3 + $0x1d0] sm:$0x3]  ;;  %v13194_v53 = vld [vmem:[#allocation10 + $0x6d4] ss:$8 sps:$4 sm:$0xff]   ;;  %v6689_v28 = vrot.slane %v6531_v51, 2 }
 0x557   :  { %9958 = vmatprep.subr.bf16.mxu1 %v13167_v29  ;;  %v6520_v29 = vld [vmem:[#allocation3 + $0x1e8] sm:$0xfc]  ;;  %v6685_v23 = vsel %vm582_vm1, %v6683_v0, %v6684_v38  ;;  %v13224_v22 = vld [vmem:[#allocation10 + $0x774] ss:$8 sps:$4 sm:$0xff]  }
 0x558   :  { %v6674_v19 = vrot.slane %v6520_v29, 2  ;;  %v13197_v29 = vld [vmem:[#allocation10 + $0x6e4] ss:$8 sps:$4 sm:$0xff]   ;;  %v6776_v51 = vld [vmem:[#allocation3 + $0x180] sm:$0xff] }
 0x559   :  { %9890 = vmatmul.mubr.bf16.gmra.mrb[8].mxu1 %v6731_v46  ;;  %v6680_v46 = vrot.slane %v6524_v31, 2  ;;  %v6761_v31 = vld [vmem:[#allocation3 + $0x48] sm:$0xff] }
 0x55a   :  { %9899 = vmatprep.mubr.bf16.mxu1 %v6734_v59  ;;  %9959 = vmatpush1.bf16.msra.mxu1 %v13165_v16  ;;  %v6666_v16 = vrot.slane %v6517_v8, 2  ;;  %v13185_v59 = vld [vmem:[#allocation10 + $0x6a4] ss:$8 sps:$4 sm:$0xff]   ;;  %v6676_v12 = vsel %vm582_vm1, %v6674_v19, %v6675_v26  ;;  %v13192_v8 = vld [vmem:[#allocation10 + $0x6d0] ss:$8 sps:$4 sm:$0xff]   ;;  %v6762_v19 = vld [vmem:[#allocation3 + $0x60] sm:$0xff] }
 0x55b   :  { %9960 = vmatprep.subr.bf16.mxu1 %v13170_v47  ;;  %v6681_v47 = vrot.slane %v6526_v6, 2  ;;  %v6763_v6 = vld [vmem:[#allocation3 + $0x68] sm:$0xff] }
 0x55c   :  { %v6667_v63 = vsel %vm582_vm1, %v6665_v44, %v6666_v16  ;;  %v13203_v44 = vld [vmem:[#allocation10 + $0x704] ss:$8 sps:$4 sm:$0xff]   ;;  %v6760_v16 = vld [vmem:[#allocation3 + $0x40] sm:$0xff] }
 0x55d   :  { %v6682_v34 = vsel %vm582_vm1, %v6680_v46, %v6681_v47  ;;  %v6737_v42 = vpack.c.bf16 %v6667_v63, %v6661_v61  ;;  %v6765_v26 = vld [vmem:[#allocation3 + $0x88] sm:$0xff]  ;;  %v13204_v63 = vld [vmem:[#allocation10 + $0x710] ss:$8 sps:$4 sm:$0xff]  }
 0x55e   :  { %9961 = vmatpush1.bf16.msra.mxu1 %v13168_v62  ;;  %v6525_v62 = vld [vmem:[#allocation3 + $0x210] sm:$0x3]  ;;  %v6740_v21 = vpack.c.bf16 %v6682_v34, %v6676_v12  ;;  %v6767_v46 = vld [vmem:[#allocation3 + $0xa8] sm:$0xff] }
 0x55f   :  { %9962 = vmatprep.subr.bf16.mxu1 %v13173_v14  ;;  %v6528_v14 = vld [vmem:[#allocation3 + $0x228] sm:$0xfc]  ;;  %v6795_v61 = vpack.c.bf16 %v6767_v46, %v6765_v26  ;;  %v6827_v26 = vld [vmem:[#allocation3 + $0x58] sm:$0x1] }
 0x560   :  { %v6686_v57 = vrot.slane %v6528_v14, 2  ;;  %v13201_v47 = vld [vmem:[#allocation10 + $0x700] ss:$8 sps:$4 sm:$0xff]   ;;  %v6794_v14 = vpack.c.bf16 %v6766_v50, %v6764_v7  ;;  %v6956_v7 = vrot.slane %v6827_v26, 1 }
 0x561   :  { %9900 = vmatmul.mubr.bf16.gmra.mrb[12].mxu1 %v6733_v10  ;;  %v6692_v10 = vrot.slane %v6532_v18, 2  ;;  %v6769_v12 = vld [vmem:[#allocation3 + $0xc8] sm:$0xff]  ;;  %v13210_v18 = vld [vmem:[#allocation10 + $0x730] ss:$8 sps:$4 sm:$0xff]  }
 0x562   :  { %9909 = vmatprep.mubr.bf16.mxu1 %v6736_v1  ;;  %9963 = vmatpush1.bf16.msra.mxu1 %v13171_v5  ;;  %v6678_v5 = vrot.slane %v6525_v62, 2  ;;  %v13191_v1 = vld [vmem:[#allocation10 + $0x6c4] ss:$8 sps:$4 sm:$0xff]   ;;  %v6688_v9 = vsel %vm582_vm1, %v6686_v57, %v6687_v11  ;;  %v13207_v62 = vld [vmem:[#allocation10 + $0x720] ss:$8 sps:$4 sm:$0xff]  }
 0x563   :  { %9964 = vmatprep.subr.bf16.mxu1 %v13176_v56  ;;  %v6693_v56 = vrot.slane %v6534_v20, 2  ;;  %v6771_v34 = vld [vmem:[#allocation3 + $0xe8] sm:$0xff]  ;;  %v13216_v11 = vld [vmem:[#allocation10 + $0x750] ss:$8 sps:$4 sm:$0xff]  }
 0x564   :  { %v6679_v48 = vsel %vm582_vm1, %v6677_v25, %v6678_v5  ;;  %v13215_v20 = vld [vmem:[#allocation10 + $0x744] ss:$8 sps:$4 sm:$0xff]   ;;  %v13218_v25 = vld [vmem:[#allocation10 + $0x754] ss:$8 sps:$4 sm:$0xff]  }
 0x565   :  { %v6694_v39 = vsel %vm582_vm1, %v6692_v10, %v6693_v56  ;;  %v6739_v13 = vpack.c.bf16 %v6679_v48, %v6673_v52  ;;  %v15782_v5 = vld [vmem:[#allocation3 + $0x8] sm:$0xff]  ;;  %v6772_v56 = vld [vmem:[#allocation3 + $0x100] sm:$0xff] }
 0x566   :  { %9965 = vmatpush1.bf16.msra.mxu1 %v13174_v60  ;;  %v6533_v60 = vld [vmem:[#allocation3 + $0x250] sm:$0x3]  ;;  %v6742_v43 = vpack.c.bf16 %v6694_v39, %v6688_v9  ;;  %v6799_v57 = vpack.c.bf16 %v15782_v5, %v6773_v45  ;;  %v13219_v52 = vld [vmem:[#allocation10 + $0x760] ss:$8 sps:$4 sm:$0xff]   ;;  %v6798_v48 = vpack.c.bf16 %v15782_v5, %v6772_v56  ;;  %v13222_v39 = vld [vmem:[#allocation10 + $0x770] ss:$8 sps:$4 sm:$0xff]  }
 0x567   :  { %9966 = vmatprep.subr.bf16.mxu1 %v13179_v27  ;;  %v13189_v27 = vld [vmem:[#allocation10 + $0x6c0] ss:$8 sps:$4 sm:$0xff]   ;;  %v6690_v4 = vrot.slane %v6533_v60, 2  ;;  %v13221_v10 = vld [vmem:[#allocation10 + $0x764] ss:$8 sps:$4 sm:$0xff]  }
 0x568   :  { %v6778_v60 = vld [vmem:[#allocation3 + $0x1a0] sm:$0xff]  ;;  %v6829_v46 = vld [vmem:[#allocation3 + $0x68] sm:$0xfe] }
 0x569   :  { %9910 = vmatmul.mubr.bf16.gmra.mrb[16].mxu1 %v6735_v33  ;;  %v13195_v33 = vld [vmem:[#allocation10 + $0x6e0] ss:$8 sps:$4 sm:$0xff]   ;;  %v6800_v0 = vpack.c.bf16 %v6778_v60, %v6776_v51  ;;  %v6961_v50 = vrot.slane %v6829_v46, 1  ;;  %v13246_v51 = vld [vmem:[#allocation10 + $0x7f0] ss:$8 sps:$4 sm:$0xff]  }
 0x56a   :  { %9919 = vmatprep.mubr.bf16.mxu1 %v6738_v35  ;;  %9967 = vmatpush1.bf16.msra.mxu1 %v13177_v3  ;;  %v6691_v3 = vsel %vm582_vm1, %v6689_v28, %v6690_v4  ;;  %v6793_v35 = vpack.c.bf16 %v6763_v6, %v6761_v31  ;;  %v13228_v28 = vld [vmem:[#allocation10 + $0x790] ss:$8 sps:$4 sm:$0xff]   ;;  %v13233_v4 = vld [vmem:[#allocation10 + $0x7a4] ss:$8 sps:$4 sm:$0xff]   ;;  %v13231_v31 = vld [vmem:[#allocation10 + $0x7a0] ss:$8 sps:$4 sm:$0xff]  }
 0x56b   :  { %9968 = vmatprep.subr.bf16.mxu1 %v13182_v36  ;;  %v6741_v36 = vpack.c.bf16 %v6691_v3, %v6685_v23  ;;  %v6785_v23 = vld [vmem:[#allocation3 + $0x208] sm:$0xff]  ;;  %v13252_v46 = vld [vmem:[#allocation10 + $0x810] ss:$8 sps:$4 sm:$0xff]  }
 0x56c   :  { %v6787_v3 = vld [vmem:[#allocation3 + $0x228] sm:$0xff] }
 0x56d   :  { %v6833_v45 = vld [vmem:[#allocation3 + $0x88] sm:$0xfe] }
 0x56e   :  { %9969 = vmatpush1.bf16.msra.mxu1 %v13180_v55  ;;  %v6792_v55 = vpack.c.bf16 %v6762_v19, %v6760_v16  ;;  %v6789_v16 = vld [vmem:[#allocation3 + $0x248] sm:$0xff] }
 0x56f   :  { %9970 = vmatprep.subr.bf16.mxu1 %v13185_v59  ;;  %v13206_v59 = vld [vmem:[#allocation10 + $0x714] ss:$8 sps:$4 sm:$0xff]   ;;  %v6825_v19 = vld [vmem:[#allocation3 + $0x48] sm:$0xfe] }
 0x570   :  { %v13251_v60 = vld [vmem:[#allocation10 + $0x804] ss:$8 sps:$4 sm:$0xff]  }
 0x571   :  { %9920 = vmatmul.mubr.bf16.gmra.mrb[20].mxu1 %v6737_v42  ;;  %v6768_v42 = vld [vmem:[#allocation3 + $0xc0] sm:$0xff] }
 0x572   :  { %9929 = vmatprep.mubr.bf16.mxu1 %v6740_v21  ;;  %9971 = vmatpush1.bf16.msra.mxu1 %v13183_v15  ;;  %v6797_v15 = vpack.c.bf16 %v6771_v34, %v6769_v12  ;;  %v13213_v21 = vld [vmem:[#allocation10 + $0x740] ss:$8 sps:$4 sm:$0xff]   ;;  %v13240_v34 = vld [vmem:[#allocation10 + $0x7d0] ss:$8 sps:$4 sm:$0xff]  }
 0x573   :  { %9972 = vmatprep.subr.bf16.mxu1 %v13188_v30  ;;  %v6770_v30 = vld [vmem:[#allocation3 + $0xe0] sm:$0xff] }
 0x574   :  { %v6796_v24 = vpack.c.bf16 %v6770_v30, %v6768_v42  ;;  %v6828_v42 = vld [vmem:[#allocation3 + $0x60] sm:$0xfe]  ;;  %v6830_v30 = vld [vmem:[#allocation3 + $0x70] sm:$0x1] }
 0x576   :  { %9973 = vmatpush1.bf16.msra.mxu1 %v13186_v2  ;;  %v6777_v2 = vld [vmem:[#allocation3 + $0x188] sm:$0xff] }
 0x577   :  { %9974 = vmatprep.subr.bf16.mxu1 %v13191_v1  ;;  %v6779_v1 = vld [vmem:[#allocation3 + $0x1a8] sm:$0xff] }
 0x578   :  { %v6801_v9 = vpack.c.bf16 %v6779_v1, %v6777_v2  ;;  %v13248_v2 = vld [vmem:[#allocation10 + $0x7f4] ss:$8 sps:$4 sm:$0xff]  }
 0x579   :  { %9930 = vmatmul.mubr.bf16.gmra.mrb[24].mxu1 %v6739_v13  ;;  %v6783_v13 = vld [vmem:[#allocation3 + $0x1e8] sm:$0xff] }
 0x57a   :  { %9939 = vmatprep.mubr.bf16.mxu1 %v6742_v43  ;;  %9975 = vmatpush1.bf16.msra.mxu1 %v13189_v27  ;;  %v6781_v27 = vld [vmem:[#allocation3 + $0x1c8] sm:$0xff]  ;;  %v13230_v43 = vld [vmem:[#allocation10 + $0x794] ss:$8 sps:$4 sm:$0xff]  }
 0x57b   :  { %9976 = vmatprep.subr.bf16.mxu1 %v13194_v53  ;;  %v13225_v53 = vld [vmem:[#allocation10 + $0x780] ss:$8 sps:$4 sm:$0xff]   ;;  %v6803_v38 = vpack.c.bf16 %v6783_v13, %v6781_v27 }
 0x57e   :  { %9977 = vmatpush1.bf16.msra.mxu1 %v13192_v8  ;;  %v6780_v8 = vld [vmem:[#allocation3 + $0x1c0] sm:$0xff] }
 0x57f   :  { %9978 = vmatprep.subr.bf16.mxu1 %v13197_v29  ;;  %v6782_v29 = vld [vmem:[#allocation3 + $0x1e0] sm:$0xff] }
 0x580   :  { %v6802_v6 = vpack.c.bf16 %v6782_v29, %v6780_v8  ;;  %v6843_v8 = vld [vmem:[#allocation3 + $0xd8] sm:$0x1]  ;;  %v13249_v29 = vld [vmem:[#allocation10 + $0x800] ss:$8 sps:$4 sm:$0xff]  }
 0x581   :  { %9940 = vmatmul.mubr.bf16.gmra.mrb[28].mxu1 %v6741_v36  ;;  %v6805_v36 = vpack.c.bf16 %v6787_v3, %v6785_v23  ;;  %v6845_v23 = vld [vmem:[#allocation3 + $0xe8] sm:$0xfe]  ;;  %v6847_v3 = vld [vmem:[#allocation3 + $0xf8] sm:$0x1] }
 0x582   :  { %9979 = vmatpush1.bf16.msra.mxu1 %v13195_v33  ;;  %9982 = vmatprep.mubr.bf16.mxu1 %v6793_v35  ;;  %v13236_v33 = vld [vmem:[#allocation10 + $0x7b4] ss:$8 sps:$4 sm:$0xff]   ;;  %v6986_v26 = vrot.slane %v6847_v3, 1 }
 0x583   :  { %9980 = vmatprep.subr.bf16.mxu1 %v13200_v40  ;;  %v13234_v40 = vld [vmem:[#allocation10 + $0x7b0] ss:$8 sps:$4 sm:$0xff]   ;;  %v6784_v35 = vld [vmem:[#allocation3 + $0x200] sm:$0xff] }
 0x586   :  { %9981 = vmatpush1.bf16.msra.mxu1 %v13198_v41  ;;  %v13239_v41 = vld [vmem:[#allocation10 + $0x7c4] ss:$8 sps:$4 sm:$0xff]  }
 0x587   :  { %10063 = vmatprep.subr.bf16.mxu1 %v13203_v44  ;;  %v6786_v44 = vld [vmem:[#allocation3 + $0x220] sm:$0xff] }
 0x589   :  { %9983 = vmatmul.mubr.bf16.vlgmr.msra.gmra.mrb[0].mxu1 %v6792_v55  ;;  %v13237_v55 = vld [vmem:[#allocation10 + $0x7c0] ss:$8 sps:$4 sm:$0xff]  }
 0x58a   :  { %9992 = vmatprep.mubr.bf16.mxu1 %v6795_v61  ;;  %10064 = vmatpush1.bf16.msra.mxu1 %v13201_v47  ;;  %v6831_v47 = vld [vmem:[#allocation3 + $0x78] sm:$0x1]  ;;  %v6807_v61 = vpack.c.bf16 %v15782_v5, %v6789_v16  ;;  %v6980_v16 = vrot.slane %v6843_v8, 1 }
 0x58b   :  { %10065 = vmatprep.subr.bf16.mxu1 %v13206_v59  ;;  %v6804_v59 = vpack.c.bf16 %v6786_v44, %v6784_v35  ;;  %v6962_v12 = vrot.slane %v6831_v47, 1  ;;  %v13257_v47 = vld [vmem:[#allocation10 + $0x824] ss:$8 sps:$4 sm:$0xff]  }
 0x58e   :  { %10066 = vmatpush1.bf16.msra.mxu1 %v13204_v63  ;;  %v13242_v63 = vld [vmem:[#allocation10 + $0x7d4] ss:$8 sps:$4 sm:$0xff]  }
 0x58f   :  { %10067 = vmatprep.subr.bf16.mxu1 %v13209_v32  ;;  %v6955_v32 = vrot.slane %v6825_v19, 1  ;;  %v6985_v19 = vrot.slane %v6845_v23, 1 }
 0x591   :  { %9993 = vmatmul.mubr.bf16.gmra.mrb[4].mxu1 %v6794_v14  ;;  %v13245_v14 = vld [vmem:[#allocation10 + $0x7e4] ss:$8 sps:$4 sm:$0xff]  }
 0x592   :  { %10002 = vmatprep.mubr.bf16.mxu1 %v6797_v15  ;;  %10068 = vmatpush1.bf16.msra.mxu1 %v13207_v62  ;;  %v6788_v62 = vld [vmem:[#allocation3 + $0x240] sm:$0xff]  ;;  %v6826_v15 = vld [vmem:[#allocation3 + $0x50] sm:$0x1] }
 0x593   :  { %10069 = vmatprep.subr.bf16.mxu1 %v13212_v17  ;;  %v6824_v17 = vld [vmem:[#allocation3 + $0x40] sm:$0xfe]  ;;  %v6953_v1 = vrot.slane %v6826_v15, 1  ;;  %v6855_v15 = vld [vmem:[#allocation3 + $0x138] sm:$0x1] }
 0x596   :  { %10070 = vmatpush1.bf16.msra.mxu1 %v13210_v18  ;;  %v6957_v18 = vsel %vm293_vm0, %v6955_v32, %v6956_v7  ;;  %v6844_v32 = vld [vmem:[#allocation3 + $0xe0] sm:$0xfe] }
 0x597   :  { %10071 = vmatprep.subr.bf16.mxu1 %v13215_v20  ;;  %v6963_v20 = vsel %vm293_vm0, %v6961_v50, %v6962_v12  ;;  %v6987_v50 = vsel %vm293_vm0, %v6985_v19, %v6986_v26  ;;  %v6846_v12 = vld [vmem:[#allocation3 + $0xf0] sm:$0x1] }
 0x598   :  { %v7081_v56 = vpack.c.bf16 %v6963_v20, %v6957_v18  ;;  %v13260_v20 = vld [vmem:[#allocation10 + $0x834] ss:$8 sps:$4 sm:$0xff]  }
 0x599   :  { %10003 = vmatmul.mubr.bf16.gmra.mrb[8].mxu1 %v6796_v24  ;;  %v6837_v24 = vld [vmem:[#allocation3 + $0xa8] sm:$0xfe] }
 0x59a   :  { %10012 = vmatprep.mubr.bf16.mxu1 %v6799_v57  ;;  %10072 = vmatpush1.bf16.msra.mxu1 %v13213_v21  ;;  %v6835_v21 = vld [vmem:[#allocation3 + $0x98] sm:$0x1]  ;;  %v6806_v57 = vpack.c.bf16 %v15782_v5, %v6788_v62 }
 0x59b   :  { %10073 = vmatprep.subr.bf16.mxu1 %v13218_v25  ;;  %v6839_v25 = vld [vmem:[#allocation3 + $0xb8] sm:$0x1] }
 0x59c   :  { %v6851_v62 = vld [vmem:[#allocation3 + $0x118] sm:$0x1] }
 0x59e   :  { %10074 = vmatpush1.bf16.msra.mxu1 %v13216_v11  ;;  %v13243_v11 = vld [vmem:[#allocation10 + $0x7e0] ss:$8 sps:$4 sm:$0xff]  }
 0x59f   :  { %10075 = vmatprep.subr.bf16.mxu1 %v13221_v10  ;;  %v6952_v10 = vrot.slane %v6824_v17, 1  ;;  %v6853_v17 = vld [vmem:[#allocation3 + $0x128] sm:$0xfe] }
 0x5a1   :  { %10013 = vmatmul.mubr.bf16.gmra.mrb[12].mxu1 %v6798_v48  ;;  %v6959_v48 = vrot.slane %v6830_v30, 1  ;;  %v6954_v5 = vsel %vm293_vm0, %v6952_v10, %v6953_v1  ;;  %v6998_v10 = vrot.slane %v6855_v15, 1 }
 0x5a2   :  { %10022 = vmatprep.mubr.bf16.mxu1 %v6801_v9  ;;  %10076 = vmatpush1.bf16.msra.mxu1 %v13219_v52  ;;  %v6958_v52 = vrot.slane %v6828_v42, 1  ;;  %v6968_v9 = vrot.slane %v6835_v21, 1  ;;  %v6982_v21 = vrot.slane %v6844_v32, 1 }
 0x5a3   :  { %10077 = vmatprep.subr.bf16.mxu1 %v13224_v22  ;;  %v6967_v22 = vrot.slane %v6833_v45, 1 }
 0x5a4   :  { %v6960_v27 = vsel %vm293_vm0, %v6958_v52, %v6959_v48  ;;  %v6848_v48 = vld [vmem:[#allocation3 + $0x100] sm:$0xfe] }
 0x5a5   :  { %v6969_v13 = vsel %vm293_vm0, %v6967_v22, %v6968_v9  ;;  %v6850_v22 = vld [vmem:[#allocation3 + $0x110] sm:$0x1]  ;;  %v6852_v9 = vld [vmem:[#allocation3 + $0x120] sm:$0xfe] }
 0x5a6   :  { %10078 = vmatpush1.bf16.msra.mxu1 %v13222_v39  ;;  %v6973_v39 = vrot.slane %v6837_v24, 1  ;;  %v6983_v24 = vrot.slane %v6846_v12, 1  ;;  %v6994_v8 = vrot.slane %v6852_v9, 1 }
 0x5a7   :  { %10079 = vmatprep.subr.bf16.mxu1 %v13227_v58  ;;  %v6974_v58 = vrot.slane %v6839_v25, 1 }
 0x5a8   :  { %v6984_v52 = vsel %vm293_vm0, %v6982_v21, %v6983_v24  ;;  %v6864_v24 = vld [vmem:[#allocation3 + $0x1c0] sm:$0xfe] }
 0x5a9   :  { %10023 = vmatmul.mubr.bf16.gmra.mrb[16].mxu1 %v6800_v0  ;;  %v6832_v0 = vld [vmem:[#allocation3 + $0x80] sm:$0xfe] }
 0x5aa   :  { %10032 = vmatprep.mubr.bf16.mxu1 %v6803_v38  ;;  %10080 = vmatpush1.bf16.msra.mxu1 %v13225_v53  ;;  %v6975_v53 = vsel %vm293_vm0, %v6973_v39, %v6974_v58  ;;  %v6836_v38 = vld [vmem:[#allocation3 + $0xa0] sm:$0xfe] }
 0x5ab   :  { %10081 = vmatprep.subr.bf16.mxu1 %v13230_v43  ;;  %v6834_v43 = vld [vmem:[#allocation3 + $0x90] sm:$0x1]  ;;  %v6970_v35 = vrot.slane %v6836_v38, 1  ;;  %v6988_v38 = vrot.slane %v6848_v48, 1  ;;  %v6877_v48 = vld [vmem:[#allocation3 + $0x228] sm:$0xfe] }
 0x5ae   :  { %10082 = vmatpush1.bf16.msra.mxu1 %v13228_v28  ;;  %v6838_v28 = vld [vmem:[#allocation3 + $0xb0] sm:$0x1] }
 0x5af   :  { %10083 = vmatprep.subr.bf16.mxu1 %v13233_v4  ;;  %v6841_v4 = vld [vmem:[#allocation3 + $0xc8] sm:$0xfe] }
 0x5b0   :  { %v6979_v44 = vrot.slane %v6841_v4, 1  ;;  %v6989_v4 = vrot.slane %v6850_v22, 1  ;;  %v6879_v22 = vld [vmem:[#allocation3 + $0x238] sm:$0x1] }
 0x5b1   :  { %10033 = vmatmul.mubr.bf16.gmra.mrb[20].mxu1 %v6802_v6  ;;  %v7083_v6 = vpack.c.bf16 %v6975_v53, %v6969_v13  ;;  %v6861_v13 = vld [vmem:[#allocation3 + $0x1a8] sm:$0xfe]  ;;  %v6863_v53 = vld [vmem:[#allocation3 + $0x1b8] sm:$0x1] }
 0x5b2   :  { %10042 = vmatprep.mubr.bf16.mxu1 %v6805_v36  ;;  %10084 = vmatpush1.bf16.msra.mxu1 %v13231_v31  ;;  %v7080_v31 = vpack.c.bf16 %v6960_v27, %v6954_v5  ;;  %v6964_v36 = vrot.slane %v6832_v0, 1  ;;  %v6981_v7 = vsel %vm293_vm0, %v6979_v44, %v6980_v16  ;;  %v6859_v5 = vld [vmem:[#allocation3 + $0x198] sm:$0x1]  ;;  %v13261_v27 = vld [vmem:[#allocation10 + $0x840] ss:$8 sps:$4 sm:$0xff]  }
 0x5b3   :  { %10085 = vmatprep.subr.bf16.mxu1 %v13236_v33  ;;  %v13254_v33 = vld [vmem:[#allocation10 + $0x814] ss:$8 sps:$4 sm:$0xff]   ;;  %v7085_v30 = vpack.c.bf16 %v6987_v50, %v6981_v7  ;;  %v7004_v3 = vrot.slane %v6859_v5, 1  ;;  %v6858_v44 = vld [vmem:[#allocation3 + $0x190] sm:$0x1] }
 0x5b4   :  { %v6860_v16 = vld [vmem:[#allocation3 + $0x1a0] sm:$0xfe] }
 0x5b5   :  { %v13272_v7 = vld [vmem:[#allocation10 + $0x874] ss:$8 sps:$4 sm:$0xff]  }
 0x5b6   :  { %10086 = vmatpush1.bf16.msra.mxu1 %v13234_v40  ;;  %v6965_v40 = vrot.slane %v6834_v43, 1  ;;  %v13266_v43 = vld [vmem:[#allocation10 + $0x854] ss:$8 sps:$4 sm:$0xff]  }
 0x5b7   :  { %10087 = vmatprep.subr.bf16.mxu1 %v13239_v41  ;;  %v6971_v41 = vrot.slane %v6838_v28, 1 }
 0x5b9   :  { %10043 = vmatmul.mubr.bf16.gmra.mrb[24].mxu1 %v6804_v59  ;;  %v6972_v59 = vsel %vm293_vm0, %v6970_v35, %v6971_v41  ;;  %v6856_v41 = vld [vmem:[#allocation3 + $0x180] sm:$0xfe] }
 0x5ba   :  { %10052 = vmatprep.mubr.bf16.mxu1 %v6807_v61  ;;  %10088 = vmatpush1.bf16.msra.mxu1 %v13237_v55  ;;  %v6966_v55 = vsel %vm293_vm0, %v6964_v36, %v6965_v40  ;;  %v6840_v61 = vld [vmem:[#allocation3 + $0xc0] sm:$0xfe]  ;;  %v13269_v36 = vld [vmem:[#allocation10 + $0x864] ss:$8 sps:$4 sm:$0xff]   ;;  %v6990_v40 = vsel %vm293_vm0, %v6988_v38, %v6989_v4  ;;  %v7000_v50 = vrot.slane %v6856_v41, 1 }
 0x5bb   :  { %10089 = vmatprep.subr.bf16.mxu1 %v13242_v63  ;;  %v6842_v63 = vld [vmem:[#allocation3 + $0xd0] sm:$0x1]  ;;  %v7082_v18 = vpack.c.bf16 %v6972_v59, %v6966_v55  ;;  %v6976_v42 = vrot.slane %v6840_v61, 1  ;;  %v6867_v55 = vld [vmem:[#allocation3 + $0x1d8] sm:$0x1] }
 0x5bc   :  { %v6977_v45 = vrot.slane %v6842_v63, 1  ;;  %v13267_v59 = vld [vmem:[#allocation10 + $0x860] ss:$8 sps:$4 sm:$0xff]   ;;  %v6871_v63 = vld [vmem:[#allocation3 + $0x1f8] sm:$0x1]  ;;  %v7016_v15 = vrot.slane %v6867_v55, 1 }
 0x5bd   :  { %v6869_v61 = vld [vmem:[#allocation3 + $0x1e8] sm:$0xfe]  ;;  %v13276_v38 = vld [vmem:[#allocation10 + $0x890] ss:$8 sps:$4 sm:$0xff]  }
 0x5be   :  { %10090 = vmatpush1.bf16.msra.mxu1 %v13240_v34  ;;  %v6849_v34 = vld [vmem:[#allocation3 + $0x108] sm:$0xfe]  ;;  %v6978_v1 = vsel %vm293_vm0, %v6976_v42, %v6977_v45  ;;  %v13270_v42 = vld [vmem:[#allocation10 + $0x870] ss:$8 sps:$4 sm:$0xff]  }
 0x5bf   :  { %10091 = vmatprep.subr.bf16.mxu1 %v13245_v14  ;;  %v13255_v14 = vld [vmem:[#allocation10 + $0x820] ss:$8 sps:$4 sm:$0xff]   ;;  %v6991_v25 = vrot.slane %v6849_v34, 1  ;;  %v7084_v0 = vpack.c.bf16 %v6984_v52, %v6978_v1  ;;  %v7001_v34 = vrot.slane %v6858_v44, 1  ;;  %v6875_v1 = vld [vmem:[#allocation3 + $0x218] sm:$0x1] }
 0x5c0   :  { %v13273_v52 = vld [vmem:[#allocation10 + $0x880] ss:$8 sps:$4 sm:$0xff]   ;;  %v6887_v44 = vld [vmem:[#allocation3 + $0x278] sm:$0x1] }
 0x5c1   :  { %10053 = vmatmul.mubr.bf16.gmra.mrb[28].mxu1 %v6806_v57  ;;  %v6992_v57 = vrot.slane %v6851_v62, 1  ;;  %v7006_v62 = vrot.slane %v6860_v16, 1  ;;  %v7002_v45 = vsel %vm293_vm0, %v7000_v50, %v7001_v34  ;;  %v6885_v41 = vld [vmem:[#allocation3 + $0x268] sm:$0xfe]  ;;  %v13282_v50 = vld [vmem:[#allocation10 + $0x8b0] ss:$8 sps:$4 sm:$0xff]  }
 0x5c2   :  { %10092 = vmatpush1.bf16.msra.mxu1 %v13243_v11  ;;  %10095 = vmatprep.mubr.bf16.mxu1 %v7081_v56  ;;  %v6997_v11 = vrot.slane %v6853_v17, 1  ;;  %v13258_v56 = vld [vmem:[#allocation10 + $0x830] ss:$8 sps:$4 sm:$0xff]  }
 0x5c3   :  { %10093 = vmatprep.subr.bf16.mxu1 %v13248_v2  ;;  %v13263_v2 = vld [vmem:[#allocation10 + $0x844] ss:$8 sps:$4 sm:$0xff]   ;;  %v6993_v39 = vsel %vm293_vm0, %v6991_v25, %v6992_v57  ;;  %v6868_v57 = vld [vmem:[#allocation3 + $0x1e0] sm:$0xfe] }
 0x5c4   :  { %v6999_v58 = vsel %vm293_vm0, %v6997_v11, %v6998_v10  ;;  %v6866_v25 = vld [vmem:[#allocation3 + $0x1d0] sm:$0x1]  ;;  %v7018_v5 = vrot.slane %v6868_v57, 1 }
 0x5c5   :  { %v7087_v28 = vpack.c.bf16 %v6999_v58, %v6993_v39  ;;  %v13278_v39 = vld [vmem:[#allocation10 + $0x894] ss:$8 sps:$4 sm:$0xff]   ;;  %v7012_v58 = vrot.slane %v6864_v24, 1  ;;  %v7117_v24 = vld [vmem:[#allocation3 + $0x68] sm:$0xfc] }
 0x5c6   :  { %10094 = vmatpush1.bf16.msra.mxu1 %v13246_v51  ;;  %v6854_v51 = vld [vmem:[#allocation3 + $0x130] sm:$0x1] }
 0x5c7   :  { %10176 = vmatprep.subr.bf16.mxu1 %v13251_v60  ;;  %v6857_v60 = vld [vmem:[#allocation3 + $0x188] sm:$0xfe] }
 0x5c8   :  { %v7003_v23 = vrot.slane %v6857_v60, 1  ;;  %v7013_v60 = vrot.slane %v6866_v25, 1  ;;  %v7119_v25 = vld [vmem:[#allocation3 + $0x78] sm:$0x3] }
 0x5c9   :  { %10096 = vmatmul.mubr.bf16.vlgmr.msra.gmra.mrb[0].mxu1 %v7080_v31  ;;  %v7009_v31 = vrot.slane %v6861_v13, 1 }
 0x5ca   :  { %10105 = vmatprep.mubr.bf16.mxu1 %v7083_v6  ;;  %10177 = vmatpush1.bf16.msra.mxu1 %v13249_v29  ;;  %v6995_v29 = vrot.slane %v6854_v51, 1  ;;  %v7010_v6 = vrot.slane %v6863_v53, 1  ;;  %v7005_v19 = vsel %vm293_vm0, %v7003_v23, %v7004_v3  ;;  %v7028_v53 = vrot.slane %v6875_v1, 1  ;;  %v6874_v23 = vld [vmem:[#allocation3 + $0x210] sm:$0x1] }
 0x5cb   :  { %10178 = vmatprep.subr.bf16.mxu1 %v13254_v33  ;;  %v13264_v33 = vld [vmem:[#allocation10 + $0x850] ss:$8 sps:$4 sm:$0xff]   ;;  %v7014_v4 = vsel %vm293_vm0, %v7012_v58, %v7013_v60  ;;  %v6876_v3 = vld [vmem:[#allocation3 + $0x220] sm:$0xfe] }
 0x5cc   :  { %v6996_v35 = vsel %vm293_vm0, %v6994_v8, %v6995_v29  ;;  %v7011_v26 = vsel %vm293_vm0, %v7009_v31, %v7010_v6  ;;  %v6872_v29 = vld [vmem:[#allocation3 + $0x200] sm:$0xfe]  ;;  %v7030_v55 = vrot.slane %v6876_v3, 1  ;;  %v13288_v58 = vld [vmem:[#allocation10 + $0x8d0] ss:$8 sps:$4 sm:$0xff]  }
 0x5cd   :  { %v7086_v32 = vpack.c.bf16 %v6996_v35, %v6990_v40  ;;  %v7089_v12 = vpack.c.bf16 %v7011_v26, %v7005_v19  ;;  %v6883_v40 = vld [vmem:[#allocation3 + $0x258] sm:$0x1]  ;;  %v13279_v35 = vld [vmem:[#allocation10 + $0x8a0] ss:$8 sps:$4 sm:$0xff]   ;;  %v7024_v26 = vrot.slane %v6872_v29, 1 }
 0x5ce   :  { %10179 = vmatpush1.bf16.msra.mxu1 %v13252_v46  ;;  %v6862_v46 = vld [vmem:[#allocation3 + $0x1b0] sm:$0x1]  ;;  %v13284_v19 = vld [vmem:[#allocation10 + $0x8b4] ss:$8 sps:$4 sm:$0xff]   ;;  %v7125_v29 = vld [vmem:[#allocation3 + $0xa8] sm:$0xfc] }
 0x5cf   :  { %10180 = vmatprep.subr.bf16.mxu1 %v13257_v47  ;;  %v6865_v47 = vld [vmem:[#allocation3 + $0x1c8] sm:$0xfe] }
 0x5d0   :  { %v7015_v17 = vrot.slane %v6865_v47, 1  ;;  %v7025_v47 = vrot.slane %v6874_v23, 1  ;;  %v7127_v23 = vld [vmem:[#allocation3 + $0xb8] sm:$0x3] }
 0x5d1   :  { %10106 = vmatmul.mubr.bf16.gmra.mrb[4].mxu1 %v7082_v18  ;;  %v7021_v18 = vrot.slane %v6869_v61, 1 }
 0x5d2   :  { %10115 = vmatprep.mubr.bf16.mxu1 %v7085_v30  ;;  %10181 = vmatpush1.bf16.msra.mxu1 %v13255_v14  ;;  %v7007_v14 = vrot.slane %v6862_v46, 1  ;;  %v13275_v30 = vld [vmem:[#allocation10 + $0x884] ss:$8 sps:$4 sm:$0xff]   ;;  %v7017_v11 = vsel %vm293_vm0, %v7015_v17, %v7016_v15  ;;  %v7026_v34 = vsel %vm293_vm0, %v7024_v26, %v7025_v47  ;;  %v6884_v15 = vld [vmem:[#allocation3 + $0x260] sm:$0xfe] }
 0x5d3   :  { %10182 = vmatprep.subr.bf16.mxu1 %v13260_v20  ;;  %v7022_v20 = vrot.slane %v6871_v63, 1  ;;  %v7040_v63 = vrot.slane %v6883_v40, 1  ;;  %v6882_v17 = vld [vmem:[#allocation3 + $0x250] sm:$0x1]  ;;  %v7042_v1 = vrot.slane %v6884_v15, 1 }
 0x5d4   :  { %v7008_v21 = vsel %vm293_vm0, %v7006_v62, %v7007_v14  ;;  %v6880_v14 = vld [vmem:[#allocation3 + $0x240] sm:$0xfe]  ;;  %v13294_v26 = vld [vmem:[#allocation10 + $0x8f0] ss:$8 sps:$4 sm:$0xff]  }
 0x5d5   :  { %v7023_v10 = vsel %vm293_vm0, %v7021_v18, %v7022_v20  ;;  %v7088_v9 = vpack.c.bf16 %v7008_v21, %v7002_v45  ;;  %v7115_v45 = vld [vmem:[#allocation3 + $0x58] sm:$0x3]  ;;  %v13285_v21 = vld [vmem:[#allocation10 + $0x8c0] ss:$8 sps:$4 sm:$0xff]  }
 0x5d6   :  { %10183 = vmatpush1.bf16.msra.mxu1 %v13258_v56  ;;  %v6870_v56 = vld [vmem:[#allocation3 + $0x1f0] sm:$0x1]  ;;  %v7091_v51 = vpack.c.bf16 %v7023_v10, %v7017_v11  ;;  %v13290_v11 = vld [vmem:[#allocation10 + $0x8d4] ss:$8 sps:$4 sm:$0xff]   ;;  %v7036_v10 = vrot.slane %v6880_v14, 1 }
 0x5d7   :  { %10184 = vmatprep.subr.bf16.mxu1 %v13263_v2  ;;  %v6873_v2 = vld [vmem:[#allocation3 + $0x208] sm:$0xfe]  ;;  %v7135_v14 = vld [vmem:[#allocation3 + $0xf8] sm:$0x3] }
 0x5d8   :  { %v7027_v13 = vrot.slane %v6873_v2, 1  ;;  %v7037_v2 = vrot.slane %v6882_v17, 1 }
 0x5d9   :  { %10116 = vmatmul.mubr.bf16.gmra.mrb[8].mxu1 %v7084_v0  ;;  %v7033_v0 = vrot.slane %v6877_v48, 1 }
 0x5da   :  { %10125 = vmatprep.mubr.bf16.mxu1 %v7087_v28  ;;  %10185 = vmatpush1.bf16.msra.mxu1 %v13261_v27  ;;  %v7019_v27 = vrot.slane %v6870_v56, 1  ;;  %v13281_v28 = vld [vmem:[#allocation10 + $0x8a4] ss:$8 sps:$4 sm:$0xff]   ;;  %v7029_v31 = vsel %vm293_vm0, %v7027_v13, %v7028_v53  ;;  %v7038_v60 = vsel %vm293_vm0, %v7036_v10, %v7037_v2  ;;  %v7116_v53 = vld [vmem:[#allocation3 + $0x60] sm:$0xfc] }
 0x5db   :  { %10186 = vmatprep.subr.bf16.mxu1 %v13266_v43  ;;  %v7034_v43 = vrot.slane %v6879_v22, 1  ;;  %v7244_v22 = vrot.slane %v7115_v45, 2  ;;  %v7114_v13 = vld [vmem:[#allocation3 + $0x50] sm:$0x3]  ;;  %v7246_v40 = vrot.slane %v7116_v53, 2 }
 0x5dc   :  { %v7020_v8 = vsel %vm293_vm0, %v7018_v5, %v7019_v27  ;;  %v7112_v27 = vld [vmem:[#allocation3 + $0x40] sm:$0xfc]  ;;  %v7130_v10 = vld [vmem:[#allocation3 + $0xd0] sm:$0x3] }
 0x5dd   :  { %v7035_v6 = vsel %vm293_vm0, %v7033_v0, %v7034_v43  ;;  %v7090_v16 = vpack.c.bf16 %v7020_v8, %v7014_v4  ;;  %v7123_v4 = vld [vmem:[#allocation3 + $0x98] sm:$0x3]  ;;  %v13291_v8 = vld [vmem:[#allocation10 + $0x8e0] ss:$8 sps:$4 sm:$0xff]   ;;  %v7134_v2 = vld [vmem:[#allocation3 + $0xf0] sm:$0x3] }
 0x5de   :  { %10187 = vmatpush1.bf16.msra.mxu1 %v13264_v33  ;;  %v6878_v33 = vld [vmem:[#allocation3 + $0x230] sm:$0x1]  ;;  %v7093_v46 = vpack.c.bf16 %v7035_v6, %v7029_v31  ;;  %v13296_v31 = vld [vmem:[#allocation10 + $0x8f4] ss:$8 sps:$4 sm:$0xff]   ;;  %v7240_v6 = vrot.slane %v7112_v27, 2  ;;  %v7271_v27 = vrot.slane %v7134_v2, 2 }
 0x5df   :  { %10188 = vmatprep.subr.bf16.mxu1 %v13269_v36  ;;  %v6881_v36 = vld [vmem:[#allocation3 + $0x248] sm:$0xfe] }
 0x5e0   :  { %v7039_v61 = vrot.slane %v6881_v36, 1  ;;  %v7241_v36 = vrot.slane %v7114_v13, 2 }
 0x5e1   :  { %10126 = vmatmul.mubr.bf16.gmra.mrb[12].mxu1 %v7086_v32  ;;  %v7045_v32 = vrot.slane %v6885_v41, 1 }
 0x5e2   :  { %10135 = vmatprep.mubr.bf16.mxu1 %v7089_v12  ;;  %10189 = vmatpush1.bf16.msra.mxu1 %v13267_v59  ;;  %v7031_v59 = vrot.slane %v6878_v33, 1  ;;  %v13287_v12 = vld [vmem:[#allocation10 + $0x8c4] ss:$8 sps:$4 sm:$0xff]   ;;  %v7041_v18 = vsel %vm293_vm0, %v7039_v61, %v7040_v63  ;;  %v7242_v47 = vsel %vm582_vm1, %v7240_v6, %v7241_v36  ;;  %v7124_v61 = vld [vmem:[#allocation3 + $0xa0] sm:$0xfc] }
 0x5e3   :  { %10190 = vmatprep.subr.bf16.mxu1 %v13272_v7  ;;  %v7046_v7 = vrot.slane %v6887_v44, 1  ;;  %v7256_v44 = vrot.slane %v7123_v4, 2  ;;  %v7126_v63 = vld [vmem:[#allocation3 + $0xb0] sm:$0x3] }
 0x5e4   :  { %v7032_v62 = vsel %vm293_vm0, %v7030_v55, %v7031_v59  ;;  %v7122_v59 = vld [vmem:[#allocation3 + $0x90] sm:$0x3] }
 0x5e5   :  { %v7047_v20 = vsel %vm293_vm0, %v7045_v32, %v7046_v7  ;;  %v7092_v57 = vpack.c.bf16 %v7032_v62, %v7026_v34  ;;  %v7131_v34 = vld [vmem:[#allocation3 + $0xd8] sm:$0x3]  ;;  %v7133_v62 = vld [vmem:[#allocation3 + $0xe8] sm:$0xfc]  ;;  %v7253_v15 = vrot.slane %v7122_v59, 2 }
 0x5e6   :  { %10191 = vmatpush1.bf16.msra.mxu1 %v13270_v42  ;;  %v6886_v42 = vld [vmem:[#allocation3 + $0x270] sm:$0x1]  ;;  %v7095_v56 = vpack.c.bf16 %v7047_v20, %v7041_v18  ;;  %v7258_v18 = vrot.slane %v7124_v61, 2  ;;  %v7259_v20 = vrot.slane %v7126_v63, 2  ;;  %v7268_v45 = vrot.slane %v7131_v34, 2 }
 0x5e7   :  { %10192 = vmatprep.subr.bf16.mxu1 %v13275_v30  ;;  %v7113_v30 = vld [vmem:[#allocation3 + $0x48] sm:$0xfc]  ;;  %v7150_v34 = vld [vmem:[#allocation3 + $0x1b0] sm:$0x3] }
 0x5e8   :  { %v7243_v48 = vrot.slane %v7113_v30, 2 }
 0x5e9   :  { %10136 = vmatmul.mubr.bf16.gmra.mrb[16].mxu1 %v7088_v9  ;;  %v7249_v9 = vrot.slane %v7117_v24, 2  ;;  %v7274_v24 = vrot.slane %v7135_v14, 2 }
 0x5ea   :  { %10145 = vmatprep.mubr.bf16.mxu1 %v7091_v51  ;;  %10193 = vmatpush1.bf16.msra.mxu1 %v13273_v52  ;;  %v7043_v52 = vrot.slane %v6886_v42, 1  ;;  %v13293_v51 = vld [vmem:[#allocation10 + $0x8e4] ss:$8 sps:$4 sm:$0xff]   ;;  %v7245_v0 = vsel %vm582_vm1, %v7243_v48, %v7244_v22 }
 0x5eb   :  { %10194 = vmatprep.subr.bf16.mxu1 %v13278_v39  ;;  %v7250_v39 = vrot.slane %v7119_v25, 2  ;;  %v7137_v48 = vld [vmem:[#allocation3 + $0x108] sm:$0xfc] }
 0x5ec   :  { %v7044_v5 = vsel %vm293_vm0, %v7042_v1, %v7043_v52  ;;  %v7279_v53 = vrot.slane %v7137_v48, 2  ;;  %v7154_v48 = vld [vmem:[#allocation3 + $0x1d0] sm:$0x3] }
 0x5ed   :  { %v7251_v43 = vsel %vm582_vm1, %v7249_v9, %v7250_v39  ;;  %v7094_v3 = vpack.c.bf16 %v7044_v5, %v7038_v60  ;;  %v7139_v9 = vld [vmem:[#allocation3 + $0x118] sm:$0x3]  ;;  %v7141_v39 = vld [vmem:[#allocation3 + $0x128] sm:$0xfc]  ;;  %v7265_v60 = vrot.slane %v7130_v10, 2 }
 0x5ee   :  { %10195 = vmatpush1.bf16.msra.mxu1 %v13276_v38  ;;  %v7118_v38 = vld [vmem:[#allocation3 + $0x70] sm:$0x3]  ;;  %v7369_v33 = vpack.c.bf16 %v7251_v43, %v7245_v0  ;;  %v7280_v0 = vrot.slane %v7139_v9, 2  ;;  %v7285_v43 = vrot.slane %v7141_v39, 2  ;;  %v7156_v39 = vld [vmem:[#allocation3 + $0x1e0] sm:$0xfc] }
 0x5ef   :  { %10196 = vmatprep.subr.bf16.mxu1 %v13281_v28  ;;  %v7121_v28 = vld [vmem:[#allocation3 + $0x88] sm:$0xfc] }
 0x5f0   :  { %v7255_v41 = vrot.slane %v7121_v28, 2 }
 0x5f1   :  { %10146 = vmatmul.mubr.bf16.gmra.mrb[20].mxu1 %v7090_v16  ;;  %v7261_v16 = vrot.slane %v7125_v29, 2  ;;  %v7138_v29 = vld [vmem:[#allocation3 + $0x110] sm:$0x3] }
 0x5f2   :  { %10155 = vmatprep.mubr.bf16.mxu1 %v7093_v46  ;;  %10197 = vmatpush1.bf16.msra.mxu1 %v13279_v35  ;;  %v7247_v35 = vrot.slane %v7118_v38, 2  ;;  %v7120_v46 = vld [vmem:[#allocation3 + $0x80] sm:$0xfc]  ;;  %v7257_v32 = vsel %vm582_vm1, %v7255_v41, %v7256_v44  ;;  %v7151_v41 = vld [vmem:[#allocation3 + $0x1b8] sm:$0x3] }
 0x5f3   :  { %10198 = vmatprep.subr.bf16.mxu1 %v13284_v19  ;;  %v7262_v19 = vrot.slane %v7127_v23, 2  ;;  %v7140_v23 = vld [vmem:[#allocation3 + $0x120] sm:$0xfc]  ;;  %v7298_v61 = vrot.slane %v7151_v41, 2  ;;  %v7166_v41 = vld [vmem:[#allocation3 + $0x230] sm:$0x3] }
 0x5f4   :  { %v7248_v55 = vsel %vm582_vm1, %v7246_v40, %v7247_v35  ;;  %v7147_v40 = vld [vmem:[#allocation3 + $0x198] sm:$0x3]  ;;  %v7149_v35 = vld [vmem:[#allocation3 + $0x1a8] sm:$0xfc] }
 0x5f5   :  { %v7263_v7 = vsel %vm582_vm1, %v7261_v16, %v7262_v19  ;;  %v7368_v17 = vpack.c.bf16 %v7248_v55, %v7242_v47  ;;  %v7277_v16 = vrot.slane %v7138_v29, 2  ;;  %v7282_v19 = vrot.slane %v7140_v23, 2 }
 0x5f6   :  { %10199 = vmatpush1.bf16.msra.mxu1 %v13282_v50  ;;  %v7252_v50 = vrot.slane %v7120_v46, 2  ;;  %v7371_v42 = vpack.c.bf16 %v7263_v7, %v7257_v32  ;;  %v7292_v55 = vrot.slane %v7147_v40, 2  ;;  %v7297_v59 = vrot.slane %v7149_v35, 2  ;;  %v7144_v7 = vld [vmem:[#allocation3 + $0x180] sm:$0xfc] }
 0x5f7   :  { %10200 = vmatprep.subr.bf16.mxu1 %v13287_v12  ;;  %v7129_v12 = vld [vmem:[#allocation3 + $0xc8] sm:$0xfc]  ;;  %v7162_v40 = vld [vmem:[#allocation3 + $0x210] sm:$0x3]  ;;  %v7164_v35 = vld [vmem:[#allocation3 + $0x220] sm:$0xfc] }
 0x5f8   :  { %v7267_v30 = vrot.slane %v7129_v12, 2  ;;  %v7254_v25 = vsel %vm582_vm1, %v7252_v50, %v7253_v15  ;;  %v7146_v50 = vld [vmem:[#allocation3 + $0x190] sm:$0x3]  ;;  %v7148_v12 = vld [vmem:[#allocation3 + $0x1a0] sm:$0xfc] }
 0x5f9   :  { %10156 = vmatmul.mubr.bf16.gmra.mrb[24].mxu1 %v7092_v57  ;;  %v7260_v57 = vsel %vm582_vm1, %v7258_v18, %v7259_v20  ;;  %v7155_v15 = vld [vmem:[#allocation3 + $0x1d8] sm:$0x3]  ;;  %v7157_v18 = vld [vmem:[#allocation3 + $0x1e8] sm:$0xfc] }
 0x5fa   :  { %10165 = vmatprep.mubr.bf16.mxu1 %v7095_v56  ;;  %10201 = vmatpush1.bf16.msra.mxu1 %v13285_v21  ;;  %v7273_v21 = vrot.slane %v7133_v62, 2  ;;  %v7132_v56 = vld [vmem:[#allocation3 + $0xe0] sm:$0xfc]  ;;  %v7269_v1 = vsel %vm582_vm1, %v7267_v30, %v7268_v45  ;;  %v7370_v22 = vpack.c.bf16 %v7260_v57, %v7254_v25  ;;  %v7153_v62 = vld [vmem:[#allocation3 + $0x1c8] sm:$0xfc]  ;;  %v7288_v30 = vrot.slane %v7144_v7, 2 }
 0x5fb   :  { %10202 = vmatprep.subr.bf16.mxu1 %v13290_v11  ;;  %v7128_v11 = vld [vmem:[#allocation3 + $0xc0] sm:$0xfc]  ;;  %v7270_v5 = vrot.slane %v7132_v56, 2  ;;  %v7159_v20 = vld [vmem:[#allocation3 + $0x1f8] sm:$0x3]  ;;  %v7289_v45 = vrot.slane %v7146_v50, 2 }
 0x5fc   :  { %v7275_v52 = vsel %vm582_vm1, %v7273_v21, %v7274_v24  ;;  %v7294_v21 = vrot.slane %v7148_v12, 2  ;;  %v7295_v24 = vrot.slane %v7150_v34, 2  ;;  %v7303_v25 = vrot.slane %v7153_v62, 2 }
 0x5fd   :  { %v7373_v13 = vpack.c.bf16 %v7275_v52, %v7269_v1  ;;  %v7272_v4 = vsel %vm582_vm1, %v7270_v5, %v7271_v27  ;;  %v7309_v10 = vrot.slane %v7157_v18, 2  ;;  %v7310_v56 = vrot.slane %v7159_v20, 2  ;;  %v7152_v52 = vld [vmem:[#allocation3 + $0x1c0] sm:$0xfc]  ;;  %v7165_v5 = vld [vmem:[#allocation3 + $0x228] sm:$0xfc] }
 0x5fe   :  { %10203 = vmatpush1.bf16.msra.mxu1 %v13288_v58  ;;  %v7143_v58 = vld [vmem:[#allocation3 + $0x138] sm:$0x3]  ;;  %v7290_v2 = vsel %vm582_vm1, %v7288_v30, %v7289_v45  ;;  %v7296_v1 = vsel %vm582_vm1, %v7294_v21, %v7295_v24  ;;  %v7321_v29 = vrot.slane %v7165_v5, 2  ;;  %v7170_v18 = vld [vmem:[#allocation3 + $0x250] sm:$0x3] }
 0x5ff   :  { %10204 = vmatprep.subr.bf16.mxu1 %v13293_v51  ;;  %v7264_v51 = vrot.slane %v7128_v11, 2  ;;  %v7286_v38 = vrot.slane %v7143_v58, 2  ;;  %v7304_v11 = vrot.slane %v7155_v15, 2  ;;  %v7311_v9 = vsel %vm582_vm1, %v7309_v10, %v7310_v56  ;;  %v7158_v58 = vld [vmem:[#allocation3 + $0x1f0] sm:$0x3] }
 0x600   :  { %v7167_v27 = vld [vmem:[#allocation3 + $0x238] sm:$0x3]  ;;  %v7172_v20 = vld [vmem:[#allocation3 + $0x260] sm:$0xfc]  ;;  %v7325_v24 = vrot.slane %v7170_v18, 2 }
 0x601   :  { %10166 = vmatmul.mubr.bf16.gmra.mrb[28].mxu1 %v7094_v3  ;;  %v7266_v28 = vsel %vm582_vm1, %v7264_v51, %v7265_v60  ;;  %v7142_v3 = vld [vmem:[#allocation3 + $0x130] sm:$0x3]  ;;  %v7287_v6 = vsel %vm582_vm1, %v7285_v43, %v7286_v38  ;;  %v7161_v51 = vld [vmem:[#allocation3 + $0x208] sm:$0xfc]  ;;  %v7163_v60 = vld [vmem:[#allocation3 + $0x218] sm:$0x3] }
 0x602   :  { %10205 = vmatpush1.bf16.msra.mxu1 %v13291_v8  ;;  %10208 = vmatprep.mubr.bf16.mxu1 %v7369_v33  ;;  %v7136_v8 = vld [vmem:[#allocation3 + $0x100] sm:$0xfc]  ;;  %v7145_v33 = vld [vmem:[#allocation3 + $0x188] sm:$0xfc]  ;;  %v7372_v36 = vpack.c.bf16 %v7272_v4, %v7266_v28  ;;  %v7301_v43 = vrot.slane %v7154_v48, 2  ;;  %v7306_v38 = vrot.slane %v7156_v39, 2 }
 0x603   :  { %10206 = vmatprep.subr.bf16.mxu1 %v13296_v31  ;;  %v7281_v31 = vsel %vm582_vm1, %v7279_v53, %v7280_v0  ;;  %v7276_v44 = vrot.slane %v7136_v8, 2  ;;  %v7291_v47 = vrot.slane %v7145_v33, 2  ;;  %v7300_v53 = vrot.slane %v7152_v52, 2 }
 0x604   :  { %v7375_v46 = vpack.c.bf16 %v7287_v6, %v7281_v31  ;;  %v7307_v28 = vrot.slane %v7158_v58, 2  ;;  %v7315_v4 = vrot.slane %v7161_v51, 2  ;;  %v7316_v8 = vrot.slane %v7163_v60, 2 }
 0x605   :  { %v7278_v63 = vsel %vm582_vm1, %v7276_v44, %v7277_v16  ;;  %v7293_v14 = vsel %vm582_vm1, %v7291_v47, %v7292_v55  ;;  %v7322_v23 = vrot.slane %v7167_v27, 2  ;;  %v7169_v44 = vld [vmem:[#allocation3 + $0x248] sm:$0xfc]  ;;  %v7171_v16 = vld [vmem:[#allocation3 + $0x258] sm:$0x3] }
 0x606   :  { %10207 = vmatpush1.bf16.msra.mxu1 %v13294_v26  ;;  %v7283_v26 = vrot.slane %v7142_v3, 2  ;;  %v7302_v3 = vsel %vm582_vm1, %v7300_v53, %v7301_v43  ;;  %v7308_v31 = vsel %vm582_vm1, %v7306_v38, %v7307_v28  ;;  %v7317_v6 = vsel %vm582_vm1, %v7315_v4, %v7316_v8 }
 0x607   :  { %v7323_v33 = vsel %vm582_vm1, %v7321_v29, %v7322_v23  ;;  %v7328_v7 = vrot.slane %v7171_v16, 2 }
 0x608   :  { %v7284_v32 = vsel %vm582_vm1, %v7282_v19, %v7283_v26  ;;  %v7173_v19 = vld [vmem:[#allocation3 + $0x268] sm:$0xfc]  ;;  %v7175_v26 = vld [vmem:[#allocation3 + $0x278] sm:$0x3]  ;;  %v7381_v47 = vpack.c.bf16 %v7323_v33, %v7317_v6 }
 0x609   :  { %10209 = vmatmul.mubr.bf16.vlgmr.msra.gmra.mrb[0].mxu1 %v7368_v17  ;;  %v7299_v17 = vsel %vm582_vm1, %v7297_v59, %v7298_v61  ;;  %v7313_v59 = vrot.slane %v7162_v40, 2  ;;  %v7318_v61 = vrot.slane %v7164_v35, 2  ;;  %v7333_v50 = vrot.slane %v7173_v19, 2 }
 0x60a   :  { %10218 = vmatprep.mubr.bf16.mxu1 %v7371_v42  ;;  %v7374_v42 = vpack.c.bf16 %v7284_v32, %v7278_v63  ;;  %v7377_v57 = vpack.c.bf16 %v7299_v17, %v7293_v14  ;;  %v7319_v63 = vrot.slane %v7166_v41, 2  ;;  %v7327_v32 = vrot.slane %v7169_v44, 2  ;;  %v7168_v14 = vld [vmem:[#allocation3 + $0x240] sm:$0xfc] }
 0x60b   :  { %v7334_v12 = vrot.slane %v7175_v26, 2  ;;  %v7324_v45 = vrot.slane %v7168_v14, 2 }
 0x60c   :  { %v7320_v62 = vsel %vm582_vm1, %v7318_v61, %v7319_v63  ;;  %v7329_v17 = vsel %vm582_vm1, %v7327_v32, %v7328_v7 }
 0x60d   :  { %v7335_v15 = vsel %vm582_vm1, %v7333_v50, %v7334_v12 }
 0x60e   :  { %v7383_v21 = vpack.c.bf16 %v7335_v15, %v7329_v17 }
 0x611   :  { %10219 = vmatmul.mubr.bf16.gmra.mrb[4].mxu1 %v7370_v22  ;;  %v7305_v22 = vsel %vm582_vm1, %v7303_v25, %v7304_v11  ;;  %v7330_v25 = vrot.slane %v7172_v20, 2  ;;  %v7326_v11 = vsel %vm582_vm1, %v7324_v45, %v7325_v24 }
 0x612   :  { %10228 = vmatprep.mubr.bf16.mxu1 %v7373_v13  ;;  %v7376_v13 = vpack.c.bf16 %v7296_v1, %v7290_v2  ;;  %v7379_v0 = vpack.c.bf16 %v7311_v9, %v7305_v22 }
 0x619   :  { %10229 = vmatmul.mubr.bf16.gmra.mrb[8].mxu1 %v7372_v36  ;;  %v7160_v36 = vld [vmem:[#allocation3 + $0x200] sm:$0xfc] }
 0x61a   :  { %10238 = vmatprep.mubr.bf16.mxu1 %v7375_v46  ;;  %v7378_v46 = vpack.c.bf16 %v7308_v31, %v7302_v3  ;;  %v7312_v55 = vrot.slane %v7160_v36, 2 }
 0x61c   :  { %v7314_v34 = vsel %vm582_vm1, %v7312_v55, %v7313_v59 }
 0x61d   :  { %v7380_v30 = vpack.c.bf16 %v7320_v62, %v7314_v34 }
 0x621   :  { %10239 = vmatmul.mubr.bf16.gmra.mrb[12].mxu1 %v7374_v42  ;;  %v7174_v42 = vld [vmem:[#allocation3 + $0x270] sm:$0x3] }
 0x622   :  { %10248 = vmatprep.mubr.bf16.mxu1 %v7377_v57  ;;  %v7331_v57 = vrot.slane %v7174_v42, 2 }
 0x624   :  { %v7332_v10 = vsel %vm582_vm1, %v7330_v25, %v7331_v57 }
 0x625   :  { %v7382_v56 = vpack.c.bf16 %v7332_v10, %v7326_v11 }
 0x629   :  { %10249 = vmatmul.mubr.bf16.gmra.mrb[16].mxu1 %v7376_v13 }
 0x62a   :  { %10258 = vmatprep.mubr.bf16.mxu1 %v7379_v0 }
 0x631   :  { %10259 = vmatmul.mubr.bf16.gmra.mrb[20].mxu1 %v7378_v46 }
 0x632   :  { %10268 = vmatprep.mubr.bf16.mxu1 %v7381_v47 }
 0x639   :  { %10269 = vmatmul.mubr.bf16.gmra.mrb[24].mxu1 %v7380_v30 }
 0x63a   :  { %10278 = vmatprep.mubr.bf16.mxu1 %v7383_v21 }
 0x641   :  { %10279 = vmatmul.mubr.bf16.gmra.mrb[28].mxu1 %v7382_v56 }
 0x6dc   :  { %v15852_v2 = vpop.f32.mrb[0].mxu1 }
 0x6dd   :  { %v15854_v1 = vpop.f32.mrb[1].mxu1  ;;  %v10333_v48 = vmul.f32 %v15852_v2, %v15852_v2 }
 0x6de   :  { %v15856_v52 = vpop.f32.mrb[2].mxu1  ;;  %v10334_v58 = vmul.f32 %v15854_v1, %v15854_v1 }
 0x6df   :  { %v10289_v22 = vadd.f32 %v15856_v52, %v15852_v2  ;;  %v10335_v9 = vmul.f32 %v15856_v52, %v15856_v52  ;;  %v15864_v39 = vpop.f32.mrb[3].mxu1 }
 0x6e0   :  { %v10310_v51 = vadd.f32 %v15864_v39, %v15854_v1  ;;  %v10336_v60 = vmul.f32 %v15864_v39, %v15864_v39 }
 0x6e1   :  { %v10365_v5 = vadd.f32 %v10335_v9, %v10333_v48 }
 0x6e2   :  { %v10386_v27 = vadd.f32 %v10336_v60, %v10334_v58 }
 0x6e4   :  { %v15872_v13 = vpop.f32.mrb[4].mxu1 }
 0x6e5   :  { %v10290_v53 = vadd.f32 %v10289_v22, %v15872_v13  ;;  %v10337_v0 = vmul.f32 %v15872_v13, %v15872_v13  ;;  %v15877_v43 = vpop.f32.mrb[5].mxu1 }
 0x6e6   :  { %v10311_v38 = vadd.f32 %v10310_v51, %v15877_v43  ;;  %v10338_v28 = vmul.f32 %v15877_v43, %v15877_v43  ;;  %v15882_v4 = vpop.f32.mrb[6].mxu1 }
 0x6e7   :  { %v10366_v8 = vadd.f32 %v10365_v5, %v10337_v0  ;;  %v10291_v29 = vadd.f32 %v10290_v53, %v15882_v4  ;;  %v10339_v23 = vmul.f32 %v15882_v4, %v15882_v4  ;;  %v15887_v3 = vpop.f32.mrb[7].mxu1 }
 0x6e8   :  { %v10387_v31 = vadd.f32 %v10386_v27, %v10338_v28  ;;  %v10312_v6 = vadd.f32 %v10311_v38, %v15887_v3  ;;  %v10340_v33 = vmul.f32 %v15887_v3, %v15887_v3 }
 0x6e9   :  { %v10367_v36 = vadd.f32 %v10366_v8, %v10339_v23 }
 0x6ea   :  { %v10388_v40 = vadd.f32 %v10387_v31, %v10340_v33 }
 0x6ec   :  { %v15892_v35 = vpop.f32.mrb[8].mxu1 }
 0x6ed   :  { %v10292_v41 = vadd.f32 %v10291_v29, %v15892_v35  ;;  %v10341_v44 = vmul.f32 %v15892_v35, %v15892_v35  ;;  %v15897_v16 = vpop.f32.mrb[9].mxu1 }
 0x6ee   :  { %v10313_v19 = vadd.f32 %v10312_v6, %v15897_v16  ;;  %v10342_v26 = vmul.f32 %v15897_v16, %v15897_v16  ;;  %v15902_v46 = vpop.f32.mrb[10].mxu1 }
 0x6ef   :  { %v10368_v47 = vadd.f32 %v10367_v36, %v10341_v44  ;;  %v10293_v55 = vadd.f32 %v10292_v41, %v15902_v46  ;;  %v10343_v59 = vmul.f32 %v15902_v46, %v15902_v46  ;;  %v15907_v61 = vpop.f32.mrb[11].mxu1 }
 0x6f0   :  { %v10389_v63 = vadd.f32 %v10388_v40, %v10342_v26  ;;  %v10314_v32 = vadd.f32 %v10313_v19, %v15907_v61  ;;  %v10344_v7 = vmul.f32 %v15907_v61, %v15907_v61 }
 0x6f1   :  { %v10369_v50 = vadd.f32 %v10368_v47, %v10343_v59 }
 0x6f2   :  { %v10390_v12 = vadd.f32 %v10389_v63, %v10344_v7 }
 0x6f4   :  { %v15912_v34 = vpop.f32.mrb[12].mxu1 }
 0x6f5   :  { %v10294_v62 = vadd.f32 %v10293_v55, %v15912_v34  ;;  %v10345_v14 = vmul.f32 %v15912_v34, %v15912_v34  ;;  %v15917_v17 = vpop.f32.mrb[13].mxu1 }
 0x6f6   :  { %v10315_v15 = vadd.f32 %v10314_v32, %v15917_v17  ;;  %v10346_v18 = vmul.f32 %v15917_v17, %v15917_v17  ;;  %v15922_v20 = vpop.f32.mrb[14].mxu1 }
 0x6f7   :  { %v10370_v42 = vadd.f32 %v10369_v50, %v10345_v14  ;;  %v10295_v30 = vadd.f32 %v10294_v62, %v15922_v20  ;;  %v10347_v45 = vmul.f32 %v15922_v20, %v15922_v20  ;;  %v15927_v21 = vpop.f32.mrb[15].mxu1 }
 0x6f8   :  { %v10391_v24 = vadd.f32 %v10390_v12, %v10346_v18  ;;  %v10316_v25 = vadd.f32 %v10315_v15, %v15927_v21  ;;  %v10348_v57 = vmul.f32 %v15927_v21, %v15927_v21 }
 0x6f9   :  { %v10371_v11 = vadd.f32 %v10370_v42, %v10347_v45 }
 0x6fa   :  { %v10392_v10 = vadd.f32 %v10391_v24, %v10348_v57 }
 0x6fc   :  { %v15932_v56 = vpop.f32.mrb[16].mxu1 }
 0x6fd   :  { %v10296_v48 = vadd.f32 %v10295_v30, %v15932_v56  ;;  %v10349_v22 = vmul.f32 %v15932_v56, %v15932_v56  ;;  %v15937_v9 = vpop.f32.mrb[17].mxu1 }
 0x6fe   :  { %v10317_v58 = vadd.f32 %v10316_v25, %v15937_v9  ;;  %v10350_v51 = vmul.f32 %v15937_v9, %v15937_v9  ;;  %v15942_v60 = vpop.f32.mrb[18].mxu1 }
 0x6ff   :  { %v10372_v5 = vadd.f32 %v10371_v11, %v10349_v22  ;;  %v10297_v27 = vadd.f32 %v10296_v48, %v15942_v60  ;;  %v10351_v53 = vmul.f32 %v15942_v60, %v15942_v60  ;;  %v15947_v0 = vpop.f32.mrb[19].mxu1 }
 0x700   :  { %v10393_v38 = vadd.f32 %v10392_v10, %v10350_v51  ;;  %v10318_v28 = vadd.f32 %v10317_v58, %v15947_v0  ;;  %v10352_v8 = vmul.f32 %v15947_v0, %v15947_v0 }
 0x701   :  { %v10373_v29 = vadd.f32 %v10372_v5, %v10351_v53 }
 0x702   :  { %v10394_v23 = vadd.f32 %v10393_v38, %v10352_v8 }
 0x704   :  { %v15952_v31 = vpop.f32.mrb[20].mxu1 }
 0x705   :  { %16612 = vst [vmem:[#allocation22_spill] sm:$0xff] %v15952_v31  ;;  %v10298_v6 = vadd.f32 %v10297_v27, %v15952_v31  ;;  %v10353_v33 = vmul.f32 %v15952_v31, %v15952_v31  ;;  %v15957_v36 = vpop.f32.mrb[21].mxu1  ;;  %v16233_v31 = vld [vmem:[%s16588_s0 + $0x190] sm:$0x1] }
 0x706   :  { %16613 = vst [vmem:[#allocation23_spill] sm:$0xff] %v15957_v36  ;;  %v10319_v40 = vadd.f32 %v10318_v28, %v15957_v36  ;;  %v10354_v41 = vmul.f32 %v15957_v36, %v15957_v36  ;;  %v15962_v44 = vpop.f32.mrb[22].mxu1  ;;  %v16212_v36 = vld [vmem:[%s16588_s0 + $0x178] sm:$0x1] }
 0x707   :  { %16614 = vst [vmem:[#allocation24_spill] sm:$0xff] %v15962_v44  ;;  %v10374_v19 = vadd.f32 %v10373_v29, %v10353_v33  ;;  %v10299_v26 = vadd.f32 %v10298_v6, %v15962_v44  ;;  %v10355_v47 = vmul.f32 %v15962_v44, %v15962_v44  ;;  %v15967_v55 = vpop.f32.mrb[23].mxu1  ;;  %v16207_v44 = vld [vmem:[%s16588_s0 + $0x170] sm:$0x1] }
 0x708   :  { %16615 = vst [vmem:[#allocation25_spill] sm:$0xff] %v15967_v55  ;;  %v10395_v59 = vadd.f32 %v10394_v23, %v10354_v41  ;;  %v10320_v63 = vadd.f32 %v10319_v40, %v15967_v55  ;;  %v10356_v32 = vmul.f32 %v15967_v55, %v15967_v55  ;;  %v16186_v55 = vld [vmem:[%s16588_s0 + $0x118] sm:$0x1] }
 0x709   :  { %v10375_v7 = vadd.f32 %v10374_v19, %v10355_v47 }
 0x70a   :  { %v10396_v50 = vadd.f32 %v10395_v59, %v10356_v32 }
 0x70c   :  { %v15972_v12 = vpop.f32.mrb[24].mxu1 }
 0x70d   :  { %16616 = vst [vmem:[#allocation26_spill] sm:$0xff] %v15972_v12  ;;  %v10300_v62 = vadd.f32 %v10299_v26, %v15972_v12  ;;  %v10357_v14 = vmul.f32 %v15972_v12, %v15972_v12  ;;  %v15977_v15 = vpop.f32.mrb[25].mxu1  ;;  %v16181_v12 = vld [vmem:[%s16588_s0 + $0x110] sm:$0x1] }
 0x70e   :  { %16617 = vst [vmem:[#allocation27_spill] sm:$0xff] %v15977_v15  ;;  %v10321_v18 = vadd.f32 %v10320_v63, %v15977_v15  ;;  %v10358_v42 = vmul.f32 %v15977_v15, %v15977_v15  ;;  %v15982_v30 = vpop.f32.mrb[26].mxu1 }
 0x70f   :  { %16618 = vst [vmem:[#allocation28_spill] sm:$0xff] %v15982_v30  ;;  %v10376_v45 = vadd.f32 %v10375_v7, %v10357_v14  ;;  %v10301_v24 = vadd.f32 %v10300_v62, %v15982_v30  ;;  %v10359_v25 = vmul.f32 %v15982_v30, %v15982_v30  ;;  %v15987_v57 = vpop.f32.mrb[27].mxu1  ;;  %v11867_v30 = vld [vmem:[%s16588_s0 + $0xd8] sm:$0x1] }
 0x710   :  { %16619 = vst [vmem:[#allocation29_spill] sm:$0xff] %v15987_v57  ;;  %v10397_v11 = vadd.f32 %v10396_v50, %v10358_v42  ;;  %v10322_v10 = vadd.f32 %v10321_v18, %v15987_v57  ;;  %v10360_v48 = vmul.f32 %v15987_v57, %v15987_v57 }
 0x711   :  { %v10377_v22 = vadd.f32 %v10376_v45, %v10359_v25 }
 0x712   :  { %v10398_v58 = vadd.f32 %v10397_v11, %v10360_v48 }
 0x714   :  { %v15992_v51 = vpop.f32.mrb[28].mxu1 }
 0x715   :  { %16620 = vst [vmem:[#allocation30_spill] sm:$0xff] %v15992_v51  ;;  %v10302_v5 = vadd.f32 %v10301_v24, %v15992_v51  ;;  %v10361_v27 = vmul.f32 %v15992_v51, %v15992_v51  ;;  %v15997_v53 = vpop.f32.mrb[29].mxu1 }
 0x716   :  { %16621 = vst [vmem:[#allocation31_spill] sm:$0xff] %v15997_v53  ;;  %v10323_v38 = vadd.f32 %v10322_v10, %v15997_v53  ;;  %v10362_v28 = vmul.f32 %v15997_v53, %v15997_v53  ;;  %v16002_v8 = vpop.f32.mrb[30].mxu1 }
 0x717   :  { %16622 = vst [vmem:[#allocation32_spill] sm:$0xff] %v16002_v8  ;;  %v10378_v29 = vadd.f32 %v10377_v22, %v10361_v27  ;;  %v10303_v23 = vadd.f32 %v10302_v5, %v16002_v8  ;;  %v10363_v6 = vmul.f32 %v16002_v8, %v16002_v8  ;;  %v16007_v33 = vpop.f32.mrb[31].mxu1  ;;  %v11866_v8 = vld [vmem:[%s16588_s0 + $0xd0] sm:$0x1] }
 0x718   :  { %16623 = vst [vmem:[#allocation33_spill] sm:$0xff] %v16007_v33  ;;  %v10399_v40 = vadd.f32 %v10398_v58, %v10362_v28  ;;  %v10324_v41 = vadd.f32 %v10323_v38, %v16007_v33  ;;  %v10364_v19 = vmul.f32 %v16007_v33, %v16007_v33  ;;  %v11865_v33 = vld [vmem:[%s16588_s0 + $0xc8] sm:$0xfe] }
 0x719   :  { %v10304_v26 = vrot.slane %v10303_v23, 4  ;;  %v10379_v47 = vadd.f32 %v10378_v29, %v10363_v6 }
 0x71a   :  { %v10325_v59 = vrot.slane %v10324_v41, 4  ;;  %v10400_v63 = vadd.f32 %v10399_v40, %v10364_v19  ;;  %v16027_v19 = vld [vmem:[%s16588_s0 + $0x30] sm:$0x1] }
 0x71b   :  { %v10305_v32 = vadd.f32 %v10304_v26, %v10303_v23  ;;  %v10380_v7 = vrot.slane %v10379_v47, 4  ;;  %v16015_v23 = vld [vmem:[%s16588_s0 + $0x20] sm:$0xfe]  ;;  %v16032_v26 = vld [vmem:[%s16588_s0 + $0x38] sm:$0x1] }
 0x71c   :  { %v10326_v50 = vadd.f32 %v10325_v59, %v10324_v41  ;;  %v10401_v62 = vrot.slane %v10400_v63, 4  ;;  %v16022_v41 = vld [vmem:[%s16588_s0 + $0x28] sm:$0xfe] }
 0x71d   :  { %v10306_v14 = vrot.slane %v10305_v32, 2  ;;  %v10381_v18 = vadd.f32 %v10380_v7, %v10379_v47  ;;  %v16049_v7 = vld [vmem:[%s16588_s0 + $0x50] sm:$0x1] }
 0x71e   :  { %v10327_v42 = vrot.slane %v10326_v50, 2  ;;  %v10402_v45 = vadd.f32 %v10401_v62, %v10400_v63  ;;  %v16039_v63 = vld [vmem:[%s16588_s0 + $0x40] sm:$0xfe] }
 0x71f   :  { %v10307_v24 = vadd.f32 %v10306_v14, %v10305_v32  ;;  %v10382_v25 = vrot.slane %v10381_v18, 2  ;;  %v16044_v32 = vld [vmem:[%s16588_s0 + $0x48] sm:$0xfe]  ;;  %v16056_v14 = vld [vmem:[%s16588_s0 + $0x58] sm:$0x1]  ;;  %v10679_v53 = vrot.slane %v16039_v63, 1 }
 0x720   :  { %v10328_v11 = vadd.f32 %v10327_v42, %v10326_v50  ;;  %v10403_v10 = vrot.slane %v10402_v45, 2  ;;  %v16066_v42 = vld [vmem:[%s16588_s0 + $0x70] sm:$0x1] }
 0x721   :  { %v10308_v48 = vrot.slane %v10307_v24, 1  ;;  %v10383_v22 = vadd.f32 %v10382_v25, %v10381_v18  ;;  %v16061_v18 = vld [vmem:[%s16588_s0 + $0x60] sm:$0xfe]  ;;  %v16073_v25 = vld [vmem:[%s16588_s0 + $0x68] sm:$0xfe]  ;;  %v10686_v57 = vrot.slane %v16066_v42, 1 }
 0x722   :  { %v10329_v58 = vrot.slane %v10328_v11, 1  ;;  %v10404_v5 = vadd.f32 %v10403_v10, %v10402_v45  ;;  %v16083_v10 = vld [vmem:[%s16588_s0 + $0x80] sm:$0xfe]  ;;  %v10685_v51 = vrot.slane %v16061_v18, 1  ;;  %v10688_v15 = vrot.slane %v16073_v25, 1 }
 0x723   :  { %v10309_v27 = vadd.f32 %v10308_v48, %v10307_v24  ;;  %v10384_v38 = vrot.slane %v10383_v22, 1 }
 0x724   :  { %v10330_v28 = vadd.f32 %v10329_v58, %v10328_v11  ;;  %v10405_v29 = vrot.slane %v10404_v5, 1  ;;  %v16078_v11 = vld [vmem:[%s16588_s0 + $0x78] sm:$0x1]  ;;  %v16093_v58 = vld [vmem:[%s16588_s0 + $0x90] sm:$0x1] }
 0x725   :  { %v16017_v6 = vmul.f32 0.0078125, %v10309_v27  ;;  %v10385_v40 = vadd.f32 %v10384_v38, %v10383_v22  ;;  %v16088_v22 = vld [vmem:[%s16588_s0 + $0x88] sm:$0xfe]  ;;  %v10673_v27 = vrot.slane %v16015_v23, 1  ;;  %v16119_v23 = vld [vmem:[%s16588_s0 + $0xb8] sm:$0x1] }
 0x726   :  { %v16034_v47 = vmul.f32 0.0078125, %v10330_v28  ;;  %v10406_v59 = vadd.f32 %v10405_v29, %v10404_v5  ;;  %v16098_v5 = vld [vmem:[%s16588_s0 + $0x98] sm:$0x1]  ;;  %v16104_v28 = vld [vmem:[%s16588_s0 + $0xa0] sm:$0xfe]  ;;  %v10689_v63 = vrot.slane %v16078_v11, 1 }
 0x727   :  { %v10407_v50 = vmul.f32 0.0078125, %v10385_v40  ;;  %v10409_v62 = vmul.f32 %v16017_v6, %v16017_v6  ;;  %v16109_v29 = vld [vmem:[%s16588_s0 + $0xa8] sm:$0xfe]  ;;  %v16114_v40 = vld [vmem:[%s16588_s0 + $0xb0] sm:$0x1]  ;;  %v10694_v18 = vrot.slane %v16088_v22, 1 }
 0x728   :  { %v10408_v45 = vmul.f32 0.0078125, %v10406_v59  ;;  %v10410_v24 = vmul.f32 %v16034_v47, %v16034_v47  ;;  %v10674_v59 = vrot.slane %v16027_v19, 1  ;;  %v10680_v19 = vrot.slane %v16049_v7, 1  ;;  %v16166_v22 = vld [vmem:[%s16588_s0 + $0xf8] sm:$0x1] }
 0x729   :  { %v10411_v48 = vsub.f32 %v10407_v50, %v10409_v62  ;;  %v10676_v50 = vrot.slane %v16022_v41, 1  ;;  %v10677_v62 = vrot.slane %v16032_v26, 1  ;;  %v10682_v41 = vrot.slane %v16044_v32, 1  ;;  %v11868_v32 = vld [vmem:[%s16588_s0 + $0xe0] sm:$0xfe] }
 0x72a   :  { %v10412_v38 = vsub.f32 %v10408_v45, %v10410_v24  ;;  %v11864_v24 = vld [vmem:[%s16588_s0 + $0xc0] sm:$0xfe]  ;;  %v10691_v7 = vrot.slane %v16083_v10, 1  ;;  %v10695_v42 = vrot.slane %v16098_v5, 1  ;;  %v10697_v25 = vrot.slane %v16104_v28, 1 }
 0x72b   :  { %v10414_v45 = vadd.f32 1e-05, %v10411_v48  ;;  %v10683_v48 = vrot.slane %v16056_v14, 1  ;;  %v10692_v14 = vrot.slane %v16093_v58, 1  ;;  %v10698_v11 = vrot.slane %v16114_v40, 1 }
 0x72c   :  { %v10415_v26 = vadd.f32 1e-05, %v10412_v38  ;;  %v11870_v38 = vld [vmem:[%s16588_s0 + $0xf0] sm:$0x1]  ;;  %v10700_v10 = vrot.slane %v16109_v29, 1  ;;  %v10703_v28 = vrot.slane %v11864_v24, 1 }
 0x72d   :  { %13301 = vrsqrt.f32 %v10414_v45  ;;  %v10701_v45 = vrot.slane %v16119_v23, 1  ;;  %v16161_v58 = vld [vmem:[%s16588_s0 + $0xe8] sm:$0xfe]  ;;  %v16171_v5 = vld [vmem:[%s16588_s0 + $0x100] sm:$0xfe]  ;;  %v10704_v40 = vrot.slane %v11866_v8, 1 }
 0x72e   :  { %13303 = vrsqrt.f32 %v10415_v26  ;;  %v10706_v29 = vrot.slane %v11865_v33, 1  ;;  %v10707_v26 = vrot.slane %v11867_v30, 1  ;;  %v16176_v23 = vld [vmem:[%s16588_s0 + $0x108] sm:$0xfe]  ;;  %v16191_v8 = vld [vmem:[%s16588_s0 + $0x160] sm:$0xfe]  ;;  %v16194_v30 = vsel %vm293_vm0, %v10673_v27, %v10674_v59 }
 0x72f   :  { %16624 = vst [vmem:[#allocation34_spill] sm:$0xff] %v16194_v30  ;;  %v16197_v33 = vsel %vm293_vm0, %v10676_v50, %v10677_v62  ;;  %v16202_v24 = vld [vmem:[%s16588_s0 + $0x168] sm:$0xfe]  ;;  %v16217_v27 = vld [vmem:[%s16588_s0 + $0x180] sm:$0xfe]  ;;  %v16220_v59 = vsel %vm293_vm0, %v10679_v53, %v10680_v19  ;;  %v16223_v50 = vsel %vm293_vm0, %v10682_v41, %v10683_v48  ;;  %v10709_v62 = vrot.slane %v11868_v32, 1 }
 0x730   :  { %16625 = vst [vmem:[#allocation35_spill] sm:$0xff] %v16197_v33  ;;  %16626 = vst [vmem:[#allocation36_spill] sm:$0xff] %v16220_v59  ;;  %v10710_v33 = vrot.slane %v11870_v38, 1  ;;  %v16228_v30 = vld [vmem:[%s16588_s0 + $0x188] sm:$0xfe]  ;;  %v16246_v41 = vsel %vm293_vm0, %v10685_v51, %v10686_v57  ;;  %v16249_v48 = vsel %vm293_vm0, %v10688_v15, %v10689_v63  ;;  %v16252_v32 = vsel %vm293_vm0, %v10691_v7, %v10692_v14 }
 0x731   :  { %16627 = vst [vmem:[#allocation37_spill] sm:$0xff] %v16223_v50  ;;  %v16238_v53 = vld [vmem:[%s16588_s0 + $0x198] sm:$0x1]  ;;  %v16243_v19 = vld [vmem:[%s16588_s0 + $0x1a0] sm:$0xfe]  ;;  %16628 = vst [vmem:[#allocation38_spill] sm:$0xff] %v16246_v41  ;;  %v16255_v38 = vsel %vm293_vm0, %v10694_v18, %v10695_v42  ;;  %v16269_v57 = vsel %vm293_vm0, %v10697_v25, %v10698_v11  ;;  %v16272_v51 = vsel %vm293_vm0, %v10700_v10, %v10701_v45 }
 0x732   :  { %16629 = vst [vmem:[#allocation39_spill] sm:$0xff] %v16249_v48  ;;  %16630 = vst [vmem:[#allocation40_spill] sm:$0xff] %v16252_v32  ;;  %v16260_v50 = vld [vmem:[%s16588_s0 + $0x1a8] sm:$0xfe]  ;;  %v11886_v59 = vld [vmem:[%s16588_s0 + $0x1b0] sm:$0x1]  ;;  %v16275_v63 = vsel %vm293_vm0, %v10703_v28, %v10704_v40  ;;  %v16278_v7 = vsel %vm293_vm0, %v10706_v29, %v10707_v26  ;;  %v16294_v28 = vsel %vm293_vm0, %v10709_v62, %v10710_v33 }
 0x733   :  { %16631 = vst [vmem:[#allocation41_spill] sm:$0xff] %v16255_v38  ;;  %v11887_v15 = vld [vmem:[%s16588_s0 + $0x1b8] sm:$0x1]  ;;  %16632 = vst [vmem:[#allocation42_spill] sm:$0xff] %v16269_v57  ;;  %v11888_v14 = vld [vmem:[%s16588_s0 + $0x1c0] sm:$0xfe] }
 0x734   :  { %16633 = vst [vmem:[#allocation43_spill] sm:$0xff] %v16272_v51  ;;  %16634 = vst [vmem:[#allocation44_spill] sm:$0xff] %v16275_v63  ;;  %v11889_v18 = vld [vmem:[%s16588_s0 + $0x1c8] sm:$0xfe]  ;;  %v10712_v42 = vrot.slane %v16161_v58, 1  ;;  %v10713_v25 = vrot.slane %v16166_v22, 1 }
 0x735   :  { %16635 = vst [vmem:[#allocation45_spill] sm:$0xff] %v16278_v7  ;;  %v10715_v11 = vrot.slane %v16171_v5, 1  ;;  %v10716_v10 = vrot.slane %v16181_v12, 1  ;;  %v11890_v45 = vld [vmem:[%s16588_s0 + $0x1d0] sm:$0x1]  ;;  %16636 = vst [vmem:[#allocation46_spill] sm:$0xff] %v16294_v28 }
 0x736   :  { %v10718_v40 = vrot.slane %v16176_v23, 1  ;;  %v10719_v29 = vrot.slane %v16186_v55, 1  ;;  %v10721_v26 = vrot.slane %v16191_v8, 1  ;;  %v11891_v22 = vld [vmem:[%s16588_s0 + $0x1d8] sm:$0x1]  ;;  %v10722_v12 = vrot.slane %v16207_v44, 1 }
 0x737   :  { %v13302_v58 = vpop.eup %13301  ;;  %v10724_v5 = vrot.slane %v16202_v24, 1  ;;  %v10725_v7 = vrot.slane %v16212_v36, 1  ;;  %v10727_v33 = vrot.slane %v16217_v27, 1  ;;  %v16309_v55 = vld [vmem:[%s16588_s0 + $0x1e0] sm:$0xfe]  ;;  %v10728_v23 = vrot.slane %v16233_v31, 1 }
 0x738   :  { %v13304_v62 = vpop.eup %13303  ;;  %v10730_v8 = vrot.slane %v16228_v30, 1  ;;  %v10731_v28 = vrot.slane %v16238_v53, 1  ;;  %v10733_v44 = vrot.slane %v16243_v19, 1  ;;  %v16318_v36 = vld [vmem:[%s16588_s0 + $0x1e8] sm:$0xfe]  ;;  %v10734_v27 = vrot.slane %v11886_v59, 1 }
 0x739   :  { %v10420_v63 = vcombine.low %v13302_v58, %v13304_v62  ;;  %v16323_v24 = vld [vmem:[%s16588_s0 + $0x1f0] sm:$0x1]  ;;  %v10736_v31 = vrot.slane %v16260_v50, 1  ;;  %v10737_v51 = vrot.slane %v11887_v15, 1  ;;  %v10413_v30 = vld [vmem:[#allocation12] sm:$0x3] }
 0x73a   :  { %v16329_v53 = vld [vmem:[%s16588_s0 + $0x1f8] sm:$0x1]  ;;  %v16334_v19 = vld [vmem:[%s16588_s0 + $0x200] sm:$0xfe]  ;;  %v10739_v58 = vrot.slane %v11888_v14, 1  ;;  %v10740_v62 = vrot.slane %v11890_v45, 1  ;;  %v16353_v14 = vsel %vm293_vm0, %v10712_v42, %v10713_v25  ;;  %v16377_v25 = vsel %vm293_vm0, %v10721_v26, %v10722_v12 }
 0x73b   :  { %v10742_v57 = vrot.slane %v11889_v18, 1  ;;  %v10743_v38 = vrot.slane %v11891_v22, 1  ;;  %v10427_v59 = vrot.slane %v10420_v63, %v15500_v37  ;;  %v16340_v50 = vld [vmem:[%s16588_s0 + $0x208] sm:$0xfe]  ;;  %v16345_v15 = vld [vmem:[%s16588_s0 + $0x210] sm:$0x1]  ;;  %v16356_v63 = vsel %vm293_vm0, %v10715_v11, %v10716_v10 }
 0x73c   :  { %v16350_v32 = vld [vmem:[%s16588_s0 + $0x218] sm:$0x1]  ;;  %16637 = vst [vmem:[#allocation47_spill] sm:$0xff] %v16353_v14  ;;  %16638 = vst [vmem:[#allocation48_spill] sm:$0xff] %v16356_v63  ;;  %v16359_v18 = vsel %vm293_vm0, %v10718_v40, %v10719_v29  ;;  %v16364_v45 = vld [vmem:[%s16588_s0 + $0x220] sm:$0xfe]  ;;  %v16380_v11 = vsel %vm293_vm0, %v10724_v5, %v10725_v7  ;;  %v16383_v10 = vsel %vm293_vm0, %v10727_v33, %v10728_v23 }
 0x73d   :  { %16639 = vst [vmem:[#allocation49_spill] sm:$0xff] %v16359_v18  ;;  %v16369_v22 = vld [vmem:[%s16588_s0 + $0x228] sm:$0xfe]  ;;  %v16374_v42 = vld [vmem:[%s16588_s0 + $0x230] sm:$0x1]  ;;  %16640 = vst [vmem:[#allocation50_spill] sm:$0xff] %v16377_v25  ;;  %v16386_v40 = vsel %vm293_vm0, %v10730_v8, %v10731_v28  ;;  %v10434_v29 = vrot.slane %v10427_v59, %v15500_v37  ;;  %v16400_v7 = vsel %vm293_vm0, %v10733_v44, %v10734_v27 }
 0x73e   :  { %16641 = vst [vmem:[#allocation51_spill] sm:$0xff] %v16380_v11  ;;  %16642 = vst [vmem:[#allocation52_spill] sm:$0xff] %v16383_v10  ;;  %v16392_v18 = vld [vmem:[%s16588_s0 + $0x238] sm:$0x1]  ;;  %v16397_v26 = vld [vmem:[%s16588_s0 + $0x240] sm:$0xfe]  ;;  %v16403_v12 = vsel %vm293_vm0, %v10736_v31, %v10737_v51  ;;  %v16417_v23 = vsel %vm293_vm0, %v10739_v58, %v10740_v62  ;;  %v16420_v8 = vsel %vm293_vm0, %v10742_v57, %v10743_v38 }
 0x73f   :  { %16643 = vst [vmem:[#allocation53_spill] sm:$0xff] %v16386_v40  ;;  %16644 = vst [vmem:[#allocation54_spill] sm:$0xff] %v16400_v7  ;;  %v16409_v5 = vld [vmem:[%s16588_s0 + $0x248] sm:$0xfe]  ;;  %v16414_v33 = vld [vmem:[%s16588_s0 + $0x250] sm:$0x1]  ;;  %v10436_v27 = vmul.f32 %v10434_v29, %v10413_v30 }
 0x740   :  { %16645 = vst [vmem:[#allocation55_spill] sm:$0xff] %v16403_v12  ;;  %16646 = vst [vmem:[#allocation56_spill] sm:$0xff] %v16417_v23  ;;  %v10746_v51 = vrot.slane %v16323_v24, 1  ;;  %v10748_v44 = vrot.slane %v16318_v36, 1  ;;  %v16427_v31 = vld [vmem:[%s16588_s0 + $0x258] sm:$0x1] }
 0x741   :  { %16647 = vst [vmem:[#allocation57_spill] sm:$0xff] %v16420_v8  ;;  %v10749_v59 = vrot.slane %v16329_v53, 1  ;;  %v10751_v28 = vrot.slane %v16334_v19, 1  ;;  %v10752_v58 = vrot.slane %v16345_v15, 1  ;;  %v10754_v62 = vrot.slane %v16340_v50, 1  ;;  %v16653_v11 = vld [vmem:[#allocation27_spill] sm:$0xff] }
 0x742   :  { %v10755_v38 = vrot.slane %v16350_v32, 1  ;;  %v10757_v57 = vrot.slane %v16364_v45, 1  ;;  %v10758_v36 = vrot.slane %v16374_v42, 1  ;;  %v10442_v24 = vrot.slane %v10436_v27, %v15504_v49  ;;  %v16654_v25 = vld [vmem:[#allocation28_spill] sm:$0xff]  ;;  %s13480_s0 = smov [#allocation15]  }
 0x743   :  { %v10446_v30 = vrot.slane %v10436_v27, %v15506_v54  ;;  %v10760_v29 = vrot.slane %v16369_v22, 1  ;;  %v10761_v53 = vrot.slane %v16392_v18, 1  ;;  %v10763_v19 = vrot.slane %v16397_v26, 1  ;;  %s10902_s3 = sshll.u32 %s13480_s0, 4  ;;  %s10903_s3 = int_to_ptr.vmem [resolvable:$true] %s10902_s3 }
 0x744   :  { %v10764_v15 = vrot.slane %v16414_v33, 1  ;;  %v10766_v50 = vrot.slane %v16409_v5, 1  ;;  %v10767_v32 = vrot.slane %v16427_v31, 1  ;;  %v10449_v45 = vmul.f32 %v10442_v24, %v16017_v6  ;;  %s13438_s11 = scalar_lea.vmem %s10903_s3, 4096  ;;  %p13443_p7 = scmp.lt.s32.totalorder %s10903_s3, %s10903_s3 }
 0x745   :  { %v10450_v42 = vmul.f32 %v10446_v30, %v16034_v47  ;;  %v10470_v8 = vmul.f32 %v10442_v24, %v15852_v2  ;;  %v10471_v27 = vmul.f32 %v10446_v30, %v15854_v1  ;;  %v10472_v22 = vmul.f32 %v10442_v24, %v15856_v52  ;;  %p13439_p6 = scmp.ne.s32.totalorder %s10903_s3, %s13438_s11  ;;  %p13444_p8 = scmp.lt.s32.totalorder %s13438_s11, %s13438_s11 }
 0x746   :  { %v10473_v18 = vmul.f32 %v10446_v30, %v15864_v39  ;;  %v10474_v26 = vmul.f32 %v10442_v24, %v15872_v13  ;;  %v10475_v33 = vmul.f32 %v10446_v30, %v15877_v43  ;;  %v10476_v5 = vmul.f32 %v10442_v24, %v15882_v4 }
 0x747   :  { %v10453_v23 = vcombine.low %v10449_v45, %v10450_v42  ;;  %v10477_v31 = vmul.f32 %v10446_v30, %v15887_v3  ;;  %v10478_v6 = vmul.f32 %v10442_v24, %v15892_v35  ;;  %v10479_v47 = vmul.f32 %v10446_v30, %v15897_v16  ;;  %v10437_v45 = vld [vmem:[#allocation13] sm:$0x3]  ;;  %p13445_p9 = por %p13444_p8, %p13443_p7 }
 0x748   :  { %v10480_v2 = vmul.f32 %v10442_v24, %v15902_v46  ;;  %v10481_v1 = vmul.f32 %v10446_v30, %v15907_v61  ;;  %v10482_v52 = vmul.f32 %v10442_v24, %v15912_v34  ;;  %v10483_v13 = vmul.f32 %v10446_v30, %v15917_v17  ;;  %v16648_v34 = vld [vmem:[#allocation22_spill] sm:$0xff]  ;;  %v16650_v17 = vld [vmem:[#allocation24_spill] sm:$0xff] }
 0x749   :  { %v10460_v39 = vrot.slane %v10453_v23, %v15500_v37  ;;  %v10484_v43 = vmul.f32 %v10442_v24, %v15922_v20  ;;  %v10485_v4 = vmul.f32 %v10446_v30, %v15927_v21  ;;  %v10486_v3 = vmul.f32 %v10442_v24, %v15932_v56  ;;  %v16649_v23 = vld [vmem:[#allocation23_spill] sm:$0xff]  ;;  %v16651_v20 = vld [vmem:[#allocation25_spill] sm:$0xff]  ;;  %v16652_v21 = vld [vmem:[#allocation26_spill] sm:$0xff]  ;;  %p13446_p10 = pnand %p13445_p9, %p13439_p6 }
 0x74a   :  { %v10487_v35 = vmul.f32 %v10446_v30, %v15937_v9  ;;  %v10488_v16 = vmul.f32 %v10442_v24, %v15942_v60  ;;  %v10489_v46 = vmul.f32 %v10446_v30, %v15947_v0  ;;  %v10490_v42 = vmul.f32 %v10442_v24, %v16648_v34  ;;  %v16655_v60 = vld [vmem:[#allocation29_spill] sm:$0xff]  ;;  %v16656_v0 = vld [vmem:[#allocation30_spill] sm:$0xff]  ;;  %v16658_v34 = vld [vmem:[#allocation32_spill] sm:$0xff] }
 0x74b   :  { %v10467_v61 = vrot.slane %v10460_v39, %v15500_v37  ;;  %v10491_v12 = vmul.f32 %v10446_v30, %v16649_v23  ;;  %v10492_v7 = vmul.f32 %v10442_v24, %v16650_v17  ;;  %v10493_v40 = vmul.f32 %v10446_v30, %v16651_v20  ;;  %v16657_v37 = vld [vmem:[#allocation31_spill] sm:$0xff]  ;;  %v16659_v23 = vld [vmem:[#allocation33_spill] sm:$0xff] }
 0x74c   :  { %v10494_v10 = vmul.f32 %v10442_v24, %v16652_v21  ;;  %v10495_v56 = vmul.f32 %v10446_v30, %v16653_v11  ;;  %v10496_v9 = vmul.f32 %v10442_v24, %v16654_v25  ;;  %v10497_v14 = vmul.f32 %v10446_v30, %v16655_v60 }
 0x74d   :  { %v10469_v63 = vsub.f32 %v10437_v45, %v10467_v61  ;;  %v10498_v48 = vmul.f32 %v10442_v24, %v16656_v0  ;;  %v10499_v39 = vmul.f32 %v10446_v30, %v16657_v37  ;;  %v10500_v41 = vmul.f32 %v10442_v24, %v16658_v34  ;;  %v16661_v45 = vld [vmem:[#allocation21_spill] sm:$0xff] }
 0x74e   :  { %v10501_v54 = vmul.f32 %v10446_v30, %v16659_v23  ;;  %v16660_v17 = vrot.slane %v16309_v55, 1  ;;  %v16486_v11 = vsel %vm293_vm0, %v10748_v44, %v10749_v59  ;;  %v16491_v21 = vsel %vm293_vm0, %v10751_v28, %v10752_v58 }
 0x74f   :  { %v10506_v25 = vrot.slane %v10469_v63, %v15504_v49  ;;  %v10510_v61 = vrot.slane %v10469_v63, %v16661_v45  ;;  %v16494_v60 = vsel %vm293_vm0, %v10754_v62, %v10755_v38  ;;  %v16497_v24 = vsel %vm293_vm0, %v10757_v57, %v10758_v36  ;;  %v16673_v45 = vld [vmem:[#allocation45_spill] sm:$0xff] }
 0x750   :  { %v16483_v20 = vsel %vm293_vm0, %v16660_v17, %v10746_v51  ;;  %v16500_v55 = vsel %vm293_vm0, %v10760_v29, %v10761_v53  ;;  %v16503_v51 = vsel %vm293_vm0, %v10763_v19, %v10764_v15  ;;  %v16506_v44 = vsel %vm293_vm0, %v10766_v50, %v10767_v32  ;;  %v16672_v17 = vld [vmem:[#allocation44_spill] sm:$0xff] }
 0x751   :  { %v10513_v49 = vadd.f32 %v10506_v25, %v10470_v8  ;;  %v10514_v63 = vadd.f32 %v10510_v61, %v10471_v27  ;;  %v10515_v59 = vadd.f32 %v10506_v25, %v10472_v22  ;;  %v10516_v28 = vadd.f32 %v10510_v61, %v10473_v18 }
 0x752   :  { %v10517_v58 = vadd.f32 %v10506_v25, %v10474_v26  ;;  %v10518_v30 = vadd.f32 %v10510_v61, %v10475_v33  ;;  %v10519_v62 = vadd.f32 %v10506_v25, %v10476_v5  ;;  %v10520_v38 = vadd.f32 %v10510_v61, %v10477_v31 }
 0x753   :  { %v10521_v0 = vadd.f32 %v10506_v25, %v10478_v6  ;;  %v10522_v57 = vadd.f32 %v10510_v61, %v10479_v47  ;;  %v10523_v36 = vadd.f32 %v10506_v25, %v10480_v2  ;;  %v10524_v37 = vadd.f32 %v10510_v61, %v10481_v1 }
 0x754   :  { %v10525_v29 = vadd.f32 %v10506_v25, %v10482_v52  ;;  %v10526_v53 = vadd.f32 %v10510_v61, %v10483_v13  ;;  %v10527_v34 = vadd.f32 %v10506_v25, %v10484_v43  ;;  %v10528_v19 = vadd.f32 %v10510_v61, %v10485_v4  ;;  %v16662_v52 = vld [vmem:[#allocation34_spill] sm:$0xff]  ;;  %v16663_v43 = vld [vmem:[#allocation35_spill] sm:$0xff] }
 0x755   :  { %v10529_v15 = vadd.f32 %v10506_v25, %v10486_v3  ;;  %v10530_v23 = vadd.f32 %v10510_v61, %v10487_v35  ;;  %v10531_v50 = vadd.f32 %v10506_v25, %v10488_v16  ;;  %v10532_v32 = vadd.f32 %v10510_v61, %v10489_v46  ;;  %v16664_v3 = vld [vmem:[#allocation36_spill] sm:$0xff]  ;;  %v16665_v16 = vld [vmem:[#allocation37_spill] sm:$0xff] }
 0x756   :  { %v10533_v8 = vadd.f32 %v10506_v25, %v10490_v42  ;;  %v10534_v27 = vadd.f32 %v10510_v61, %v10491_v12  ;;  %v10535_v22 = vadd.f32 %v10506_v25, %v10492_v7  ;;  %v10536_v18 = vadd.f32 %v10510_v61, %v10493_v40  ;;  %v16666_v42 = vld [vmem:[#allocation38_spill] sm:$0xff]  ;;  %v16667_v7 = vld [vmem:[#allocation39_spill] sm:$0xff] }
 0x757   :  { %v10537_v26 = vadd.f32 %v10506_v25, %v10494_v10  ;;  %v10538_v33 = vadd.f32 %v10510_v61, %v10495_v56  ;;  %v10539_v5 = vadd.f32 %v10506_v25, %v10496_v9  ;;  %v10540_v31 = vadd.f32 %v10510_v61, %v10497_v14  ;;  %v16668_v10 = vld [vmem:[#allocation40_spill] sm:$0xff]  ;;  %v16669_v9 = vld [vmem:[#allocation41_spill] sm:$0xff] }
 0x758   :  { %v10541_v6 = vadd.f32 %v10506_v25, %v10498_v48  ;;  %v10542_v47 = vadd.f32 %v10510_v61, %v10499_v39  ;;  %v10543_v2 = vadd.f32 %v10506_v25, %v10500_v41  ;;  %v10544_v1 = vadd.f32 %v10510_v61, %v10501_v54  ;;  %v16670_v48 = vld [vmem:[#allocation42_spill] sm:$0xff]  ;;  %v16671_v41 = vld [vmem:[#allocation43_spill] sm:$0xff] }
 0x759   :  { %v10801_v13 = vadd.f32 %v16662_v52, %v10513_v49  ;;  %v10802_v4 = vadd.f32 %v16663_v43, %v10514_v63  ;;  %v10803_v35 = vadd.f32 %v16664_v3, %v10515_v59  ;;  %v10804_v46 = vadd.f32 %v16665_v16, %v10516_v28  ;;  %v16674_v49 = vld [vmem:[#allocation46_spill] sm:$0xff]  ;;  %v16675_v59 = vld [vmem:[#allocation47_spill] sm:$0xff]  ;;  %v16676_v52 = vld [vmem:[#allocation48_spill] sm:$0xff] }
 0x75a   :  { %v10805_v12 = vadd.f32 %v16666_v42, %v10517_v58  ;;  %v10806_v40 = vadd.f32 %v16667_v7, %v10518_v30  ;;  %v10807_v56 = vadd.f32 %v16668_v10, %v10519_v62  ;;  %v10808_v14 = vadd.f32 %v16669_v9, %v10520_v38  ;;  %v16677_v43 = vld [vmem:[#allocation49_spill] sm:$0xff]  ;;  %v16678_v3 = vld [vmem:[#allocation50_spill] sm:$0xff]  ;;  %v16679_v16 = vld [vmem:[#allocation51_spill] sm:$0xff] }
 0x75b   :  { %v10809_v39 = vadd.f32 %v16670_v48, %v10521_v0  ;;  %v10810_v54 = vadd.f32 %v16671_v41, %v10522_v57  ;;  %v10811_v25 = vadd.f32 %v16672_v17, %v10523_v36  ;;  %v10812_v61 = vadd.f32 %v16673_v45, %v10524_v37  ;;  %v16680_v42 = vld [vmem:[#allocation52_spill] sm:$0xff]  ;;  %v16681_v7 = vld [vmem:[#allocation53_spill] sm:$0xff]  ;;  %v16682_v10 = vld [vmem:[#allocation54_spill] sm:$0xff] }
 0x75c   :  { %v10813_v63 = vadd.f32 %v16674_v49, %v10525_v29  ;;  %v10814_v28 = vadd.f32 %v16675_v59, %v10526_v53  ;;  %v10815_v58 = vadd.f32 %v16676_v52, %v10527_v34  ;;  %v10816_v30 = vadd.f32 %v16677_v43, %v10528_v19  ;;  %v16683_v37 = vld [vmem:[#allocation55_spill] sm:$0xff]  ;;  %v16684_v29 = vld [vmem:[#allocation56_spill] sm:$0xff]  ;;  %v16685_v34 = vld [vmem:[#allocation57_spill] sm:$0xff] }
 0x75d   :  { %v10817_v62 = vadd.f32 %v16678_v3, %v10529_v15  ;;  %v10818_v38 = vadd.f32 %v16679_v16, %v10530_v23  ;;  %v10819_v0 = vadd.f32 %v16680_v42, %v10531_v50  ;;  %v10820_v57 = vadd.f32 %v16681_v7, %v10532_v32 }
 0x75e   :  { %v16529_v36 = vadd.f32 %v16682_v10, %v10533_v8  ;;  %v16532_v9 = vadd.f32 %v16683_v37, %v10534_v27  ;;  %v16535_v53 = vadd.f32 %v16684_v29, %v10535_v22  ;;  %v16538_v48 = vadd.f32 %v16685_v34, %v10536_v18 }
 0x75f   :  { %v16541_v19 = vadd.f32 %v16483_v20, %v10537_v26  ;;  %v16544_v15 = vadd.f32 %v16486_v11, %v10538_v33  ;;  %v16547_v23 = vadd.f32 %v16491_v21, %v10539_v5  ;;  %v16550_v50 = vadd.f32 %v16494_v60, %v10540_v31 }
 0x760   :  { %v16553_v32 = vadd.f32 %v16497_v24, %v10541_v6  ;;  %v16556_v8 = vadd.f32 %v16500_v55, %v10542_v47  ;;  %v16559_v27 = vadd.f32 %v16503_v51, %v10543_v2  ;;  %v16562_v20 = vadd.f32 %v16506_v44, %v10544_v1 }
 0x761   :  { %v10833_v11 = vmax.f32 %v10801_v13, 0.0  ;;  %v10834_v22 = vmax.f32 %v10802_v4, 0.0  ;;  %v10835_v18 = vmax.f32 %v10803_v35, 0.0  ;;  %v10836_v21 = vmax.f32 %v10804_v46, 0.0 }
 0x762   :  { %v10837_v26 = vmax.f32 %v10805_v12, 0.0  ;;  %v10838_v33 = vmax.f32 %v10806_v40, 0.0  ;;  %v10839_v60 = vmax.f32 %v10807_v56, 0.0  ;;  %v10840_v5 = vmax.f32 %v10808_v14, 0.0 }
 0x763   :  { %v10841_v31 = vmax.f32 %v10809_v39, 0.0  ;;  %v10842_v24 = vmax.f32 %v10810_v54, 0.0  ;;  %v10843_v6 = vmax.f32 %v10811_v25, 0.0  ;;  %v10844_v41 = vmax.f32 %v10812_v61, 0.0  ;;  %10865 = vst [vmem:[#allocation15] sm:$0xff] %v10833_v11  ;;  %10866 = vst [vmem:[#allocation15 + $0x8] sm:$0xff] %v10834_v22 }
 0x764   :  { %10867 = vst [vmem:[#allocation15 + $0x10] sm:$0xff] %v10835_v18  ;;  %10868 = vst [vmem:[#allocation15 + $0x18] sm:$0xff] %v10836_v21  ;;  %v10845_v55 = vmax.f32 %v10813_v63, 0.0  ;;  %v10846_v51 = vmax.f32 %v10814_v28, 0.0  ;;  %v10847_v44 = vmax.f32 %v10815_v58, 0.0  ;;  %v10848_v47 = vmax.f32 %v10816_v30, 0.0 }
 0x765   :  { %10869 = vst [vmem:[#allocation15 + $0x20] sm:$0xff] %v10837_v26  ;;  %10870 = vst [vmem:[#allocation15 + $0x28] sm:$0xff] %v10838_v33  ;;  %v10849_v2 = vmax.f32 %v10817_v62, 0.0  ;;  %v10850_v1 = vmax.f32 %v10818_v38, 0.0  ;;  %v10851_v13 = vmax.f32 %v10819_v0, 0.0  ;;  %v10852_v4 = vmax.f32 %v10820_v57, 0.0 }
 0x766   :  { %10871 = vst [vmem:[#allocation15 + $0x30] sm:$0xff] %v10839_v60  ;;  %10872 = vst [vmem:[#allocation15 + $0x38] sm:$0xff] %v10840_v5  ;;  %v10853_v35 = vmax.f32 %v16529_v36, 0.0  ;;  %v10854_v46 = vmax.f32 %v16532_v9, 0.0  ;;  %v10855_v12 = vmax.f32 %v16535_v53, 0.0  ;;  %v10856_v40 = vmax.f32 %v16538_v48, 0.0 }
 0x767   :  { %10873 = vst [vmem:[#allocation15 + $0x40] sm:$0xff] %v10841_v31  ;;  %10874 = vst [vmem:[#allocation15 + $0x48] sm:$0xff] %v10842_v24  ;;  %v10857_v56 = vmax.f32 %v16541_v19, 0.0  ;;  %v10858_v14 = vmax.f32 %v16544_v15, 0.0  ;;  %v10859_v39 = vmax.f32 %v16547_v23, 0.0  ;;  %v10860_v54 = vmax.f32 %v16550_v50, 0.0 }
 0x768   :  { %10875 = vst [vmem:[#allocation15 + $0x50] sm:$0xff] %v10843_v6  ;;  %10876 = vst [vmem:[#allocation15 + $0x58] sm:$0xff] %v10844_v41  ;;  %v10861_v17 = vmax.f32 %v16553_v32, 0.0  ;;  %v10862_v25 = vmax.f32 %v16556_v8, 0.0  ;;  %v10863_v45 = vmax.f32 %v16559_v27, 0.0  ;;  %v10864_v61 = vmax.f32 %v16562_v20, 0.0 }
 0x769   :  { %10877 = vst [vmem:[#allocation15 + $0x60] sm:$0xff] %v10845_v55  ;;  %10878 = vst [vmem:[#allocation15 + $0x68] sm:$0xff] %v10846_v51 }
 0x76a   :  { %10879 = vst [vmem:[#allocation15 + $0x70] sm:$0xff] %v10847_v44  ;;  %10880 = vst [vmem:[#allocation15 + $0x78] sm:$0xff] %v10848_v47 }
 0x76b   :  { %10881 = vst [vmem:[#allocation15 + $0x80] sm:$0xff] %v10849_v2  ;;  %10882 = vst [vmem:[#allocation15 + $0x88] sm:$0xff] %v10850_v1 }
 0x76c   :  { %10883 = vst [vmem:[#allocation15 + $0x90] sm:$0xff] %v10851_v13  ;;  %10884 = vst [vmem:[#allocation15 + $0x98] sm:$0xff] %v10852_v4 }
 0x76d   :  { %10885 = vst [vmem:[#allocation15 + $0xa0] sm:$0xff] %v10853_v35  ;;  %10886 = vst [vmem:[#allocation15 + $0xa8] sm:$0xff] %v10854_v46 }
 0x76e   :  { %10887 = vst [vmem:[#allocation15 + $0xb0] sm:$0xff] %v10855_v12  ;;  %10888 = vst [vmem:[#allocation15 + $0xb8] sm:$0xff] %v10856_v40 }
 0x76f   :  { %10889 = vst [vmem:[#allocation15 + $0xc0] sm:$0xff] %v10857_v56  ;;  %10890 = vst [vmem:[#allocation15 + $0xc8] sm:$0xff] %v10858_v14 }
 0x770   :  { %10891 = vst [vmem:[#allocation15 + $0xd0] sm:$0xff] %v10859_v39  ;;  %10892 = vst [vmem:[#allocation15 + $0xd8] sm:$0xff] %v10860_v54 }
 0x771   :  { %10893 = vst [vmem:[#allocation15 + $0xe0] sm:$0xff] %v10861_v17  ;;  %10894 = vst [vmem:[#allocation15 + $0xe8] sm:$0xff] %v10862_v25 }
 0x772   :  { %10895 = vst [vmem:[#allocation15 + $0xf0] sm:$0xff] %v10863_v45  ;;  %10896 = vst [vmem:[#allocation15 + $0xf8] sm:$0xff] %v10864_v61 }
 0x773   :  { %13449 = shalt.err (!%p13446_p10)
}
 0x774   :  { %s13450_s13 = scalar_lea.hbm %s16595_s7, 4096 }
 0x775   :  { %p13451_p11 = scmp.ne.s32.totalorder %s16595_s7, %s13450_s13  ;;  %p13454_p12 = scmp.lt.u32.totalorder %s13450_s13, %s16595_s7 }
 0x777   :  { %p13456_p13 = pnand %p13454_p12, %p13451_p11 }
 0x779   :  { %13459 = shalt.err (!%p13456_p13)
}
 0x77a   :  { %s13481_s20 = smov 256   ;;  %s13482_s21 = smov 16  }
 0x77b   :  { %10908 = dma.vmem_to_hbm [thread:$0]  %s10903_s3, 4096, %s16595_s7, [#allocation6], %s13481_s20, %s13481_s20, %s13482_s21  }
 0x77c   :  { %13468 = dma.done.wait [#allocation6], 4096  }
 0x77d   :  { %13469 = vsyncadd [#allocation6], 4294963200 }
 0x77e   :  { %10912 = vsyncpa [#allocation5], 1 }
 0x77f   :  { %10913 = vsyncpa [#allocation8], 1 }
 0x780   :  { %10914 = vsyncpa [#allocation11], 1 }
 0x781   :  { %10915 = vsyncpa [#allocation14], 1 }
 0x782   :  { %10916 = vsyncpa [#allocation6], 1 }

</bundles_post_ra>
